<compile_context>
chip_gen: v7x
topology: tpu7x:2x2x1
jax: 0.10.0
libtpu: 0.0.40
codegen_flags: <defaults>
</compile_context>

<pallas_src>
import functools

import jax
import jax.numpy as jnp
from jax.experimental import pallas as pl
from jax.experimental.pallas import tpu as pltpu

LANES = 128       # lane-dense padded output-channel width
BN_EPS = 1e-5


# ----------------------------------------------------------------------------
# Pallas kernels
# ----------------------------------------------------------------------------
def _gemm_act_kernel(a_ref, w_ref, bias_ref, o_ref, *, pre_act, tanh_out):
    """out = [tanh]( act(A) @ W + bias ) for one (group / M) tile.

    a_ref: (1, TM, K) bf16, w_ref: (1, K, 128) bf16, bias_ref: (1, 128) f32,
    o_ref: (1, TM, 128) f32.
    pre_act: 0 = identity, 1 = LeakyReLU(0.2), 2 = ReLU.
    """
    a = a_ref[0].astype(jnp.float32)
    if pre_act == 1:
        a = jnp.where(a >= 0.0, a, 0.2 * a)
    elif pre_act == 2:
        a = jnp.maximum(a, 0.0)
    y = jnp.dot(a.astype(jnp.bfloat16), w_ref[0],
                preferred_element_type=jnp.float32)
    y = y + bias_ref[...]
    if tanh_out:
        y = jnp.tanh(y)
    o_ref[0] = y


def _gemm_bn_kernel(a_ref, w_ref, gamma_ref, beta_ref, o_ref, *, pre_act, eps):
    """out = BatchNorm( act(A_g) @ W_g ), stats over ALL groups and rows.

    a_ref: (G, M, K) bf16, w_ref: (G, K, 128) bf16,
    gamma_ref / beta_ref: (1, 128) f32, o_ref: (G, M, 128) f32.
    Whole layer slab lives in VMEM (single grid step), so batch statistics are
    exact training-mode statistics.
    """
    G, M, _ = a_ref.shape
    inv_n = 1.0 / float(G * M)

    ssum = jnp.zeros((1, LANES), jnp.float32)
    for g in range(G):
        a = a_ref[g].astype(jnp.float32)
        if pre_act == 1:
            a = jnp.where(a >= 0.0, a, 0.2 * a)
        elif pre_act == 2:
            a = jnp.maximum(a, 0.0)
        y = jnp.dot(a.astype(jnp.bfloat16), w_ref[g],
                    preferred_element_type=jnp.float32)
        o_ref[g] = y
        ssum = ssum + jnp.sum(y, axis=0, keepdims=True)
    mean = ssum * inv_n

    svar = jnp.zeros((1, LANES), jnp.float32)
    for g in range(G):
        d = o_ref[g] - mean
        svar = svar + jnp.sum(d * d, axis=0, keepdims=True)
    var = svar * inv_n

    scale = gamma_ref[...] * jax.lax.rsqrt(var + eps)
    shift = beta_ref[...] - mean * scale
    for g in range(G):
        o_ref[g] = o_ref[g] * scale + shift


# ----------------------------------------------------------------------------
# Pallas wrappers
# ----------------------------------------------------------------------------
def fused_gemm_act(a, w, bias, *, pre_act, tanh_out):
    """a: (G, M, K) bf16, w: (G, K, 128) bf16, bias: (1, 128) f32.

    Grids over parities (G > 1) or over M tiles when M is large so that the
    work can be split across TensorCores (v7x megacore)."""
    G, M, K = a.shape
    kern = functools.partial(_gemm_act_kernel, pre_act=pre_act,
                             tanh_out=tanh_out)
    if G > 1:
        grid = (G,)
        a_spec = pl.BlockSpec((1, M, K), lambda i: (i, 0, 0))
        w_spec = pl.BlockSpec((1, K, LANES), lambda i: (i, 0, 0))
        o_spec = pl.BlockSpec((1, M, LANES), lambda i: (i, 0, 0))
    else:
        tm = 128 if (M % 128 == 0 and M >= 256) else M
        grid = (M // tm,)
        a_spec = pl.BlockSpec((1, tm, K), lambda i: (0, i, 0))
        w_spec = pl.BlockSpec((1, K, LANES), lambda i: (0, 0, 0))
        o_spec = pl.BlockSpec((1, tm, LANES), lambda i: (0, i, 0))
    return pl.pallas_call(
        kern,
        out_shape=jax.ShapeDtypeStruct((G, M, LANES), jnp.float32),
        grid=grid,
        in_specs=[a_spec, w_spec, pl.BlockSpec((1, LANES), lambda i: (0, 0))],
        out_specs=o_spec,
        compiler_params=pltpu.CompilerParams(
            dimension_semantics=("parallel",)),
    )(a, w, bias)


def fused_gemm_bn(a, w, gamma, beta, *, pre_act):
    """a: (G, M, K) bf16, w: (G, K, 128) bf16, gamma/beta: (1, 128) f32.

    Single grid step: the whole layer output slab (<= 512 x 128 f32) stays in
    VMEM so the BatchNorm batch statistics are computed in the GEMM epilogue."""
    G, M, K = a.shape
    kern = functools.partial(_gemm_bn_kernel, pre_act=pre_act, eps=BN_EPS)
    return pl.pallas_call(
        kern,
        out_shape=jax.ShapeDtypeStruct((G, M, LANES), jnp.float32),
        grid=(1,),
        in_specs=[
            pl.BlockSpec((G, M, K), lambda i: (0, 0, 0)),
            pl.BlockSpec((G, K, LANES), lambda i: (0, 0, 0)),
            pl.BlockSpec((1, LANES), lambda i: (0, 0)),
            pl.BlockSpec((1, LANES), lambda i: (0, 0)),
        ],
        out_specs=pl.BlockSpec((G, M, LANES), lambda i: (0, 0, 0)),
        compiler_params=pltpu.CompilerParams(
            dimension_semantics=("arbitrary",)),
    )(a, w, gamma, beta)


# ----------------------------------------------------------------------------
# Conv / ConvTranspose layers (each is ONE fused pallas_call)
# ----------------------------------------------------------------------------
def conv_down(x, w_pad, cout, *, pre_act, bn=None):
    """[LeakyReLU] -> Conv2d(k=4, s=2, p=1, bias=False) -> [BatchNorm], fused.

    x NHWC f32, w_pad (1, 16*Cin, 128) bf16."""
    N, H, W, Cin = x.shape
    Ho, Wo = H // 2, W // 2
    xp = jnp.pad(x, ((0, 0), (1, 1), (1, 1), (0, 0)))
    # TODO(synk): move this im2col into the kernel (strided VMEM reads) to avoid
    # the wrapper-side K-expansion of the activation; kept here (in bf16) for
    # robust Mosaic lowering with tiny channel counts.
    cols = [xp[:, kh:kh + 2 * Ho:2, kw:kw + 2 * Wo:2, :]
            for kh in range(4) for kw in range(4)]
    a = jnp.concatenate(cols, axis=-1).reshape(1, N * Ho * Wo, 16 * Cin)
    a = a.astype(jnp.bfloat16)
    if bn is None:
        zero_bias = jnp.zeros((1, LANES), jnp.float32)
        y = fused_gemm_act(a, w_pad, zero_bias, pre_act=pre_act,
                           tanh_out=False)
    else:
        y = fused_gemm_bn(a, w_pad, bn[0], bn[1], pre_act=pre_act)
    return y[0, :, :cout].reshape(N, Ho, Wo, cout)


# Sub-pixel decomposition of ConvTranspose2d(k=4, s=2, p=1):
# output row 2a+po only receives kernel rows kh with kh = po+1 (mod 2); the
# input row it reads, expressed in the (pad=1) padded input, is a + offset.
_SUBPIX_TAPS = {0: ((1, 1), (3, 0)),   # parity 0: (kh, padded-row offset)
                1: ((0, 2), (2, 1))}   # parity 1


def conv_transpose_up(x, w_pad, bias_pad, cout, *, tanh_out, bn=None):
    """ReLU -> ConvTranspose2d(k=4, s=2, p=1) -> (Tanh | BatchNorm), fused.

    Done as 4 output-parity GEMMs (K = 4*Cin each, no zero-dilation).
    x NHWC f32, w_pad (4, 4*Cin, 128) bf16, bias_pad (1, 128) f32."""
    N, H, W, Cin = x.shape
    xp = jnp.pad(x, ((0, 0), (1, 1), (1, 1), (0, 0)))
    slabs = []
    for po in range(2):
        for pw in range(2):
            taps = [xp[:, oh:oh + H, ow:ow + W, :]
                    for (_, oh) in _SUBPIX_TAPS[po]
                    for (_, ow) in _SUBPIX_TAPS[pw]]
            slabs.append(jnp.concatenate(taps, axis=-1)
                         .reshape(N * H * W, 4 * Cin))
    a = jnp.stack(slabs, axis=0).astype(jnp.bfloat16)      # (4, N*H*W, 4*Cin)
    if bn is None:
        y = fused_gemm_act(a, w_pad, bias_pad, pre_act=2, tanh_out=tanh_out)
    else:
        y = fused_gemm_bn(a, w_pad, bn[0], bn[1], pre_act=2)
    y = y[:, :, :cout].reshape(2, 2, N, H, W, cout)
    # interleave parities: out[n, 2a+po, 2b+pw, c] = y[po, pw, n, a, b, c]
    y = jnp.transpose(y, (2, 3, 0, 4, 1, 5)).reshape(N, 2 * H, 2 * W, cout)
    return y


# ----------------------------------------------------------------------------
# Parameter construction (deterministic, mirrors nn.Module __init__ shapes)
# ----------------------------------------------------------------------------
def _pad_lanes(w, cout):
    return jnp.pad(w, [(0, 0)] * (w.ndim - 1) + [(0, LANES - cout)])


def make_block_params(key, outer_nc, inner_nc, input_nc=None,
                      outermost=False, innermost=False):
    if input_nc is None:
        input_nc = outer_nc
    k0, k1, k2 = jax.random.split(key, 3)
    p = {"outermost": outermost, "innermost": innermost,
         "inner_nc": inner_nc, "outer_nc": outer_nc}

    # downconv: Conv2d(input_nc, inner_nc, 4, 2, 1, bias=False)
    # correlation weight (kh, kw, Cin, Cout) -> GEMM B (1, 16*Cin, 128) bf16
    dw = 0.05 * jax.random.normal(k0, (4, 4, input_nc, inner_nc), jnp.float32)
    p["down_w"] = (_pad_lanes(dw.reshape(16 * input_nc, inner_nc), inner_nc)
                   [None].astype(jnp.bfloat16))

    # upconv: ConvTranspose2d(up_cin, outer_nc, 4, 2, 1); torch weight is
    # (Cin, Cout, kh, kw).  Build the 4 per-parity sub-pixel GEMM weights.
    up_cin = inner_nc if innermost else inner_nc * 2
    wt = 0.05 * jax.random.normal(k1, (up_cin, outer_nc, 4, 4), jnp.float32)
    per_parity = []
    for po in range(2):
        for pw in range(2):
            blocks = [wt[:, :, kh, kw]
                      for (kh, _) in _SUBPIX_TAPS[po]
                      for (kw, _) in _SUBPIX_TAPS[pw]]
            per_parity.append(jnp.concatenate(blocks, axis=0))  # (4*Cin, Cout)
    p["up_w"] = _pad_lanes(jnp.stack(per_parity, axis=0),
                           outer_nc).astype(jnp.bfloat16)       # (4,4*Cin,128)

    # bias only on the outermost upconv (others have bias=use_bias=False)
    up_b = (0.05 * jax.random.normal(k2, (outer_nc,), jnp.float32)
            if outermost else jnp.zeros((outer_nc,), jnp.float32))
    p["up_b"] = _pad_lanes(up_b.reshape(1, outer_nc), outer_nc)

    # BatchNorm2d params (gamma=1, beta=0), padded to 128 lanes
    if (not outermost) and (not innermost):
        p["downnorm"] = (jnp.ones((1, LANES), jnp.float32),
                         jnp.zeros((1, LANES), jnp.float32))
    if not outermost:
        p["upnorm"] = (jnp.ones((1, LANES), jnp.float32),
                       jnp.zeros((1, LANES), jnp.float32))
    return p


def build_unet_params(key, input_nc, output_nc, num_downs, ngf):
    """Blocks listed innermost -> outermost, exactly as UnetGenerator builds them."""
    blocks = []
    key, sk = jax.random.split(key)
    blocks.append(make_block_params(sk, ngf * 8, ngf * 8, innermost=True))
    for _ in range(num_downs - 5):
        key, sk = jax.random.split(key)
        blocks.append(make_block_params(sk, ngf * 8, ngf * 8))
    for outer, inner in [(ngf * 4, ngf * 8), (ngf * 2, ngf * 4), (ngf, ngf * 2)]:
        key, sk = jax.random.split(key)
        blocks.append(make_block_params(sk, outer, inner))
    key, sk = jax.random.split(key)
    blocks.append(make_block_params(sk, output_nc, ngf, input_nc=input_nc,
                                    outermost=True))
    return blocks


# ----------------------------------------------------------------------------
# Forward pass (recursive U-Net skip blocks)
# ----------------------------------------------------------------------------
def unet_forward(x_nhwc, blocks):
    def run(idx, x):
        p = blocks[idx]
        outermost, innermost = p["outermost"], p["innermost"]
        # down path: [LeakyReLU(0.2)] -> Conv2d -> [BatchNorm]   (one fused call)
        d = conv_down(x, p["down_w"], p["inner_nc"],
                      pre_act=0 if outermost else 1,
                      bn=None if (outermost or innermost) else p["downnorm"])
        # submodule
        s = d if innermost else run(idx - 1, d)
        # up path: ReLU -> ConvTranspose2d -> (Tanh | BatchNorm)  (one fused call)
        u = conv_transpose_up(s, p["up_w"], p["up_b"], p["outer_nc"],
                              tanh_out=outermost,
                              bn=None if outermost else p["upnorm"])
        if outermost:
            return u
        return jnp.concatenate([x, u], axis=-1)   # torch.cat(dim=1) in NCHW

    return run(len(blocks) - 1, x_nhwc)


# ----------------------------------------------------------------------------
if __name__ == "__main__":
    key = jax.random.PRNGKey(0)
    kx, kp = jax.random.split(key)

    # small-but-consistent shapes: num_downs=5 needs spatial >= 32
    N, C_IN, C_OUT, HW, NGF, NUM_DOWNS = 2, 3, 3, 32, 8, 5

    x_nchw = jax.random.normal(kx, (N, C_IN, HW, HW), jnp.float32)
    x_nhwc = jnp.transpose(x_nchw, (0, 2, 3, 1))

    blocks = build_unet_params(kp, C_IN, C_OUT, NUM_DOWNS, NGF)

    fwd = jax.jit(lambda inp: unet_forward(inp, blocks))
    y_nhwc = fwd(x_nhwc)
    y_nchw = jnp.transpose(y_nhwc, (0, 3, 1, 2))
    jax.block_until_ready(y_nchw)

    assert y_nchw.shape == (N, C_OUT, HW, HW), y_nchw.shape
    assert bool(jnp.all(jnp.isfinite(y_nchw)))
    assert bool(jnp.all(jnp.abs(y_nchw) <= 1.0 + 1e-6))   # Tanh output range
    print("KERNEL_OK")
</pallas_src>

<mosaic_0001>
module attributes {stable_mosaic.version = 11 : i64} {
  func.func @_gemm_act_kernel(%arg0: i32, %arg1: memref<1x128x48xbf16, #tpu.memory_space<vmem>>, %arg2: memref<1x48x128xbf16, #tpu.memory_space<vmem>>, %arg3: memref<1x128xf32, #tpu.memory_space<vmem>>, %arg4: memref<1x128x128xf32, #tpu.memory_space<vmem>>) attributes {dimension_semantics = [#tpu.dimension_semantics<parallel>], iteration_bounds = array<i64: 4>, scalar_prefetch = 0 : i64, scratch_operands = 0 : i64, tpu.core_type = #tpu.core_type<tc>, window_params = [{transform_indices = @transform_0, window_bounds = array<i64: 1, 128, 48>}, {pipeline_mode = #tpu.pipeline_mode<synchronous>, transform_indices = @transform_1, window_bounds = array<i64: 1, 48, 128>}, {pipeline_mode = #tpu.pipeline_mode<synchronous>, transform_indices = @transform_2, window_bounds = array<i64: 1, 128>}, {transform_indices = @transform_3, window_bounds = array<i64: 1, 128, 128>}]} {
    %c0 = arith.constant 0 : index
    %c0_0 = arith.constant 0 : index
    %c0_1 = arith.constant 0 : index
    %0 = vector.load %arg1[%c0, %c0_0, %c0_1] : memref<1x128x48xbf16, #tpu.memory_space<vmem>>, vector<1x128x48xbf16>
    %1 = vector.shape_cast %0 : vector<1x128x48xbf16> to vector<128x48xbf16>
    %2 = arith.extf %1 : vector<128x48xbf16> to vector<128x48xf32>
    %3 = arith.truncf %2 : vector<128x48xf32> to vector<128x48xbf16>
    %c0_2 = arith.constant 0 : index
    %c0_3 = arith.constant 0 : index
    %c0_4 = arith.constant 0 : index
    %4 = vector.load %arg2[%c0_2, %c0_3, %c0_4] : memref<1x48x128xbf16, #tpu.memory_space<vmem>>, vector<1x48x128xbf16>
    %5 = vector.shape_cast %4 : vector<1x48x128xbf16> to vector<48x128xbf16>
    %cst = arith.constant dense<0.000000e+00> : vector<128x128xf32>
    %6 = tpu.matmul %3, %5, %cst {dimension_numbers = #tpu.dot_dimension_numbers<[1], [0], [0], [1], [0, 0, 1, 1], [], []>} : vector<128x48xbf16>, vector<48x128xbf16>, vector<128x128xf32> -> vector<128x128xf32>
    %c0_5 = arith.constant 0 : index
    %c0_6 = arith.constant 0 : index
    %7 = vector.load %arg3[%c0_5, %c0_6] : memref<1x128xf32, #tpu.memory_space<vmem>>, vector<1x128xf32>
    %8 = vector.broadcast %7 : vector<1x128xf32> to vector<128x128xf32>
    %9 = arith.addf %6, %8 : vector<128x128xf32>
    %c0_7 = arith.constant 0 : index
    %c0_8 = arith.constant 0 : index
    %c0_9 = arith.constant 0 : index
    %10 = vector.load %arg4[%c0_7, %c0_8, %c0_9] : memref<1x128x128xf32, #tpu.memory_space<vmem>>, vector<1x128x128xf32>
    %11 = vector.shape_cast %10 : vector<1x128x128xf32> to vector<128x128xf32>
    %12 = vector.shape_cast %9 : vector<128x128xf32> to vector<1x128x128xf32>
    tpu.vector_store %arg4[%c0_7, %c0_8, %c0_9], %12 {strides = array<i32>} : memref<1x128x128xf32, #tpu.memory_space<vmem>>, vector<1x128x128xf32>,
    return
  }
  func.func @transform_0(%arg0: i32) -> (i32, i32, i32) {
    %c0_i32 = arith.constant 0 : i32
    %c0_i32_0 = arith.constant 0 : i32
    %c0_i32_1 = arith.constant 0 : i32
    return %c0_i32, %arg0, %c0_i32_0 : i32, i32, i32
  }
  func.func @transform_1(%arg0: i32) -> (i32, i32, i32) {
    %c0_i32 = arith.constant 0 : i32
    %c0_i32_0 = arith.constant 0 : i32
    %c0_i32_1 = arith.constant 0 : i32
    %c0_i32_2 = arith.constant 0 : i32
    return %c0_i32, %c0_i32_0, %c0_i32_1 : i32, i32, i32
  }
  func.func @transform_2(%arg0: i32) -> (i32, i32) {
    %c0_i32 = arith.constant 0 : i32
    %c0_i32_0 = arith.constant 0 : i32
    %c0_i32_1 = arith.constant 0 : i32
    return %c0_i32, %c0_i32_0 : i32, i32
  }
  func.func @transform_3(%arg0: i32) -> (i32, i32, i32) {
    %c0_i32 = arith.constant 0 : i32
    %c0_i32_0 = arith.constant 0 : i32
    %c0_i32_1 = arith.constant 0 : i32
    return %c0_i32, %arg0, %c0_i32_0 : i32, i32, i32
  }
}

module attributes {stable_mosaic.version = 11 : i64} {
  func.func @_gemm_bn_kernel(%arg0: i32, %arg1: memref<1x128x128xbf16, #tpu.memory_space<vmem>>, %arg2: memref<1x128x128xbf16, #tpu.memory_space<vmem>>, %arg3: memref<1x128xf32, #tpu.memory_space<vmem>>, %arg4: memref<1x128xf32, #tpu.memory_space<vmem>>, %arg5: memref<1x128x128xf32, #tpu.memory_space<vmem>>) attributes {dimension_semantics = [#tpu.dimension_semantics<arbitrary>], iteration_bounds = array<i64: 1>, scalar_prefetch = 0 : i64, scratch_operands = 0 : i64, tpu.core_type = #tpu.core_type<tc>, window_params = [{pipeline_mode = #tpu.pipeline_mode<synchronous>, transform_indices = @transform_0, window_bounds = array<i64: 1, 128, 128>}, {pipeline_mode = #tpu.pipeline_mode<synchronous>, transform_indices = @transform_1, window_bounds = array<i64: 1, 128, 128>}, {pipeline_mode = #tpu.pipeline_mode<synchronous>, transform_indices = @transform_2, window_bounds = array<i64: 1, 128>}, {pipeline_mode = #tpu.pipeline_mode<synchronous>, transform_indices = @transform_3, window_bounds = array<i64: 1, 128>}, {pipeline_mode = #tpu.pipeline_mode<synchronous>, transform_indices = @transform_4, window_bounds = array<i64: 1, 128, 128>}]} {
    %cst = arith.constant 0.000000e+00 : f32
    %0 = vector.broadcast %cst : f32 to vector<1x128xf32>
    %c0 = arith.constant 0 : index
    %c0_0 = arith.constant 0 : index
    %c0_1 = arith.constant 0 : index
    %1 = vector.load %arg1[%c0, %c0_0, %c0_1] : memref<1x128x128xbf16, #tpu.memory_space<vmem>>, vector<1x128x128xbf16>
    %2 = vector.shape_cast %1 : vector<1x128x128xbf16> to vector<128x128xbf16>
    %3 = arith.extf %2 : vector<128x128xbf16> to vector<128x128xf32>
    %cst_2 = arith.constant 0.000000e+00 : f32
    %4 = vector.broadcast %cst_2 : f32 to vector<128x128xf32>
    %5 = arith.cmpf oge, %3, %4 : vector<128x128xf32>
    %cst_3 = arith.constant 2.000000e-01 : f32
    %6 = vector.broadcast %cst_3 : f32 to vector<128x128xf32>
    %7 = arith.mulf %6, %3 : vector<128x128xf32>
    %8 = arith.select %5, %3, %7 : vector<128x128xi1>, vector<128x128xf32>
    %9 = arith.truncf %8 : vector<128x128xf32> to vector<128x128xbf16>
    %c0_4 = arith.constant 0 : index
    %c0_5 = arith.constant 0 : index
    %c0_6 = arith.constant 0 : index
    %10 = vector.load %arg2[%c0_4, %c0_5, %c0_6] : memref<1x128x128xbf16, #tpu.memory_space<vmem>>, vector<1x128x128xbf16>
    %11 = vector.shape_cast %10 : vector<1x128x128xbf16> to vector<128x128xbf16>
    %cst_7 = arith.constant dense<0.000000e+00> : vector<128x128xf32>
    %12 = tpu.matmul %9, %11, %cst_7 {dimension_numbers = #tpu.dot_dimension_numbers<[1], [0], [0], [1], [0, 0, 1, 1], [], []>} : vector<128x128xbf16>, vector<128x128xbf16>, vector<128x128xf32> -> vector<128x128xf32>
    %c0_8 = arith.constant 0 : index
    %c0_9 = arith.constant 0 : index
    %c0_10 = arith.constant 0 : index
    %13 = vector.load %arg5[%c0_8, %c0_9, %c0_10] : memref<1x128x128xf32, #tpu.memory_space<vmem>>, vector<1x128x128xf32>
    %14 = vector.shape_cast %13 : vector<1x128x128xf32> to vector<128x128xf32>
    %15 = vector.shape_cast %12 : vector<128x128xf32> to vector<1x128x128xf32>
    tpu.vector_store %arg5[%c0_8, %c0_9, %c0_10], %15 {strides = array<i32>} : memref<1x128x128xf32, #tpu.memory_space<vmem>>, vector<1x128x128xf32>,
    %cst_11 = arith.constant dense<0.000000e+00> : vector<128xf32>
    %16 = vector.multi_reduction <add>, %12, %cst_11 [0] : vector<128x128xf32> to vector<128xf32>
    %17 = vector.shape_cast %16 : vector<128xf32> to vector<1x128xf32>
    %18 = arith.addf %0, %17 : vector<1x128xf32>
    %cst_12 = arith.constant 7.812500e-03 : f32
    %19 = vector.broadcast %cst_12 : f32 to vector<1x128xf32>
    %20 = arith.mulf %18, %19 : vector<1x128xf32>
    %cst_13 = arith.constant 0.000000e+00 : f32
    %21 = vector.broadcast %cst_13 : f32 to vector<1x128xf32>
    %c0_14 = arith.constant 0 : index
    %c0_15 = arith.constant 0 : index
    %c0_16 = arith.constant 0 : index
    %22 = vector.load %arg5[%c0_14, %c0_15, %c0_16] : memref<1x128x128xf32, #tpu.memory_space<vmem>>, vector<1x128x128xf32>
    %23 = vector.shape_cast %22 : vector<1x128x128xf32> to vector<128x128xf32>
    %24 = vector.broadcast %20 : vector<1x128xf32> to vector<128x128xf32>
    %25 = arith.subf %23, %24 : vector<128x128xf32>
    %26 = arith.mulf %25, %25 : vector<128x128xf32>
    %cst_17 = arith.constant dense<0.000000e+00> : vector<128xf32>
    %27 = vector.multi_reduction <add>, %26, %cst_17 [0] : vector<128x128xf32> to vector<128xf32>
    %28 = vector.shape_cast %27 : vector<128xf32> to vector<1x128xf32>
    %29 = arith.addf %21, %28 : vector<1x128xf32>
    %cst_18 = arith.constant 7.812500e-03 : f32
    %30 = vector.broadcast %cst_18 : f32 to vector<1x128xf32>
    %31 = arith.mulf %29, %30 : vector<1x128xf32>
    %c0_19 = arith.constant 0 : index
    %c0_20 = arith.constant 0 : index
    %32 = vector.load %arg3[%c0_19, %c0_20] : memref<1x128xf32, #tpu.memory_space<vmem>>, vector<1x128xf32>
    %cst_21 = arith.constant 9.99999974E-6 : f32
    %33 = vector.broadcast %cst_21 : f32 to vector<1x128xf32>
    %34 = arith.addf %31, %33 : vector<1x128xf32>
    %35 = math.rsqrt %34 : vector<1x128xf32>
    %36 = arith.mulf %32, %35 : vector<1x128xf32>
    %c0_22 = arith.constant 0 : index
    %c0_23 = arith.constant 0 : index
    %37 = vector.load %arg4[%c0_22, %c0_23] : memref<1x128xf32, #tpu.memory_space<vmem>>, vector<1x128xf32>
    %38 = arith.mulf %20, %36 : vector<1x128xf32>
    %39 = arith.subf %37, %38 : vector<1x128xf32>
    %c0_24 = arith.constant 0 : index
    %c0_25 = arith.constant 0 : index
    %c0_26 = arith.constant 0 : index
    %40 = vector.load %arg5[%c0_24, %c0_25, %c0_26] : memref<1x128x128xf32, #tpu.memory_space<vmem>>, vector<1x128x128xf32>
    %41 = vector.shape_cast %40 : vector<1x128x128xf32> to vector<128x128xf32>
    %42 = vector.broadcast %36 : vector<1x128xf32> to vector<128x128xf32>
    %43 = arith.mulf %41, %42 : vector<128x128xf32>
    %44 = vector.broadcast %39 : vector<1x128xf32> to vector<128x128xf32>
    %45 = arith.addf %43, %44 : vector<128x128xf32>
    %c0_27 = arith.constant 0 : index
    %c0_28 = arith.constant 0 : index
    %c0_29 = arith.constant 0 : index
    %46 = vector.load %arg5[%c0_27, %c0_28, %c0_29] : memref<1x128x128xf32, #tpu.memory_space<vmem>>, vector<1x128x128xf32>
    %47 = vector.shape_cast %46 : vector<1x128x128xf32> to vector<128x128xf32>
    %48 = vector.shape_cast %45 : vector<128x128xf32> to vector<1x128x128xf32>
    tpu.vector_store %arg5[%c0_27, %c0_28, %c0_29], %48 {strides = array<i32>} : memref<1x128x128xf32, #tpu.memory_space<vmem>>, vector<1x128x128xf32>,
    return
  }
  func.func @transform_0(%arg0: i32) -> (i32, i32, i32) {
    %c0_i32 = arith.constant 0 : i32
    %c0_i32_0 = arith.constant 0 : i32
    %c0_i32_1 = arith.constant 0 : i32
    %c0_i32_2 = arith.constant 0 : i32
    return %c0_i32, %c0_i32_0, %c0_i32_1 : i32, i32, i32
  }
  func.func @transform_1(%arg0: i32) -> (i32, i32, i32) {
    %c0_i32 = arith.constant 0 : i32
    %c0_i32_0 = arith.constant 0 : i32
    %c0_i32_1 = arith.constant 0 : i32
    %c0_i32_2 = arith.constant 0 : i32
    return %c0_i32, %c0_i32_0, %c0_i32_1 : i32, i32, i32
  }
  func.func @transform_2(%arg0: i32) -> (i32, i32) {
    %c0_i32 = arith.constant 0 : i32
    %c0_i32_0 = arith.constant 0 : i32
    %c0_i32_1 = arith.constant 0 : i32
    return %c0_i32, %c0_i32_0 : i32, i32
  }
  func.func @transform_3(%arg0: i32) -> (i32, i32) {
    %c0_i32 = arith.constant 0 : i32
    %c0_i32_0 = arith.constant 0 : i32
    %c0_i32_1 = arith.constant 0 : i32
    return %c0_i32, %c0_i32_0 : i32, i32
  }
  func.func @transform_4(%arg0: i32) -> (i32, i32, i32) {
    %c0_i32 = arith.constant 0 : i32
    %c0_i32_0 = arith.constant 0 : i32
    %c0_i32_1 = arith.constant 0 : i32
    %c0_i32_2 = arith.constant 0 : i32
    return %c0_i32, %c0_i32_0, %c0_i32_1 : i32, i32, i32
  }
}

module attributes {stable_mosaic.version = 11 : i64} {
  func.func @_gemm_bn_kernel(%arg0: i32, %arg1: memref<1x32x256xbf16, #tpu.memory_space<vmem>>, %arg2: memref<1x256x128xbf16, #tpu.memory_space<vmem>>, %arg3: memref<1x128xf32, #tpu.memory_space<vmem>>, %arg4: memref<1x128xf32, #tpu.memory_space<vmem>>, %arg5: memref<1x32x128xf32, #tpu.memory_space<vmem>>) attributes {dimension_semantics = [#tpu.dimension_semantics<arbitrary>], iteration_bounds = array<i64: 1>, scalar_prefetch = 0 : i64, scratch_operands = 0 : i64, tpu.core_type = #tpu.core_type<tc>, window_params = [{pipeline_mode = #tpu.pipeline_mode<synchronous>, transform_indices = @transform_0, window_bounds = array<i64: 1, 32, 256>}, {pipeline_mode = #tpu.pipeline_mode<synchronous>, transform_indices = @transform_1, window_bounds = array<i64: 1, 256, 128>}, {pipeline_mode = #tpu.pipeline_mode<synchronous>, transform_indices = @transform_2, window_bounds = array<i64: 1, 128>}, {pipeline_mode = #tpu.pipeline_mode<synchronous>, transform_indices = @transform_3, window_bounds = array<i64: 1, 128>}, {pipeline_mode = #tpu.pipeline_mode<synchronous>, transform_indices = @transform_4, window_bounds = array<i64: 1, 32, 128>}]} {
    %cst = arith.constant 0.000000e+00 : f32
    %0 = vector.broadcast %cst : f32 to vector<1x128xf32>
    %c0 = arith.constant 0 : index
    %c0_0 = arith.constant 0 : index
    %c0_1 = arith.constant 0 : index
    %1 = vector.load %arg1[%c0, %c0_0, %c0_1] : memref<1x32x256xbf16, #tpu.memory_space<vmem>>, vector<1x32x256xbf16>
    %2 = vector.shape_cast %1 : vector<1x32x256xbf16> to vector<32x256xbf16>
    %3 = arith.extf %2 : vector<32x256xbf16> to vector<32x256xf32>
    %cst_2 = arith.constant 0.000000e+00 : f32
    %4 = vector.broadcast %cst_2 : f32 to vector<32x256xf32>
    %5 = arith.cmpf oge, %3, %4 : vector<32x256xf32>
    %cst_3 = arith.constant 2.000000e-01 : f32
    %6 = vector.broadcast %cst_3 : f32 to vector<32x256xf32>
    %7 = arith.mulf %6, %3 : vector<32x256xf32>
    %8 = arith.select %5, %3, %7 : vector<32x256xi1>, vector<32x256xf32>
    %9 = arith.truncf %8 : vector<32x256xf32> to vector<32x256xbf16>
    %c0_4 = arith.constant 0 : index
    %c0_5 = arith.constant 0 : index
    %c0_6 = arith.constant 0 : index
    %10 = vector.load %arg2[%c0_4, %c0_5, %c0_6] : memref<1x256x128xbf16, #tpu.memory_space<vmem>>, vector<1x256x128xbf16>
    %11 = vector.shape_cast %10 : vector<1x256x128xbf16> to vector<256x128xbf16>
    %cst_7 = arith.constant dense<0.000000e+00> : vector<32x128xf32>
    %12 = tpu.matmul %9, %11, %cst_7 {dimension_numbers = #tpu.dot_dimension_numbers<[1], [0], [0], [1], [0, 0, 1, 1], [], []>} : vector<32x256xbf16>, vector<256x128xbf16>, vector<32x128xf32> -> vector<32x128xf32>
    %c0_8 = arith.constant 0 : index
    %c0_9 = arith.constant 0 : index
    %c0_10 = arith.constant 0 : index
    %13 = vector.load %arg5[%c0_8, %c0_9, %c0_10] : memref<1x32x128xf32, #tpu.memory_space<vmem>>, vector<1x32x128xf32>
    %14 = vector.shape_cast %13 : vector<1x32x128xf32> to vector<32x128xf32>
    %15 = vector.shape_cast %12 : vector<32x128xf32> to vector<1x32x128xf32>
    tpu.vector_store %arg5[%c0_8, %c0_9, %c0_10], %15 {strides = array<i32>} : memref<1x32x128xf32, #tpu.memory_space<vmem>>, vector<1x32x128xf32>,
    %cst_11 = arith.constant dense<0.000000e+00> : vector<128xf32>
    %16 = vector.multi_reduction <add>, %12, %cst_11 [0] : vector<32x128xf32> to vector<128xf32>
    %17 = vector.shape_cast %16 : vector<128xf32> to vector<1x128xf32>
    %18 = arith.addf %0, %17 : vector<1x128xf32>
    %cst_12 = arith.constant 3.125000e-02 : f32
    %19 = vector.broadcast %cst_12 : f32 to vector<1x128xf32>
    %20 = arith.mulf %18, %19 : vector<1x128xf32>
    %cst_13 = arith.constant 0.000000e+00 : f32
    %21 = vector.broadcast %cst_13 : f32 to vector<1x128xf32>
    %c0_14 = arith.constant 0 : index
    %c0_15 = arith.constant 0 : index
    %c0_16 = arith.constant 0 : index
    %22 = vector.load %arg5[%c0_14, %c0_15, %c0_16] : memref<1x32x128xf32, #tpu.memory_space<vmem>>, vector<1x32x128xf32>
    %23 = vector.shape_cast %22 : vector<1x32x128xf32> to vector<32x128xf32>
    %24 = vector.broadcast %20 : vector<1x128xf32> to vector<32x128xf32>
    %25 = arith.subf %23, %24 : vector<32x128xf32>
    %26 = arith.mulf %25, %25 : vector<32x128xf32>
    %cst_17 = arith.constant dense<0.000000e+00> : vector<128xf32>
    %27 = vector.multi_reduction <add>, %26, %cst_17 [0] : vector<32x128xf32> to vector<128xf32>
    %28 = vector.shape_cast %27 : vector<128xf32> to vector<1x128xf32>
    %29 = arith.addf %21, %28 : vector<1x128xf32>
    %cst_18 = arith.constant 3.125000e-02 : f32
    %30 = vector.broadcast %cst_18 : f32 to vector<1x128xf32>
    %31 = arith.mulf %29, %30 : vector<1x128xf32>
    %c0_19 = arith.constant 0 : index
    %c0_20 = arith.constant 0 : index
    %32 = vector.load %arg3[%c0_19, %c0_20] : memref<1x128xf32, #tpu.memory_space<vmem>>, vector<1x128xf32>
    %cst_21 = arith.constant 9.99999974E-6 : f32
    %33 = vector.broadcast %cst_21 : f32 to vector<1x128xf32>
    %34 = arith.addf %31, %33 : vector<1x128xf32>
    %35 = math.rsqrt %34 : vector<1x128xf32>
    %36 = arith.mulf %32, %35 : vector<1x128xf32>
    %c0_22 = arith.constant 0 : index
    %c0_23 = arith.constant 0 : index
    %37 = vector.load %arg4[%c0_22, %c0_23] : memref<1x128xf32, #tpu.memory_space<vmem>>, vector<1x128xf32>
    %38 = arith.mulf %20, %36 : vector<1x128xf32>
    %39 = arith.subf %37, %38 : vector<1x128xf32>
    %c0_24 = arith.constant 0 : index
    %c0_25 = arith.constant 0 : index
    %c0_26 = arith.constant 0 : index
    %40 = vector.load %arg5[%c0_24, %c0_25, %c0_26] : memref<1x32x128xf32, #tpu.memory_space<vmem>>, vector<1x32x128xf32>
    %41 = vector.shape_cast %40 : vector<1x32x128xf32> to vector<32x128xf32>
    %42 = vector.broadcast %36 : vector<1x128xf32> to vector<32x128xf32>
    %43 = arith.mulf %41, %42 : vector<32x128xf32>
    %44 = vector.broadcast %39 : vector<1x128xf32> to vector<32x128xf32>
    %45 = arith.addf %43, %44 : vector<32x128xf32>
    %c0_27 = arith.constant 0 : index
    %c0_28 = arith.constant 0 : index
    %c0_29 = arith.constant 0 : index
    %46 = vector.load %arg5[%c0_27, %c0_28, %c0_29] : memref<1x32x128xf32, #tpu.memory_space<vmem>>, vector<1x32x128xf32>
    %47 = vector.shape_cast %46 : vector<1x32x128xf32> to vector<32x128xf32>
    %48 = vector.shape_cast %45 : vector<32x128xf32> to vector<1x32x128xf32>
    tpu.vector_store %arg5[%c0_27, %c0_28, %c0_29], %48 {strides = array<i32>} : memref<1x32x128xf32, #tpu.memory_space<vmem>>, vector<1x32x128xf32>,
    return
  }
  func.func @transform_0(%arg0: i32) -> (i32, i32, i32) {
    %c0_i32 = arith.constant 0 : i32
    %c0_i32_0 = arith.constant 0 : i32
    %c0_i32_1 = arith.constant 0 : i32
    %c0_i32_2 = arith.constant 0 : i32
    return %c0_i32, %c0_i32_0, %c0_i32_1 : i32, i32, i32
  }
  func.func @transform_1(%arg0: i32) -> (i32, i32, i32) {
    %c0_i32 = arith.constant 0 : i32
    %c0_i32_0 = arith.constant 0 : i32
    %c0_i32_1 = arith.constant 0 : i32
    %c0_i32_2 = arith.constant 0 : i32
    return %c0_i32, %c0_i32_0, %c0_i32_1 : i32, i32, i32
  }
  func.func @transform_2(%arg0: i32) -> (i32, i32) {
    %c0_i32 = arith.constant 0 : i32
    %c0_i32_0 = arith.constant 0 : i32
    %c0_i32_1 = arith.constant 0 : i32
    return %c0_i32, %c0_i32_0 : i32, i32
  }
  func.func @transform_3(%arg0: i32) -> (i32, i32) {
    %c0_i32 = arith.constant 0 : i32
    %c0_i32_0 = arith.constant 0 : i32
    %c0_i32_1 = arith.constant 0 : i32
    return %c0_i32, %c0_i32_0 : i32, i32
  }
  func.func @transform_4(%arg0: i32) -> (i32, i32, i32) {
    %c0_i32 = arith.constant 0 : i32
    %c0_i32_0 = arith.constant 0 : i32
    %c0_i32_1 = arith.constant 0 : i32
    %c0_i32_2 = arith.constant 0 : i32
    return %c0_i32, %c0_i32_0, %c0_i32_1 : i32, i32, i32
  }
}

module attributes {stable_mosaic.version = 11 : i64} {
  func.func @_gemm_bn_kernel(%arg0: i32, %arg1: memref<1x8x512xbf16, #tpu.memory_space<vmem>>, %arg2: memref<1x512x128xbf16, #tpu.memory_space<vmem>>, %arg3: memref<1x128xf32, #tpu.memory_space<vmem>>, %arg4: memref<1x128xf32, #tpu.memory_space<vmem>>, %arg5: memref<1x8x128xf32, #tpu.memory_space<vmem>>) attributes {dimension_semantics = [#tpu.dimension_semantics<arbitrary>], iteration_bounds = array<i64: 1>, scalar_prefetch = 0 : i64, scratch_operands = 0 : i64, tpu.core_type = #tpu.core_type<tc>, window_params = [{pipeline_mode = #tpu.pipeline_mode<synchronous>, transform_indices = @transform_0, window_bounds = array<i64: 1, 8, 512>}, {pipeline_mode = #tpu.pipeline_mode<synchronous>, transform_indices = @transform_1, window_bounds = array<i64: 1, 512, 128>}, {pipeline_mode = #tpu.pipeline_mode<synchronous>, transform_indices = @transform_2, window_bounds = array<i64: 1, 128>}, {pipeline_mode = #tpu.pipeline_mode<synchronous>, transform_indices = @transform_3, window_bounds = array<i64: 1, 128>}, {pipeline_mode = #tpu.pipeline_mode<synchronous>, transform_indices = @transform_4, window_bounds = array<i64: 1, 8, 128>}]} {
    %cst = arith.constant 0.000000e+00 : f32
    %0 = vector.broadcast %cst : f32 to vector<1x128xf32>
    %c0 = arith.constant 0 : index
    %c0_0 = arith.constant 0 : index
    %c0_1 = arith.constant 0 : index
    %1 = vector.load %arg1[%c0, %c0_0, %c0_1] : memref<1x8x512xbf16, #tpu.memory_space<vmem>>, vector<1x8x512xbf16>
    %2 = vector.shape_cast %1 : vector<1x8x512xbf16> to vector<8x512xbf16>
    %3 = arith.extf %2 : vector<8x512xbf16> to vector<8x512xf32>
    %cst_2 = arith.constant 0.000000e+00 : f32
    %4 = vector.broadcast %cst_2 : f32 to vector<8x512xf32>
    %5 = arith.cmpf oge, %3, %4 : vector<8x512xf32>
    %cst_3 = arith.constant 2.000000e-01 : f32
    %6 = vector.broadcast %cst_3 : f32 to vector<8x512xf32>
    %7 = arith.mulf %6, %3 : vector<8x512xf32>
    %8 = arith.select %5, %3, %7 : vector<8x512xi1>, vector<8x512xf32>
    %9 = arith.truncf %8 : vector<8x512xf32> to vector<8x512xbf16>
    %c0_4 = arith.constant 0 : index
    %c0_5 = arith.constant 0 : index
    %c0_6 = arith.constant 0 : index
    %10 = vector.load %arg2[%c0_4, %c0_5, %c0_6] : memref<1x512x128xbf16, #tpu.memory_space<vmem>>, vector<1x512x128xbf16>
    %11 = vector.shape_cast %10 : vector<1x512x128xbf16> to vector<512x128xbf16>
    %cst_7 = arith.constant dense<0.000000e+00> : vector<8x128xf32>
    %12 = tpu.matmul %9, %11, %cst_7 {dimension_numbers = #tpu.dot_dimension_numbers<[1], [0], [0], [1], [0, 0, 1, 1], [], []>} : vector<8x512xbf16>, vector<512x128xbf16>, vector<8x128xf32> -> vector<8x128xf32>
    %c0_8 = arith.constant 0 : index
    %c0_9 = arith.constant 0 : index
    %c0_10 = arith.constant 0 : index
    %13 = vector.load %arg5[%c0_8, %c0_9, %c0_10] : memref<1x8x128xf32, #tpu.memory_space<vmem>>, vector<1x8x128xf32>
    %14 = vector.shape_cast %13 : vector<1x8x128xf32> to vector<8x128xf32>
    %15 = vector.shape_cast %12 : vector<8x128xf32> to vector<1x8x128xf32>
    tpu.vector_store %arg5[%c0_8, %c0_9, %c0_10], %15 {strides = array<i32>} : memref<1x8x128xf32, #tpu.memory_space<vmem>>, vector<1x8x128xf32>,
    %cst_11 = arith.constant dense<0.000000e+00> : vector<128xf32>
    %16 = vector.multi_reduction <add>, %12, %cst_11 [0] : vector<8x128xf32> to vector<128xf32>
    %17 = vector.shape_cast %16 : vector<128xf32> to vector<1x128xf32>
    %18 = arith.addf %0, %17 : vector<1x128xf32>
    %cst_12 = arith.constant 1.250000e-01 : f32
    %19 = vector.broadcast %cst_12 : f32 to vector<1x128xf32>
    %20 = arith.mulf %18, %19 : vector<1x128xf32>
    %cst_13 = arith.constant 0.000000e+00 : f32
    %21 = vector.broadcast %cst_13 : f32 to vector<1x128xf32>
    %c0_14 = arith.constant 0 : index
    %c0_15 = arith.constant 0 : index
    %c0_16 = arith.constant 0 : index
    %22 = vector.load %arg5[%c0_14, %c0_15, %c0_16] : memref<1x8x128xf32, #tpu.memory_space<vmem>>, vector<1x8x128xf32>
    %23 = vector.shape_cast %22 : vector<1x8x128xf32> to vector<8x128xf32>
    %24 = vector.broadcast %20 : vector<1x128xf32> to vector<8x128xf32>
    %25 = arith.subf %23, %24 : vector<8x128xf32>
    %26 = arith.mulf %25, %25 : vector<8x128xf32>
    %cst_17 = arith.constant dense<0.000000e+00> : vector<128xf32>
    %27 = vector.multi_reduction <add>, %26, %cst_17 [0] : vector<8x128xf32> to vector<128xf32>
    %28 = vector.shape_cast %27 : vector<128xf32> to vector<1x128xf32>
    %29 = arith.addf %21, %28 : vector<1x128xf32>
    %cst_18 = arith.constant 1.250000e-01 : f32
    %30 = vector.broadcast %cst_18 : f32 to vector<1x128xf32>
    %31 = arith.mulf %29, %30 : vector<1x128xf32>
    %c0_19 = arith.constant 0 : index
    %c0_20 = arith.constant 0 : index
    %32 = vector.load %arg3[%c0_19, %c0_20] : memref<1x128xf32, #tpu.memory_space<vmem>>, vector<1x128xf32>
    %cst_21 = arith.constant 9.99999974E-6 : f32
    %33 = vector.broadcast %cst_21 : f32 to vector<1x128xf32>
    %34 = arith.addf %31, %33 : vector<1x128xf32>
    %35 = math.rsqrt %34 : vector<1x128xf32>
    %36 = arith.mulf %32, %35 : vector<1x128xf32>
    %c0_22 = arith.constant 0 : index
    %c0_23 = arith.constant 0 : index
    %37 = vector.load %arg4[%c0_22, %c0_23] : memref<1x128xf32, #tpu.memory_space<vmem>>, vector<1x128xf32>
    %38 = arith.mulf %20, %36 : vector<1x128xf32>
    %39 = arith.subf %37, %38 : vector<1x128xf32>
    %c0_24 = arith.constant 0 : index
    %c0_25 = arith.constant 0 : index
    %c0_26 = arith.constant 0 : index
    %40 = vector.load %arg5[%c0_24, %c0_25, %c0_26] : memref<1x8x128xf32, #tpu.memory_space<vmem>>, vector<1x8x128xf32>
    %41 = vector.shape_cast %40 : vector<1x8x128xf32> to vector<8x128xf32>
    %42 = vector.broadcast %36 : vector<1x128xf32> to vector<8x128xf32>
    %43 = arith.mulf %41, %42 : vector<8x128xf32>
    %44 = vector.broadcast %39 : vector<1x128xf32> to vector<8x128xf32>
    %45 = arith.addf %43, %44 : vector<8x128xf32>
    %c0_27 = arith.constant 0 : index
    %c0_28 = arith.constant 0 : index
    %c0_29 = arith.constant 0 : index
    %46 = vector.load %arg5[%c0_27, %c0_28, %c0_29] : memref<1x8x128xf32, #tpu.memory_space<vmem>>, vector<1x8x128xf32>
    %47 = vector.shape_cast %46 : vector<1x8x128xf32> to vector<8x128xf32>
    %48 = vector.shape_cast %45 : vector<8x128xf32> to vector<1x8x128xf32>
    tpu.vector_store %arg5[%c0_27, %c0_28, %c0_29], %48 {strides = array<i32>} : memref<1x8x128xf32, #tpu.memory_space<vmem>>, vector<1x8x128xf32>,
    return
  }
  func.func @transform_0(%arg0: i32) -> (i32, i32, i32) {
    %c0_i32 = arith.constant 0 : i32
    %c0_i32_0 = arith.constant 0 : i32
    %c0_i32_1 = arith.constant 0 : i32
    %c0_i32_2 = arith.constant 0 : i32
    return %c0_i32, %c0_i32_0, %c0_i32_1 : i32, i32, i32
  }
  func.func @transform_1(%arg0: i32) -> (i32, i32, i32) {
    %c0_i32 = arith.constant 0 : i32
    %c0_i32_0 = arith.constant 0 : i32
    %c0_i32_1 = arith.constant 0 : i32
    %c0_i32_2 = arith.constant 0 : i32
    return %c0_i32, %c0_i32_0, %c0_i32_1 : i32, i32, i32
  }
  func.func @transform_2(%arg0: i32) -> (i32, i32) {
    %c0_i32 = arith.constant 0 : i32
    %c0_i32_0 = arith.constant 0 : i32
    %c0_i32_1 = arith.constant 0 : i32
    return %c0_i32, %c0_i32_0 : i32, i32
  }
  func.func @transform_3(%arg0: i32) -> (i32, i32) {
    %c0_i32 = arith.constant 0 : i32
    %c0_i32_0 = arith.constant 0 : i32
    %c0_i32_1 = arith.constant 0 : i32
    return %c0_i32, %c0_i32_0 : i32, i32
  }
  func.func @transform_4(%arg0: i32) -> (i32, i32, i32) {
    %c0_i32 = arith.constant 0 : i32
    %c0_i32_0 = arith.constant 0 : i32
    %c0_i32_1 = arith.constant 0 : i32
    %c0_i32_2 = arith.constant 0 : i32
    return %c0_i32, %c0_i32_0, %c0_i32_1 : i32, i32, i32
  }
}

module attributes {stable_mosaic.version = 11 : i64} {
  func.func @_gemm_act_kernel(%arg0: i32, %arg1: memref<1x2x1024xbf16, #tpu.memory_space<vmem>>, %arg2: memref<1x1024x128xbf16, #tpu.memory_space<vmem>>, %arg3: memref<1x128xf32, #tpu.memory_space<vmem>>, %arg4: memref<1x2x128xf32, #tpu.memory_space<vmem>>) attributes {dimension_semantics = [#tpu.dimension_semantics<parallel>], iteration_bounds = array<i64: 1>, scalar_prefetch = 0 : i64, scratch_operands = 0 : i64, tpu.core_type = #tpu.core_type<tc>, window_params = [{transform_indices = @transform_0, window_bounds = array<i64: 1, 2, 1024>}, {pipeline_mode = #tpu.pipeline_mode<synchronous>, transform_indices = @transform_1, window_bounds = array<i64: 1, 1024, 128>}, {pipeline_mode = #tpu.pipeline_mode<synchronous>, transform_indices = @transform_2, window_bounds = array<i64: 1, 128>}, {transform_indices = @transform_3, window_bounds = array<i64: 1, 2, 128>}]} {
    %c0 = arith.constant 0 : index
    %c0_0 = arith.constant 0 : index
    %c0_1 = arith.constant 0 : index
    %0 = vector.load %arg1[%c0, %c0_0, %c0_1] : memref<1x2x1024xbf16, #tpu.memory_space<vmem>>, vector<1x2x1024xbf16>
    %1 = vector.shape_cast %0 : vector<1x2x1024xbf16> to vector<2x1024xbf16>
    %2 = arith.extf %1 : vector<2x1024xbf16> to vector<2x1024xf32>
    %cst = arith.constant 0.000000e+00 : f32
    %3 = vector.broadcast %cst : f32 to vector<2x1024xf32>
    %4 = arith.cmpf oge, %2, %3 : vector<2x1024xf32>
    %cst_2 = arith.constant 2.000000e-01 : f32
    %5 = vector.broadcast %cst_2 : f32 to vector<2x1024xf32>
    %6 = arith.mulf %5, %2 : vector<2x1024xf32>
    %7 = arith.select %4, %2, %6 : vector<2x1024xi1>, vector<2x1024xf32>
    %8 = arith.truncf %7 : vector<2x1024xf32> to vector<2x1024xbf16>
    %c0_3 = arith.constant 0 : index
    %c0_4 = arith.constant 0 : index
    %c0_5 = arith.constant 0 : index
    %9 = vector.load %arg2[%c0_3, %c0_4, %c0_5] : memref<1x1024x128xbf16, #tpu.memory_space<vmem>>, vector<1x1024x128xbf16>
    %10 = vector.shape_cast %9 : vector<1x1024x128xbf16> to vector<1024x128xbf16>
    %cst_6 = arith.constant dense<0.000000e+00> : vector<2x128xf32>
    %11 = tpu.matmul %8, %10, %cst_6 {dimension_numbers = #tpu.dot_dimension_numbers<[1], [0], [0], [1], [0, 0, 1, 1], [], []>} : vector<2x1024xbf16>, vector<1024x128xbf16>, vector<2x128xf32> -> vector<2x128xf32>
    %c0_7 = arith.constant 0 : index
    %c0_8 = arith.constant 0 : index
    %12 = vector.load %arg3[%c0_7, %c0_8] : memref<1x128xf32, #tpu.memory_space<vmem>>, vector<1x128xf32>
    %13 = vector.broadcast %12 : vector<1x128xf32> to vector<2x128xf32>
    %14 = arith.addf %11, %13 : vector<2x128xf32>
    %c0_9 = arith.constant 0 : index
    %c0_10 = arith.constant 0 : index
    %c0_11 = arith.constant 0 : index
    %15 = vector.load %arg4[%c0_9, %c0_10, %c0_11] : memref<1x2x128xf32, #tpu.memory_space<vmem>>, vector<1x2x128xf32>
    %16 = vector.shape_cast %15 : vector<1x2x128xf32> to vector<2x128xf32>
    %17 = vector.shape_cast %14 : vector<2x128xf32> to vector<1x2x128xf32>
    tpu.vector_store %arg4[%c0_9, %c0_10, %c0_11], %17 {strides = array<i32>} : memref<1x2x128xf32, #tpu.memory_space<vmem>>, vector<1x2x128xf32>,
    return
  }
  func.func @transform_0(%arg0: i32) -> (i32, i32, i32) {
    %c0_i32 = arith.constant 0 : i32
    %c0_i32_0 = arith.constant 0 : i32
    %c0_i32_1 = arith.constant 0 : i32
    return %c0_i32, %arg0, %c0_i32_0 : i32, i32, i32
  }
  func.func @transform_1(%arg0: i32) -> (i32, i32, i32) {
    %c0_i32 = arith.constant 0 : i32
    %c0_i32_0 = arith.constant 0 : i32
    %c0_i32_1 = arith.constant 0 : i32
    %c0_i32_2 = arith.constant 0 : i32
    return %c0_i32, %c0_i32_0, %c0_i32_1 : i32, i32, i32
  }
  func.func @transform_2(%arg0: i32) -> (i32, i32) {
    %c0_i32 = arith.constant 0 : i32
    %c0_i32_0 = arith.constant 0 : i32
    %c0_i32_1 = arith.constant 0 : i32
    return %c0_i32, %c0_i32_0 : i32, i32
  }
  func.func @transform_3(%arg0: i32) -> (i32, i32, i32) {
    %c0_i32 = arith.constant 0 : i32
    %c0_i32_0 = arith.constant 0 : i32
    %c0_i32_1 = arith.constant 0 : i32
    return %c0_i32, %arg0, %c0_i32_0 : i32, i32, i32
  }
}

module attributes {stable_mosaic.version = 11 : i64} {
  func.func @_gemm_bn_kernel(%arg0: i32, %arg1: memref<4x2x256xbf16, #tpu.memory_space<vmem>>, %arg2: memref<4x256x128xbf16, #tpu.memory_space<vmem>>, %arg3: memref<1x128xf32, #tpu.memory_space<vmem>>, %arg4: memref<1x128xf32, #tpu.memory_space<vmem>>, %arg5: memref<4x2x128xf32, #tpu.memory_space<vmem>>) attributes {dimension_semantics = [#tpu.dimension_semantics<arbitrary>], iteration_bounds = array<i64: 1>, scalar_prefetch = 0 : i64, scratch_operands = 0 : i64, tpu.core_type = #tpu.core_type<tc>, window_params = [{pipeline_mode = #tpu.pipeline_mode<synchronous>, transform_indices = @transform_0, window_bounds = array<i64: 4, 2, 256>}, {pipeline_mode = #tpu.pipeline_mode<synchronous>, transform_indices = @transform_1, window_bounds = array<i64: 4, 256, 128>}, {pipeline_mode = #tpu.pipeline_mode<synchronous>, transform_indices = @transform_2, window_bounds = array<i64: 1, 128>}, {pipeline_mode = #tpu.pipeline_mode<synchronous>, transform_indices = @transform_3, window_bounds = array<i64: 1, 128>}, {pipeline_mode = #tpu.pipeline_mode<synchronous>, transform_indices = @transform_4, window_bounds = array<i64: 4, 2, 128>}]} {
    %cst = arith.constant 0.000000e+00 : f32
    %0 = vector.broadcast %cst : f32 to vector<1x128xf32>
    %c0 = arith.constant 0 : index
    %c0_0 = arith.constant 0 : index
    %c0_1 = arith.constant 0 : index
    %1 = vector.load %arg1[%c0, %c0_0, %c0_1] : memref<4x2x256xbf16, #tpu.memory_space<vmem>>, vector<1x2x256xbf16>
    %2 = vector.shape_cast %1 : vector<1x2x256xbf16> to vector<2x256xbf16>
    %3 = arith.extf %2 : vector<2x256xbf16> to vector<2x256xf32>
    %cst_2 = arith.constant 0.000000e+00 : f32
    %4 = vector.broadcast %cst_2 : f32 to vector<2x256xf32>
    %5 = arith.maximumf %3, %4 : vector<2x256xf32>
    %6 = arith.truncf %5 : vector<2x256xf32> to vector<2x256xbf16>
    %c0_3 = arith.constant 0 : index
    %c0_4 = arith.constant 0 : index
    %c0_5 = arith.constant 0 : index
    %7 = vector.load %arg2[%c0_3, %c0_4, %c0_5] : memref<4x256x128xbf16, #tpu.memory_space<vmem>>, vector<1x256x128xbf16>
    %8 = vector.shape_cast %7 : vector<1x256x128xbf16> to vector<256x128xbf16>
    %cst_6 = arith.constant dense<0.000000e+00> : vector<2x128xf32>
    %9 = tpu.matmul %6, %8, %cst_6 {dimension_numbers = #tpu.dot_dimension_numbers<[1], [0], [0], [1], [0, 0, 1, 1], [], []>} : vector<2x256xbf16>, vector<256x128xbf16>, vector<2x128xf32> -> vector<2x128xf32>
    %c0_7 = arith.constant 0 : index
    %c0_8 = arith.constant 0 : index
    %c0_9 = arith.constant 0 : index
    %10 = vector.load %arg5[%c0_7, %c0_8, %c0_9] : memref<4x2x128xf32, #tpu.memory_space<vmem>>, vector<1x2x128xf32>
    %11 = vector.shape_cast %10 : vector<1x2x128xf32> to vector<2x128xf32>
    %12 = vector.shape_cast %9 : vector<2x128xf32> to vector<1x2x128xf32>
    tpu.vector_store %arg5[%c0_7, %c0_8, %c0_9], %12 {strides = array<i32>} : memref<4x2x128xf32, #tpu.memory_space<vmem>>, vector<1x2x128xf32>,
    %cst_10 = arith.constant dense<0.000000e+00> : vector<128xf32>
    %13 = vector.multi_reduction <add>, %9, %cst_10 [0] : vector<2x128xf32> to vector<128xf32>
    %14 = vector.shape_cast %13 : vector<128xf32> to vector<1x128xf32>
    %15 = arith.addf %0, %14 : vector<1x128xf32>
    %c1 = arith.constant 1 : index
    %c0_11 = arith.constant 0 : index
    %c0_12 = arith.constant 0 : index
    %16 = vector.load %arg1[%c1, %c0_11, %c0_12] : memref<4x2x256xbf16, #tpu.memory_space<vmem>>, vector<1x2x256xbf16>
    %17 = vector.shape_cast %16 : vector<1x2x256xbf16> to vector<2x256xbf16>
    %18 = arith.extf %17 : vector<2x256xbf16> to vector<2x256xf32>
    %cst_13 = arith.constant 0.000000e+00 : f32
    %19 = vector.broadcast %cst_13 : f32 to vector<2x256xf32>
    %20 = arith.maximumf %18, %19 : vector<2x256xf32>
    %21 = arith.truncf %20 : vector<2x256xf32> to vector<2x256xbf16>
    %c1_14 = arith.constant 1 : index
    %c0_15 = arith.constant 0 : index
    %c0_16 = arith.constant 0 : index
    %22 = vector.load %arg2[%c1_14, %c0_15, %c0_16] : memref<4x256x128xbf16, #tpu.memory_space<vmem>>, vector<1x256x128xbf16>
    %23 = vector.shape_cast %22 : vector<1x256x128xbf16> to vector<256x128xbf16>
    %cst_17 = arith.constant dense<0.000000e+00> : vector<2x128xf32>
    %24 = tpu.matmul %21, %23, %cst_17 {dimension_numbers = #tpu.dot_dimension_numbers<[1], [0], [0], [1], [0, 0, 1, 1], [], []>} : vector<2x256xbf16>, vector<256x128xbf16>, vector<2x128xf32> -> vector<2x128xf32>
    %c1_18 = arith.constant 1 : index
    %c0_19 = arith.constant 0 : index
    %c0_20 = arith.constant 0 : index
    %25 = vector.load %arg5[%c1_18, %c0_19, %c0_20] : memref<4x2x128xf32, #tpu.memory_space<vmem>>, vector<1x2x128xf32>
    %26 = vector.shape_cast %25 : vector<1x2x128xf32> to vector<2x128xf32>
    %27 = vector.shape_cast %24 : vector<2x128xf32> to vector<1x2x128xf32>
    tpu.vector_store %arg5[%c1_18, %c0_19, %c0_20], %27 {strides = array<i32>} : memref<4x2x128xf32, #tpu.memory_space<vmem>>, vector<1x2x128xf32>,
    %cst_21 = arith.constant dense<0.000000e+00> : vector<128xf32>
    %28 = vector.multi_reduction <add>, %24, %cst_21 [0] : vector<2x128xf32> to vector<128xf32>
    %29 = vector.shape_cast %28 : vector<128xf32> to vector<1x128xf32>
    %30 = arith.addf %15, %29 : vector<1x128xf32>
    %c2 = arith.constant 2 : index
    %c0_22 = arith.constant 0 : index
    %c0_23 = arith.constant 0 : index
    %31 = vector.load %arg1[%c2, %c0_22, %c0_23] : memref<4x2x256xbf16, #tpu.memory_space<vmem>>, vector<1x2x256xbf16>
    %32 = vector.shape_cast %31 : vector<1x2x256xbf16> to vector<2x256xbf16>
    %33 = arith.extf %32 : vector<2x256xbf16> to vector<2x256xf32>
    %cst_24 = arith.constant 0.000000e+00 : f32
    %34 = vector.broadcast %cst_24 : f32 to vector<2x256xf32>
    %35 = arith.maximumf %33, %34 : vector<2x256xf32>
    %36 = arith.truncf %35 : vector<2x256xf32> to vector<2x256xbf16>
    %c2_25 = arith.constant 2 : index
    %c0_26 = arith.constant 0 : index
    %c0_27 = arith.constant 0 : index
    %37 = vector.load %arg2[%c2_25, %c0_26, %c0_27] : memref<4x256x128xbf16, #tpu.memory_space<vmem>>, vector<1x256x128xbf16>
    %38 = vector.shape_cast %37 : vector<1x256x128xbf16> to vector<256x128xbf16>
    %cst_28 = arith.constant dense<0.000000e+00> : vector<2x128xf32>
    %39 = tpu.matmul %36, %38, %cst_28 {dimension_numbers = #tpu.dot_dimension_numbers<[1], [0], [0], [1], [0, 0, 1, 1], [], []>} : vector<2x256xbf16>, vector<256x128xbf16>, vector<2x128xf32> -> vector<2x128xf32>
    %c2_29 = arith.constant 2 : index
    %c0_30 = arith.constant 0 : index
    %c0_31 = arith.constant 0 : index
    %40 = vector.load %arg5[%c2_29, %c0_30, %c0_31] : memref<4x2x128xf32, #tpu.memory_space<vmem>>, vector<1x2x128xf32>
    %41 = vector.shape_cast %40 : vector<1x2x128xf32> to vector<2x128xf32>
    %42 = vector.shape_cast %39 : vector<2x128xf32> to vector<1x2x128xf32>
    tpu.vector_store %arg5[%c2_29, %c0_30, %c0_31], %42 {strides = array<i32>} : memref<4x2x128xf32, #tpu.memory_space<vmem>>, vector<1x2x128xf32>,
    %cst_32 = arith.constant dense<0.000000e+00> : vector<128xf32>
    %43 = vector.multi_reduction <add>, %39, %cst_32 [0] : vector<2x128xf32> to vector<128xf32>
    %44 = vector.shape_cast %43 : vector<128xf32> to vector<1x128xf32>
    %45 = arith.addf %30, %44 : vector<1x128xf32>
    %c3 = arith.constant 3 : index
    %c0_33 = arith.constant 0 : index
    %c0_34 = arith.constant 0 : index
    %46 = vector.load %arg1[%c3, %c0_33, %c0_34] : memref<4x2x256xbf16, #tpu.memory_space<vmem>>, vector<1x2x256xbf16>
    %47 = vector.shape_cast %46 : vector<1x2x256xbf16> to vector<2x256xbf16>
    %48 = arith.extf %47 : vector<2x256xbf16> to vector<2x256xf32>
    %cst_35 = arith.constant 0.000000e+00 : f32
    %49 = vector.broadcast %cst_35 : f32 to vector<2x256xf32>
    %50 = arith.maximumf %48, %49 : vector<2x256xf32>
    %51 = arith.truncf %50 : vector<2x256xf32> to vector<2x256xbf16>
    %c3_36 = arith.constant 3 : index
    %c0_37 = arith.constant 0 : index
    %c0_38 = arith.constant 0 : index
    %52 = vector.load %arg2[%c3_36, %c0_37, %c0_38] : memref<4x256x128xbf16, #tpu.memory_space<vmem>>, vector<1x256x128xbf16>
    %53 = vector.shape_cast %52 : vector<1x256x128xbf16> to vector<256x128xbf16>
    %cst_39 = arith.constant dense<0.000000e+00> : vector<2x128xf32>
    %54 = tpu.matmul %51, %53, %cst_39 {dimension_numbers = #tpu.dot_dimension_numbers<[1], [0], [0], [1], [0, 0, 1, 1], [], []>} : vector<2x256xbf16>, vector<256x128xbf16>, vector<2x128xf32> -> vector<2x128xf32>
    %c3_40 = arith.constant 3 : index
    %c0_41 = arith.constant 0 : index
    %c0_42 = arith.constant 0 : index
    %55 = vector.load %arg5[%c3_40, %c0_41, %c0_42] : memref<4x2x128xf32, #tpu.memory_space<vmem>>, vector<1x2x128xf32>
    %56 = vector.shape_cast %55 : vector<1x2x128xf32> to vector<2x128xf32>
    %57 = vector.shape_cast %54 : vector<2x128xf32> to vector<1x2x128xf32>
    tpu.vector_store %arg5[%c3_40, %c0_41, %c0_42], %57 {strides = array<i32>} : memref<4x2x128xf32, #tpu.memory_space<vmem>>, vector<1x2x128xf32>,
    %cst_43 = arith.constant dense<0.000000e+00> : vector<128xf32>
    %58 = vector.multi_reduction <add>, %54, %cst_43 [0] : vector<2x128xf32> to vector<128xf32>
    %59 = vector.shape_cast %58 : vector<128xf32> to vector<1x128xf32>
    %60 = arith.addf %45, %59 : vector<1x128xf32>
    %cst_44 = arith.constant 1.250000e-01 : f32
    %61 = vector.broadcast %cst_44 : f32 to vector<1x128xf32>
    %62 = arith.mulf %60, %61 : vector<1x128xf32>
    %cst_45 = arith.constant 0.000000e+00 : f32
    %63 = vector.broadcast %cst_45 : f32 to vector<1x128xf32>
    %c0_46 = arith.constant 0 : index
    %c0_47 = arith.constant 0 : index
    %c0_48 = arith.constant 0 : index
    %64 = vector.load %arg5[%c0_46, %c0_47, %c0_48] : memref<4x2x128xf32, #tpu.memory_space<vmem>>, vector<1x2x128xf32>
    %65 = vector.shape_cast %64 : vector<1x2x128xf32> to vector<2x128xf32>
    %66 = vector.broadcast %62 : vector<1x128xf32> to vector<2x128xf32>
    %67 = arith.subf %65, %66 : vector<2x128xf32>
    %68 = arith.mulf %67, %67 : vector<2x128xf32>
    %cst_49 = arith.constant dense<0.000000e+00> : vector<128xf32>
    %69 = vector.multi_reduction <add>, %68, %cst_49 [0] : vector<2x128xf32> to vector<128xf32>
    %70 = vector.shape_cast %69 : vector<128xf32> to vector<1x128xf32>
    %71 = arith.addf %63, %70 : vector<1x128xf32>
    %c1_50 = arith.constant 1 : index
    %c0_51 = arith.constant 0 : index
    %c0_52 = arith.constant 0 : index
    %72 = vector.load %arg5[%c1_50, %c0_51, %c0_52] : memref<4x2x128xf32, #tpu.memory_space<vmem>>, vector<1x2x128xf32>
    %73 = vector.shape_cast %72 : vector<1x2x128xf32> to vector<2x128xf32>
    %74 = vector.broadcast %62 : vector<1x128xf32> to vector<2x128xf32>
    %75 = arith.subf %73, %74 : vector<2x128xf32>
    %76 = arith.mulf %75, %75 : vector<2x128xf32>
    %cst_53 = arith.constant dense<0.000000e+00> : vector<128xf32>
    %77 = vector.multi_reduction <add>, %76, %cst_53 [0] : vector<2x128xf32> to vector<128xf32>
    %78 = vector.shape_cast %77 : vector<128xf32> to vector<1x128xf32>
    %79 = arith.addf %71, %78 : vector<1x128xf32>
    %c2_54 = arith.constant 2 : index
    %c0_55 = arith.constant 0 : index
    %c0_56 = arith.constant 0 : index
    %80 = vector.load %arg5[%c2_54, %c0_55, %c0_56] : memref<4x2x128xf32, #tpu.memory_space<vmem>>, vector<1x2x128xf32>
    %81 = vector.shape_cast %80 : vector<1x2x128xf32> to vector<2x128xf32>
    %82 = vector.broadcast %62 : vector<1x128xf32> to vector<2x128xf32>
    %83 = arith.subf %81, %82 : vector<2x128xf32>
    %84 = arith.mulf %83, %83 : vector<2x128xf32>
    %cst_57 = arith.constant dense<0.000000e+00> : vector<128xf32>
    %85 = vector.multi_reduction <add>, %84, %cst_57 [0] : vector<2x128xf32> to vector<128xf32>
    %86 = vector.shape_cast %85 : vector<128xf32> to vector<1x128xf32>
    %87 = arith.addf %79, %86 : vector<1x128xf32>
    %c3_58 = arith.constant 3 : index
    %c0_59 = arith.constant 0 : index
    %c0_60 = arith.constant 0 : index
    %88 = vector.load %arg5[%c3_58, %c0_59, %c0_60] : memref<4x2x128xf32, #tpu.memory_space<vmem>>, vector<1x2x128xf32>
    %89 = vector.shape_cast %88 : vector<1x2x128xf32> to vector<2x128xf32>
    %90 = vector.broadcast %62 : vector<1x128xf32> to vector<2x128xf32>
    %91 = arith.subf %89, %90 : vector<2x128xf32>
    %92 = arith.mulf %91, %91 : vector<2x128xf32>
    %cst_61 = arith.constant dense<0.000000e+00> : vector<128xf32>
    %93 = vector.multi_reduction <add>, %92, %cst_61 [0] : vector<2x128xf32> to vector<128xf32>
    %94 = vector.shape_cast %93 : vector<128xf32> to vector<1x128xf32>
    %95 = arith.addf %87, %94 : vector<1x128xf32>
    %cst_62 = arith.constant 1.250000e-01 : f32
    %96 = vector.broadcast %cst_62 : f32 to vector<1x128xf32>
    %97 = arith.mulf %95, %96 : vector<1x128xf32>
    %c0_63 = arith.constant 0 : index
    %c0_64 = arith.constant 0 : index
    %98 = vector.load %arg3[%c0_63, %c0_64] : memref<1x128xf32, #tpu.memory_space<vmem>>, vector<1x128xf32>
    %cst_65 = arith.constant 9.99999974E-6 : f32
    %99 = vector.broadcast %cst_65 : f32 to vector<1x128xf32>
    %100 = arith.addf %97, %99 : vector<1x128xf32>
    %101 = math.rsqrt %100 : vector<1x128xf32>
    %102 = arith.mulf %98, %101 : vector<1x128xf32>
    %c0_66 = arith.constant 0 : index
    %c0_67 = arith.constant 0 : index
    %103 = vector.load %arg4[%c0_66, %c0_67] : memref<1x128xf32, #tpu.memory_space<vmem>>, vector<1x128xf32>
    %104 = arith.mulf %62, %102 : vector<1x128xf32>
    %105 = arith.subf %103, %104 : vector<1x128xf32>
    %c0_68 = arith.constant 0 : index
    %c0_69 = arith.constant 0 : index
    %c0_70 = arith.constant 0 : index
    %106 = vector.load %arg5[%c0_68, %c0_69, %c0_70] : memref<4x2x128xf32, #tpu.memory_space<vmem>>, vector<1x2x128xf32>
    %107 = vector.shape_cast %106 : vector<1x2x128xf32> to vector<2x128xf32>
    %108 = vector.broadcast %102 : vector<1x128xf32> to vector<2x128xf32>
    %109 = arith.mulf %107, %108 : vector<2x128xf32>
    %110 = vector.broadcast %105 : vector<1x128xf32> to vector<2x128xf32>
    %111 = arith.addf %109, %110 : vector<2x128xf32>
    %c0_71 = arith.constant 0 : index
    %c0_72 = arith.constant 0 : index
    %c0_73 = arith.constant 0 : index
    %112 = vector.load %arg5[%c0_71, %c0_72, %c0_73] : memref<4x2x128xf32, #tpu.memory_space<vmem>>, vector<1x2x128xf32>
    %113 = vector.shape_cast %112 : vector<1x2x128xf32> to vector<2x128xf32>
    %114 = vector.shape_cast %111 : vector<2x128xf32> to vector<1x2x128xf32>
    tpu.vector_store %arg5[%c0_71, %c0_72, %c0_73], %114 {strides = array<i32>} : memref<4x2x128xf32, #tpu.memory_space<vmem>>, vector<1x2x128xf32>,
    %c1_74 = arith.constant 1 : index
    %c0_75 = arith.constant 0 : index
    %c0_76 = arith.constant 0 : index
    %115 = vector.load %arg5[%c1_74, %c0_75, %c0_76] : memref<4x2x128xf32, #tpu.memory_space<vmem>>, vector<1x2x128xf32>
    %116 = vector.shape_cast %115 : vector<1x2x128xf32> to vector<2x128xf32>
    %117 = vector.broadcast %102 : vector<1x128xf32> to vector<2x128xf32>
    %118 = arith.mulf %116, %117 : vector<2x128xf32>
    %119 = vector.broadcast %105 : vector<1x128xf32> to vector<2x128xf32>
    %120 = arith.addf %118, %119 : vector<2x128xf32>
    %c1_77 = arith.constant 1 : index
    %c0_78 = arith.constant 0 : index
    %c0_79 = arith.constant 0 : index
    %121 = vector.load %arg5[%c1_77, %c0_78, %c0_79] : memref<4x2x128xf32, #tpu.memory_space<vmem>>, vector<1x2x128xf32>
    %122 = vector.shape_cast %121 : vector<1x2x128xf32> to vector<2x128xf32>
    %123 = vector.shape_cast %120 : vector<2x128xf32> to vector<1x2x128xf32>
    tpu.vector_store %arg5[%c1_77, %c0_78, %c0_79], %123 {strides = array<i32>} : memref<4x2x128xf32, #tpu.memory_space<vmem>>, vector<1x2x128xf32>,
    %c2_80 = arith.constant 2 : index
    %c0_81 = arith.constant 0 : index
    %c0_82 = arith.constant 0 : index
    %124 = vector.load %arg5[%c2_80, %c0_81, %c0_82] : memref<4x2x128xf32, #tpu.memory_space<vmem>>, vector<1x2x128xf32>
    %125 = vector.shape_cast %124 : vector<1x2x128xf32> to vector<2x128xf32>
    %126 = vector.broadcast %102 : vector<1x128xf32> to vector<2x128xf32>
    %127 = arith.mulf %125, %126 : vector<2x128xf32>
    %128 = vector.broadcast %105 : vector<1x128xf32> to vector<2x128xf32>
    %129 = arith.addf %127, %128 : vector<2x128xf32>
    %c2_83 = arith.constant 2 : index
    %c0_84 = arith.constant 0 : index
    %c0_85 = arith.constant 0 : index
    %130 = vector.load %arg5[%c2_83, %c0_84, %c0_85] : memref<4x2x128xf32, #tpu.memory_space<vmem>>, vector<1x2x128xf32>
    %131 = vector.shape_cast %130 : vector<1x2x128xf32> to vector<2x128xf32>
    %132 = vector.shape_cast %129 : vector<2x128xf32> to vector<1x2x128xf32>
    tpu.vector_store %arg5[%c2_83, %c0_84, %c0_85], %132 {strides = array<i32>} : memref<4x2x128xf32, #tpu.memory_space<vmem>>, vector<1x2x128xf32>,
    %c3_86 = arith.constant 3 : index
    %c0_87 = arith.constant 0 : index
    %c0_88 = arith.constant 0 : index
    %133 = vector.load %arg5[%c3_86, %c0_87, %c0_88] : memref<4x2x128xf32, #tpu.memory_space<vmem>>, vector<1x2x128xf32>
    %134 = vector.shape_cast %133 : vector<1x2x128xf32> to vector<2x128xf32>
    %135 = vector.broadcast %102 : vector<1x128xf32> to vector<2x128xf32>
    %136 = arith.mulf %134, %135 : vector<2x128xf32>
    %137 = vector.broadcast %105 : vector<1x128xf32> to vector<2x128xf32>
    %138 = arith.addf %136, %137 : vector<2x128xf32>
    %c3_89 = arith.constant 3 : index
    %c0_90 = arith.constant 0 : index
    %c0_91 = arith.constant 0 : index
    %139 = vector.load %arg5[%c3_89, %c0_90, %c0_91] : memref<4x2x128xf32, #tpu.memory_space<vmem>>, vector<1x2x128xf32>
    %140 = vector.shape_cast %139 : vector<1x2x128xf32> to vector<2x128xf32>
    %141 = vector.shape_cast %138 : vector<2x128xf32> to vector<1x2x128xf32>
    tpu.vector_store %arg5[%c3_89, %c0_90, %c0_91], %141 {strides = array<i32>} : memref<4x2x128xf32, #tpu.memory_space<vmem>>, vector<1x2x128xf32>,
    return
  }
  func.func @transform_0(%arg0: i32) -> (i32, i32, i32) {
    %c0_i32 = arith.constant 0 : i32
    %c0_i32_0 = arith.constant 0 : i32
    %c0_i32_1 = arith.constant 0 : i32
    %c0_i32_2 = arith.constant 0 : i32
    return %c0_i32, %c0_i32_0, %c0_i32_1 : i32, i32, i32
  }
  func.func @transform_1(%arg0: i32) -> (i32, i32, i32) {
    %c0_i32 = arith.constant 0 : i32
    %c0_i32_0 = arith.constant 0 : i32
    %c0_i32_1 = arith.constant 0 : i32
    %c0_i32_2 = arith.constant 0 : i32
    return %c0_i32, %c0_i32_0, %c0_i32_1 : i32, i32, i32
  }
  func.func @transform_2(%arg0: i32) -> (i32, i32) {
    %c0_i32 = arith.constant 0 : i32
    %c0_i32_0 = arith.constant 0 : i32
    %c0_i32_1 = arith.constant 0 : i32
    return %c0_i32, %c0_i32_0 : i32, i32
  }
  func.func @transform_3(%arg0: i32) -> (i32, i32) {
    %c0_i32 = arith.constant 0 : i32
    %c0_i32_0 = arith.constant 0 : i32
    %c0_i32_1 = arith.constant 0 : i32
    return %c0_i32, %c0_i32_0 : i32, i32
  }
  func.func @transform_4(%arg0: i32) -> (i32, i32, i32) {
    %c0_i32 = arith.constant 0 : i32
    %c0_i32_0 = arith.constant 0 : i32
    %c0_i32_1 = arith.constant 0 : i32
    %c0_i32_2 = arith.constant 0 : i32
    return %c0_i32, %c0_i32_0, %c0_i32_1 : i32, i32, i32
  }
}

module attributes {stable_mosaic.version = 11 : i64} {
  func.func @_gemm_bn_kernel(%arg0: i32, %arg1: memref<4x8x512xbf16, #tpu.memory_space<vmem>>, %arg2: memref<4x512x128xbf16, #tpu.memory_space<vmem>>, %arg3: memref<1x128xf32, #tpu.memory_space<vmem>>, %arg4: memref<1x128xf32, #tpu.memory_space<vmem>>, %arg5: memref<4x8x128xf32, #tpu.memory_space<vmem>>) attributes {dimension_semantics = [#tpu.dimension_semantics<arbitrary>], iteration_bounds = array<i64: 1>, scalar_prefetch = 0 : i64, scratch_operands = 0 : i64, tpu.core_type = #tpu.core_type<tc>, window_params = [{pipeline_mode = #tpu.pipeline_mode<synchronous>, transform_indices = @transform_0, window_bounds = array<i64: 4, 8, 512>}, {pipeline_mode = #tpu.pipeline_mode<synchronous>, transform_indices = @transform_1, window_bounds = array<i64: 4, 512, 128>}, {pipeline_mode = #tpu.pipeline_mode<synchronous>, transform_indices = @transform_2, window_bounds = array<i64: 1, 128>}, {pipeline_mode = #tpu.pipeline_mode<synchronous>, transform_indices = @transform_3, window_bounds = array<i64: 1, 128>}, {pipeline_mode = #tpu.pipeline_mode<synchronous>, transform_indices = @transform_4, window_bounds = array<i64: 4, 8, 128>}]} {
    %cst = arith.constant 0.000000e+00 : f32
    %0 = vector.broadcast %cst : f32 to vector<1x128xf32>
    %c0 = arith.constant 0 : index
    %c0_0 = arith.constant 0 : index
    %c0_1 = arith.constant 0 : index
    %1 = vector.load %arg1[%c0, %c0_0, %c0_1] : memref<4x8x512xbf16, #tpu.memory_space<vmem>>, vector<1x8x512xbf16>
    %2 = vector.shape_cast %1 : vector<1x8x512xbf16> to vector<8x512xbf16>
    %3 = arith.extf %2 : vector<8x512xbf16> to vector<8x512xf32>
    %cst_2 = arith.constant 0.000000e+00 : f32
    %4 = vector.broadcast %cst_2 : f32 to vector<8x512xf32>
    %5 = arith.maximumf %3, %4 : vector<8x512xf32>
    %6 = arith.truncf %5 : vector<8x512xf32> to vector<8x512xbf16>
    %c0_3 = arith.constant 0 : index
    %c0_4 = arith.constant 0 : index
    %c0_5 = arith.constant 0 : index
    %7 = vector.load %arg2[%c0_3, %c0_4, %c0_5] : memref<4x512x128xbf16, #tpu.memory_space<vmem>>, vector<1x512x128xbf16>
    %8 = vector.shape_cast %7 : vector<1x512x128xbf16> to vector<512x128xbf16>
    %cst_6 = arith.constant dense<0.000000e+00> : vector<8x128xf32>
    %9 = tpu.matmul %6, %8, %cst_6 {dimension_numbers = #tpu.dot_dimension_numbers<[1], [0], [0], [1], [0, 0, 1, 1], [], []>} : vector<8x512xbf16>, vector<512x128xbf16>, vector<8x128xf32> -> vector<8x128xf32>
    %c0_7 = arith.constant 0 : index
    %c0_8 = arith.constant 0 : index
    %c0_9 = arith.constant 0 : index
    %10 = vector.load %arg5[%c0_7, %c0_8, %c0_9] : memref<4x8x128xf32, #tpu.memory_space<vmem>>, vector<1x8x128xf32>
    %11 = vector.shape_cast %10 : vector<1x8x128xf32> to vector<8x128xf32>
    %12 = vector.shape_cast %9 : vector<8x128xf32> to vector<1x8x128xf32>
    tpu.vector_store %arg5[%c0_7, %c0_8, %c0_9], %12 {strides = array<i32>} : memref<4x8x128xf32, #tpu.memory_space<vmem>>, vector<1x8x128xf32>,
    %cst_10 = arith.constant dense<0.000000e+00> : vector<128xf32>
    %13 = vector.multi_reduction <add>, %9, %cst_10 [0] : vector<8x128xf32> to vector<128xf32>
    %14 = vector.shape_cast %13 : vector<128xf32> to vector<1x128xf32>
    %15 = arith.addf %0, %14 : vector<1x128xf32>
    %c1 = arith.constant 1 : index
    %c0_11 = arith.constant 0 : index
    %c0_12 = arith.constant 0 : index
    %16 = vector.load %arg1[%c1, %c0_11, %c0_12] : memref<4x8x512xbf16, #tpu.memory_space<vmem>>, vector<1x8x512xbf16>
    %17 = vector.shape_cast %16 : vector<1x8x512xbf16> to vector<8x512xbf16>
    %18 = arith.extf %17 : vector<8x512xbf16> to vector<8x512xf32>
    %cst_13 = arith.constant 0.000000e+00 : f32
    %19 = vector.broadcast %cst_13 : f32 to vector<8x512xf32>
    %20 = arith.maximumf %18, %19 : vector<8x512xf32>
    %21 = arith.truncf %20 : vector<8x512xf32> to vector<8x512xbf16>
    %c1_14 = arith.constant 1 : index
    %c0_15 = arith.constant 0 : index
    %c0_16 = arith.constant 0 : index
    %22 = vector.load %arg2[%c1_14, %c0_15, %c0_16] : memref<4x512x128xbf16, #tpu.memory_space<vmem>>, vector<1x512x128xbf16>
    %23 = vector.shape_cast %22 : vector<1x512x128xbf16> to vector<512x128xbf16>
    %cst_17 = arith.constant dense<0.000000e+00> : vector<8x128xf32>
    %24 = tpu.matmul %21, %23, %cst_17 {dimension_numbers = #tpu.dot_dimension_numbers<[1], [0], [0], [1], [0, 0, 1, 1], [], []>} : vector<8x512xbf16>, vector<512x128xbf16>, vector<8x128xf32> -> vector<8x128xf32>
    %c1_18 = arith.constant 1 : index
    %c0_19 = arith.constant 0 : index
    %c0_20 = arith.constant 0 : index
    %25 = vector.load %arg5[%c1_18, %c0_19, %c0_20] : memref<4x8x128xf32, #tpu.memory_space<vmem>>, vector<1x8x128xf32>
    %26 = vector.shape_cast %25 : vector<1x8x128xf32> to vector<8x128xf32>
    %27 = vector.shape_cast %24 : vector<8x128xf32> to vector<1x8x128xf32>
    tpu.vector_store %arg5[%c1_18, %c0_19, %c0_20], %27 {strides = array<i32>} : memref<4x8x128xf32, #tpu.memory_space<vmem>>, vector<1x8x128xf32>,
    %cst_21 = arith.constant dense<0.000000e+00> : vector<128xf32>
    %28 = vector.multi_reduction <add>, %24, %cst_21 [0] : vector<8x128xf32> to vector<128xf32>
    %29 = vector.shape_cast %28 : vector<128xf32> to vector<1x128xf32>
    %30 = arith.addf %15, %29 : vector<1x128xf32>
    %c2 = arith.constant 2 : index
    %c0_22 = arith.constant 0 : index
    %c0_23 = arith.constant 0 : index
    %31 = vector.load %arg1[%c2, %c0_22, %c0_23] : memref<4x8x512xbf16, #tpu.memory_space<vmem>>, vector<1x8x512xbf16>
    %32 = vector.shape_cast %31 : vector<1x8x512xbf16> to vector<8x512xbf16>
    %33 = arith.extf %32 : vector<8x512xbf16> to vector<8x512xf32>
    %cst_24 = arith.constant 0.000000e+00 : f32
    %34 = vector.broadcast %cst_24 : f32 to vector<8x512xf32>
    %35 = arith.maximumf %33, %34 : vector<8x512xf32>
    %36 = arith.truncf %35 : vector<8x512xf32> to vector<8x512xbf16>
    %c2_25 = arith.constant 2 : index
    %c0_26 = arith.constant 0 : index
    %c0_27 = arith.constant 0 : index
    %37 = vector.load %arg2[%c2_25, %c0_26, %c0_27] : memref<4x512x128xbf16, #tpu.memory_space<vmem>>, vector<1x512x128xbf16>
    %38 = vector.shape_cast %37 : vector<1x512x128xbf16> to vector<512x128xbf16>
    %cst_28 = arith.constant dense<0.000000e+00> : vector<8x128xf32>
    %39 = tpu.matmul %36, %38, %cst_28 {dimension_numbers = #tpu.dot_dimension_numbers<[1], [0], [0], [1], [0, 0, 1, 1], [], []>} : vector<8x512xbf16>, vector<512x128xbf16>, vector<8x128xf32> -> vector<8x128xf32>
    %c2_29 = arith.constant 2 : index
    %c0_30 = arith.constant 0 : index
    %c0_31 = arith.constant 0 : index
    %40 = vector.load %arg5[%c2_29, %c0_30, %c0_31] : memref<4x8x128xf32, #tpu.memory_space<vmem>>, vector<1x8x128xf32>
    %41 = vector.shape_cast %40 : vector<1x8x128xf32> to vector<8x128xf32>
    %42 = vector.shape_cast %39 : vector<8x128xf32> to vector<1x8x128xf32>
    tpu.vector_store %arg5[%c2_29, %c0_30, %c0_31], %42 {strides = array<i32>} : memref<4x8x128xf32, #tpu.memory_space<vmem>>, vector<1x8x128xf32>,
    %cst_32 = arith.constant dense<0.000000e+00> : vector<128xf32>
    %43 = vector.multi_reduction <add>, %39, %cst_32 [0] : vector<8x128xf32> to vector<128xf32>
    %44 = vector.shape_cast %43 : vector<128xf32> to vector<1x128xf32>
    %45 = arith.addf %30, %44 : vector<1x128xf32>
    %c3 = arith.constant 3 : index
    %c0_33 = arith.constant 0 : index
    %c0_34 = arith.constant 0 : index
    %46 = vector.load %arg1[%c3, %c0_33, %c0_34] : memref<4x8x512xbf16, #tpu.memory_space<vmem>>, vector<1x8x512xbf16>
    %47 = vector.shape_cast %46 : vector<1x8x512xbf16> to vector<8x512xbf16>
    %48 = arith.extf %47 : vector<8x512xbf16> to vector<8x512xf32>
    %cst_35 = arith.constant 0.000000e+00 : f32
    %49 = vector.broadcast %cst_35 : f32 to vector<8x512xf32>
    %50 = arith.maximumf %48, %49 : vector<8x512xf32>
    %51 = arith.truncf %50 : vector<8x512xf32> to vector<8x512xbf16>
    %c3_36 = arith.constant 3 : index
    %c0_37 = arith.constant 0 : index
    %c0_38 = arith.constant 0 : index
    %52 = vector.load %arg2[%c3_36, %c0_37, %c0_38] : memref<4x512x128xbf16, #tpu.memory_space<vmem>>, vector<1x512x128xbf16>
    %53 = vector.shape_cast %52 : vector<1x512x128xbf16> to vector<512x128xbf16>
    %cst_39 = arith.constant dense<0.000000e+00> : vector<8x128xf32>
    %54 = tpu.matmul %51, %53, %cst_39 {dimension_numbers = #tpu.dot_dimension_numbers<[1], [0], [0], [1], [0, 0, 1, 1], [], []>} : vector<8x512xbf16>, vector<512x128xbf16>, vector<8x128xf32> -> vector<8x128xf32>
    %c3_40 = arith.constant 3 : index
    %c0_41 = arith.constant 0 : index
    %c0_42 = arith.constant 0 : index
    %55 = vector.load %arg5[%c3_40, %c0_41, %c0_42] : memref<4x8x128xf32, #tpu.memory_space<vmem>>, vector<1x8x128xf32>
    %56 = vector.shape_cast %55 : vector<1x8x128xf32> to vector<8x128xf32>
    %57 = vector.shape_cast %54 : vector<8x128xf32> to vector<1x8x128xf32>
    tpu.vector_store %arg5[%c3_40, %c0_41, %c0_42], %57 {strides = array<i32>} : memref<4x8x128xf32, #tpu.memory_space<vmem>>, vector<1x8x128xf32>,
    %cst_43 = arith.constant dense<0.000000e+00> : vector<128xf32>
    %58 = vector.multi_reduction <add>, %54, %cst_43 [0] : vector<8x128xf32> to vector<128xf32>
    %59 = vector.shape_cast %58 : vector<128xf32> to vector<1x128xf32>
    %60 = arith.addf %45, %59 : vector<1x128xf32>
    %cst_44 = arith.constant 3.125000e-02 : f32
    %61 = vector.broadcast %cst_44 : f32 to vector<1x128xf32>
    %62 = arith.mulf %60, %61 : vector<1x128xf32>
    %cst_45 = arith.constant 0.000000e+00 : f32
    %63 = vector.broadcast %cst_45 : f32 to vector<1x128xf32>
    %c0_46 = arith.constant 0 : index
    %c0_47 = arith.constant 0 : index
    %c0_48 = arith.constant 0 : index
    %64 = vector.load %arg5[%c0_46, %c0_47, %c0_48] : memref<4x8x128xf32, #tpu.memory_space<vmem>>, vector<1x8x128xf32>
    %65 = vector.shape_cast %64 : vector<1x8x128xf32> to vector<8x128xf32>
    %66 = vector.broadcast %62 : vector<1x128xf32> to vector<8x128xf32>
    %67 = arith.subf %65, %66 : vector<8x128xf32>
    %68 = arith.mulf %67, %67 : vector<8x128xf32>
    %cst_49 = arith.constant dense<0.000000e+00> : vector<128xf32>
    %69 = vector.multi_reduction <add>, %68, %cst_49 [0] : vector<8x128xf32> to vector<128xf32>
    %70 = vector.shape_cast %69 : vector<128xf32> to vector<1x128xf32>
    %71 = arith.addf %63, %70 : vector<1x128xf32>
    %c1_50 = arith.constant 1 : index
    %c0_51 = arith.constant 0 : index
    %c0_52 = arith.constant 0 : index
    %72 = vector.load %arg5[%c1_50, %c0_51, %c0_52] : memref<4x8x128xf32, #tpu.memory_space<vmem>>, vector<1x8x128xf32>
    %73 = vector.shape_cast %72 : vector<1x8x128xf32> to vector<8x128xf32>
    %74 = vector.broadcast %62 : vector<1x128xf32> to vector<8x128xf32>
    %75 = arith.subf %73, %74 : vector<8x128xf32>
    %76 = arith.mulf %75, %75 : vector<8x128xf32>
    %cst_53 = arith.constant dense<0.000000e+00> : vector<128xf32>
    %77 = vector.multi_reduction <add>, %76, %cst_53 [0] : vector<8x128xf32> to vector<128xf32>
    %78 = vector.shape_cast %77 : vector<128xf32> to vector<1x128xf32>
    %79 = arith.addf %71, %78 : vector<1x128xf32>
    %c2_54 = arith.constant 2 : index
    %c0_55 = arith.constant 0 : index
    %c0_56 = arith.constant 0 : index
    %80 = vector.load %arg5[%c2_54, %c0_55, %c0_56] : memref<4x8x128xf32, #tpu.memory_space<vmem>>, vector<1x8x128xf32>
    %81 = vector.shape_cast %80 : vector<1x8x128xf32> to vector<8x128xf32>
    %82 = vector.broadcast %62 : vector<1x128xf32> to vector<8x128xf32>
    %83 = arith.subf %81, %82 : vector<8x128xf32>
    %84 = arith.mulf %83, %83 : vector<8x128xf32>
    %cst_57 = arith.constant dense<0.000000e+00> : vector<128xf32>
    %85 = vector.multi_reduction <add>, %84, %cst_57 [0] : vector<8x128xf32> to vector<128xf32>
    %86 = vector.shape_cast %85 : vector<128xf32> to vector<1x128xf32>
    %87 = arith.addf %79, %86 : vector<1x128xf32>
    %c3_58 = arith.constant 3 : index
    %c0_59 = arith.constant 0 : index
    %c0_60 = arith.constant 0 : index
    %88 = vector.load %arg5[%c3_58, %c0_59, %c0_60] : memref<4x8x128xf32, #tpu.memory_space<vmem>>, vector<1x8x128xf32>
    %89 = vector.shape_cast %88 : vector<1x8x128xf32> to vector<8x128xf32>
    %90 = vector.broadcast %62 : vector<1x128xf32> to vector<8x128xf32>
    %91 = arith.subf %89, %90 : vector<8x128xf32>
    %92 = arith.mulf %91, %91 : vector<8x128xf32>
    %cst_61 = arith.constant dense<0.000000e+00> : vector<128xf32>
    %93 = vector.multi_reduction <add>, %92, %cst_61 [0] : vector<8x128xf32> to vector<128xf32>
    %94 = vector.shape_cast %93 : vector<128xf32> to vector<1x128xf32>
    %95 = arith.addf %87, %94 : vector<1x128xf32>
    %cst_62 = arith.constant 3.125000e-02 : f32
    %96 = vector.broadcast %cst_62 : f32 to vector<1x128xf32>
    %97 = arith.mulf %95, %96 : vector<1x128xf32>
    %c0_63 = arith.constant 0 : index
    %c0_64 = arith.constant 0 : index
    %98 = vector.load %arg3[%c0_63, %c0_64] : memref<1x128xf32, #tpu.memory_space<vmem>>, vector<1x128xf32>
    %cst_65 = arith.constant 9.99999974E-6 : f32
    %99 = vector.broadcast %cst_65 : f32 to vector<1x128xf32>
    %100 = arith.addf %97, %99 : vector<1x128xf32>
    %101 = math.rsqrt %100 : vector<1x128xf32>
    %102 = arith.mulf %98, %101 : vector<1x128xf32>
    %c0_66 = arith.constant 0 : index
    %c0_67 = arith.constant 0 : index
    %103 = vector.load %arg4[%c0_66, %c0_67] : memref<1x128xf32, #tpu.memory_space<vmem>>, vector<1x128xf32>
    %104 = arith.mulf %62, %102 : vector<1x128xf32>
    %105 = arith.subf %103, %104 : vector<1x128xf32>
    %c0_68 = arith.constant 0 : index
    %c0_69 = arith.constant 0 : index
    %c0_70 = arith.constant 0 : index
    %106 = vector.load %arg5[%c0_68, %c0_69, %c0_70] : memref<4x8x128xf32, #tpu.memory_space<vmem>>, vector<1x8x128xf32>
    %107 = vector.shape_cast %106 : vector<1x8x128xf32> to vector<8x128xf32>
    %108 = vector.broadcast %102 : vector<1x128xf32> to vector<8x128xf32>
    %109 = arith.mulf %107, %108 : vector<8x128xf32>
    %110 = vector.broadcast %105 : vector<1x128xf32> to vector<8x128xf32>
    %111 = arith.addf %109, %110 : vector<8x128xf32>
    %c0_71 = arith.constant 0 : index
    %c0_72 = arith.constant 0 : index
    %c0_73 = arith.constant 0 : index
    %112 = vector.load %arg5[%c0_71, %c0_72, %c0_73] : memref<4x8x128xf32, #tpu.memory_space<vmem>>, vector<1x8x128xf32>
    %113 = vector.shape_cast %112 : vector<1x8x128xf32> to vector<8x128xf32>
    %114 = vector.shape_cast %111 : vector<8x128xf32> to vector<1x8x128xf32>
    tpu.vector_store %arg5[%c0_71, %c0_72, %c0_73], %114 {strides = array<i32>} : memref<4x8x128xf32, #tpu.memory_space<vmem>>, vector<1x8x128xf32>,
    %c1_74 = arith.constant 1 : index
    %c0_75 = arith.constant 0 : index
    %c0_76 = arith.constant 0 : index
    %115 = vector.load %arg5[%c1_74, %c0_75, %c0_76] : memref<4x8x128xf32, #tpu.memory_space<vmem>>, vector<1x8x128xf32>
    %116 = vector.shape_cast %115 : vector<1x8x128xf32> to vector<8x128xf32>
    %117 = vector.broadcast %102 : vector<1x128xf32> to vector<8x128xf32>
    %118 = arith.mulf %116, %117 : vector<8x128xf32>
    %119 = vector.broadcast %105 : vector<1x128xf32> to vector<8x128xf32>
    %120 = arith.addf %118, %119 : vector<8x128xf32>
    %c1_77 = arith.constant 1 : index
    %c0_78 = arith.constant 0 : index
    %c0_79 = arith.constant 0 : index
    %121 = vector.load %arg5[%c1_77, %c0_78, %c0_79] : memref<4x8x128xf32, #tpu.memory_space<vmem>>, vector<1x8x128xf32>
    %122 = vector.shape_cast %121 : vector<1x8x128xf32> to vector<8x128xf32>
    %123 = vector.shape_cast %120 : vector<8x128xf32> to vector<1x8x128xf32>
    tpu.vector_store %arg5[%c1_77, %c0_78, %c0_79], %123 {strides = array<i32>} : memref<4x8x128xf32, #tpu.memory_space<vmem>>, vector<1x8x128xf32>,
    %c2_80 = arith.constant 2 : index
    %c0_81 = arith.constant 0 : index
    %c0_82 = arith.constant 0 : index
    %124 = vector.load %arg5[%c2_80, %c0_81, %c0_82] : memref<4x8x128xf32, #tpu.memory_space<vmem>>, vector<1x8x128xf32>
    %125 = vector.shape_cast %124 : vector<1x8x128xf32> to vector<8x128xf32>
    %126 = vector.broadcast %102 : vector<1x128xf32> to vector<8x128xf32>
    %127 = arith.mulf %125, %126 : vector<8x128xf32>
    %128 = vector.broadcast %105 : vector<1x128xf32> to vector<8x128xf32>
    %129 = arith.addf %127, %128 : vector<8x128xf32>
    %c2_83 = arith.constant 2 : index
    %c0_84 = arith.constant 0 : index
    %c0_85 = arith.constant 0 : index
    %130 = vector.load %arg5[%c2_83, %c0_84, %c0_85] : memref<4x8x128xf32, #tpu.memory_space<vmem>>, vector<1x8x128xf32>
    %131 = vector.shape_cast %130 : vector<1x8x128xf32> to vector<8x128xf32>
    %132 = vector.shape_cast %129 : vector<8x128xf32> to vector<1x8x128xf32>
    tpu.vector_store %arg5[%c2_83, %c0_84, %c0_85], %132 {strides = array<i32>} : memref<4x8x128xf32, #tpu.memory_space<vmem>>, vector<1x8x128xf32>,
    %c3_86 = arith.constant 3 : index
    %c0_87 = arith.constant 0 : index
    %c0_88 = arith.constant 0 : index
    %133 = vector.load %arg5[%c3_86, %c0_87, %c0_88] : memref<4x8x128xf32, #tpu.memory_space<vmem>>, vector<1x8x128xf32>
    %134 = vector.shape_cast %133 : vector<1x8x128xf32> to vector<8x128xf32>
    %135 = vector.broadcast %102 : vector<1x128xf32> to vector<8x128xf32>
    %136 = arith.mulf %134, %135 : vector<8x128xf32>
    %137 = vector.broadcast %105 : vector<1x128xf32> to vector<8x128xf32>
    %138 = arith.addf %136, %137 : vector<8x128xf32>
    %c3_89 = arith.constant 3 : index
    %c0_90 = arith.constant 0 : index
    %c0_91 = arith.constant 0 : index
    %139 = vector.load %arg5[%c3_89, %c0_90, %c0_91] : memref<4x8x128xf32, #tpu.memory_space<vmem>>, vector<1x8x128xf32>
    %140 = vector.shape_cast %139 : vector<1x8x128xf32> to vector<8x128xf32>
    %141 = vector.shape_cast %138 : vector<8x128xf32> to vector<1x8x128xf32>
    tpu.vector_store %arg5[%c3_89, %c0_90, %c0_91], %141 {strides = array<i32>} : memref<4x8x128xf32, #tpu.memory_space<vmem>>, vector<1x8x128xf32>,
    return
  }
  func.func @transform_0(%arg0: i32) -> (i32, i32, i32) {
    %c0_i32 = arith.constant 0 : i32
    %c0_i32_0 = arith.constant 0 : i32
    %c0_i32_1 = arith.constant 0 : i32
    %c0_i32_2 = arith.constant 0 : i32
    return %c0_i32, %c0_i32_0, %c0_i32_1 : i32, i32, i32
  }
  func.func @transform_1(%arg0: i32) -> (i32, i32, i32) {
    %c0_i32 = arith.constant 0 : i32
    %c0_i32_0 = arith.constant 0 : i32
    %c0_i32_1 = arith.constant 0 : i32
    %c0_i32_2 = arith.constant 0 : i32
    return %c0_i32, %c0_i32_0, %c0_i32_1 : i32, i32, i32
  }
  func.func @transform_2(%arg0: i32) -> (i32, i32) {
    %c0_i32 = arith.constant 0 : i32
    %c0_i32_0 = arith.constant 0 : i32
    %c0_i32_1 = arith.constant 0 : i32
    return %c0_i32, %c0_i32_0 : i32, i32
  }
  func.func @transform_3(%arg0: i32) -> (i32, i32) {
    %c0_i32 = arith.constant 0 : i32
    %c0_i32_0 = arith.constant 0 : i32
    %c0_i32_1 = arith.constant 0 : i32
    return %c0_i32, %c0_i32_0 : i32, i32
  }
  func.func @transform_4(%arg0: i32) -> (i32, i32, i32) {
    %c0_i32 = arith.constant 0 : i32
    %c0_i32_0 = arith.constant 0 : i32
    %c0_i32_1 = arith.constant 0 : i32
    %c0_i32_2 = arith.constant 0 : i32
    return %c0_i32, %c0_i32_0, %c0_i32_1 : i32, i32, i32
  }
}

module attributes {stable_mosaic.version = 11 : i64} {
  func.func @_gemm_bn_kernel(%arg0: i32, %arg1: memref<4x32x256xbf16, #tpu.memory_space<vmem>>, %arg2: memref<4x256x128xbf16, #tpu.memory_space<vmem>>, %arg3: memref<1x128xf32, #tpu.memory_space<vmem>>, %arg4: memref<1x128xf32, #tpu.memory_space<vmem>>, %arg5: memref<4x32x128xf32, #tpu.memory_space<vmem>>) attributes {dimension_semantics = [#tpu.dimension_semantics<arbitrary>], iteration_bounds = array<i64: 1>, scalar_prefetch = 0 : i64, scratch_operands = 0 : i64, tpu.core_type = #tpu.core_type<tc>, window_params = [{pipeline_mode = #tpu.pipeline_mode<synchronous>, transform_indices = @transform_0, window_bounds = array<i64: 4, 32, 256>}, {pipeline_mode = #tpu.pipeline_mode<synchronous>, transform_indices = @transform_1, window_bounds = array<i64: 4, 256, 128>}, {pipeline_mode = #tpu.pipeline_mode<synchronous>, transform_indices = @transform_2, window_bounds = array<i64: 1, 128>}, {pipeline_mode = #tpu.pipeline_mode<synchronous>, transform_indices = @transform_3, window_bounds = array<i64: 1, 128>}, {pipeline_mode = #tpu.pipeline_mode<synchronous>, transform_indices = @transform_4, window_bounds = array<i64: 4, 32, 128>}]} {
    %cst = arith.constant 0.000000e+00 : f32
    %0 = vector.broadcast %cst : f32 to vector<1x128xf32>
    %c0 = arith.constant 0 : index
    %c0_0 = arith.constant 0 : index
    %c0_1 = arith.constant 0 : index
    %1 = vector.load %arg1[%c0, %c0_0, %c0_1] : memref<4x32x256xbf16, #tpu.memory_space<vmem>>, vector<1x32x256xbf16>
    %2 = vector.shape_cast %1 : vector<1x32x256xbf16> to vector<32x256xbf16>
    %3 = arith.extf %2 : vector<32x256xbf16> to vector<32x256xf32>
    %cst_2 = arith.constant 0.000000e+00 : f32
    %4 = vector.broadcast %cst_2 : f32 to vector<32x256xf32>
    %5 = arith.maximumf %3, %4 : vector<32x256xf32>
    %6 = arith.truncf %5 : vector<32x256xf32> to vector<32x256xbf16>
    %c0_3 = arith.constant 0 : index
    %c0_4 = arith.constant 0 : index
    %c0_5 = arith.constant 0 : index
    %7 = vector.load %arg2[%c0_3, %c0_4, %c0_5] : memref<4x256x128xbf16, #tpu.memory_space<vmem>>, vector<1x256x128xbf16>
    %8 = vector.shape_cast %7 : vector<1x256x128xbf16> to vector<256x128xbf16>
    %cst_6 = arith.constant dense<0.000000e+00> : vector<32x128xf32>
    %9 = tpu.matmul %6, %8, %cst_6 {dimension_numbers = #tpu.dot_dimension_numbers<[1], [0], [0], [1], [0, 0, 1, 1], [], []>} : vector<32x256xbf16>, vector<256x128xbf16>, vector<32x128xf32> -> vector<32x128xf32>
    %c0_7 = arith.constant 0 : index
    %c0_8 = arith.constant 0 : index
    %c0_9 = arith.constant 0 : index
    %10 = vector.load %arg5[%c0_7, %c0_8, %c0_9] : memref<4x32x128xf32, #tpu.memory_space<vmem>>, vector<1x32x128xf32>
    %11 = vector.shape_cast %10 : vector<1x32x128xf32> to vector<32x128xf32>
    %12 = vector.shape_cast %9 : vector<32x128xf32> to vector<1x32x128xf32>
    tpu.vector_store %arg5[%c0_7, %c0_8, %c0_9], %12 {strides = array<i32>} : memref<4x32x128xf32, #tpu.memory_space<vmem>>, vector<1x32x128xf32>,
    %cst_10 = arith.constant dense<0.000000e+00> : vector<128xf32>
    %13 = vector.multi_reduction <add>, %9, %cst_10 [0] : vector<32x128xf32> to vector<128xf32>
    %14 = vector.shape_cast %13 : vector<128xf32> to vector<1x128xf32>
    %15 = arith.addf %0, %14 : vector<1x128xf32>
    %c1 = arith.constant 1 : index
    %c0_11 = arith.constant 0 : index
    %c0_12 = arith.constant 0 : index
    %16 = vector.load %arg1[%c1, %c0_11, %c0_12] : memref<4x32x256xbf16, #tpu.memory_space<vmem>>, vector<1x32x256xbf16>
    %17 = vector.shape_cast %16 : vector<1x32x256xbf16> to vector<32x256xbf16>
    %18 = arith.extf %17 : vector<32x256xbf16> to vector<32x256xf32>
    %cst_13 = arith.constant 0.000000e+00 : f32
    %19 = vector.broadcast %cst_13 : f32 to vector<32x256xf32>
    %20 = arith.maximumf %18, %19 : vector<32x256xf32>
    %21 = arith.truncf %20 : vector<32x256xf32> to vector<32x256xbf16>
    %c1_14 = arith.constant 1 : index
    %c0_15 = arith.constant 0 : index
    %c0_16 = arith.constant 0 : index
    %22 = vector.load %arg2[%c1_14, %c0_15, %c0_16] : memref<4x256x128xbf16, #tpu.memory_space<vmem>>, vector<1x256x128xbf16>
    %23 = vector.shape_cast %22 : vector<1x256x128xbf16> to vector<256x128xbf16>
    %cst_17 = arith.constant dense<0.000000e+00> : vector<32x128xf32>
    %24 = tpu.matmul %21, %23, %cst_17 {dimension_numbers = #tpu.dot_dimension_numbers<[1], [0], [0], [1], [0, 0, 1, 1], [], []>} : vector<32x256xbf16>, vector<256x128xbf16>, vector<32x128xf32> -> vector<32x128xf32>
    %c1_18 = arith.constant 1 : index
    %c0_19 = arith.constant 0 : index
    %c0_20 = arith.constant 0 : index
    %25 = vector.load %arg5[%c1_18, %c0_19, %c0_20] : memref<4x32x128xf32, #tpu.memory_space<vmem>>, vector<1x32x128xf32>
    %26 = vector.shape_cast %25 : vector<1x32x128xf32> to vector<32x128xf32>
    %27 = vector.shape_cast %24 : vector<32x128xf32> to vector<1x32x128xf32>
    tpu.vector_store %arg5[%c1_18, %c0_19, %c0_20], %27 {strides = array<i32>} : memref<4x32x128xf32, #tpu.memory_space<vmem>>, vector<1x32x128xf32>,
    %cst_21 = arith.constant dense<0.000000e+00> : vector<128xf32>
    %28 = vector.multi_reduction <add>, %24, %cst_21 [0] : vector<32x128xf32> to vector<128xf32>
    %29 = vector.shape_cast %28 : vector<128xf32> to vector<1x128xf32>
    %30 = arith.addf %15, %29 : vector<1x128xf32>
    %c2 = arith.constant 2 : index
    %c0_22 = arith.constant 0 : index
    %c0_23 = arith.constant 0 : index
    %31 = vector.load %arg1[%c2, %c0_22, %c0_23] : memref<4x32x256xbf16, #tpu.memory_space<vmem>>, vector<1x32x256xbf16>
    %32 = vector.shape_cast %31 : vector<1x32x256xbf16> to vector<32x256xbf16>
    %33 = arith.extf %32 : vector<32x256xbf16> to vector<32x256xf32>
    %cst_24 = arith.constant 0.000000e+00 : f32
    %34 = vector.broadcast %cst_24 : f32 to vector<32x256xf32>
    %35 = arith.maximumf %33, %34 : vector<32x256xf32>
    %36 = arith.truncf %35 : vector<32x256xf32> to vector<32x256xbf16>
    %c2_25 = arith.constant 2 : index
    %c0_26 = arith.constant 0 : index
    %c0_27 = arith.constant 0 : index
    %37 = vector.load %arg2[%c2_25, %c0_26, %c0_27] : memref<4x256x128xbf16, #tpu.memory_space<vmem>>, vector<1x256x128xbf16>
    %38 = vector.shape_cast %37 : vector<1x256x128xbf16> to vector<256x128xbf16>
    %cst_28 = arith.constant dense<0.000000e+00> : vector<32x128xf32>
    %39 = tpu.matmul %36, %38, %cst_28 {dimension_numbers = #tpu.dot_dimension_numbers<[1], [0], [0], [1], [0, 0, 1, 1], [], []>} : vector<32x256xbf16>, vector<256x128xbf16>, vector<32x128xf32> -> vector<32x128xf32>
    %c2_29 = arith.constant 2 : index
    %c0_30 = arith.constant 0 : index
    %c0_31 = arith.constant 0 : index
    %40 = vector.load %arg5[%c2_29, %c0_30, %c0_31] : memref<4x32x128xf32, #tpu.memory_space<vmem>>, vector<1x32x128xf32>
    %41 = vector.shape_cast %40 : vector<1x32x128xf32> to vector<32x128xf32>
    %42 = vector.shape_cast %39 : vector<32x128xf32> to vector<1x32x128xf32>
    tpu.vector_store %arg5[%c2_29, %c0_30, %c0_31], %42 {strides = array<i32>} : memref<4x32x128xf32, #tpu.memory_space<vmem>>, vector<1x32x128xf32>,
    %cst_32 = arith.constant dense<0.000000e+00> : vector<128xf32>
    %43 = vector.multi_reduction <add>, %39, %cst_32 [0] : vector<32x128xf32> to vector<128xf32>
    %44 = vector.shape_cast %43 : vector<128xf32> to vector<1x128xf32>
    %45 = arith.addf %30, %44 : vector<1x128xf32>
    %c3 = arith.constant 3 : index
    %c0_33 = arith.constant 0 : index
    %c0_34 = arith.constant 0 : index
    %46 = vector.load %arg1[%c3, %c0_33, %c0_34] : memref<4x32x256xbf16, #tpu.memory_space<vmem>>, vector<1x32x256xbf16>
    %47 = vector.shape_cast %46 : vector<1x32x256xbf16> to vector<32x256xbf16>
    %48 = arith.extf %47 : vector<32x256xbf16> to vector<32x256xf32>
    %cst_35 = arith.constant 0.000000e+00 : f32
    %49 = vector.broadcast %cst_35 : f32 to vector<32x256xf32>
    %50 = arith.maximumf %48, %49 : vector<32x256xf32>
    %51 = arith.truncf %50 : vector<32x256xf32> to vector<32x256xbf16>
    %c3_36 = arith.constant 3 : index
    %c0_37 = arith.constant 0 : index
    %c0_38 = arith.constant 0 : index
    %52 = vector.load %arg2[%c3_36, %c0_37, %c0_38] : memref<4x256x128xbf16, #tpu.memory_space<vmem>>, vector<1x256x128xbf16>
    %53 = vector.shape_cast %52 : vector<1x256x128xbf16> to vector<256x128xbf16>
    %cst_39 = arith.constant dense<0.000000e+00> : vector<32x128xf32>
    %54 = tpu.matmul %51, %53, %cst_39 {dimension_numbers = #tpu.dot_dimension_numbers<[1], [0], [0], [1], [0, 0, 1, 1], [], []>} : vector<32x256xbf16>, vector<256x128xbf16>, vector<32x128xf32> -> vector<32x128xf32>
    %c3_40 = arith.constant 3 : index
    %c0_41 = arith.constant 0 : index
    %c0_42 = arith.constant 0 : index
    %55 = vector.load %arg5[%c3_40, %c0_41, %c0_42] : memref<4x32x128xf32, #tpu.memory_space<vmem>>, vector<1x32x128xf32>
    %56 = vector.shape_cast %55 : vector<1x32x128xf32> to vector<32x128xf32>
    %57 = vector.shape_cast %54 : vector<32x128xf32> to vector<1x32x128xf32>
    tpu.vector_store %arg5[%c3_40, %c0_41, %c0_42], %57 {strides = array<i32>} : memref<4x32x128xf32, #tpu.memory_space<vmem>>, vector<1x32x128xf32>,
    %cst_43 = arith.constant dense<0.000000e+00> : vector<128xf32>
    %58 = vector.multi_reduction <add>, %54, %cst_43 [0] : vector<32x128xf32> to vector<128xf32>
    %59 = vector.shape_cast %58 : vector<128xf32> to vector<1x128xf32>
    %60 = arith.addf %45, %59 : vector<1x128xf32>
    %cst_44 = arith.constant 7.812500e-03 : f32
    %61 = vector.broadcast %cst_44 : f32 to vector<1x128xf32>
    %62 = arith.mulf %60, %61 : vector<1x128xf32>
    %cst_45 = arith.constant 0.000000e+00 : f32
    %63 = vector.broadcast %cst_45 : f32 to vector<1x128xf32>
    %c0_46 = arith.constant 0 : index
    %c0_47 = arith.constant 0 : index
    %c0_48 = arith.constant 0 : index
    %64 = vector.load %arg5[%c0_46, %c0_47, %c0_48] : memref<4x32x128xf32, #tpu.memory_space<vmem>>, vector<1x32x128xf32>
    %65 = vector.shape_cast %64 : vector<1x32x128xf32> to vector<32x128xf32>
    %66 = vector.broadcast %62 : vector<1x128xf32> to vector<32x128xf32>
    %67 = arith.subf %65, %66 : vector<32x128xf32>
    %68 = arith.mulf %67, %67 : vector<32x128xf32>
    %cst_49 = arith.constant dense<0.000000e+00> : vector<128xf32>
    %69 = vector.multi_reduction <add>, %68, %cst_49 [0] : vector<32x128xf32> to vector<128xf32>
    %70 = vector.shape_cast %69 : vector<128xf32> to vector<1x128xf32>
    %71 = arith.addf %63, %70 : vector<1x128xf32>
    %c1_50 = arith.constant 1 : index
    %c0_51 = arith.constant 0 : index
    %c0_52 = arith.constant 0 : index
    %72 = vector.load %arg5[%c1_50, %c0_51, %c0_52] : memref<4x32x128xf32, #tpu.memory_space<vmem>>, vector<1x32x128xf32>
    %73 = vector.shape_cast %72 : vector<1x32x128xf32> to vector<32x128xf32>
    %74 = vector.broadcast %62 : vector<1x128xf32> to vector<32x128xf32>
    %75 = arith.subf %73, %74 : vector<32x128xf32>
    %76 = arith.mulf %75, %75 : vector<32x128xf32>
    %cst_53 = arith.constant dense<0.000000e+00> : vector<128xf32>
    %77 = vector.multi_reduction <add>, %76, %cst_53 [0] : vector<32x128xf32> to vector<128xf32>
    %78 = vector.shape_cast %77 : vector<128xf32> to vector<1x128xf32>
    %79 = arith.addf %71, %78 : vector<1x128xf32>
    %c2_54 = arith.constant 2 : index
    %c0_55 = arith.constant 0 : index
    %c0_56 = arith.constant 0 : index
    %80 = vector.load %arg5[%c2_54, %c0_55, %c0_56] : memref<4x32x128xf32, #tpu.memory_space<vmem>>, vector<1x32x128xf32>
    %81 = vector.shape_cast %80 : vector<1x32x128xf32> to vector<32x128xf32>
    %82 = vector.broadcast %62 : vector<1x128xf32> to vector<32x128xf32>
    %83 = arith.subf %81, %82 : vector<32x128xf32>
    %84 = arith.mulf %83, %83 : vector<32x128xf32>
    %cst_57 = arith.constant dense<0.000000e+00> : vector<128xf32>
    %85 = vector.multi_reduction <add>, %84, %cst_57 [0] : vector<32x128xf32> to vector<128xf32>
    %86 = vector.shape_cast %85 : vector<128xf32> to vector<1x128xf32>
    %87 = arith.addf %79, %86 : vector<1x128xf32>
    %c3_58 = arith.constant 3 : index
    %c0_59 = arith.constant 0 : index
    %c0_60 = arith.constant 0 : index
    %88 = vector.load %arg5[%c3_58, %c0_59, %c0_60] : memref<4x32x128xf32, #tpu.memory_space<vmem>>, vector<1x32x128xf32>
    %89 = vector.shape_cast %88 : vector<1x32x128xf32> to vector<32x128xf32>
    %90 = vector.broadcast %62 : vector<1x128xf32> to vector<32x128xf32>
    %91 = arith.subf %89, %90 : vector<32x128xf32>
    %92 = arith.mulf %91, %91 : vector<32x128xf32>
    %cst_61 = arith.constant dense<0.000000e+00> : vector<128xf32>
    %93 = vector.multi_reduction <add>, %92, %cst_61 [0] : vector<32x128xf32> to vector<128xf32>
    %94 = vector.shape_cast %93 : vector<128xf32> to vector<1x128xf32>
    %95 = arith.addf %87, %94 : vector<1x128xf32>
    %cst_62 = arith.constant 7.812500e-03 : f32
    %96 = vector.broadcast %cst_62 : f32 to vector<1x128xf32>
    %97 = arith.mulf %95, %96 : vector<1x128xf32>
    %c0_63 = arith.constant 0 : index
    %c0_64 = arith.constant 0 : index
    %98 = vector.load %arg3[%c0_63, %c0_64] : memref<1x128xf32, #tpu.memory_space<vmem>>, vector<1x128xf32>
    %cst_65 = arith.constant 9.99999974E-6 : f32
    %99 = vector.broadcast %cst_65 : f32 to vector<1x128xf32>
    %100 = arith.addf %97, %99 : vector<1x128xf32>
    %101 = math.rsqrt %100 : vector<1x128xf32>
    %102 = arith.mulf %98, %101 : vector<1x128xf32>
    %c0_66 = arith.constant 0 : index
    %c0_67 = arith.constant 0 : index
    %103 = vector.load %arg4[%c0_66, %c0_67] : memref<1x128xf32, #tpu.memory_space<vmem>>, vector<1x128xf32>
    %104 = arith.mulf %62, %102 : vector<1x128xf32>
    %105 = arith.subf %103, %104 : vector<1x128xf32>
    %c0_68 = arith.constant 0 : index
    %c0_69 = arith.constant 0 : index
    %c0_70 = arith.constant 0 : index
    %106 = vector.load %arg5[%c0_68, %c0_69, %c0_70] : memref<4x32x128xf32, #tpu.memory_space<vmem>>, vector<1x32x128xf32>
    %107 = vector.shape_cast %106 : vector<1x32x128xf32> to vector<32x128xf32>
    %108 = vector.broadcast %102 : vector<1x128xf32> to vector<32x128xf32>
    %109 = arith.mulf %107, %108 : vector<32x128xf32>
    %110 = vector.broadcast %105 : vector<1x128xf32> to vector<32x128xf32>
    %111 = arith.addf %109, %110 : vector<32x128xf32>
    %c0_71 = arith.constant 0 : index
    %c0_72 = arith.constant 0 : index
    %c0_73 = arith.constant 0 : index
    %112 = vector.load %arg5[%c0_71, %c0_72, %c0_73] : memref<4x32x128xf32, #tpu.memory_space<vmem>>, vector<1x32x128xf32>
    %113 = vector.shape_cast %112 : vector<1x32x128xf32> to vector<32x128xf32>
    %114 = vector.shape_cast %111 : vector<32x128xf32> to vector<1x32x128xf32>
    tpu.vector_store %arg5[%c0_71, %c0_72, %c0_73], %114 {strides = array<i32>} : memref<4x32x128xf32, #tpu.memory_space<vmem>>, vector<1x32x128xf32>,
    %c1_74 = arith.constant 1 : index
    %c0_75 = arith.constant 0 : index
    %c0_76 = arith.constant 0 : index
    %115 = vector.load %arg5[%c1_74, %c0_75, %c0_76] : memref<4x32x128xf32, #tpu.memory_space<vmem>>, vector<1x32x128xf32>
    %116 = vector.shape_cast %115 : vector<1x32x128xf32> to vector<32x128xf32>
    %117 = vector.broadcast %102 : vector<1x128xf32> to vector<32x128xf32>
    %118 = arith.mulf %116, %117 : vector<32x128xf32>
    %119 = vector.broadcast %105 : vector<1x128xf32> to vector<32x128xf32>
    %120 = arith.addf %118, %119 : vector<32x128xf32>
    %c1_77 = arith.constant 1 : index
    %c0_78 = arith.constant 0 : index
    %c0_79 = arith.constant 0 : index
    %121 = vector.load %arg5[%c1_77, %c0_78, %c0_79] : memref<4x32x128xf32, #tpu.memory_space<vmem>>, vector<1x32x128xf32>
    %122 = vector.shape_cast %121 : vector<1x32x128xf32> to vector<32x128xf32>
    %123 = vector.shape_cast %120 : vector<32x128xf32> to vector<1x32x128xf32>
    tpu.vector_store %arg5[%c1_77, %c0_78, %c0_79], %123 {strides = array<i32>} : memref<4x32x128xf32, #tpu.memory_space<vmem>>, vector<1x32x128xf32>,
    %c2_80 = arith.constant 2 : index
    %c0_81 = arith.constant 0 : index
    %c0_82 = arith.constant 0 : index
    %124 = vector.load %arg5[%c2_80, %c0_81, %c0_82] : memref<4x32x128xf32, #tpu.memory_space<vmem>>, vector<1x32x128xf32>
    %125 = vector.shape_cast %124 : vector<1x32x128xf32> to vector<32x128xf32>
    %126 = vector.broadcast %102 : vector<1x128xf32> to vector<32x128xf32>
    %127 = arith.mulf %125, %126 : vector<32x128xf32>
    %128 = vector.broadcast %105 : vector<1x128xf32> to vector<32x128xf32>
    %129 = arith.addf %127, %128 : vector<32x128xf32>
    %c2_83 = arith.constant 2 : index
    %c0_84 = arith.constant 0 : index
    %c0_85 = arith.constant 0 : index
    %130 = vector.load %arg5[%c2_83, %c0_84, %c0_85] : memref<4x32x128xf32, #tpu.memory_space<vmem>>, vector<1x32x128xf32>
    %131 = vector.shape_cast %130 : vector<1x32x128xf32> to vector<32x128xf32>
    %132 = vector.shape_cast %129 : vector<32x128xf32> to vector<1x32x128xf32>
    tpu.vector_store %arg5[%c2_83, %c0_84, %c0_85], %132 {strides = array<i32>} : memref<4x32x128xf32, #tpu.memory_space<vmem>>, vector<1x32x128xf32>,
    %c3_86 = arith.constant 3 : index
    %c0_87 = arith.constant 0 : index
    %c0_88 = arith.constant 0 : index
    %133 = vector.load %arg5[%c3_86, %c0_87, %c0_88] : memref<4x32x128xf32, #tpu.memory_space<vmem>>, vector<1x32x128xf32>
    %134 = vector.shape_cast %133 : vector<1x32x128xf32> to vector<32x128xf32>
    %135 = vector.broadcast %102 : vector<1x128xf32> to vector<32x128xf32>
    %136 = arith.mulf %134, %135 : vector<32x128xf32>
    %137 = vector.broadcast %105 : vector<1x128xf32> to vector<32x128xf32>
    %138 = arith.addf %136, %137 : vector<32x128xf32>
    %c3_89 = arith.constant 3 : index
    %c0_90 = arith.constant 0 : index
    %c0_91 = arith.constant 0 : index
    %139 = vector.load %arg5[%c3_89, %c0_90, %c0_91] : memref<4x32x128xf32, #tpu.memory_space<vmem>>, vector<1x32x128xf32>
    %140 = vector.shape_cast %139 : vector<1x32x128xf32> to vector<32x128xf32>
    %141 = vector.shape_cast %138 : vector<32x128xf32> to vector<1x32x128xf32>
    tpu.vector_store %arg5[%c3_89, %c0_90, %c0_91], %141 {strides = array<i32>} : memref<4x32x128xf32, #tpu.memory_space<vmem>>, vector<1x32x128xf32>,
    return
  }
  func.func @transform_0(%arg0: i32) -> (i32, i32, i32) {
    %c0_i32 = arith.constant 0 : i32
    %c0_i32_0 = arith.constant 0 : i32
    %c0_i32_1 = arith.constant 0 : i32
    %c0_i32_2 = arith.constant 0 : i32
    return %c0_i32, %c0_i32_0, %c0_i32_1 : i32, i32, i32
  }
  func.func @transform_1(%arg0: i32) -> (i32, i32, i32) {
    %c0_i32 = arith.constant 0 : i32
    %c0_i32_0 = arith.constant 0 : i32
    %c0_i32_1 = arith.constant 0 : i32
    %c0_i32_2 = arith.constant 0 : i32
    return %c0_i32, %c0_i32_0, %c0_i32_1 : i32, i32, i32
  }
  func.func @transform_2(%arg0: i32) -> (i32, i32) {
    %c0_i32 = arith.constant 0 : i32
    %c0_i32_0 = arith.constant 0 : i32
    %c0_i32_1 = arith.constant 0 : i32
    return %c0_i32, %c0_i32_0 : i32, i32
  }
  func.func @transform_3(%arg0: i32) -> (i32, i32) {
    %c0_i32 = arith.constant 0 : i32
    %c0_i32_0 = arith.constant 0 : i32
    %c0_i32_1 = arith.constant 0 : i32
    return %c0_i32, %c0_i32_0 : i32, i32
  }
  func.func @transform_4(%arg0: i32) -> (i32, i32, i32) {
    %c0_i32 = arith.constant 0 : i32
    %c0_i32_0 = arith.constant 0 : i32
    %c0_i32_1 = arith.constant 0 : i32
    %c0_i32_2 = arith.constant 0 : i32
    return %c0_i32, %c0_i32_0, %c0_i32_1 : i32, i32, i32
  }
}

module attributes {stable_mosaic.version = 11 : i64} {
  func.func @_gemm_bn_kernel(%arg0: i32, %arg1: memref<4x128x128xbf16, #tpu.memory_space<vmem>>, %arg2: memref<4x128x128xbf16, #tpu.memory_space<vmem>>, %arg3: memref<1x128xf32, #tpu.memory_space<vmem>>, %arg4: memref<1x128xf32, #tpu.memory_space<vmem>>, %arg5: memref<4x128x128xf32, #tpu.memory_space<vmem>>) attributes {dimension_semantics = [#tpu.dimension_semantics<arbitrary>], iteration_bounds = array<i64: 1>, scalar_prefetch = 0 : i64, scratch_operands = 0 : i64, tpu.core_type = #tpu.core_type<tc>, window_params = [{pipeline_mode = #tpu.pipeline_mode<synchronous>, transform_indices = @transform_0, window_bounds = array<i64: 4, 128, 128>}, {pipeline_mode = #tpu.pipeline_mode<synchronous>, transform_indices = @transform_1, window_bounds = array<i64: 4, 128, 128>}, {pipeline_mode = #tpu.pipeline_mode<synchronous>, transform_indices = @transform_2, window_bounds = array<i64: 1, 128>}, {pipeline_mode = #tpu.pipeline_mode<synchronous>, transform_indices = @transform_3, window_bounds = array<i64: 1, 128>}, {pipeline_mode = #tpu.pipeline_mode<synchronous>, transform_indices = @transform_4, window_bounds = array<i64: 4, 128, 128>}]} {
    %cst = arith.constant 0.000000e+00 : f32
    %0 = vector.broadcast %cst : f32 to vector<1x128xf32>
    %c0 = arith.constant 0 : index
    %c0_0 = arith.constant 0 : index
    %c0_1 = arith.constant 0 : index
    %1 = vector.load %arg1[%c0, %c0_0, %c0_1] : memref<4x128x128xbf16, #tpu.memory_space<vmem>>, vector<1x128x128xbf16>
    %2 = vector.shape_cast %1 : vector<1x128x128xbf16> to vector<128x128xbf16>
    %3 = arith.extf %2 : vector<128x128xbf16> to vector<128x128xf32>
    %cst_2 = arith.constant 0.000000e+00 : f32
    %4 = vector.broadcast %cst_2 : f32 to vector<128x128xf32>
    %5 = arith.maximumf %3, %4 : vector<128x128xf32>
    %6 = arith.truncf %5 : vector<128x128xf32> to vector<128x128xbf16>
    %c0_3 = arith.constant 0 : index
    %c0_4 = arith.constant 0 : index
    %c0_5 = arith.constant 0 : index
    %7 = vector.load %arg2[%c0_3, %c0_4, %c0_5] : memref<4x128x128xbf16, #tpu.memory_space<vmem>>, vector<1x128x128xbf16>
    %8 = vector.shape_cast %7 : vector<1x128x128xbf16> to vector<128x128xbf16>
    %cst_6 = arith.constant dense<0.000000e+00> : vector<128x128xf32>
    %9 = tpu.matmul %6, %8, %cst_6 {dimension_numbers = #tpu.dot_dimension_numbers<[1], [0], [0], [1], [0, 0, 1, 1], [], []>} : vector<128x128xbf16>, vector<128x128xbf16>, vector<128x128xf32> -> vector<128x128xf32>
    %c0_7 = arith.constant 0 : index
    %c0_8 = arith.constant 0 : index
    %c0_9 = arith.constant 0 : index
    %10 = vector.load %arg5[%c0_7, %c0_8, %c0_9] : memref<4x128x128xf32, #tpu.memory_space<vmem>>, vector<1x128x128xf32>
    %11 = vector.shape_cast %10 : vector<1x128x128xf32> to vector<128x128xf32>
    %12 = vector.shape_cast %9 : vector<128x128xf32> to vector<1x128x128xf32>
    tpu.vector_store %arg5[%c0_7, %c0_8, %c0_9], %12 {strides = array<i32>} : memref<4x128x128xf32, #tpu.memory_space<vmem>>, vector<1x128x128xf32>,
    %cst_10 = arith.constant dense<0.000000e+00> : vector<128xf32>
    %13 = vector.multi_reduction <add>, %9, %cst_10 [0] : vector<128x128xf32> to vector<128xf32>
    %14 = vector.shape_cast %13 : vector<128xf32> to vector<1x128xf32>
    %15 = arith.addf %0, %14 : vector<1x128xf32>
    %c1 = arith.constant 1 : index
    %c0_11 = arith.constant 0 : index
    %c0_12 = arith.constant 0 : index
    %16 = vector.load %arg1[%c1, %c0_11, %c0_12] : memref<4x128x128xbf16, #tpu.memory_space<vmem>>, vector<1x128x128xbf16>
    %17 = vector.shape_cast %16 : vector<1x128x128xbf16> to vector<128x128xbf16>
    %18 = arith.extf %17 : vector<128x128xbf16> to vector<128x128xf32>
    %cst_13 = arith.constant 0.000000e+00 : f32
    %19 = vector.broadcast %cst_13 : f32 to vector<128x128xf32>
    %20 = arith.maximumf %18, %19 : vector<128x128xf32>
    %21 = arith.truncf %20 : vector<128x128xf32> to vector<128x128xbf16>
    %c1_14 = arith.constant 1 : index
    %c0_15 = arith.constant 0 : index
    %c0_16 = arith.constant 0 : index
    %22 = vector.load %arg2[%c1_14, %c0_15, %c0_16] : memref<4x128x128xbf16, #tpu.memory_space<vmem>>, vector<1x128x128xbf16>
    %23 = vector.shape_cast %22 : vector<1x128x128xbf16> to vector<128x128xbf16>
    %cst_17 = arith.constant dense<0.000000e+00> : vector<128x128xf32>
    %24 = tpu.matmul %21, %23, %cst_17 {dimension_numbers = #tpu.dot_dimension_numbers<[1], [0], [0], [1], [0, 0, 1, 1], [], []>} : vector<128x128xbf16>, vector<128x128xbf16>, vector<128x128xf32> -> vector<128x128xf32>
    %c1_18 = arith.constant 1 : index
    %c0_19 = arith.constant 0 : index
    %c0_20 = arith.constant 0 : index
    %25 = vector.load %arg5[%c1_18, %c0_19, %c0_20] : memref<4x128x128xf32, #tpu.memory_space<vmem>>, vector<1x128x128xf32>
    %26 = vector.shape_cast %25 : vector<1x128x128xf32> to vector<128x128xf32>
    %27 = vector.shape_cast %24 : vector<128x128xf32> to vector<1x128x128xf32>
    tpu.vector_store %arg5[%c1_18, %c0_19, %c0_20], %27 {strides = array<i32>} : memref<4x128x128xf32, #tpu.memory_space<vmem>>, vector<1x128x128xf32>,
    %cst_21 = arith.constant dense<0.000000e+00> : vector<128xf32>
    %28 = vector.multi_reduction <add>, %24, %cst_21 [0] : vector<128x128xf32> to vector<128xf32>
    %29 = vector.shape_cast %28 : vector<128xf32> to vector<1x128xf32>
    %30 = arith.addf %15, %29 : vector<1x128xf32>
    %c2 = arith.constant 2 : index
    %c0_22 = arith.constant 0 : index
    %c0_23 = arith.constant 0 : index
    %31 = vector.load %arg1[%c2, %c0_22, %c0_23] : memref<4x128x128xbf16, #tpu.memory_space<vmem>>, vector<1x128x128xbf16>
    %32 = vector.shape_cast %31 : vector<1x128x128xbf16> to vector<128x128xbf16>
    %33 = arith.extf %32 : vector<128x128xbf16> to vector<128x128xf32>
    %cst_24 = arith.constant 0.000000e+00 : f32
    %34 = vector.broadcast %cst_24 : f32 to vector<128x128xf32>
    %35 = arith.maximumf %33, %34 : vector<128x128xf32>
    %36 = arith.truncf %35 : vector<128x128xf32> to vector<128x128xbf16>
    %c2_25 = arith.constant 2 : index
    %c0_26 = arith.constant 0 : index
    %c0_27 = arith.constant 0 : index
    %37 = vector.load %arg2[%c2_25, %c0_26, %c0_27] : memref<4x128x128xbf16, #tpu.memory_space<vmem>>, vector<1x128x128xbf16>
    %38 = vector.shape_cast %37 : vector<1x128x128xbf16> to vector<128x128xbf16>
    %cst_28 = arith.constant dense<0.000000e+00> : vector<128x128xf32>
    %39 = tpu.matmul %36, %38, %cst_28 {dimension_numbers = #tpu.dot_dimension_numbers<[1], [0], [0], [1], [0, 0, 1, 1], [], []>} : vector<128x128xbf16>, vector<128x128xbf16>, vector<128x128xf32> -> vector<128x128xf32>
    %c2_29 = arith.constant 2 : index
    %c0_30 = arith.constant 0 : index
    %c0_31 = arith.constant 0 : index
    %40 = vector.load %arg5[%c2_29, %c0_30, %c0_31] : memref<4x128x128xf32, #tpu.memory_space<vmem>>, vector<1x128x128xf32>
    %41 = vector.shape_cast %40 : vector<1x128x128xf32> to vector<128x128xf32>
    %42 = vector.shape_cast %39 : vector<128x128xf32> to vector<1x128x128xf32>
    tpu.vector_store %arg5[%c2_29, %c0_30, %c0_31], %42 {strides = array<i32>} : memref<4x128x128xf32, #tpu.memory_space<vmem>>, vector<1x128x128xf32>,
    %cst_32 = arith.constant dense<0.000000e+00> : vector<128xf32>
    %43 = vector.multi_reduction <add>, %39, %cst_32 [0] : vector<128x128xf32> to vector<128xf32>
    %44 = vector.shape_cast %43 : vector<128xf32> to vector<1x128xf32>
    %45 = arith.addf %30, %44 : vector<1x128xf32>
    %c3 = arith.constant 3 : index
    %c0_33 = arith.constant 0 : index
    %c0_34 = arith.constant 0 : index
    %46 = vector.load %arg1[%c3, %c0_33, %c0_34] : memref<4x128x128xbf16, #tpu.memory_space<vmem>>, vector<1x128x128xbf16>
    %47 = vector.shape_cast %46 : vector<1x128x128xbf16> to vector<128x128xbf16>
    %48 = arith.extf %47 : vector<128x128xbf16> to vector<128x128xf32>
    %cst_35 = arith.constant 0.000000e+00 : f32
    %49 = vector.broadcast %cst_35 : f32 to vector<128x128xf32>
    %50 = arith.maximumf %48, %49 : vector<128x128xf32>
    %51 = arith.truncf %50 : vector<128x128xf32> to vector<128x128xbf16>
    %c3_36 = arith.constant 3 : index
    %c0_37 = arith.constant 0 : index
    %c0_38 = arith.constant 0 : index
    %52 = vector.load %arg2[%c3_36, %c0_37, %c0_38] : memref<4x128x128xbf16, #tpu.memory_space<vmem>>, vector<1x128x128xbf16>
    %53 = vector.shape_cast %52 : vector<1x128x128xbf16> to vector<128x128xbf16>
    %cst_39 = arith.constant dense<0.000000e+00> : vector<128x128xf32>
    %54 = tpu.matmul %51, %53, %cst_39 {dimension_numbers = #tpu.dot_dimension_numbers<[1], [0], [0], [1], [0, 0, 1, 1], [], []>} : vector<128x128xbf16>, vector<128x128xbf16>, vector<128x128xf32> -> vector<128x128xf32>
    %c3_40 = arith.constant 3 : index
    %c0_41 = arith.constant 0 : index
    %c0_42 = arith.constant 0 : index
    %55 = vector.load %arg5[%c3_40, %c0_41, %c0_42] : memref<4x128x128xf32, #tpu.memory_space<vmem>>, vector<1x128x128xf32>
    %56 = vector.shape_cast %55 : vector<1x128x128xf32> to vector<128x128xf32>
    %57 = vector.shape_cast %54 : vector<128x128xf32> to vector<1x128x128xf32>
    tpu.vector_store %arg5[%c3_40, %c0_41, %c0_42], %57 {strides = array<i32>} : memref<4x128x128xf32, #tpu.memory_space<vmem>>, vector<1x128x128xf32>,
    %cst_43 = arith.constant dense<0.000000e+00> : vector<128xf32>
    %58 = vector.multi_reduction <add>, %54, %cst_43 [0] : vector<128x128xf32> to vector<128xf32>
    %59 = vector.shape_cast %58 : vector<128xf32> to vector<1x128xf32>
    %60 = arith.addf %45, %59 : vector<1x128xf32>
    %cst_44 = arith.constant 0.001953125 : f32
    %61 = vector.broadcast %cst_44 : f32 to vector<1x128xf32>
    %62 = arith.mulf %60, %61 : vector<1x128xf32>
    %cst_45 = arith.constant 0.000000e+00 : f32
    %63 = vector.broadcast %cst_45 : f32 to vector<1x128xf32>
    %c0_46 = arith.constant 0 : index
    %c0_47 = arith.constant 0 : index
    %c0_48 = arith.constant 0 : index
    %64 = vector.load %arg5[%c0_46, %c0_47, %c0_48] : memref<4x128x128xf32, #tpu.memory_space<vmem>>, vector<1x128x128xf32>
    %65 = vector.shape_cast %64 : vector<1x128x128xf32> to vector<128x128xf32>
    %66 = vector.broadcast %62 : vector<1x128xf32> to vector<128x128xf32>
    %67 = arith.subf %65, %66 : vector<128x128xf32>
    %68 = arith.mulf %67, %67 : vector<128x128xf32>
    %cst_49 = arith.constant dense<0.000000e+00> : vector<128xf32>
    %69 = vector.multi_reduction <add>, %68, %cst_49 [0] : vector<128x128xf32> to vector<128xf32>
    %70 = vector.shape_cast %69 : vector<128xf32> to vector<1x128xf32>
    %71 = arith.addf %63, %70 : vector<1x128xf32>
    %c1_50 = arith.constant 1 : index
    %c0_51 = arith.constant 0 : index
    %c0_52 = arith.constant 0 : index
    %72 = vector.load %arg5[%c1_50, %c0_51, %c0_52] : memref<4x128x128xf32, #tpu.memory_space<vmem>>, vector<1x128x128xf32>
    %73 = vector.shape_cast %72 : vector<1x128x128xf32> to vector<128x128xf32>
    %74 = vector.broadcast %62 : vector<1x128xf32> to vector<128x128xf32>
    %75 = arith.subf %73, %74 : vector<128x128xf32>
    %76 = arith.mulf %75, %75 : vector<128x128xf32>
    %cst_53 = arith.constant dense<0.000000e+00> : vector<128xf32>
    %77 = vector.multi_reduction <add>, %76, %cst_53 [0] : vector<128x128xf32> to vector<128xf32>
    %78 = vector.shape_cast %77 : vector<128xf32> to vector<1x128xf32>
    %79 = arith.addf %71, %78 : vector<1x128xf32>
    %c2_54 = arith.constant 2 : index
    %c0_55 = arith.constant 0 : index
    %c0_56 = arith.constant 0 : index
    %80 = vector.load %arg5[%c2_54, %c0_55, %c0_56] : memref<4x128x128xf32, #tpu.memory_space<vmem>>, vector<1x128x128xf32>
    %81 = vector.shape_cast %80 : vector<1x128x128xf32> to vector<128x128xf32>
    %82 = vector.broadcast %62 : vector<1x128xf32> to vector<128x128xf32>
    %83 = arith.subf %81, %82 : vector<128x128xf32>
    %84 = arith.mulf %83, %83 : vector<128x128xf32>
    %cst_57 = arith.constant dense<0.000000e+00> : vector<128xf32>
    %85 = vector.multi_reduction <add>, %84, %cst_57 [0] : vector<128x128xf32> to vector<128xf32>
    %86 = vector.shape_cast %85 : vector<128xf32> to vector<1x128xf32>
    %87 = arith.addf %79, %86 : vector<1x128xf32>
    %c3_58 = arith.constant 3 : index
    %c0_59 = arith.constant 0 : index
    %c0_60 = arith.constant 0 : index
    %88 = vector.load %arg5[%c3_58, %c0_59, %c0_60] : memref<4x128x128xf32, #tpu.memory_space<vmem>>, vector<1x128x128xf32>
    %89 = vector.shape_cast %88 : vector<1x128x128xf32> to vector<128x128xf32>
    %90 = vector.broadcast %62 : vector<1x128xf32> to vector<128x128xf32>
    %91 = arith.subf %89, %90 : vector<128x128xf32>
    %92 = arith.mulf %91, %91 : vector<128x128xf32>
    %cst_61 = arith.constant dense<0.000000e+00> : vector<128xf32>
    %93 = vector.multi_reduction <add>, %92, %cst_61 [0] : vector<128x128xf32> to vector<128xf32>
    %94 = vector.shape_cast %93 : vector<128xf32> to vector<1x128xf32>
    %95 = arith.addf %87, %94 : vector<1x128xf32>
    %cst_62 = arith.constant 0.001953125 : f32
    %96 = vector.broadcast %cst_62 : f32 to vector<1x128xf32>
    %97 = arith.mulf %95, %96 : vector<1x128xf32>
    %c0_63 = arith.constant 0 : index
    %c0_64 = arith.constant 0 : index
    %98 = vector.load %arg3[%c0_63, %c0_64] : memref<1x128xf32, #tpu.memory_space<vmem>>, vector<1x128xf32>
    %cst_65 = arith.constant 9.99999974E-6 : f32
    %99 = vector.broadcast %cst_65 : f32 to vector<1x128xf32>
    %100 = arith.addf %97, %99 : vector<1x128xf32>
    %101 = math.rsqrt %100 : vector<1x128xf32>
    %102 = arith.mulf %98, %101 : vector<1x128xf32>
    %c0_66 = arith.constant 0 : index
    %c0_67 = arith.constant 0 : index
    %103 = vector.load %arg4[%c0_66, %c0_67] : memref<1x128xf32, #tpu.memory_space<vmem>>, vector<1x128xf32>
    %104 = arith.mulf %62, %102 : vector<1x128xf32>
    %105 = arith.subf %103, %104 : vector<1x128xf32>
    %c0_68 = arith.constant 0 : index
    %c0_69 = arith.constant 0 : index
    %c0_70 = arith.constant 0 : index
    %106 = vector.load %arg5[%c0_68, %c0_69, %c0_70] : memref<4x128x128xf32, #tpu.memory_space<vmem>>, vector<1x128x128xf32>
    %107 = vector.shape_cast %106 : vector<1x128x128xf32> to vector<128x128xf32>
    %108 = vector.broadcast %102 : vector<1x128xf32> to vector<128x128xf32>
    %109 = arith.mulf %107, %108 : vector<128x128xf32>
    %110 = vector.broadcast %105 : vector<1x128xf32> to vector<128x128xf32>
    %111 = arith.addf %109, %110 : vector<128x128xf32>
    %c0_71 = arith.constant 0 : index
    %c0_72 = arith.constant 0 : index
    %c0_73 = arith.constant 0 : index
    %112 = vector.load %arg5[%c0_71, %c0_72, %c0_73] : memref<4x128x128xf32, #tpu.memory_space<vmem>>, vector<1x128x128xf32>
    %113 = vector.shape_cast %112 : vector<1x128x128xf32> to vector<128x128xf32>
    %114 = vector.shape_cast %111 : vector<128x128xf32> to vector<1x128x128xf32>
    tpu.vector_store %arg5[%c0_71, %c0_72, %c0_73], %114 {strides = array<i32>} : memref<4x128x128xf32, #tpu.memory_space<vmem>>, vector<1x128x128xf32>,
    %c1_74 = arith.constant 1 : index
    %c0_75 = arith.constant 0 : index
    %c0_76 = arith.constant 0 : index
    %115 = vector.load %arg5[%c1_74, %c0_75, %c0_76] : memref<4x128x128xf32, #tpu.memory_space<vmem>>, vector<1x128x128xf32>
    %116 = vector.shape_cast %115 : vector<1x128x128xf32> to vector<128x128xf32>
    %117 = vector.broadcast %102 : vector<1x128xf32> to vector<128x128xf32>
    %118 = arith.mulf %116, %117 : vector<128x128xf32>
    %119 = vector.broadcast %105 : vector<1x128xf32> to vector<128x128xf32>
    %120 = arith.addf %118, %119 : vector<128x128xf32>
    %c1_77 = arith.constant 1 : index
    %c0_78 = arith.constant 0 : index
    %c0_79 = arith.constant 0 : index
    %121 = vector.load %arg5[%c1_77, %c0_78, %c0_79] : memref<4x128x128xf32, #tpu.memory_space<vmem>>, vector<1x128x128xf32>
    %122 = vector.shape_cast %121 : vector<1x128x128xf32> to vector<128x128xf32>
    %123 = vector.shape_cast %120 : vector<128x128xf32> to vector<1x128x128xf32>
    tpu.vector_store %arg5[%c1_77, %c0_78, %c0_79], %123 {strides = array<i32>} : memref<4x128x128xf32, #tpu.memory_space<vmem>>, vector<1x128x128xf32>,
    %c2_80 = arith.constant 2 : index
    %c0_81 = arith.constant 0 : index
    %c0_82 = arith.constant 0 : index
    %124 = vector.load %arg5[%c2_80, %c0_81, %c0_82] : memref<4x128x128xf32, #tpu.memory_space<vmem>>, vector<1x128x128xf32>
    %125 = vector.shape_cast %124 : vector<1x128x128xf32> to vector<128x128xf32>
    %126 = vector.broadcast %102 : vector<1x128xf32> to vector<128x128xf32>
    %127 = arith.mulf %125, %126 : vector<128x128xf32>
    %128 = vector.broadcast %105 : vector<1x128xf32> to vector<128x128xf32>
    %129 = arith.addf %127, %128 : vector<128x128xf32>
    %c2_83 = arith.constant 2 : index
    %c0_84 = arith.constant 0 : index
    %c0_85 = arith.constant 0 : index
    %130 = vector.load %arg5[%c2_83, %c0_84, %c0_85] : memref<4x128x128xf32, #tpu.memory_space<vmem>>, vector<1x128x128xf32>
    %131 = vector.shape_cast %130 : vector<1x128x128xf32> to vector<128x128xf32>
    %132 = vector.shape_cast %129 : vector<128x128xf32> to vector<1x128x128xf32>
    tpu.vector_store %arg5[%c2_83, %c0_84, %c0_85], %132 {strides = array<i32>} : memref<4x128x128xf32, #tpu.memory_space<vmem>>, vector<1x128x128xf32>,
    %c3_86 = arith.constant 3 : index
    %c0_87 = arith.constant 0 : index
    %c0_88 = arith.constant 0 : index
    %133 = vector.load %arg5[%c3_86, %c0_87, %c0_88] : memref<4x128x128xf32, #tpu.memory_space<vmem>>, vector<1x128x128xf32>
    %134 = vector.shape_cast %133 : vector<1x128x128xf32> to vector<128x128xf32>
    %135 = vector.broadcast %102 : vector<1x128xf32> to vector<128x128xf32>
    %136 = arith.mulf %134, %135 : vector<128x128xf32>
    %137 = vector.broadcast %105 : vector<1x128xf32> to vector<128x128xf32>
    %138 = arith.addf %136, %137 : vector<128x128xf32>
    %c3_89 = arith.constant 3 : index
    %c0_90 = arith.constant 0 : index
    %c0_91 = arith.constant 0 : index
    %139 = vector.load %arg5[%c3_89, %c0_90, %c0_91] : memref<4x128x128xf32, #tpu.memory_space<vmem>>, vector<1x128x128xf32>
    %140 = vector.shape_cast %139 : vector<1x128x128xf32> to vector<128x128xf32>
    %141 = vector.shape_cast %138 : vector<128x128xf32> to vector<1x128x128xf32>
    tpu.vector_store %arg5[%c3_89, %c0_90, %c0_91], %141 {strides = array<i32>} : memref<4x128x128xf32, #tpu.memory_space<vmem>>, vector<1x128x128xf32>,
    return
  }
  func.func @transform_0(%arg0: i32) -> (i32, i32, i32) {
    %c0_i32 = arith.constant 0 : i32
    %c0_i32_0 = arith.constant 0 : i32
    %c0_i32_1 = arith.constant 0 : i32
    %c0_i32_2 = arith.constant 0 : i32
    return %c0_i32, %c0_i32_0, %c0_i32_1 : i32, i32, i32
  }
  func.func @transform_1(%arg0: i32) -> (i32, i32, i32) {
    %c0_i32 = arith.constant 0 : i32
    %c0_i32_0 = arith.constant 0 : i32
    %c0_i32_1 = arith.constant 0 : i32
    %c0_i32_2 = arith.constant 0 : i32
    return %c0_i32, %c0_i32_0, %c0_i32_1 : i32, i32, i32
  }
  func.func @transform_2(%arg0: i32) -> (i32, i32) {
    %c0_i32 = arith.constant 0 : i32
    %c0_i32_0 = arith.constant 0 : i32
    %c0_i32_1 = arith.constant 0 : i32
    return %c0_i32, %c0_i32_0 : i32, i32
  }
  func.func @transform_3(%arg0: i32) -> (i32, i32) {
    %c0_i32 = arith.constant 0 : i32
    %c0_i32_0 = arith.constant 0 : i32
    %c0_i32_1 = arith.constant 0 : i32
    return %c0_i32, %c0_i32_0 : i32, i32
  }
  func.func @transform_4(%arg0: i32) -> (i32, i32, i32) {
    %c0_i32 = arith.constant 0 : i32
    %c0_i32_0 = arith.constant 0 : i32
    %c0_i32_1 = arith.constant 0 : i32
    %c0_i32_2 = arith.constant 0 : i32
    return %c0_i32, %c0_i32_0, %c0_i32_1 : i32, i32, i32
  }
}

module attributes {stable_mosaic.version = 11 : i64} {
  func.func @_gemm_act_kernel(%arg0: i32, %arg1: memref<1x512x64xbf16, #tpu.memory_space<vmem>>, %arg2: memref<1x64x128xbf16, #tpu.memory_space<vmem>>, %arg3: memref<1x128xf32, #tpu.memory_space<vmem>>, %arg4: memref<1x512x128xf32, #tpu.memory_space<vmem>>) attributes {dimension_semantics = [#tpu.dimension_semantics<parallel>], iteration_bounds = array<i64: 4>, scalar_prefetch = 0 : i64, scratch_operands = 0 : i64, tpu.core_type = #tpu.core_type<tc>, window_params = [{transform_indices = @transform_0, window_bounds = array<i64: 1, 512, 64>}, {transform_indices = @transform_1, window_bounds = array<i64: 1, 64, 128>}, {pipeline_mode = #tpu.pipeline_mode<synchronous>, transform_indices = @transform_2, window_bounds = array<i64: 1, 128>}, {transform_indices = @transform_3, window_bounds = array<i64: 1, 512, 128>}]} {
    %c0 = arith.constant 0 : index
    %c0_0 = arith.constant 0 : index
    %c0_1 = arith.constant 0 : index
    %0 = vector.load %arg1[%c0, %c0_0, %c0_1] : memref<1x512x64xbf16, #tpu.memory_space<vmem>>, vector<1x512x64xbf16>
    %1 = vector.shape_cast %0 : vector<1x512x64xbf16> to vector<512x64xbf16>
    %2 = arith.extf %1 : vector<512x64xbf16> to vector<512x64xf32>
    %cst = arith.constant 0.000000e+00 : f32
    %3 = vector.broadcast %cst : f32 to vector<512x64xf32>
    %4 = arith.maximumf %2, %3 : vector<512x64xf32>
    %5 = arith.truncf %4 : vector<512x64xf32> to vector<512x64xbf16>
    %c0_2 = arith.constant 0 : index
    %c0_3 = arith.constant 0 : index
    %c0_4 = arith.constant 0 : index
    %6 = vector.load %arg2[%c0_2, %c0_3, %c0_4] : memref<1x64x128xbf16, #tpu.memory_space<vmem>>, vector<1x64x128xbf16>
    %7 = vector.shape_cast %6 : vector<1x64x128xbf16> to vector<64x128xbf16>
    %cst_5 = arith.constant dense<0.000000e+00> : vector<512x128xf32>
    %8 = tpu.matmul %5, %7, %cst_5 {dimension_numbers = #tpu.dot_dimension_numbers<[1], [0], [0], [1], [0, 0, 1, 1], [], []>} : vector<512x64xbf16>, vector<64x128xbf16>, vector<512x128xf32> -> vector<512x128xf32>
    %c0_6 = arith.constant 0 : index
    %c0_7 = arith.constant 0 : index
    %9 = vector.load %arg3[%c0_6, %c0_7] : memref<1x128xf32, #tpu.memory_space<vmem>>, vector<1x128xf32>
    %10 = vector.broadcast %9 : vector<1x128xf32> to vector<512x128xf32>
    %11 = arith.addf %8, %10 : vector<512x128xf32>
    %12 = math.tanh %11 : vector<512x128xf32>
    %c0_8 = arith.constant 0 : index
    %c0_9 = arith.constant 0 : index
    %c0_10 = arith.constant 0 : index
    %13 = vector.load %arg4[%c0_8, %c0_9, %c0_10] : memref<1x512x128xf32, #tpu.memory_space<vmem>>, vector<1x512x128xf32>
    %14 = vector.shape_cast %13 : vector<1x512x128xf32> to vector<512x128xf32>
    %15 = vector.shape_cast %12 : vector<512x128xf32> to vector<1x512x128xf32>
    tpu.vector_store %arg4[%c0_8, %c0_9, %c0_10], %15 {strides = array<i32>} : memref<1x512x128xf32, #tpu.memory_space<vmem>>, vector<1x512x128xf32>,
    return
  }
  func.func @transform_0(%arg0: i32) -> (i32, i32, i32) {
    %c0_i32 = arith.constant 0 : i32
    %c0_i32_0 = arith.constant 0 : i32
    %c0_i32_1 = arith.constant 0 : i32
    return %arg0, %c0_i32, %c0_i32_0 : i32, i32, i32
  }
  func.func @transform_1(%arg0: i32) -> (i32, i32, i32) {
    %c0_i32 = arith.constant 0 : i32
    %c0_i32_0 = arith.constant 0 : i32
    %c0_i32_1 = arith.constant 0 : i32
    return %arg0, %c0_i32, %c0_i32_0 : i32, i32, i32
  }
  func.func @transform_2(%arg0: i32) -> (i32, i32) {
    %c0_i32 = arith.constant 0 : i32
    %c0_i32_0 = arith.constant 0 : i32
    %c0_i32_1 = arith.constant 0 : i32
    return %c0_i32, %c0_i32_0 : i32, i32
  }
  func.func @transform_3(%arg0: i32) -> (i32, i32, i32) {
    %c0_i32 = arith.constant 0 : i32
    %c0_i32_0 = arith.constant 0 : i32
    %c0_i32_1 = arith.constant 0 : i32
    return %arg0, %c0_i32, %c0_i32_0 : i32, i32, i32
  }
}

</mosaic_0001>

<bundles_post_ra>
// kernel: _lambda_.10
= control target key start
LH: loop header
LB: loop body
LE: loop exit
PB: predicated region body
PF: predicated region fallthrough
CT: control target
= control target key end

     0   :  { %s573_s12 = smov 0   ;;  %s632_s0 = inlined_call_operand.vmem [shape: bf16[1,512,48], index: 0, kind: input, shape index: {}]   ;;  %s633_s1 = inlined_call_operand.vmem [shape: bf16[1,48,128], index: 1, kind: input, shape index: {}]   ;;  %s634_s2 = inlined_call_operand.vmem [shape: f32[1,128], index: 2, kind: input, shape index: {}]   ;;  %s635_s3 = inlined_call_operand.vmem [shape: f32[1,512,128], index: 3, kind: output, shape index: {}]  }
   0x1 LB: > { %s456_s13 = sadd.s32 4294967295, %s551_s12   ;;  %p460_p0 = scmp.ge.s32.totalorder %s551_s12, 1  ;;  %s551_s12 = sphi %s573_s12, %s13_s12  }
   0x2   : > { %p138_p1 = scmp.lt.s32.totalorder %s551_s12, 5 }
   0x4   : > { %p139_p2 = pnand %p460_p0, %p138_p1 }
   0x5   : > { %v534_v0 = vld [vmem:[%s633_s1] sm:$0xff] (!%p139_p2)   ;;  %s461_s16 = sshll.u32 (!%p139_p2), %s456_s13, 4  ;;  %v535_v1 = vld [vmem:[%s633_s1 + $0x8] sm:$0xff] (!%p139_p2)   ;;  %v536_v2 = vld [vmem:[%s633_s1 + $0x10] sm:$0xff] (!%p139_p2)   ;;  %vm262_vm0 = vcmask (!%p139_p2), 392192  }
   0x6   : > { %142 = sbr.rel (%p139_p2) target bundleno = 245 (0xf5), region = 32  ;;  %p163_p3 = scmp.lt.s32.totalorder (!%p139_p2), %s461_s16, 63  ;;  %498 = vmatprep.subr.bf16.mxu0 (!%p139_p2), %v534_v0  ;;  %520 = vmatprep.subr.bf16.mxu1 (!%p139_p2), %v534_v0  ;;  %v465_v11 = vld [vmem:[%s634_s2] ss:$0 sm:$0xff] (!%p139_p2) }
   0x7   : > { %499 = vmatpush3.bf16.msra.mxu0 (!%p139_p2), %v534_v0  ;;  %523 = vmatpush3.bf16.msra.mxu1 (!%p139_p2), %v534_v0 }
   0x8   : > { %500 = vmatprep.subr.bf16.mxu0 (!%p139_p2), %v535_v1  ;;  %521 = vmatprep.subr.bf16.mxu1 (!%p139_p2), %v535_v1 }
   0xb   : > { %501 = vmatpush3.bf16.msra.mxu0 (!%p139_p2), %v535_v1  ;;  %524 = vmatpush3.bf16.msra.mxu1 (!%p139_p2), %v535_v1 }
   0xc   : > { %502 = vmatprep.subr.bf16.mxu0 (!%p139_p2), %v536_v2  ;;  %522 = vmatprep.subr.bf16.mxu1 (!%p139_p2), %v536_v2 }
   0xd   : > { %s637_s16 = smov (!%p163_p3, %s461_s16), 63 }
   0xe   : > { %s462_s21 = sshll.u32 %s637_s16, 2  ;;  %s464_s25 = sshll.u32 %s637_s16, 3 }
   0xf   : > { %s166_s24 = scalar_lea.vmem %s632_s0, %s462_s21  ;;  %503 = vmatpush3.bf16.msra.mxu0 %v536_v2  ;;  %525 = vmatpush3.bf16.msra.mxu1 %v536_v2  ;;  %s611_s30 = scalar_lea.vmem %s635_s3, %s464_s25 }
  0x10   : > { %v537_v3 = vld [vmem:[%s166_s24] sm:$0xff]   ;;  %v539_v5 = vld [vmem:[%s166_s24 + $0x8] sm:$0xff]   ;;  %v541_v7 = vld [vmem:[%s166_s24 + $0x10] sm:$0xff]  }
  0x11   : > { %v538_v4 = vld [vmem:[%s166_s24 + $0x20] sm:$0xff]   ;;  %504 = vmatprep.mubr.msk.bf16.mxu0 %vm262_vm0, %v537_v3  ;;  %v540_v6 = vld [vmem:[%s166_s24 + $0x28] sm:$0xff]   ;;  %v542_v8 = vld [vmem:[%s166_s24 + $0x30] sm:$0xff]  }
  0x12   : > { %512 = vmatprep.mubr.msk.bf16.mxu1 %vm262_vm0, %v538_v4  ;;  %505 = vmatmul.mubr.msk.bf16.vlgmr.msra.gmra.mrb[0].mxu0 %vm262_vm0, %v539_v5  ;;  %v543_v9 = vld [vmem:[%s166_s24 + $0x18] sm:$0xff]  }
  0x13   : > { %513 = vmatmul.mubr.msk.bf16.vlgmr.msra.gmra.mrb[0].mxu1 %vm262_vm0, %v540_v6  ;;  %508 = vmatprep.mubr.msk.bf16.mxu0 %vm262_vm0, %v541_v7  ;;  %v544_v10 = vld [vmem:[%s166_s24 + $0x38] sm:$0xff]  }
  0x14   : > { %516 = vmatprep.mubr.msk.bf16.mxu1 %vm262_vm0, %v542_v8 }
  0x1a   : > { %509 = vmatmul.mubr.msk.bf16.gmra.mrb[4].mxu0 %vm262_vm0, %v543_v9 }
  0x1b   : > { %517 = vmatmul.mubr.msk.bf16.gmra.mrb[4].mxu1 %vm262_vm0, %v544_v10 }
  0xe5   : > { %v506_v12 = vpop.f32.mrb[0].mxu0 }
  0xe6   : > { %v514_v13 = vpop.f32.mrb[0].mxu1  ;;  %v330_v14 = vadd.f32 %v506_v12, %v465_v11  ;;  %v321_v16 = vpop.f32.mrb[1].mxu0 }
  0xe7   : > { %v362_v15 = vadd.f32 %v514_v13, %v465_v11  ;;  %v353_v17 = vpop.f32.mrb[1].mxu1  ;;  %v322_v18 = vadd.f32 %v465_v11, %v321_v16  ;;  %v507_v20 = vpop.f32.mrb[2].mxu0 }
  0xe8   : > { %v354_v19 = vadd.f32 %v465_v11, %v353_v17  ;;  %v515_v21 = vpop.f32.mrb[2].mxu1  ;;  %386 = vst [vmem:[%s611_s30 + $0x10] sm:$0xff] %v330_v14  ;;  %v333_v22 = vadd.f32 %v507_v20, %v465_v11  ;;  %v324_v24 = vpop.f32.mrb[3].mxu0 }
  0xe9   : > { %394 = vst [vmem:[%s611_s30 + $0x50] sm:$0xff] %v362_v15  ;;  %v365_v23 = vadd.f32 %v515_v21, %v465_v11  ;;  %v356_v25 = vpop.f32.mrb[3].mxu1  ;;  %384 = vst [vmem:[%s611_s30] sm:$0xff] %v322_v18  ;;  %v325_v26 = vadd.f32 %v465_v11, %v324_v24 }
  0xea   : > { %392 = vst [vmem:[%s611_s30 + $0x40] sm:$0xff] %v354_v19  ;;  %v357_v27 = vadd.f32 %v465_v11, %v356_v25  ;;  %387 = vst [vmem:[%s611_s30 + $0x18] sm:$0xff] %v333_v22 }
  0xeb   : > { %395 = vst [vmem:[%s611_s30 + $0x58] sm:$0xff] %v365_v23  ;;  %385 = vst [vmem:[%s611_s30 + $0x8] sm:$0xff] %v325_v26 }
  0xec   : > { %393 = vst [vmem:[%s611_s30 + $0x48] sm:$0xff] %v357_v27 }
  0xed   : > { %v510_v28 = vpop.f32.mrb[4].mxu0 }
  0xee   : > { %v518_v29 = vpop.f32.mrb[4].mxu1  ;;  %v346_v30 = vadd.f32 %v510_v28, %v465_v11  ;;  %v337_v32 = vpop.f32.mrb[5].mxu0 }
  0xef   : > { %v378_v31 = vadd.f32 %v518_v29, %v465_v11  ;;  %v369_v33 = vpop.f32.mrb[5].mxu1  ;;  %v338_v34 = vadd.f32 %v465_v11, %v337_v32  ;;  %v511_v36 = vpop.f32.mrb[6].mxu0 }
  0xf0   : > { %v370_v35 = vadd.f32 %v465_v11, %v369_v33  ;;  %v519_v37 = vpop.f32.mrb[6].mxu1  ;;  %390 = vst [vmem:[%s611_s30 + $0x30] sm:$0xff] %v346_v30  ;;  %v349_v38 = vadd.f32 %v511_v36, %v465_v11  ;;  %v340_v40 = vpop.f32.mrb[7].mxu0 }
  0xf1   : > { %398 = vst [vmem:[%s611_s30 + $0x70] sm:$0xff] %v378_v31  ;;  %v381_v39 = vadd.f32 %v519_v37, %v465_v11  ;;  %v372_v41 = vpop.f32.mrb[7].mxu1  ;;  %388 = vst [vmem:[%s611_s30 + $0x20] sm:$0xff] %v338_v34  ;;  %v341_v42 = vadd.f32 %v465_v11, %v340_v40 }
  0xf2   : > { %396 = vst [vmem:[%s611_s30 + $0x60] sm:$0xff] %v370_v35  ;;  %v373_v43 = vadd.f32 %v465_v11, %v372_v41  ;;  %391 = vst [vmem:[%s611_s30 + $0x38] sm:$0xff] %v349_v38 }
  0xf3   : > { %399 = vst [vmem:[%s611_s30 + $0x78] sm:$0xff] %v381_v39  ;;  %389 = vst [vmem:[%s611_s30 + $0x28] sm:$0xff] %v341_v42 }
  0xf4   : > { %397 = vst [vmem:[%s611_s30 + $0x68] sm:$0xff] %v373_v43 }
  0xf5 PF: > { %s13_s12 = sadd.s32 1, %s551_s12  }
  0xf6   : > { %p10_p4 = scmp.ge.s32.totalorder %s13_s12, 6  }
  0xf8   :  { %12 = sbr.rel (!%p10_p4) target bundleno = 1 (0x1), region = 62 }

// kernel: _lambda_.11
= control target key start
LH: loop header
LB: loop body
LE: loop exit
PB: predicated region body
PF: predicated region fallthrough
CT: control target
= control target key end

     0   :  { %s800_s1 = inlined_call_operand.vmem [shape: bf16[1,128,128], index: 1, kind: input, shape index: {}]   ;;  %s801_s0 = inlined_call_operand.vmem [shape: bf16[1,128,128], index: 0, kind: input, shape index: {}]   ;;  %s802_s2 = inlined_call_operand.vmem [shape: f32[1,128], index: 2, kind: input, shape index: {}]   ;;  %s803_s3 = inlined_call_operand.vmem [shape: f32[1,128], index: 3, kind: input, shape index: {}]   ;;  %s804_s4 = inlined_call_operand.vmem [shape: f32[1,128,128], index: 4, kind: output, shape index: {}]  }
   0x1   :  { %v559_v0 = vld [vmem:[%s800_s1] sm:$0xff]   ;;  %v560_v1 = vld [vmem:[%s800_s1 + $0x8] sm:$0xff]   ;;  %v561_v2 = vld [vmem:[%s800_s1 + $0x10] sm:$0xff]  }
   0x2   :  { %511 = vmatprep.subr.bf16.mxu0 %v559_v0  ;;  %543 = vmatprep.subr.bf16.mxu1 %v559_v0  ;;  %v562_v3 = vld [vmem:[%s800_s1 + $0x18] sm:$0xff]   ;;  %v457_v4 = vld [vmem:[%s801_s0] sm:$0xff]   ;;  %v488_v12 = vld [vmem:[%s801_s0 + $0x8] sm:$0xff]  }
   0x3   :  { %512 = vmatpush3.bf16.msra.mxu0 %v559_v0  ;;  %551 = vmatpush3.bf16.msra.mxu1 %v559_v0  ;;  %v458_v5 = vunpack.c.l.bf16 %v457_v4  ;;  %v459_v6 = vunpack.c.h.bf16 %v457_v4  ;;  %v563_v9 = vld [vmem:[%s800_s1 + $0x20] sm:$0xff]   ;;  %v489_v15 = vld [vmem:[%s801_s0 + $0x10] sm:$0xff]   ;;  %v492_v16 = vld [vmem:[%s801_s0 + $0x28] sm:$0xff]   ;;  %v462_v18 = vunpack.c.l.bf16 %v488_v12  ;;  %v463_v19 = vunpack.c.h.bf16 %v488_v12 }
   0x4   :  { %513 = vmatprep.subr.bf16.mxu0 %v560_v1  ;;  %544 = vmatprep.subr.bf16.mxu1 %v560_v1  ;;  %v491_v13 = vld [vmem:[%s801_s0 + $0x20] sm:$0xff]   ;;  %v564_v17 = vld [vmem:[%s800_s1 + $0x28] sm:$0xff]   ;;  %v466_v22 = vunpack.c.l.bf16 %v489_v15  ;;  %v467_v23 = vunpack.c.h.bf16 %v489_v15  ;;  %v478_v24 = vunpack.c.l.bf16 %v492_v16  ;;  %v493_v25 = vld [vmem:[%s801_s0 + $0x30] sm:$0xff]   ;;  %v479_v28 = vunpack.c.h.bf16 %v492_v16 }
   0x5   :  { %vm50_vm0 = vcmp.ge.f32.partialorder %v458_v5, 0.0  ;;  %vm51_vm1 = vcmp.ge.f32.partialorder %v459_v6, 0.0  ;;  %v66_v7 = vmul.f32 0.2, %v458_v5  ;;  %v67_v8 = vmul.f32 0.2, %v459_v6 }
   0x6   :  { %v474_v20 = vunpack.c.l.bf16 %v491_v13  ;;  %v475_v21 = vunpack.c.h.bf16 %v491_v13  ;;  %v565_v29 = vld [vmem:[%s800_s1 + $0x30] sm:$0xff]   ;;  %vm52_vm4 = vcmp.ge.f32.partialorder %v462_v18, 0.0  ;;  %vm53_vm5 = vcmp.ge.f32.partialorder %v463_v19, 0.0  ;;  %v490_v31 = vld [vmem:[%s801_s0 + $0x18] sm:$0xff]  }
   0x7   :  { %514 = vmatpush3.bf16.msra.mxu0 %v560_v1  ;;  %552 = vmatpush3.bf16.msra.mxu1 %v560_v1  ;;  %v82_v10 = vsel %vm50_vm0, %v458_v5, %v66_v7  ;;  %v83_v11 = vsel %vm51_vm1, %v459_v6, %v67_v8  ;;  %v68_v30 = vmul.f32 0.2, %v462_v18  ;;  %v482_v34 = vunpack.c.l.bf16 %v493_v25  ;;  %v566_v36 = vld [vmem:[%s800_s1 + $0x38] sm:$0xff]  }
   0x8   :  { %515 = vmatprep.subr.bf16.mxu0 %v561_v2  ;;  %545 = vmatprep.subr.bf16.mxu1 %v561_v2  ;;  %v98_v14 = vpack.c.bf16 %v83_v11, %v82_v10  ;;  %vm58_vm2 = vcmp.ge.f32.partialorder %v474_v20, 0.0  ;;  %vm59_vm3 = vcmp.ge.f32.partialorder %v475_v21, 0.0  ;;  %v74_v26 = vmul.f32 0.2, %v474_v20  ;;  %v494_v40 = vld [vmem:[%s801_s0 + $0x38] sm:$0xff]  }
   0x9   :  { %v75_v27 = vmul.f32 0.2, %v475_v21  ;;  %v483_v35 = vunpack.c.h.bf16 %v493_v25  ;;  %v69_v37 = vmul.f32 0.2, %v463_v19  ;;  %vm54_vm6 = vcmp.ge.f32.partialorder %v466_v22, 0.0 }
   0xa   :  { %527 = vmatprep.mubr.bf16.mxu0 %v98_v14  ;;  %v90_v32 = vsel %vm58_vm2, %v474_v20, %v74_v26  ;;  %v70_v38 = vmul.f32 0.2, %v466_v22  ;;  %v71_v41 = vmul.f32 0.2, %v467_v23  ;;  %v76_v42 = vmul.f32 0.2, %v478_v24 }
   0xb   :  { %516 = vmatpush3.bf16.msra.mxu0 %v561_v2  ;;  %553 = vmatpush3.bf16.msra.mxu1 %v561_v2  ;;  %v91_v33 = vsel %vm59_vm3, %v475_v21, %v75_v27  ;;  %v77_v43 = vmul.f32 0.2, %v479_v28  ;;  %vm60_vm7 = vcmp.ge.f32.partialorder %v478_v24, 0.0  ;;  %vm61_vm8 = vcmp.ge.f32.partialorder %v479_v28, 0.0 }
   0xc   :  { %517 = vmatprep.subr.bf16.mxu0 %v562_v3  ;;  %546 = vmatprep.subr.bf16.mxu1 %v562_v3  ;;  %v102_v39 = vpack.c.bf16 %v91_v33, %v90_v32  ;;  %v78_v44 = vmul.f32 0.2, %v482_v34  ;;  %v79_v45 = vmul.f32 0.2, %v483_v35  ;;  %vm55_vm9 = vcmp.ge.f32.partialorder %v467_v23, 0.0 }
   0xd   :  { %v470_v46 = vunpack.c.l.bf16 %v490_v31  ;;  %vm62_vm10 = vcmp.ge.f32.partialorder %v482_v34, 0.0  ;;  %vm63_vm11 = vcmp.ge.f32.partialorder %v483_v35, 0.0  ;;  %v84_v47 = vsel %vm52_vm4, %v462_v18, %v68_v30 }
   0xe   :  { %535 = vmatprep.mubr.bf16.mxu1 %v102_v39  ;;  %v85_v48 = vsel %vm53_vm5, %v463_v19, %v69_v37  ;;  %v86_v49 = vsel %vm54_vm6, %v466_v22, %v70_v38  ;;  %v471_v50 = vunpack.c.h.bf16 %v490_v31  ;;  %v92_v51 = vsel %vm60_vm7, %v478_v24, %v76_v42 }
   0xf   :  { %518 = vmatpush3.bf16.msra.mxu0 %v562_v3  ;;  %554 = vmatpush3.bf16.msra.mxu1 %v562_v3  ;;  %v93_v52 = vsel %vm61_vm8, %v479_v28, %v77_v43  ;;  %v486_v53 = vunpack.c.l.bf16 %v494_v40  ;;  %v487_v54 = vunpack.c.h.bf16 %v494_v40  ;;  %v87_v55 = vsel %vm55_vm9, %v467_v23, %v71_v41 }
  0x10   :  { %519 = vmatprep.subr.bf16.mxu0 %v563_v9  ;;  %547 = vmatprep.subr.bf16.mxu1 %v563_v9  ;;  %v94_v56 = vsel %vm62_vm10, %v482_v34, %v78_v44  ;;  %v95_v57 = vsel %vm63_vm11, %v483_v35, %v79_v45  ;;  %v99_v58 = vpack.c.bf16 %v85_v48, %v84_v47  ;;  %vm56_vm12 = vcmp.ge.f32.partialorder %v470_v46, 0.0 }
  0x11   :  { %v72_v59 = vmul.f32 0.2, %v470_v46  ;;  %v73_v60 = vmul.f32 0.2, %v471_v50  ;;  %v103_v61 = vpack.c.bf16 %v93_v52, %v92_v51  ;;  %v100_v62 = vpack.c.bf16 %v87_v55, %v86_v49 }
  0x12   :  { %v104_v63 = vpack.c.bf16 %v95_v57, %v94_v56  ;;  %v80_v0 = vmul.f32 0.2, %v486_v53  ;;  %v81_v1 = vmul.f32 0.2, %v487_v54  ;;  %vm57_vm13 = vcmp.ge.f32.partialorder %v471_v50, 0.0 }
  0x13   :  { %520 = vmatpush3.bf16.msra.mxu0 %v563_v9  ;;  %555 = vmatpush3.bf16.msra.mxu1 %v563_v9  ;;  %vm64_vm14 = vcmp.ge.f32.partialorder %v486_v53, 0.0  ;;  %vm65_vm15 = vcmp.ge.f32.partialorder %v487_v54, 0.0  ;;  %v88_v2 = vsel %vm56_vm12, %v470_v46, %v72_v59  ;;  %v89_v3 = vsel %vm57_vm13, %v471_v50, %v73_v60 }
  0x14   :  { %521 = vmatprep.subr.bf16.mxu0 %v564_v17  ;;  %548 = vmatprep.subr.bf16.mxu1 %v564_v17  ;;  %v96_v4 = vsel %vm64_vm14, %v486_v53, %v80_v0  ;;  %v97_v5 = vsel %vm65_vm15, %v487_v54, %v81_v1  ;;  %v101_v6 = vpack.c.bf16 %v89_v3, %v88_v2 }
  0x15   :  { %v105_v7 = vpack.c.bf16 %v97_v5, %v96_v4 }
  0x17   :  { %522 = vmatpush3.bf16.msra.mxu0 %v564_v17  ;;  %556 = vmatpush3.bf16.msra.mxu1 %v564_v17 }
  0x18   :  { %523 = vmatprep.subr.bf16.mxu0 %v565_v29  ;;  %549 = vmatprep.subr.bf16.mxu1 %v565_v29 }
  0x1b   :  { %524 = vmatpush3.bf16.msra.mxu0 %v565_v29  ;;  %557 = vmatpush3.bf16.msra.mxu1 %v565_v29 }
  0x1c   :  { %525 = vmatprep.subr.bf16.mxu0 %v566_v36  ;;  %550 = vmatprep.subr.bf16.mxu1 %v566_v36 }
  0x1f   :  { %526 = vmatpush3.bf16.msra.mxu0 %v566_v36  ;;  %558 = vmatpush3.bf16.msra.mxu1 %v566_v36 }
  0x22   :  { %528 = vmatmul.mubr.bf16.vlgmr.msra.gmra.mrb[0].mxu0 %v99_v58  ;;  %536 = vmatmul.mubr.bf16.vlgmr.msra.gmra.mrb[0].mxu1 %v103_v61 }
  0x23   :  { %531 = vmatprep.mubr.bf16.mxu0 %v100_v62  ;;  %539 = vmatprep.mubr.bf16.mxu1 %v104_v63 }
  0x2a   :  { %532 = vmatmul.mubr.bf16.gmra.mrb[4].mxu0 %v101_v6  ;;  %540 = vmatmul.mubr.bf16.gmra.mrb[4].mxu1 %v105_v7 }
  0xf5   :  { %v647_v8 = vpop.f32.mrb[0].mxu0  ;;  %v649_v9 = vpop.f32.mrb[0].mxu1 }
  0xf6   :  { %v651_v10 = vpop.f32.mrb[1].mxu0  ;;  %v653_v11 = vpop.f32.mrb[1].mxu1 }
  0xf7   :  { %v655_v12 = vpop.f32.mrb[2].mxu0  ;;  %v657_v13 = vpop.f32.mrb[2].mxu1 }
  0xf8   :  { %v659_v14 = vpop.f32.mrb[3].mxu0  ;;  %v661_v15 = vpop.f32.mrb[3].mxu1 }
  0xf9   :  { %v283_v16 = vadd.f32 %v659_v14, %v651_v10 }
  0xfb   :  { %v284_v17 = vadd.f32 %v647_v8, %v283_v16 }
  0xfd   :  { %v666_v18 = vpop.f32.mrb[4].mxu0  ;;  %v285_v19 = vadd.f32 %v655_v12, %v284_v17  ;;  %v669_v20 = vpop.f32.mrb[4].mxu1 }
  0xfe   :  { %v671_v21 = vpop.f32.mrb[5].mxu0  ;;  %v673_v22 = vpop.f32.mrb[5].mxu1 }
  0xff   :  { %v286_v23 = vadd.f32 %v285_v19, %v671_v21  ;;  %v676_v24 = vpop.f32.mrb[6].mxu0  ;;  %v678_v25 = vpop.f32.mrb[6].mxu1 }
 0x100   :  { %v680_v26 = vpop.f32.mrb[7].mxu0  ;;  %v682_v27 = vpop.f32.mrb[7].mxu1 }
 0x101   :  { %v287_v28 = vadd.f32 %v286_v23, %v680_v26 }
 0x103   :  { %v288_v29 = vadd.f32 %v666_v18, %v287_v28 }
 0x105   :  { %v289_v30 = vadd.f32 %v676_v24, %v288_v29 }
 0x107   :  { %v290_v31 = vadd.f32 %v289_v30, %v653_v11 }
 0x109   :  { %v291_v32 = vadd.f32 %v290_v31, %v661_v15 }
 0x10b   :  { %v292_v33 = vadd.f32 %v649_v9, %v291_v32 }
 0x10d   :  { %v293_v34 = vadd.f32 %v657_v13, %v292_v33 }
 0x10f   :  { %v294_v35 = vadd.f32 %v293_v34, %v673_v22 }
 0x111   :  { %v295_v36 = vadd.f32 %v294_v35, %v682_v27 }
 0x113   :  { %v296_v37 = vadd.f32 %v669_v20, %v295_v36 }
 0x115   :  { %v297_v38 = vadd.f32 %v678_v25, %v296_v37 }
 0x117   :  { %v298_v39 = vrot.slane %v297_v38, 4 }
 0x119   :  { %v299_v40 = vadd.f32 %v298_v39, %v297_v38 }
 0x11b   :  { %v300_v41 = vrot.slane %v299_v40, 2 }
 0x11d   :  { %v301_v42 = vadd.f32 %v300_v41, %v299_v40 }
 0x11f   :  { %v302_v43 = vrot.slane %v301_v42, 1 }
 0x121   :  { %v303_v44 = vadd.f32 %v302_v43, %v301_v42 }
 0x123   :  { %v695_v45 = vmul.f32 0.0078125, %v303_v44 }
 0x125   :  { %v322_v46 = vsub.f32 %v651_v10, %v695_v45  ;;  %v323_v47 = vsub.f32 %v659_v14, %v695_v45  ;;  %v324_v48 = vsub.f32 %v647_v8, %v695_v45  ;;  %v325_v49 = vsub.f32 %v655_v12, %v695_v45 }
 0x126   :  { %v326_v50 = vsub.f32 %v671_v21, %v695_v45  ;;  %v327_v51 = vsub.f32 %v680_v26, %v695_v45  ;;  %v328_v52 = vsub.f32 %v666_v18, %v695_v45  ;;  %v329_v53 = vsub.f32 %v676_v24, %v695_v45 }
 0x127   :  { %v330_v54 = vsub.f32 %v653_v11, %v695_v45  ;;  %v331_v55 = vsub.f32 %v661_v15, %v695_v45  ;;  %v332_v56 = vsub.f32 %v649_v9, %v695_v45  ;;  %v333_v57 = vsub.f32 %v657_v13, %v695_v45 }
 0x128   :  { %v334_v58 = vsub.f32 %v673_v22, %v695_v45  ;;  %v335_v59 = vsub.f32 %v682_v27, %v695_v45  ;;  %v336_v60 = vsub.f32 %v669_v20, %v695_v45  ;;  %v337_v61 = vsub.f32 %v678_v25, %v695_v45 }
 0x129   :  { %v338_v62 = vmul.f32 %v322_v46, %v322_v46  ;;  %v339_v63 = vmul.f32 %v323_v47, %v323_v47  ;;  %v340_v0 = vmul.f32 %v324_v48, %v324_v48  ;;  %v341_v2 = vmul.f32 %v325_v49, %v325_v49 }
 0x12a   :  { %v342_v4 = vmul.f32 %v326_v50, %v326_v50  ;;  %v343_v6 = vmul.f32 %v327_v51, %v327_v51  ;;  %v344_v16 = vmul.f32 %v328_v52, %v328_v52  ;;  %v345_v19 = vmul.f32 %v329_v53, %v329_v53 }
 0x12b   :  { %v354_v1 = vadd.f32 %v339_v63, %v338_v62  ;;  %v346_v28 = vmul.f32 %v330_v54, %v330_v54  ;;  %v347_v30 = vmul.f32 %v331_v55, %v331_v55  ;;  %v348_v32 = vmul.f32 %v332_v56, %v332_v56  ;;  %v377_v56 = vld [vmem:[%s802_s2] sm:$0x1] }
 0x12c   :  { %v349_v34 = vmul.f32 %v333_v57, %v333_v57  ;;  %v350_v36 = vmul.f32 %v334_v58, %v334_v58  ;;  %v351_v38 = vmul.f32 %v335_v59, %v335_v59  ;;  %v352_v40 = vmul.f32 %v336_v60, %v336_v60  ;;  %v381_v60 = vld [vmem:[%s803_s3] sm:$0x1] }
 0x12d   :  { %v355_v3 = vadd.f32 %v354_v1, %v340_v0  ;;  %v353_v42 = vmul.f32 %v337_v61, %v337_v61  ;;  %v385_v54 = vlaneseq }
 0x12f   :  { %v356_v5 = vadd.f32 %v355_v3, %v341_v2  ;;  %v386_v55 = vshrl.u32 %v385_v54, 7 }
 0x131   :  { %v357_v7 = vadd.f32 %v356_v5, %v342_v4  ;;  %v387_v57 = vsub.s32 0, %v386_v55 }
 0x133   :  { %v358_v17 = vadd.f32 %v357_v7, %v343_v6 }
 0x135   :  { %v359_v23 = vadd.f32 %v358_v17, %v344_v16 }
 0x137   :  { %v360_v29 = vadd.f32 %v359_v23, %v345_v19 }
 0x139   :  { %v361_v31 = vadd.f32 %v360_v29, %v346_v28 }
 0x13b   :  { %v362_v33 = vadd.f32 %v361_v31, %v347_v30 }
 0x13d   :  { %v363_v35 = vadd.f32 %v362_v33, %v348_v32 }
 0x13f   :  { %v364_v37 = vadd.f32 %v363_v35, %v349_v34 }
 0x141   :  { %v365_v39 = vadd.f32 %v364_v37, %v350_v36 }
 0x143   :  { %v366_v41 = vadd.f32 %v365_v39, %v351_v38 }
 0x145   :  { %v367_v43 = vadd.f32 %v366_v41, %v352_v40 }
 0x147   :  { %v368_v44 = vadd.f32 %v367_v43, %v353_v42 }
 0x149   :  { %v369_v46 = vrot.slane %v368_v44, 4 }
 0x14b   :  { %v370_v47 = vadd.f32 %v369_v46, %v368_v44 }
 0x14d   :  { %v371_v48 = vrot.slane %v370_v47, 2 }
 0x14f   :  { %v372_v49 = vadd.f32 %v371_v48, %v370_v47 }
 0x151   :  { %v373_v50 = vrot.slane %v372_v49, 1 }
 0x153   :  { %v374_v51 = vadd.f32 %v373_v50, %v372_v49 }
 0x155   :  { %v376_v52 = vmul.f32 0.0078125, %v374_v51 }
 0x157   :  { %v378_v53 = vadd.f32 1e-05, %v376_v52 }
 0x159   :  { %567 = vrsqrt.f32 %v378_v53 }
 0x163   :  { %v568_v58 = vpop.eup %567 }
 0x164   :  { %v380_v59 = vmul.f32 %v568_v58, %v377_v56 }
 0x166   :  { %v382_v61 = vmul.f32 %v380_v59, %v695_v45  ;;  %v388_v62 = vrot.slane %v380_v59, %v387_v57 }
 0x168   :  { %v383_v63 = vsub.f32 %v381_v60, %v382_v61  ;;  %v390_v0 = vmul.f32 %v388_v62, %v651_v10  ;;  %v391_v1 = vmul.f32 %v388_v62, %v659_v14  ;;  %v392_v2 = vmul.f32 %v647_v8, %v388_v62 }
 0x169   :  { %v393_v3 = vmul.f32 %v655_v12, %v388_v62  ;;  %v394_v4 = vmul.f32 %v388_v62, %v671_v21  ;;  %v395_v5 = vmul.f32 %v388_v62, %v680_v26  ;;  %v396_v6 = vmul.f32 %v666_v18, %v388_v62 }
 0x16a   :  { %v397_v7 = vmul.f32 %v676_v24, %v388_v62  ;;  %v398_v45 = vmul.f32 %v388_v62, %v653_v11  ;;  %v399_v16 = vmul.f32 %v388_v62, %v661_v15  ;;  %v400_v10 = vmul.f32 %v649_v9, %v388_v62 }
 0x16b   :  { %v401_v14 = vmul.f32 %v657_v13, %v388_v62  ;;  %v402_v8 = vmul.f32 %v388_v62, %v673_v22  ;;  %v403_v12 = vmul.f32 %v388_v62, %v682_v27  ;;  %v404_v21 = vmul.f32 %v669_v20, %v388_v62 }
 0x16c   :  { %v405_v26 = vmul.f32 %v678_v25, %v388_v62  ;;  %v410_v17 = vrot.slane %v383_v63, %v387_v57 }
 0x16e   :  { %v412_v18 = vadd.f32 %v410_v17, %v390_v0  ;;  %v413_v19 = vadd.f32 %v410_v17, %v391_v1  ;;  %v414_v24 = vadd.f32 %v410_v17, %v392_v2  ;;  %v415_v23 = vadd.f32 %v410_v17, %v393_v3 }
 0x16f   :  { %v416_v11 = vadd.f32 %v410_v17, %v394_v4  ;;  %v417_v28 = vadd.f32 %v410_v17, %v395_v5  ;;  %v418_v15 = vadd.f32 %v410_v17, %v396_v6  ;;  %v419_v29 = vadd.f32 %v410_v17, %v397_v7 }
 0x170   :  { %v420_v9 = vadd.f32 %v410_v17, %v398_v45  ;;  %v421_v30 = vadd.f32 %v410_v17, %v399_v16  ;;  %v422_v13 = vadd.f32 %v410_v17, %v400_v10  ;;  %v423_v31 = vadd.f32 %v410_v17, %v401_v14  ;;  %428 = vst [vmem:[%s804_s4] sm:$0xff] %v412_v18 }
 0x171   :  { %429 = vst [vmem:[%s804_s4 + $0x8] sm:$0xff] %v413_v19  ;;  %430 = vst [vmem:[%s804_s4 + $0x10] sm:$0xff] %v414_v24  ;;  %v424_v20 = vadd.f32 %v410_v17, %v402_v8  ;;  %v425_v22 = vadd.f32 %v410_v17, %v403_v12  ;;  %v426_v25 = vadd.f32 %v410_v17, %v404_v21 }
 0x172   :  { %431 = vst [vmem:[%s804_s4 + $0x18] sm:$0xff] %v415_v23  ;;  %v427_v27 = vadd.f32 %v410_v17, %v405_v26  ;;  %432 = vst [vmem:[%s804_s4 + $0x20] sm:$0xff] %v416_v11 }
 0x173   :  { %433 = vst [vmem:[%s804_s4 + $0x28] sm:$0xff] %v417_v28  ;;  %434 = vst [vmem:[%s804_s4 + $0x30] sm:$0xff] %v418_v15 }
 0x174   :  { %435 = vst [vmem:[%s804_s4 + $0x38] sm:$0xff] %v419_v29  ;;  %436 = vst [vmem:[%s804_s4 + $0x40] sm:$0xff] %v420_v9 }
 0x175   :  { %437 = vst [vmem:[%s804_s4 + $0x48] sm:$0xff] %v421_v30  ;;  %438 = vst [vmem:[%s804_s4 + $0x50] sm:$0xff] %v422_v13 }
 0x176   :  { %439 = vst [vmem:[%s804_s4 + $0x58] sm:$0xff] %v423_v31  ;;  %440 = vst [vmem:[%s804_s4 + $0x60] sm:$0xff] %v424_v20 }
 0x177   :  { %441 = vst [vmem:[%s804_s4 + $0x68] sm:$0xff] %v425_v22  ;;  %442 = vst [vmem:[%s804_s4 + $0x70] sm:$0xff] %v426_v25 }
 0x178   :  { %443 = vst [vmem:[%s804_s4 + $0x78] sm:$0xff] %v427_v27 }

// kernel: _lambda_.12
= control target key start
LH: loop header
LB: loop body
LE: loop exit
PB: predicated region body
PF: predicated region fallthrough
CT: control target
= control target key end

     0   :  { %s493_s1 = inlined_call_operand.vmem [shape: bf16[1,256,128], index: 1, kind: input, shape index: {}]   ;;  %s494_s0 = inlined_call_operand.vmem [shape: bf16[1,32,256], index: 0, kind: input, shape index: {}]   ;;  %s495_s2 = inlined_call_operand.vmem [shape: f32[1,128], index: 2, kind: input, shape index: {}]   ;;  %s496_s3 = inlined_call_operand.vmem [shape: f32[1,128], index: 3, kind: input, shape index: {}]   ;;  %s497_s4 = inlined_call_operand.vmem [shape: f32[1,32,128], index: 4, kind: output, shape index: {}]  }
   0x1   :  { %v368_v0 = vld [vmem:[%s493_s1 + $0x40] sm:$0xff]   ;;  %v370_v2 = vld [vmem:[%s493_s1 + $0x48] sm:$0xff]   ;;  %v372_v4 = vld [vmem:[%s493_s1 + $0x50] sm:$0xff]  }
   0x2   :  { %v369_v1 = vld [vmem:[%s493_s1] sm:$0xff]   ;;  %324 = vmatprep.subr.bf16.mxu0 %v368_v0  ;;  %352 = vmatprep.subr.bf16.mxu1 %v368_v0  ;;  %v371_v3 = vld [vmem:[%s493_s1 + $0x8] sm:$0xff]   ;;  %v373_v5 = vld [vmem:[%s493_s1 + $0x10] sm:$0xff]  }
   0x3   :  { %325 = vmatpush3.bf16.msra.mxu0 %v369_v1  ;;  %360 = vmatpush3.bf16.msra.mxu1 %v369_v1  ;;  %v374_v6 = vld [vmem:[%s493_s1 + $0x58] sm:$0xff]   ;;  %v376_v8 = vld [vmem:[%s493_s1 + $0x60] sm:$0xff]   ;;  %v378_v10 = vld [vmem:[%s493_s1 + $0x68] sm:$0xff]  }
   0x4   :  { %326 = vmatprep.subr.bf16.mxu0 %v370_v2  ;;  %353 = vmatprep.subr.bf16.mxu1 %v370_v2  ;;  %v375_v7 = vld [vmem:[%s493_s1 + $0x18] sm:$0xff]   ;;  %v377_v9 = vld [vmem:[%s493_s1 + $0x20] sm:$0xff]   ;;  %v19_v12 = vld [vmem:[%s494_s0 + $0x8] sm:$0xff] }
   0x5   :  { %v18_v11 = vld [vmem:[%s494_s0] sm:$0xff]  ;;  %v20_v13 = vld [vmem:[%s494_s0 + $0x10] sm:$0xff]  ;;  %v25_v16 = vunpack.c.h.bf16 %v19_v12  ;;  %v21_v17 = vld [vmem:[%s494_s0 + $0x18] sm:$0xff]  ;;  %v24_v19 = vunpack.c.l.bf16 %v19_v12 }
   0x6   :  { %v22_v14 = vunpack.c.l.bf16 %v18_v11  ;;  %v23_v15 = vunpack.c.h.bf16 %v18_v11  ;;  %v379_v18 = vld [vmem:[%s493_s1 + $0x28] sm:$0xff]   ;;  %v26_v20 = vunpack.c.l.bf16 %v20_v13  ;;  %v27_v21 = vunpack.c.h.bf16 %v20_v13  ;;  %v380_v25 = vld [vmem:[%s493_s1 + $0x70] sm:$0xff]   ;;  %v382_v35 = vld [vmem:[%s493_s1 + $0x78] sm:$0xff]  }
   0x7   :  { %327 = vmatpush3.bf16.msra.mxu0 %v371_v3  ;;  %361 = vmatpush3.bf16.msra.mxu1 %v371_v3  ;;  %v29_v22 = vunpack.c.h.bf16 %v21_v17  ;;  %vm33_vm1 = vcmp.ge.f32.partialorder %v25_v16, 0.0  ;;  %v41_v24 = vmul.f32 0.2, %v25_v16  ;;  %v28_v26 = vunpack.c.l.bf16 %v21_v17  ;;  %v381_v29 = vld [vmem:[%s493_s1 + $0x30] sm:$0xff]   ;;  %v383_v42 = vld [vmem:[%s493_s1 + $0x38] sm:$0xff]  }
   0x8   :  { %328 = vmatprep.subr.bf16.mxu0 %v372_v4  ;;  %354 = vmatprep.subr.bf16.mxu1 %v372_v4  ;;  %vm31_vm0 = vcmp.ge.f32.partialorder %v23_v15, 0.0  ;;  %v39_v23 = vmul.f32 0.2, %v23_v15  ;;  %vm30_vm2 = vcmp.ge.f32.partialorder %v22_v14, 0.0  ;;  %vm35_vm3 = vcmp.ge.f32.partialorder %v27_v21, 0.0 }
   0x9   :  { %v49_v28 = vsel %vm33_vm1, %v25_v16, %v41_v24  ;;  %v38_v31 = vmul.f32 0.2, %v22_v14  ;;  %vm37_vm4 = vcmp.ge.f32.partialorder %v29_v22, 0.0  ;;  %v43_v32 = vmul.f32 0.2, %v27_v21 }
   0xa   :  { %v47_v27 = vsel %vm31_vm0, %v23_v15, %v39_v23  ;;  %vm32_vm5 = vcmp.ge.f32.partialorder %v24_v19, 0.0  ;;  %v40_v33 = vmul.f32 0.2, %v24_v19  ;;  %v45_v34 = vmul.f32 0.2, %v29_v22 }
   0xb   :  { %329 = vmatpush3.bf16.msra.mxu0 %v373_v5  ;;  %362 = vmatpush3.bf16.msra.mxu1 %v373_v5  ;;  %v55_v30 = vpack.c.bf16 %v49_v28, %v47_v27  ;;  %vm34_vm6 = vcmp.ge.f32.partialorder %v26_v20, 0.0  ;;  %v51_v36 = vsel %vm35_vm3, %v27_v21, %v43_v32  ;;  %vm36_vm7 = vcmp.ge.f32.partialorder %v28_v26, 0.0  ;;  %v273_v27 = vld [vmem:[%s495_s2] sm:$0x1] }
   0xc   :  { %330 = vmatprep.subr.bf16.mxu0 %v374_v6  ;;  %355 = vmatprep.subr.bf16.mxu1 %v374_v6  ;;  %v42_v37 = vmul.f32 0.2, %v26_v20  ;;  %v44_v38 = vmul.f32 0.2, %v28_v26  ;;  %v53_v39 = vsel %vm37_vm4, %v29_v22, %v45_v34  ;;  %v46_v40 = vsel %vm30_vm2, %v22_v14, %v38_v31  ;;  %v277_v31 = vld [vmem:[%s496_s3] sm:$0x1] }
   0xd   :  { %218 = vmatprep.mubr.bf16.mxu0 %v55_v30  ;;  %v57_v41 = vpack.c.bf16 %v53_v39, %v51_v36  ;;  %v48_v43 = vsel %vm32_vm5, %v24_v19, %v40_v33 }
   0xe   :  { %v50_v44 = vsel %vm34_vm6, %v26_v20, %v42_v37  ;;  %v52_v45 = vsel %vm36_vm7, %v28_v26, %v44_v38  ;;  %v54_v46 = vpack.c.bf16 %v48_v43, %v46_v40 }
   0xf   :  { %331 = vmatpush3.bf16.msra.mxu0 %v375_v7  ;;  %363 = vmatpush3.bf16.msra.mxu1 %v375_v7  ;;  %v56_v47 = vpack.c.bf16 %v52_v45, %v50_v44 }
  0x10   :  { %332 = vmatprep.subr.bf16.mxu0 %v376_v8  ;;  %356 = vmatprep.subr.bf16.mxu1 %v376_v8 }
  0x11   :  { %226 = vmatprep.mubr.bf16.mxu1 %v57_v41 }
  0x13   :  { %333 = vmatpush3.bf16.msra.mxu0 %v377_v9  ;;  %364 = vmatpush3.bf16.msra.mxu1 %v377_v9 }
  0x14   :  { %334 = vmatprep.subr.bf16.mxu0 %v378_v10  ;;  %357 = vmatprep.subr.bf16.mxu1 %v378_v10 }
  0x17   :  { %335 = vmatpush3.bf16.msra.mxu0 %v379_v18  ;;  %365 = vmatpush3.bf16.msra.mxu1 %v379_v18 }
  0x18   :  { %336 = vmatprep.subr.bf16.mxu0 %v380_v25  ;;  %358 = vmatprep.subr.bf16.mxu1 %v380_v25  ;;  %v281_v25 = vlaneseq }
  0x1a   :  { %v282_v26 = vshrl.u32 %v281_v25, 7 }
  0x1b   :  { %337 = vmatpush3.bf16.msra.mxu0 %v381_v29  ;;  %366 = vmatpush3.bf16.msra.mxu1 %v381_v29 }
  0x1c   :  { %338 = vmatprep.subr.bf16.mxu0 %v382_v35  ;;  %359 = vmatprep.subr.bf16.mxu1 %v382_v35  ;;  %v283_v28 = vsub.s32 0, %v282_v26 }
  0x1f   :  { %339 = vmatpush3.bf16.msra.mxu0 %v383_v42  ;;  %367 = vmatpush3.bf16.msra.mxu1 %v383_v42 }
  0x22   :  { %219 = vmatmul.mubr.bf16.vlgmr.msra.gmra.mrb[0].mxu0 %v54_v46  ;;  %227 = vmatmul.mubr.bf16.vlgmr.msra.gmra.mrb[0].mxu1 %v56_v47 }
  0xf5   :  { %v340_v48 = vpop.f32.mrb[0].mxu0  ;;  %v346_v49 = vpop.f32.mrb[0].mxu1 }
  0xf6   :  { %v341_v50 = vpop.f32.mrb[1].mxu0  ;;  %v347_v51 = vpop.f32.mrb[1].mxu1 }
  0xf7   :  { %v342_v52 = vadd.f32 %v341_v50, %v340_v48  ;;  %v343_v53 = vpop.f32.mrb[2].mxu0  ;;  %v348_v54 = vadd.f32 %v347_v51, %v346_v49  ;;  %v349_v55 = vpop.f32.mrb[2].mxu1 }
  0xf8   :  { %v344_v56 = vpop.f32.mrb[3].mxu0  ;;  %v350_v57 = vpop.f32.mrb[3].mxu1 }
  0xf9   :  { %v345_v58 = vadd.f32 %v344_v56, %v343_v53  ;;  %v351_v59 = vadd.f32 %v350_v57, %v349_v55 }
  0xfb   :  { %v239_v60 = vadd.f32 %v345_v58, %v342_v52 }
  0xfd   :  { %v240_v61 = vadd.f32 %v348_v54, %v239_v60 }
  0xff   :  { %v241_v62 = vadd.f32 %v351_v59, %v240_v61 }
 0x101   :  { %v242_v63 = vrot.slane %v241_v62, 4 }
 0x103   :  { %v243_v0 = vadd.f32 %v242_v63, %v241_v62 }
 0x105   :  { %v244_v1 = vrot.slane %v243_v0, 2 }
 0x107   :  { %v245_v2 = vadd.f32 %v244_v1, %v243_v0 }
 0x109   :  { %v246_v3 = vrot.slane %v245_v2, 1 }
 0x10b   :  { %v247_v4 = vadd.f32 %v246_v3, %v245_v2 }
 0x10d   :  { %v249_v5 = vmul.f32 0.03125, %v247_v4 }
 0x10f   :  { %v254_v6 = vsub.f32 %v342_v52, %v249_v5  ;;  %v255_v7 = vsub.f32 %v345_v58, %v249_v5  ;;  %v256_v8 = vsub.f32 %v348_v54, %v249_v5  ;;  %v257_v9 = vsub.f32 %v351_v59, %v249_v5 }
 0x111   :  { %v258_v10 = vmul.f32 %v254_v6, %v254_v6  ;;  %v259_v11 = vmul.f32 %v255_v7, %v255_v7  ;;  %v260_v12 = vmul.f32 %v256_v8, %v256_v8  ;;  %v261_v14 = vmul.f32 %v257_v9, %v257_v9 }
 0x113   :  { %v262_v13 = vadd.f32 %v259_v11, %v258_v10 }
 0x115   :  { %v263_v15 = vadd.f32 %v262_v13, %v260_v12 }
 0x117   :  { %v264_v16 = vadd.f32 %v263_v15, %v261_v14 }
 0x119   :  { %v265_v17 = vrot.slane %v264_v16, 4 }
 0x11b   :  { %v266_v18 = vadd.f32 %v265_v17, %v264_v16 }
 0x11d   :  { %v267_v19 = vrot.slane %v266_v18, 2 }
 0x11f   :  { %v268_v20 = vadd.f32 %v267_v19, %v266_v18 }
 0x121   :  { %v269_v21 = vrot.slane %v268_v20, 1 }
 0x123   :  { %v270_v22 = vadd.f32 %v269_v21, %v268_v20 }
 0x125   :  { %v272_v23 = vmul.f32 0.03125, %v270_v22 }
 0x127   :  { %v274_v24 = vadd.f32 1e-05, %v272_v23 }
 0x129   :  { %384 = vrsqrt.f32 %v274_v24 }
 0x133   :  { %v385_v29 = vpop.eup %384 }
 0x134   :  { %v276_v30 = vmul.f32 %v385_v29, %v273_v27 }
 0x136   :  { %v278_v32 = vmul.f32 %v276_v30, %v249_v5  ;;  %v284_v33 = vrot.slane %v276_v30, %v283_v28 }
 0x138   :  { %v279_v34 = vsub.f32 %v277_v31, %v278_v32  ;;  %v286_v35 = vmul.f32 %v342_v52, %v284_v33  ;;  %v287_v36 = vmul.f32 %v345_v58, %v284_v33  ;;  %v288_v37 = vmul.f32 %v348_v54, %v284_v33 }
 0x139   :  { %v289_v38 = vmul.f32 %v351_v59, %v284_v33 }
 0x13a   :  { %v294_v39 = vrot.slane %v279_v34, %v283_v28 }
 0x13c   :  { %v296_v40 = vadd.f32 %v294_v39, %v286_v35  ;;  %v297_v41 = vadd.f32 %v294_v39, %v287_v36  ;;  %v298_v42 = vadd.f32 %v294_v39, %v288_v37  ;;  %v299_v43 = vadd.f32 %v294_v39, %v289_v38 }
 0x13e   :  { %300 = vst [vmem:[%s497_s4] sm:$0xff] %v296_v40  ;;  %301 = vst [vmem:[%s497_s4 + $0x8] sm:$0xff] %v297_v41 }
 0x13f   :  { %302 = vst [vmem:[%s497_s4 + $0x10] sm:$0xff] %v298_v42  ;;  %303 = vst [vmem:[%s497_s4 + $0x18] sm:$0xff] %v299_v43 }

// kernel: _lambda_.13
= control target key start
LH: loop header
LB: loop body
LE: loop exit
PB: predicated region body
PF: predicated region fallthrough
CT: control target
= control target key end

     0   :  { %s668_s1 = inlined_call_operand.vmem [shape: bf16[1,512,128], index: 1, kind: input, shape index: {}]   ;;  %s669_s0 = inlined_call_operand.vmem [shape: bf16[1,8,512], index: 0, kind: input, shape index: {}]   ;;  %s670_s2 = inlined_call_operand.vmem [shape: f32[1,128], index: 2, kind: input, shape index: {}]   ;;  %s671_s3 = inlined_call_operand.vmem [shape: f32[1,128], index: 3, kind: input, shape index: {}]   ;;  %s672_s4 = inlined_call_operand.vmem [shape: f32[1,8,128], index: 4, kind: output, shape index: {}]  }
   0x1   :  { %v498_v0 = vld [vmem:[%s668_s1 + $0x40] sm:$0xff]   ;;  %v502_v4 = vld [vmem:[%s668_s1 + $0x48] sm:$0xff]   ;;  %v506_v8 = vld [vmem:[%s668_s1 + $0x50] sm:$0xff]  }
   0x2   :  { %v499_v1 = vld [vmem:[%s668_s1 + $0xc0] sm:$0xff]   ;;  %454 = vmatprep.subr.bf16.mxu0 %v498_v0  ;;  %v503_v5 = vld [vmem:[%s668_s1 + $0xc8] sm:$0xff]   ;;  %v507_v9 = vld [vmem:[%s668_s1 + $0xd0] sm:$0xff]  }
   0x3   :  { %v500_v2 = vld [vmem:[%s668_s1] sm:$0xff]   ;;  %476 = vmatprep.subr.bf16.mxu1 %v499_v1  ;;  %v504_v6 = vld [vmem:[%s668_s1 + $0x8] sm:$0xff]   ;;  %v508_v10 = vld [vmem:[%s668_s1 + $0x10] sm:$0xff]  }
   0x4   :  { %v501_v3 = vld [vmem:[%s668_s1 + $0x80] sm:$0xff]   ;;  %455 = vmatpush3.bf16.msra.mxu0 %v500_v2  ;;  %v505_v7 = vld [vmem:[%s668_s1 + $0x88] sm:$0xff]   ;;  %v509_v11 = vld [vmem:[%s668_s1 + $0x90] sm:$0xff]  }
   0x5   :  { %477 = vmatpush3.bf16.msra.mxu1 %v501_v3  ;;  %456 = vmatprep.subr.bf16.mxu0 %v502_v4  ;;  %v510_v12 = vld [vmem:[%s668_s1 + $0x58] sm:$0xff]   ;;  %v514_v16 = vld [vmem:[%s668_s1 + $0x60] sm:$0xff]   ;;  %v518_v20 = vld [vmem:[%s668_s1 + $0x68] sm:$0xff]  }
   0x6   :  { %478 = vmatprep.subr.bf16.mxu1 %v503_v5  ;;  %v511_v13 = vld [vmem:[%s668_s1 + $0xd8] sm:$0xff]   ;;  %v515_v17 = vld [vmem:[%s668_s1 + $0xe0] sm:$0xff]   ;;  %v519_v21 = vld [vmem:[%s668_s1 + $0xe8] sm:$0xff]  }
   0x7   :  { %v512_v14 = vld [vmem:[%s668_s1 + $0x18] sm:$0xff]   ;;  %v516_v18 = vld [vmem:[%s668_s1 + $0x20] sm:$0xff]   ;;  %v520_v22 = vld [vmem:[%s668_s1 + $0x28] sm:$0xff]  }
   0x8   :  { %457 = vmatpush3.bf16.msra.mxu0 %v504_v6  ;;  %v513_v15 = vld [vmem:[%s668_s1 + $0x98] sm:$0xff]   ;;  %v517_v19 = vld [vmem:[%s668_s1 + $0xa0] sm:$0xff]   ;;  %v521_v23 = vld [vmem:[%s668_s1 + $0xa8] sm:$0xff]  }
   0x9   :  { %479 = vmatpush3.bf16.msra.mxu1 %v505_v7  ;;  %458 = vmatprep.subr.bf16.mxu0 %v506_v8  ;;  %v522_v24 = vld [vmem:[%s668_s1 + $0x70] sm:$0xff]   ;;  %v526_v28 = vld [vmem:[%s668_s1 + $0x78] sm:$0xff]   ;;  %v18_v32 = vld [vmem:[%s669_s0] sm:$0xff] }
   0xa   :  { %480 = vmatprep.subr.bf16.mxu1 %v507_v9  ;;  %v523_v25 = vld [vmem:[%s668_s1 + $0xf0] sm:$0xff]   ;;  %v527_v29 = vld [vmem:[%s668_s1 + $0xf8] sm:$0xff]   ;;  %v19_v33 = vld [vmem:[%s669_s0 + $0x8] sm:$0xff]  ;;  %v20_v34 = vunpack.c.l.bf16 %v18_v32  ;;  %v21_v35 = vunpack.c.h.bf16 %v18_v32 }
   0xb   :  { %v524_v26 = vld [vmem:[%s668_s1 + $0x30] sm:$0xff]   ;;  %v528_v30 = vld [vmem:[%s668_s1 + $0x38] sm:$0xff]   ;;  %v22_v36 = vunpack.c.l.bf16 %v19_v33  ;;  %v23_v37 = vunpack.c.h.bf16 %v19_v33 }
   0xc   :  { %459 = vmatpush3.bf16.msra.mxu0 %v508_v10  ;;  %v525_v27 = vld [vmem:[%s668_s1 + $0xb0] sm:$0xff]   ;;  %v529_v31 = vld [vmem:[%s668_s1 + $0xb8] sm:$0xff]   ;;  %vm25_vm0 = vcmp.ge.f32.partialorder %v21_v35, 0.0  ;;  %v29_v38 = vmul.f32 0.2, %v21_v35  ;;  %vm24_vm2 = vcmp.ge.f32.partialorder %v20_v34, 0.0 }
   0xd   :  { %481 = vmatpush3.bf16.msra.mxu1 %v509_v11  ;;  %460 = vmatprep.subr.bf16.mxu0 %v510_v12  ;;  %vm27_vm1 = vcmp.ge.f32.partialorder %v23_v37, 0.0  ;;  %v31_v39 = vmul.f32 0.2, %v23_v37  ;;  %v28_v40 = vmul.f32 0.2, %v20_v34  ;;  %vm26_vm3 = vcmp.ge.f32.partialorder %v22_v36, 0.0 }
   0xe   :  { %482 = vmatprep.subr.bf16.mxu1 %v511_v13  ;;  %v30_v41 = vmul.f32 0.2, %v22_v36  ;;  %v33_v42 = vsel %vm25_vm0, %v21_v35, %v29_v38 }
   0xf   :  { %v35_v43 = vsel %vm27_vm1, %v23_v37, %v31_v39  ;;  %v37_v44 = vpack.c.bf16 %v33_v42, %v33_v42  ;;  %v32_v46 = vsel %vm24_vm2, %v20_v34, %v28_v40 }
  0x10   :  { %461 = vmatpush3.bf16.msra.mxu0 %v512_v14  ;;  %v39_v45 = vpack.c.bf16 %v35_v43, %v35_v43  ;;  %v34_v47 = vsel %vm26_vm3, %v22_v36, %v30_v41  ;;  %v36_v48 = vpack.c.bf16 %v32_v46, %v32_v46  ;;  %v404_v14 = vlaneseq }
  0x11   :  { %483 = vmatpush3.bf16.msra.mxu1 %v513_v15  ;;  %462 = vmatprep.subr.bf16.mxu0 %v514_v16  ;;  %v38_v49 = vpack.c.bf16 %v34_v47, %v34_v47  ;;  %v396_v16 = vld [vmem:[%s670_s2] sm:$0x1] }
  0x12   :  { %484 = vmatprep.subr.bf16.mxu1 %v515_v17  ;;  %328 = vmatprep.mubr.bf16.mxu0 %v37_v44  ;;  %v405_v15 = vshrl.u32 %v404_v14, 7 }
  0x13   :  { %368 = vmatprep.mubr.bf16.mxu1 %v39_v45 }
  0x14   :  { %463 = vmatpush3.bf16.msra.mxu0 %v516_v18  ;;  %v406_v17 = vsub.s32 0, %v405_v15 }
  0x15   :  { %485 = vmatpush3.bf16.msra.mxu1 %v517_v19  ;;  %464 = vmatprep.subr.bf16.mxu0 %v518_v20  ;;  %v400_v20 = vld [vmem:[%s671_s3] sm:$0x1] }
  0x16   :  { %486 = vmatprep.subr.bf16.mxu1 %v519_v21 }
  0x18   :  { %465 = vmatpush3.bf16.msra.mxu0 %v520_v22 }
  0x19   :  { %487 = vmatpush3.bf16.msra.mxu1 %v521_v23  ;;  %466 = vmatprep.subr.bf16.mxu0 %v522_v24 }
  0x1a   :  { %488 = vmatprep.subr.bf16.mxu1 %v523_v25 }
  0x1c   :  { %467 = vmatpush3.bf16.msra.mxu0 %v524_v26 }
  0x1d   :  { %489 = vmatpush3.bf16.msra.mxu1 %v525_v27  ;;  %468 = vmatprep.subr.bf16.mxu0 %v526_v28 }
  0x1e   :  { %490 = vmatprep.subr.bf16.mxu1 %v527_v29 }
  0x20   :  { %469 = vmatpush3.bf16.msra.mxu0 %v528_v30 }
  0x21   :  { %491 = vmatpush3.bf16.msra.mxu1 %v529_v31 }
  0x23   :  { %329 = vmatmul.mubr.bf16.vlgmr.msra.gmra.mrb[0].mxu0 %v36_v48 }
  0x24   :  { %369 = vmatmul.mubr.bf16.vlgmr.msra.gmra.mrb[0].mxu1 %v38_v49 }
  0xf6   :  { %v470_v50 = vpop.f32.mrb[0].mxu0 }
  0xf7   :  { %v492_v51 = vpop.f32.mrb[0].mxu1  ;;  %v471_v52 = vpop.f32.mrb[1].mxu0 }
  0xf8   :  { %v493_v53 = vpop.f32.mrb[1].mxu1  ;;  %v472_v54 = vadd.f32 %v471_v52, %v470_v50  ;;  %v473_v56 = vpop.f32.mrb[2].mxu0 }
  0xf9   :  { %v494_v55 = vadd.f32 %v493_v53, %v492_v51  ;;  %v495_v57 = vpop.f32.mrb[2].mxu1  ;;  %v474_v58 = vpop.f32.mrb[3].mxu0 }
  0xfa   :  { %v496_v59 = vpop.f32.mrb[3].mxu1 }
  0xfb   :  { %v371_v60 = vadd.f32 %v494_v55, %v472_v54 }
  0xfd   :  { %v377_v61 = vrot.slane %v371_v60, 4 }
  0xff   :  { %v378_v62 = vadd.f32 %v377_v61, %v371_v60 }
 0x101   :  { %v379_v63 = vrot.slane %v378_v62, 2 }
 0x103   :  { %v380_v0 = vadd.f32 %v379_v63, %v378_v62 }
 0x105   :  { %v381_v1 = vrot.slane %v380_v0, 1 }
 0x107   :  { %v382_v2 = vadd.f32 %v381_v1, %v380_v0 }
 0x109   :  { %v384_v3 = vmul.f32 0.125, %v382_v2 }
 0x10b   :  { %v386_v4 = vsub.f32 %v371_v60, %v384_v3 }
 0x10d   :  { %v387_v5 = vmul.f32 %v386_v4, %v386_v4 }
 0x10f   :  { %v388_v6 = vrot.slane %v387_v5, 4 }
 0x111   :  { %v389_v7 = vadd.f32 %v388_v6, %v387_v5 }
 0x113   :  { %v390_v8 = vrot.slane %v389_v7, 2 }
 0x115   :  { %v391_v9 = vadd.f32 %v390_v8, %v389_v7 }
 0x117   :  { %v392_v10 = vrot.slane %v391_v9, 1 }
 0x119   :  { %v393_v11 = vadd.f32 %v392_v10, %v391_v9 }
 0x11b   :  { %v395_v12 = vmul.f32 0.125, %v393_v11 }
 0x11d   :  { %v397_v13 = vadd.f32 1e-05, %v395_v12 }
 0x11f   :  { %530 = vrsqrt.f32 %v397_v13 }
 0x129   :  { %v531_v18 = vpop.eup %530 }
 0x12a   :  { %v399_v19 = vmul.f32 %v531_v18, %v396_v16 }
 0x12c   :  { %v401_v21 = vmul.f32 %v399_v19, %v384_v3  ;;  %v407_v22 = vrot.slane %v399_v19, %v406_v17 }
 0x12e   :  { %v402_v23 = vsub.f32 %v400_v20, %v401_v21  ;;  %v409_v24 = vmul.f32 %v407_v22, %v371_v60 }
 0x130   :  { %v414_v25 = vrot.slane %v402_v23, %v406_v17 }
 0x132   :  { %v416_v26 = vadd.f32 %v414_v25, %v409_v24 }
 0x134   :  { %417 = vst [vmem:[%s672_s4] sm:$0xff] %v416_v26 }

// kernel: _lambda_.14
= control target key start
LH: loop header
LB: loop body
LE: loop exit
PB: predicated region body
PF: predicated region fallthrough
CT: control target
= control target key end

     0   :  { %v978_v27 = vmov 1983009808   ;;  %v30_v29 = vlaneseq  ;;  %s1206_s1 = inlined_call_operand.vmem [shape: bf16[1,1024,128], index: 1, kind: input, shape index: {}]   ;;  %s1207_s0 = inlined_call_operand.vmem [shape: bf16[1,2,1024], index: 0, kind: input, shape index: {}]   ;;  %s1208_s2 = inlined_call_operand.vmem [shape: f32[1,128], index: 2, kind: input, shape index: {}]   ;;  %s1209_s3 = inlined_call_operand.vmem [shape: f32[1,2,128], index: 3, kind: output, shape index: {}]  }
   0x1   :  { %v914_v0 = vld [vmem:[%s1206_s1 + $0x40] sm:$0xff]   ;;  %v918_v4 = vld [vmem:[%s1206_s1 + $0x48] sm:$0xff]   ;;  %v922_v8 = vld [vmem:[%s1206_s1 + $0x50] sm:$0xff]   ;;  %v28_v28 = vunpack.c.l.s4 %v978_v27 }
   0x2   :  { %v915_v1 = vld [vmem:[%s1206_s1 + $0xc0] sm:$0xff]   ;;  %825 = vmatprep.subr.bf16.mxu0 %v914_v0  ;;  %v919_v5 = vld [vmem:[%s1206_s1 + $0xc8] sm:$0xff]   ;;  %v923_v9 = vld [vmem:[%s1206_s1 + $0xd0] sm:$0xff]   ;;  %v31_v35 = vshrl.u32 %v30_v29, 7 }
   0x3   :  { %v916_v2 = vld [vmem:[%s1206_s1] sm:$0xff]   ;;  %847 = vmatprep.subr.bf16.mxu1 %v915_v1  ;;  %v920_v6 = vld [vmem:[%s1206_s1 + $0x8] sm:$0xff]   ;;  %v924_v10 = vld [vmem:[%s1206_s1 + $0x10] sm:$0xff]   ;;  %v29_v34 = vunpack.c.0.s8 %v28_v28 }
   0x4   :  { %v917_v3 = vld [vmem:[%s1206_s1 + $0x80] sm:$0xff]   ;;  %826 = vmatpush3.bf16.msra.mxu0 %v916_v2  ;;  %v921_v7 = vld [vmem:[%s1206_s1 + $0x88] sm:$0xff]   ;;  %v925_v11 = vld [vmem:[%s1206_s1 + $0x90] sm:$0xff]  }
   0x5   :  { %848 = vmatpush3.bf16.msra.mxu1 %v917_v3  ;;  %827 = vmatprep.subr.bf16.mxu0 %v918_v4  ;;  %v926_v12 = vld [vmem:[%s1206_s1 + $0x58] sm:$0xff]   ;;  %v930_v16 = vld [vmem:[%s1206_s1 + $0x60] sm:$0xff]   ;;  %v934_v20 = vld [vmem:[%s1206_s1 + $0x68] sm:$0xff]   ;;  %v1101_v40 = vsub.s32 %v29_v34, %v31_v35 }
   0x6   :  { %849 = vmatprep.subr.bf16.mxu1 %v919_v5  ;;  %v927_v13 = vld [vmem:[%s1206_s1 + $0xd8] sm:$0xff]   ;;  %v931_v17 = vld [vmem:[%s1206_s1 + $0xe0] sm:$0xff]   ;;  %v935_v21 = vld [vmem:[%s1206_s1 + $0xe8] sm:$0xff]  }
   0x7   :  { %v928_v14 = vld [vmem:[%s1206_s1 + $0x18] sm:$0xff]   ;;  %v932_v18 = vld [vmem:[%s1206_s1 + $0x20] sm:$0xff]   ;;  %v936_v22 = vld [vmem:[%s1206_s1 + $0x28] sm:$0xff]  }
   0x8   :  { %828 = vmatpush3.bf16.msra.mxu0 %v920_v6  ;;  %v929_v15 = vld [vmem:[%s1206_s1 + $0x98] sm:$0xff]   ;;  %v933_v19 = vld [vmem:[%s1206_s1 + $0xa0] sm:$0xff]   ;;  %v937_v23 = vld [vmem:[%s1206_s1 + $0xa8] sm:$0xff]  }
   0x9   :  { %850 = vmatpush3.bf16.msra.mxu1 %v921_v7  ;;  %829 = vmatprep.subr.bf16.mxu0 %v922_v8  ;;  %v938_v24 = vld [vmem:[%s1206_s1 + $0x70] sm:$0xff]   ;;  %v942_v31 = vld [vmem:[%s1206_s1 + $0x78] sm:$0xff]   ;;  %v15_v37 = vld [vmem:[%s1207_s0] sm:$0xff] }
   0xa   :  { %851 = vmatprep.subr.bf16.mxu1 %v923_v9  ;;  %v939_v25 = vld [vmem:[%s1206_s1 + $0xf0] sm:$0xff]   ;;  %v943_v32 = vld [vmem:[%s1206_s1 + $0xf8] sm:$0xff]   ;;  %v16_v38 = vunpack.c.l.bf16 %v15_v37  ;;  %v946_v39 = vld [vmem:[%s1206_s1 + $0x140] sm:$0xff]   ;;  %v17_v6 = vunpack.c.h.bf16 %v15_v37 }
   0xb   :  { %v940_v26 = vld [vmem:[%s1206_s1 + $0x30] sm:$0xff]   ;;  %v944_v33 = vld [vmem:[%s1206_s1 + $0x38] sm:$0xff]   ;;  %v947_v41 = vld [vmem:[%s1206_s1 + $0x1c0] sm:$0xff]  }
   0xc   :  { %830 = vmatpush3.bf16.msra.mxu0 %v924_v10  ;;  %v941_v30 = vld [vmem:[%s1206_s1 + $0xb0] sm:$0xff]   ;;  %v945_v36 = vld [vmem:[%s1206_s1 + $0xb8] sm:$0xff]   ;;  %vm18_vm0 = vcmp.ge.f32.partialorder %v16_v38, 0.0  ;;  %v20_v42 = vmul.f32 0.2, %v16_v38  ;;  %v948_v51 = vld [vmem:[%s1206_s1 + $0x100] sm:$0xff]  }
   0xd   :  { %852 = vmatpush3.bf16.msra.mxu1 %v925_v11  ;;  %831 = vmatprep.subr.bf16.mxu0 %v926_v12  ;;  %v950_v53 = vld [vmem:[%s1206_s1 + $0x148] sm:$0xff]   ;;  %v949_v55 = vld [vmem:[%s1206_s1 + $0x180] sm:$0xff]   ;;  %v954_v58 = vld [vmem:[%s1206_s1 + $0x150] sm:$0xff]   ;;  %vm19_vm1 = vcmp.ge.f32.partialorder %v17_v6, 0.0 }
   0xe   :  { %853 = vmatprep.subr.bf16.mxu1 %v927_v13  ;;  %v22_v43 = vsel %vm18_vm0, %v16_v38, %v20_v42  ;;  %v951_v56 = vld [vmem:[%s1206_s1 + $0x1c8] sm:$0xff]   ;;  %v955_v60 = vld [vmem:[%s1206_s1 + $0x1d0] sm:$0xff]   ;;  %v958_v62 = vld [vmem:[%s1206_s1 + $0x158] sm:$0xff]   ;;  %v21_v13 = vmul.f32 0.2, %v17_v6 }
   0xf   :  { %v33_v44 = vrot.slane %v22_v43, %v1101_v40  ;;  %v26_v45 = vcombine.high %v22_v43, %v22_v43  ;;  %v952_v57 = vld [vmem:[%s1206_s1 + $0x108] sm:$0xff]   ;;  %v956_v61 = vld [vmem:[%s1206_s1 + $0x110] sm:$0xff]   ;;  %v959_v0 = vld [vmem:[%s1206_s1 + $0x1d8] sm:$0xff]  }
  0x10   :  { %832 = vmatpush3.bf16.msra.mxu0 %v928_v14  ;;  %v953_v59 = vld [vmem:[%s1206_s1 + $0x188] sm:$0xff]   ;;  %v957_v63 = vld [vmem:[%s1206_s1 + $0x190] sm:$0xff]   ;;  %v960_v1 = vld [vmem:[%s1206_s1 + $0x118] sm:$0xff]  }
  0x11   :  { %854 = vmatpush3.bf16.msra.mxu1 %v929_v15  ;;  %833 = vmatprep.subr.bf16.mxu0 %v930_v16  ;;  %v41_v46 = vcombine.high %v33_v44, %v33_v44  ;;  %v40_v47 = vrot.slane %v26_v45, %v1101_v40  ;;  %v68_v48 = vpack.c.bf16 %v33_v44, %v33_v44  ;;  %v962_v2 = vld [vmem:[%s1206_s1 + $0x160] sm:$0xff]   ;;  %v961_v3 = vld [vmem:[%s1206_s1 + $0x198] sm:$0xff]   ;;  %v966_v7 = vld [vmem:[%s1206_s1 + $0x168] sm:$0xff]  }
  0x12   :  { %855 = vmatprep.subr.bf16.mxu1 %v931_v17  ;;  %v963_v4 = vld [vmem:[%s1206_s1 + $0x1e0] sm:$0xff]   ;;  %v967_v9 = vld [vmem:[%s1206_s1 + $0x1e8] sm:$0xff]   ;;  %v970_v11 = vld [vmem:[%s1206_s1 + $0x170] sm:$0xff]   ;;  %v23_v16 = vsel %vm19_vm1, %v17_v6, %v21_v13 }
  0x13   :  { %v69_v49 = vpack.c.bf16 %v41_v46, %v41_v46  ;;  %v42_v50 = vcombine.high %v40_v47, %v40_v47  ;;  %v70_v52 = vpack.c.bf16 %v40_v47, %v40_v47  ;;  %v964_v5 = vld [vmem:[%s1206_s1 + $0x120] sm:$0xff]   ;;  %v968_v10 = vld [vmem:[%s1206_s1 + $0x128] sm:$0xff]   ;;  %v971_v14 = vld [vmem:[%s1206_s1 + $0x1f0] sm:$0xff]  }
  0x14   :  { %834 = vmatpush3.bf16.msra.mxu0 %v932_v18  ;;  %v965_v8 = vld [vmem:[%s1206_s1 + $0x1a0] sm:$0xff]   ;;  %v969_v12 = vld [vmem:[%s1206_s1 + $0x1a8] sm:$0xff]   ;;  %v972_v15 = vld [vmem:[%s1206_s1 + $0x130] sm:$0xff]   ;;  %v50_v18 = vrot.slane %v23_v16, %v1101_v40 }
  0x15   :  { %856 = vmatpush3.bf16.msra.mxu1 %v933_v19  ;;  %835 = vmatprep.subr.bf16.mxu0 %v934_v20  ;;  %v71_v54 = vpack.c.bf16 %v42_v50, %v42_v50  ;;  %v974_v17 = vld [vmem:[%s1206_s1 + $0x178] sm:$0xff]   ;;  %v43_v19 = vcombine.high %v23_v16, %v23_v16  ;;  %v973_v20 = vld [vmem:[%s1206_s1 + $0x1b0] sm:$0xff]  }
  0x16   :  { %857 = vmatprep.subr.bf16.mxu1 %v935_v21  ;;  %627 = vmatprep.mubr.bf16.mxu0 %v69_v49  ;;  %v975_v21 = vld [vmem:[%s1206_s1 + $0x1f8] sm:$0xff]   ;;  %v72_v29 = vpack.c.bf16 %v50_v18, %v50_v18 }
  0x17   :  { %667 = vmatprep.mubr.bf16.mxu1 %v71_v54  ;;  %v977_v27 = vld [vmem:[%s1206_s1 + $0x1b8] sm:$0xff]  }
  0x18   :  { %836 = vmatpush3.bf16.msra.mxu0 %v936_v22  ;;  %v58_v22 = vcombine.high %v50_v18, %v50_v18 }
  0x19   :  { %858 = vmatpush3.bf16.msra.mxu1 %v937_v23  ;;  %837 = vmatprep.subr.bf16.mxu0 %v938_v24  ;;  %v57_v23 = vrot.slane %v43_v19, %v1101_v40  ;;  %v976_v24 = vld [vmem:[%s1206_s1 + $0x138] sm:$0xff]  }
  0x1a   :  { %859 = vmatprep.subr.bf16.mxu1 %v939_v25  ;;  %v73_v25 = vpack.c.bf16 %v58_v22, %v58_v22 }
  0x1c   :  { %838 = vmatpush3.bf16.msra.mxu0 %v940_v26  ;;  %v59_v26 = vcombine.high %v57_v23, %v57_v23 }
  0x1d   :  { %860 = vmatpush3.bf16.msra.mxu1 %v941_v30  ;;  %839 = vmatprep.subr.bf16.mxu0 %v942_v31  ;;  %v74_v30 = vpack.c.bf16 %v57_v23, %v57_v23 }
  0x1e   :  { %861 = vmatprep.subr.bf16.mxu1 %v943_v32  ;;  %v75_v28 = vpack.c.bf16 %v59_v26, %v59_v26  ;;  %v760_v32 = vld [vmem:[%s1208_s2] ss:$0 sm:$0xff] }
  0x20   :  { %840 = vmatpush3.bf16.msra.mxu0 %v944_v33 }
  0x21   :  { %862 = vmatpush3.bf16.msra.mxu1 %v945_v36  ;;  %869 = vmatprep.subr.bf16.mxu0 %v946_v39 }
  0x22   :  { %891 = vmatprep.subr.bf16.mxu1 %v947_v41 }
  0x23   :  { %628 = vmatmul.mubr.bf16.vlgmr.msra.gmra.mrb[0].mxu0 %v68_v48 }
  0x24   :  { %870 = vmatpush3.bf16.msra.mxu0 %v948_v51  ;;  %668 = vmatmul.mubr.bf16.vlgmr.msra.gmra.mrb[0].mxu1 %v70_v52 }
  0x25   :  { %871 = vmatprep.subr.bf16.mxu0 %v950_v53  ;;  %892 = vmatpush3.bf16.msra.mxu1 %v949_v55 }
  0x26   :  { %893 = vmatprep.subr.bf16.mxu1 %v951_v56  ;;  %707 = vmatprep.mubr.bf16.mxu0 %v73_v25 }
  0x27   :  { %747 = vmatprep.mubr.bf16.mxu1 %v75_v28 }
  0x28   :  { %872 = vmatpush3.bf16.msra.mxu0 %v952_v57 }
  0x29   :  { %873 = vmatprep.subr.bf16.mxu0 %v954_v58  ;;  %894 = vmatpush3.bf16.msra.mxu1 %v953_v59 }
  0x2a   :  { %895 = vmatprep.subr.bf16.mxu1 %v955_v60 }
  0x2c   :  { %874 = vmatpush3.bf16.msra.mxu0 %v956_v61 }
  0x2d   :  { %875 = vmatprep.subr.bf16.mxu0 %v958_v62  ;;  %896 = vmatpush3.bf16.msra.mxu1 %v957_v63 }
  0x2e   :  { %897 = vmatprep.subr.bf16.mxu1 %v959_v0 }
  0x30   :  { %876 = vmatpush3.bf16.msra.mxu0 %v960_v1 }
  0x31   :  { %877 = vmatprep.subr.bf16.mxu0 %v962_v2  ;;  %898 = vmatpush3.bf16.msra.mxu1 %v961_v3 }
  0x32   :  { %899 = vmatprep.subr.bf16.mxu1 %v963_v4 }
  0x34   :  { %878 = vmatpush3.bf16.msra.mxu0 %v964_v5 }
  0x35   :  { %879 = vmatprep.subr.bf16.mxu0 %v966_v7  ;;  %900 = vmatpush3.bf16.msra.mxu1 %v965_v8 }
  0x36   :  { %901 = vmatprep.subr.bf16.mxu1 %v967_v9 }
  0x38   :  { %880 = vmatpush3.bf16.msra.mxu0 %v968_v10 }
  0x39   :  { %881 = vmatprep.subr.bf16.mxu0 %v970_v11  ;;  %902 = vmatpush3.bf16.msra.mxu1 %v969_v12 }
  0x3a   :  { %903 = vmatprep.subr.bf16.mxu1 %v971_v14 }
  0x3c   :  { %882 = vmatpush3.bf16.msra.mxu0 %v972_v15 }
  0x3d   :  { %883 = vmatprep.subr.bf16.mxu0 %v974_v17  ;;  %904 = vmatpush3.bf16.msra.mxu1 %v973_v20 }
  0x3e   :  { %905 = vmatprep.subr.bf16.mxu1 %v975_v21 }
  0x40   :  { %884 = vmatpush3.bf16.msra.mxu0 %v976_v24 }
  0x41   :  { %906 = vmatpush3.bf16.msra.mxu1 %v977_v27 }
  0x43   :  { %708 = vmatmul.mubr.bf16.vlgmr.msra.gmra.mrb[4].mxu0 %v72_v29 }
  0x44   :  { %748 = vmatmul.mubr.bf16.vlgmr.msra.gmra.mrb[4].mxu1 %v74_v30 }
  0xf6   :  { %v841_v31 = vpop.f32.mrb[0].mxu0 }
  0xf7   :  { %v842_v33 = vpop.f32.mrb[1].mxu0  ;;  %v863_v34 = vpop.f32.mrb[0].mxu1 }
  0xf8   :  { %v843_v35 = vadd.f32 %v842_v33, %v841_v31  ;;  %v844_v36 = vpop.f32.mrb[2].mxu0  ;;  %v864_v37 = vpop.f32.mrb[1].mxu1 }
  0xf9   :  { %v845_v38 = vpop.f32.mrb[3].mxu0  ;;  %v865_v40 = vadd.f32 %v864_v37, %v863_v34  ;;  %v866_v41 = vpop.f32.mrb[2].mxu1 }
  0xfa   :  { %v630_v39 = vadd.f32 %v843_v35, %v760_v32  ;;  %v867_v42 = vpop.f32.mrb[3].mxu1 }
  0xfc   :  { %v670_v43 = vadd.f32 %v865_v40, %v630_v39 }
 0x116   :  { %v885_v44 = vpop.f32.mrb[4].mxu0 }
 0x117   :  { %v886_v45 = vpop.f32.mrb[5].mxu0  ;;  %v907_v46 = vpop.f32.mrb[4].mxu1 }
 0x118   :  { %v887_v47 = vadd.f32 %v886_v45, %v885_v44  ;;  %v888_v48 = vpop.f32.mrb[6].mxu0  ;;  %v908_v49 = vpop.f32.mrb[5].mxu1 }
 0x119   :  { %v889_v50 = vpop.f32.mrb[7].mxu0  ;;  %v909_v52 = vadd.f32 %v908_v49, %v907_v46  ;;  %v910_v53 = vpop.f32.mrb[6].mxu1 }
 0x11a   :  { %v710_v51 = vadd.f32 %v887_v47, %v670_v43  ;;  %v911_v54 = vpop.f32.mrb[7].mxu1 }
 0x11c   :  { %v750_v55 = vadd.f32 %v909_v52, %v710_v51 }
 0x11e   :  { %755 = vst [vmem:[%s1209_s3] sm:$0x3] %v750_v55 }

// kernel: _lambda_.15
= control target key start
LH: loop header
LB: loop body
LE: loop exit
PB: predicated region body
PF: predicated region fallthrough
CT: control target
= control target key end

     0   :  { %v1214_v26 = vmov 1983009808   ;;  %v25_v28 = vlaneseq  ;;  %vm203_vm0 = vcmask 1041408   ;;  %s1513_s1 = inlined_call_operand.vmem [shape: bf16[4,256,128], index: 1, kind: input, shape index: {}]   ;;  %s1514_s0 = inlined_call_operand.vmem [shape: bf16[4,2,256], index: 0, kind: input, shape index: {}]   ;;  %s1515_s4 = inlined_call_operand.vmem [shape: f32[4,2,128], index: 4, kind: output, shape index: {}]   ;;  %s1516_s2 = inlined_call_operand.vmem [shape: f32[1,128], index: 2, kind: input, shape index: {}]   ;;  %s1517_s3 = inlined_call_operand.vmem [shape: f32[1,128], index: 3, kind: input, shape index: {}]  }
   0x1   :  { %v1148_v0 = vld [vmem:[%s1513_s1 + $0x40] sm:$0xff]   ;;  %v1152_v4 = vld [vmem:[%s1513_s1 + $0x48] sm:$0xff]   ;;  %v1156_v8 = vld [vmem:[%s1513_s1 + $0x50] sm:$0xff]   ;;  %v23_v27 = vunpack.c.l.s4 %v1214_v26 }
   0x2   :  { %v1149_v1 = vld [vmem:[%s1513_s1 + $0xc0] sm:$0xff]   ;;  %1059 = vmatprep.subr.bf16.mxu0 %v1148_v0  ;;  %v1153_v5 = vld [vmem:[%s1513_s1 + $0xc8] sm:$0xff]   ;;  %v1157_v9 = vld [vmem:[%s1513_s1 + $0xd0] sm:$0xff]   ;;  %v1330_v34 = vshrl.u32 %v25_v28, 7 }
   0x3   :  { %v1150_v2 = vld [vmem:[%s1513_s1] sm:$0xff]   ;;  %1081 = vmatprep.subr.bf16.mxu1 %v1149_v1  ;;  %v1154_v6 = vld [vmem:[%s1513_s1 + $0x8] sm:$0xff]   ;;  %v1158_v10 = vld [vmem:[%s1513_s1 + $0x10] sm:$0xff]   ;;  %v24_v33 = vunpack.c.0.s8 %v23_v27 }
   0x4   :  { %v1151_v3 = vld [vmem:[%s1513_s1 + $0x80] sm:$0xff]   ;;  %1060 = vmatpush3.bf16.msra.mxu0 %v1150_v2  ;;  %v1155_v7 = vld [vmem:[%s1513_s1 + $0x88] sm:$0xff]   ;;  %v1159_v11 = vld [vmem:[%s1513_s1 + $0x90] sm:$0xff]  }
   0x5   :  { %1082 = vmatpush3.bf16.msra.mxu1 %v1151_v3  ;;  %1061 = vmatprep.subr.bf16.mxu0 %v1152_v4  ;;  %v1160_v12 = vld [vmem:[%s1513_s1 + $0x58] sm:$0xff]   ;;  %v1164_v16 = vld [vmem:[%s1513_s1 + $0x60] sm:$0xff]   ;;  %v1168_v20 = vld [vmem:[%s1513_s1 + $0x68] sm:$0xff]   ;;  %v1345_v40 = vsub.s32 %v24_v33, %v1330_v34 }
   0x6   :  { %1083 = vmatprep.subr.bf16.mxu1 %v1153_v5  ;;  %v1161_v13 = vld [vmem:[%s1513_s1 + $0xd8] sm:$0xff]   ;;  %v1165_v17 = vld [vmem:[%s1513_s1 + $0xe0] sm:$0xff]   ;;  %v1169_v21 = vld [vmem:[%s1513_s1 + $0xe8] sm:$0xff]  }
   0x7   :  { %v1162_v14 = vld [vmem:[%s1513_s1 + $0x18] sm:$0xff]   ;;  %v1166_v18 = vld [vmem:[%s1513_s1 + $0x20] sm:$0xff]   ;;  %v1170_v22 = vld [vmem:[%s1513_s1 + $0x28] sm:$0xff]  }
   0x8   :  { %1062 = vmatpush3.bf16.msra.mxu0 %v1154_v6  ;;  %v1163_v15 = vld [vmem:[%s1513_s1 + $0x98] sm:$0xff]   ;;  %v1167_v19 = vld [vmem:[%s1513_s1 + $0xa0] sm:$0xff]   ;;  %v1171_v23 = vld [vmem:[%s1513_s1 + $0xa8] sm:$0xff]  }
   0x9   :  { %1084 = vmatpush3.bf16.msra.mxu1 %v1155_v7  ;;  %1063 = vmatprep.subr.bf16.mxu0 %v1156_v8  ;;  %v1172_v24 = vld [vmem:[%s1513_s1 + $0x70] sm:$0xff]   ;;  %v1176_v31 = vld [vmem:[%s1513_s1 + $0x78] sm:$0xff]   ;;  %v18_v37 = vld [vmem:[%s1514_s0] sm:$0x3] }
   0xa   :  { %1085 = vmatprep.subr.bf16.mxu1 %v1157_v9  ;;  %v1173_v25 = vld [vmem:[%s1513_s1 + $0xf0] sm:$0xff]   ;;  %v1177_v32 = vld [vmem:[%s1513_s1 + $0xf8] sm:$0xff]   ;;  %v900_v38 = vld [vmem:[%s1514_s0 + $0x2] sm:$0x3]  ;;  %v19_v39 = vunpack.c.l.bf16 %v18_v37 }
   0xb   :  { %v1174_v29 = vld [vmem:[%s1513_s1 + $0x30] sm:$0xff]   ;;  %v1178_v35 = vld [vmem:[%s1513_s1 + $0x38] sm:$0xff]   ;;  %v214_v41 = vunpack.c.l.bf16 %v900_v38  ;;  %v1180_v42 = vld [vmem:[%s1513_s1 + $0x140] sm:$0xff]  }
   0xc   :  { %1064 = vmatpush3.bf16.msra.mxu0 %v1158_v10  ;;  %v1175_v30 = vld [vmem:[%s1513_s1 + $0xb0] sm:$0xff]   ;;  %v1179_v36 = vld [vmem:[%s1513_s1 + $0xb8] sm:$0xff]   ;;  %v1181_v43 = vld [vmem:[%s1513_s1 + $0x1c0] sm:$0xff]   ;;  %v20_v44 = vmax.f32 %v19_v39, 0.0 }
   0xd   :  { %1086 = vmatpush3.bf16.msra.mxu1 %v1159_v11  ;;  %1065 = vmatprep.subr.bf16.mxu0 %v1160_v12  ;;  %v215_v45 = vmax.f32 %v214_v41, 0.0  ;;  %v1182_v50 = vld [vmem:[%s1513_s1 + $0x100] sm:$0xff]   ;;  %v1184_v56 = vld [vmem:[%s1513_s1 + $0x148] sm:$0xff]   ;;  %v1188_v60 = vld [vmem:[%s1513_s1 + $0x150] sm:$0xff]  }
   0xe   :  { %1087 = vmatprep.subr.bf16.mxu1 %v1161_v13  ;;  %v28_v46 = vrot.slane %v20_v44, %v1345_v40  ;;  %v1183_v53 = vld [vmem:[%s1513_s1 + $0x180] sm:$0xff]   ;;  %v1185_v57 = vld [vmem:[%s1513_s1 + $0x1c8] sm:$0xff]   ;;  %v1189_v61 = vld [vmem:[%s1513_s1 + $0x1d0] sm:$0xff]  }
   0xf   :  { %v223_v47 = vrot.slane %v215_v45, %v1345_v40  ;;  %v1186_v58 = vld [vmem:[%s1513_s1 + $0x108] sm:$0xff]   ;;  %v1190_v62 = vld [vmem:[%s1513_s1 + $0x110] sm:$0xff]   ;;  %v1192_v0 = vld [vmem:[%s1513_s1 + $0x158] sm:$0xff]  }
  0x10   :  { %1066 = vmatpush3.bf16.msra.mxu0 %v1162_v14  ;;  %v29_v48 = vcombine.high %v28_v46, %v28_v46  ;;  %v32_v51 = vpack.c.bf16 %v28_v46, %v28_v46  ;;  %v1187_v59 = vld [vmem:[%s1513_s1 + $0x188] sm:$0xff]   ;;  %v1191_v63 = vld [vmem:[%s1513_s1 + $0x190] sm:$0xff]   ;;  %v1193_v1 = vld [vmem:[%s1513_s1 + $0x1d8] sm:$0xff]  }
  0x11   :  { %1088 = vmatpush3.bf16.msra.mxu1 %v1163_v15  ;;  %1067 = vmatprep.subr.bf16.mxu0 %v1164_v16  ;;  %v224_v49 = vcombine.high %v223_v47, %v223_v47  ;;  %v227_v52 = vpack.c.bf16 %v223_v47, %v223_v47  ;;  %v1194_v2 = vld [vmem:[%s1513_s1 + $0x118] sm:$0xff]   ;;  %v1196_v4 = vld [vmem:[%s1513_s1 + $0x160] sm:$0xff]   ;;  %v1200_v8 = vld [vmem:[%s1513_s1 + $0x168] sm:$0xff]  }
  0x12   :  { %1089 = vmatprep.subr.bf16.mxu1 %v1165_v17  ;;  %v33_v54 = vpack.c.bf16 %v29_v48, %v29_v48  ;;  %v1195_v3 = vld [vmem:[%s1513_s1 + $0x198] sm:$0xff]   ;;  %v1197_v5 = vld [vmem:[%s1513_s1 + $0x1e0] sm:$0xff]   ;;  %v1201_v9 = vld [vmem:[%s1513_s1 + $0x1e8] sm:$0xff]  }
  0x13   :  { %v228_v55 = vpack.c.bf16 %v224_v49, %v224_v49  ;;  %v1198_v6 = vld [vmem:[%s1513_s1 + $0x120] sm:$0xff]   ;;  %v1202_v10 = vld [vmem:[%s1513_s1 + $0x128] sm:$0xff]   ;;  %v1204_v12 = vld [vmem:[%s1513_s1 + $0x170] sm:$0xff]  }
  0x14   :  { %1068 = vmatpush3.bf16.msra.mxu0 %v1166_v18  ;;  %194 = vmatprep.mubr.bf16.mxu0 %v33_v54  ;;  %v1199_v7 = vld [vmem:[%s1513_s1 + $0x1a0] sm:$0xff]   ;;  %v1203_v11 = vld [vmem:[%s1513_s1 + $0x1a8] sm:$0xff]   ;;  %v1205_v13 = vld [vmem:[%s1513_s1 + $0x1f0] sm:$0xff]  }
  0x15   :  { %1090 = vmatpush3.bf16.msra.mxu1 %v1167_v19  ;;  %1069 = vmatprep.subr.bf16.mxu0 %v1168_v20  ;;  %v950_v14 = vld [vmem:[%s1514_s0 + $0x4] sm:$0x3]  ;;  %v1206_v15 = vld [vmem:[%s1513_s1 + $0x130] sm:$0xff]   ;;  %v1000_v18 = vld [vmem:[%s1514_s0 + $0x6] sm:$0x3] }
  0x16   :  { %1091 = vmatprep.subr.bf16.mxu1 %v1169_v21  ;;  %390 = vmatprep.mubr.bf16.mxu1 %v228_v55  ;;  %v1207_v16 = vld [vmem:[%s1513_s1 + $0x1b0] sm:$0xff]   ;;  %v410_v17 = vunpack.c.l.bf16 %v950_v14  ;;  %v1208_v19 = vld [vmem:[%s1513_s1 + $0x178] sm:$0xff]   ;;  %v606_v21 = vunpack.c.l.bf16 %v1000_v18 }
  0x17   :  { %v1209_v20 = vld [vmem:[%s1513_s1 + $0x1f8] sm:$0xff]  }
  0x18   :  { %1070 = vmatpush3.bf16.msra.mxu0 %v1170_v22  ;;  %v411_v22 = vmax.f32 %v410_v17, 0.0 }
  0x19   :  { %1092 = vmatpush3.bf16.msra.mxu1 %v1171_v23  ;;  %1071 = vmatprep.subr.bf16.mxu0 %v1172_v24  ;;  %v607_v23 = vmax.f32 %v606_v21, 0.0  ;;  %v1210_v24 = vld [vmem:[%s1513_s1 + $0x138] sm:$0xff]  }
  0x1a   :  { %1093 = vmatprep.subr.bf16.mxu1 %v1173_v25  ;;  %v1211_v25 = vld [vmem:[%s1513_s1 + $0x1b8] sm:$0xff]   ;;  %v419_v26 = vrot.slane %v411_v22, %v1345_v40 }
  0x1b   :  { %v615_v27 = vrot.slane %v607_v23, %v1345_v40 }
  0x1c   :  { %1072 = vmatpush3.bf16.msra.mxu0 %v1174_v29  ;;  %v420_v28 = vcombine.high %v419_v26, %v419_v26 }
  0x1d   :  { %1094 = vmatpush3.bf16.msra.mxu1 %v1175_v30  ;;  %1073 = vmatprep.subr.bf16.mxu0 %v1176_v31  ;;  %v616_v29 = vcombine.high %v615_v27, %v615_v27  ;;  %v423_v30 = vpack.c.bf16 %v419_v26, %v419_v26 }
  0x1e   :  { %1095 = vmatprep.subr.bf16.mxu1 %v1177_v32  ;;  %v424_v31 = vpack.c.bf16 %v420_v28, %v420_v28  ;;  %v619_v32 = vpack.c.bf16 %v615_v27, %v615_v27 }
  0x1f   :  { %v620_v33 = vpack.c.bf16 %v616_v29, %v616_v29 }
  0x20   :  { %1074 = vmatpush3.bf16.msra.mxu0 %v1178_v35 }
  0x21   :  { %1096 = vmatpush3.bf16.msra.mxu1 %v1179_v36  ;;  %1103 = vmatprep.subr.bf16.mxu0 %v1180_v42 }
  0x22   :  { %1125 = vmatprep.subr.bf16.mxu1 %v1181_v43 }
  0x23   :  { %195 = vmatmul.mubr.bf16.vlgmr.msra.gmra.mrb[0].mxu0 %v32_v51 }
  0x24   :  { %391 = vmatmul.mubr.bf16.vlgmr.msra.gmra.mrb[0].mxu1 %v227_v52  ;;  %1104 = vmatpush3.bf16.msra.mxu0 %v1182_v50 }
  0x25   :  { %1126 = vmatpush3.bf16.msra.mxu1 %v1183_v53  ;;  %1105 = vmatprep.subr.bf16.mxu0 %v1184_v56 }
  0x26   :  { %1127 = vmatprep.subr.bf16.mxu1 %v1185_v57  ;;  %586 = vmatprep.mubr.bf16.mxu0 %v424_v31 }
  0x27   :  { %782 = vmatprep.mubr.bf16.mxu1 %v620_v33 }
  0x28   :  { %1106 = vmatpush3.bf16.msra.mxu0 %v1186_v58 }
  0x29   :  { %1128 = vmatpush3.bf16.msra.mxu1 %v1187_v59  ;;  %1107 = vmatprep.subr.bf16.mxu0 %v1188_v60 }
  0x2a   :  { %1129 = vmatprep.subr.bf16.mxu1 %v1189_v61 }
  0x2c   :  { %1108 = vmatpush3.bf16.msra.mxu0 %v1190_v62 }
  0x2d   :  { %1130 = vmatpush3.bf16.msra.mxu1 %v1191_v63  ;;  %1109 = vmatprep.subr.bf16.mxu0 %v1192_v0 }
  0x2e   :  { %1131 = vmatprep.subr.bf16.mxu1 %v1193_v1 }
  0x30   :  { %1110 = vmatpush3.bf16.msra.mxu0 %v1194_v2 }
  0x31   :  { %1132 = vmatpush3.bf16.msra.mxu1 %v1195_v3  ;;  %1111 = vmatprep.subr.bf16.mxu0 %v1196_v4 }
  0x32   :  { %1133 = vmatprep.subr.bf16.mxu1 %v1197_v5 }
  0x34   :  { %1112 = vmatpush3.bf16.msra.mxu0 %v1198_v6 }
  0x35   :  { %1134 = vmatpush3.bf16.msra.mxu1 %v1199_v7  ;;  %1113 = vmatprep.subr.bf16.mxu0 %v1200_v8 }
  0x36   :  { %1135 = vmatprep.subr.bf16.mxu1 %v1201_v9 }
  0x38   :  { %1114 = vmatpush3.bf16.msra.mxu0 %v1202_v10 }
  0x39   :  { %1136 = vmatpush3.bf16.msra.mxu1 %v1203_v11  ;;  %1115 = vmatprep.subr.bf16.mxu0 %v1204_v12 }
  0x3a   :  { %1137 = vmatprep.subr.bf16.mxu1 %v1205_v13 }
  0x3c   :  { %1116 = vmatpush3.bf16.msra.mxu0 %v1206_v15 }
  0x3d   :  { %1138 = vmatpush3.bf16.msra.mxu1 %v1207_v16  ;;  %1117 = vmatprep.subr.bf16.mxu0 %v1208_v19 }
  0x3e   :  { %1139 = vmatprep.subr.bf16.mxu1 %v1209_v20 }
  0x40   :  { %1118 = vmatpush3.bf16.msra.mxu0 %v1210_v24 }
  0x41   :  { %1140 = vmatpush3.bf16.msra.mxu1 %v1211_v25 }
  0x43   :  { %587 = vmatmul.mubr.bf16.vlgmr.msra.gmra.mrb[4].mxu0 %v423_v30 }
  0x44   :  { %783 = vmatmul.mubr.bf16.vlgmr.msra.gmra.mrb[4].mxu1 %v619_v32 }
  0xf6   :  { %v1075_v35 = vpop.f32.mrb[0].mxu0 }
  0xf7   :  { %v1097_v36 = vpop.f32.mrb[0].mxu1  ;;  %v1076_v37 = vpop.f32.mrb[1].mxu0 }
  0xf8   :  { %v1098_v38 = vpop.f32.mrb[1].mxu1  ;;  %v1077_v39 = vadd.f32 %v1076_v37, %v1075_v35  ;;  %v1078_v40 = vpop.f32.mrb[2].mxu0 }
  0xf9   :  { %v1099_v41 = vadd.f32 %v1098_v38, %v1097_v36  ;;  %v1100_v42 = vpop.f32.mrb[2].mxu1  ;;  %v1079_v43 = vpop.f32.mrb[3].mxu0 }
  0xfa   :  { %v1101_v44 = vpop.f32.mrb[3].mxu1  ;;  %202 = vst [vmem:[%s1515_s4] sm:$0x3] %v1077_v39  ;;  %v204_v45 = vsel %vm203_vm0, %v1077_v39, 0.0 }
  0xfb   :  { %949 = vst [vmem:[%s1515_s4 + $0x2] sm:$0x3] %v1099_v41  ;;  %v400_v46 = vsel %vm203_vm0, %v1099_v41, 0.0  ;;  %v205_v47 = vrot.slane %v204_v45, 4 }
  0xfc   :  { %v401_v48 = vrot.slane %v400_v46, 4 }
  0xfd   :  { %v206_v49 = vadd.f32 %v205_v47, %v204_v45 }
  0xfe   :  { %v402_v50 = vadd.f32 %v401_v48, %v400_v46 }
  0xff   :  { %v207_v51 = vrot.slane %v206_v49, 2 }
 0x100   :  { %v403_v52 = vrot.slane %v402_v50, 2 }
 0x101   :  { %v208_v53 = vadd.f32 %v207_v51, %v206_v49  ;;  %v801_v23 = vld [vmem:[%s1515_s4] sm:$0x3] }
 0x102   :  { %v404_v54 = vadd.f32 %v403_v52, %v402_v50  ;;  %v1050_v24 = vld [vmem:[%s1515_s4 + $0x2] sm:$0x3] }
 0x103   :  { %v209_v55 = vrot.slane %v208_v53, 1 }
 0x104   :  { %v405_v56 = vrot.slane %v404_v54, 1 }
 0x105   :  { %v210_v57 = vadd.f32 %v209_v55, %v208_v53 }
 0x106   :  { %v406_v58 = vadd.f32 %v405_v56, %v404_v54 }
 0x108   :  { %v407_v59 = vadd.f32 %v406_v58, %v210_v57 }
 0x116   :  { %v1119_v60 = vpop.f32.mrb[4].mxu0 }
 0x117   :  { %v1141_v61 = vpop.f32.mrb[4].mxu1  ;;  %v1120_v62 = vpop.f32.mrb[5].mxu0 }
 0x118   :  { %v1121_v63 = vadd.f32 %v1120_v62, %v1119_v60  ;;  %v1142_v0 = vpop.f32.mrb[5].mxu1  ;;  %v1122_v1 = vpop.f32.mrb[6].mxu0 }
 0x119   :  { %v1143_v2 = vadd.f32 %v1142_v0, %v1141_v61  ;;  %v1144_v3 = vpop.f32.mrb[6].mxu1  ;;  %v1123_v4 = vpop.f32.mrb[7].mxu0 }
 0x11a   :  { %999 = vst [vmem:[%s1515_s4 + $0x4] sm:$0x3] %v1121_v63  ;;  %v596_v5 = vsel %vm203_vm0, %v1121_v63, 0.0  ;;  %v1145_v6 = vpop.f32.mrb[7].mxu1 }
 0x11b   :  { %v597_v7 = vrot.slane %v596_v5, 4  ;;  %1049 = vst [vmem:[%s1515_s4 + $0x6] sm:$0x3] %v1143_v2  ;;  %v792_v8 = vsel %vm203_vm0, %v1143_v2, 0.0  ;;  %v856_v6 = vsub.s32 0, %v1330_v34 }
 0x11c   :  { %v793_v9 = vrot.slane %v792_v8, 4 }
 0x11d   :  { %v598_v10 = vadd.f32 %v597_v7, %v596_v5  ;;  %v846_v5 = vld [vmem:[%s1516_s2] sm:$0x1] }
 0x11e   :  { %v794_v11 = vadd.f32 %v793_v9, %v792_v8  ;;  %v850_v9 = vld [vmem:[%s1517_s3] sm:$0x1] }
 0x11f   :  { %v599_v12 = vrot.slane %v598_v10, 2 }
 0x120   :  { %v795_v13 = vrot.slane %v794_v11, 2 }
 0x121   :  { %v600_v14 = vadd.f32 %v599_v12, %v598_v10  ;;  %v1051_v25 = vld [vmem:[%s1515_s4 + $0x4] sm:$0x3] }
 0x122   :  { %v796_v15 = vadd.f32 %v795_v13, %v794_v11  ;;  %v1052_v26 = vld [vmem:[%s1515_s4 + $0x6] sm:$0x3] }
 0x123   :  { %v601_v16 = vrot.slane %v600_v14, 1  ;;  %v1057_v34 = vld [vmem:[%s1515_s4 + $0x6] sm:$0x3] }
 0x124   :  { %v797_v17 = vrot.slane %v796_v15, 1 }
 0x125   :  { %v602_v18 = vadd.f32 %v601_v16, %v600_v14  ;;  %v1053_v14 = vld [vmem:[%s1515_s4 + $0x2] sm:$0x3] }
 0x126   :  { %v798_v20 = vadd.f32 %v797_v17, %v796_v15  ;;  %v1055_v15 = vld [vmem:[%s1515_s4 + $0x4] sm:$0x3] }
 0x127   :  { %v603_v19 = vadd.f32 %v602_v18, %v407_v59 }
 0x129   :  { %v799_v21 = vadd.f32 %v798_v20, %v603_v19 }
 0x12b   :  { %v800_v22 = vmul.f32 0.125, %v799_v21 }
 0x12d   :  { %v802_v27 = vsub.f32 %v801_v23, %v800_v22  ;;  %v813_v28 = vsub.f32 %v1050_v24, %v800_v22  ;;  %v824_v29 = vsub.f32 %v1051_v25, %v800_v22  ;;  %v835_v30 = vsub.f32 %v1052_v26, %v800_v22 }
 0x12f   :  { %v803_v31 = vmul.f32 %v802_v27, %v802_v27  ;;  %v814_v32 = vmul.f32 %v813_v28, %v813_v28  ;;  %v825_v33 = vmul.f32 %v824_v29, %v824_v29  ;;  %v836_v35 = vmul.f32 %v835_v30, %v835_v30 }
 0x131   :  { %v804_v36 = vsel %vm203_vm0, %v803_v31, 0.0  ;;  %v815_v37 = vsel %vm203_vm0, %v814_v32, 0.0  ;;  %v826_v38 = vsel %vm203_vm0, %v825_v33, 0.0  ;;  %v837_v39 = vsel %vm203_vm0, %v836_v35, 0.0 }
 0x132   :  { %v805_v41 = vrot.slane %v804_v36, 4  ;;  %v816_v40 = vrot.slane %v815_v37, 4  ;;  %v827_v42 = vrot.slane %v826_v38, 4  ;;  %v838_v43 = vrot.slane %v837_v39, 4 }
 0x134   :  { %v806_v44 = vadd.f32 %v805_v41, %v804_v36  ;;  %v817_v45 = vadd.f32 %v816_v40, %v815_v37  ;;  %v828_v46 = vadd.f32 %v827_v42, %v826_v38  ;;  %v839_v47 = vadd.f32 %v838_v43, %v837_v39 }
 0x136   :  { %v807_v48 = vrot.slane %v806_v44, 2  ;;  %v818_v49 = vrot.slane %v817_v45, 2  ;;  %v829_v50 = vrot.slane %v828_v46, 2  ;;  %v840_v51 = vrot.slane %v839_v47, 2 }
 0x138   :  { %v808_v52 = vadd.f32 %v807_v48, %v806_v44  ;;  %v819_v53 = vadd.f32 %v818_v49, %v817_v45  ;;  %v830_v54 = vadd.f32 %v829_v50, %v828_v46  ;;  %v841_v55 = vadd.f32 %v840_v51, %v839_v47 }
 0x13a   :  { %v809_v56 = vrot.slane %v808_v52, 1  ;;  %v820_v57 = vrot.slane %v819_v53, 1  ;;  %v831_v58 = vrot.slane %v830_v54, 1  ;;  %v842_v61 = vrot.slane %v841_v55, 1 }
 0x13c   :  { %v810_v59 = vadd.f32 %v809_v56, %v808_v52  ;;  %v821_v60 = vadd.f32 %v820_v57, %v819_v53  ;;  %v832_v63 = vadd.f32 %v831_v58, %v830_v54  ;;  %v843_v1 = vadd.f32 %v842_v61, %v841_v55 }
 0x13e   :  { %v822_v62 = vadd.f32 %v821_v60, %v810_v59 }
 0x140   :  { %v833_v0 = vadd.f32 %v832_v63, %v822_v62 }
 0x142   :  { %v844_v2 = vadd.f32 %v843_v1, %v833_v0 }
 0x144   :  { %v845_v3 = vmul.f32 0.125, %v844_v2 }
 0x146   :  { %v847_v4 = vadd.f32 1e-05, %v845_v3 }
 0x148   :  { %1212 = vrsqrt.f32 %v847_v4 }
 0x152   :  { %v1213_v7 = vpop.eup %1212 }
 0x153   :  { %v849_v8 = vmul.f32 %v1213_v7, %v846_v5 }
 0x155   :  { %v851_v10 = vmul.f32 %v849_v8, %v800_v22  ;;  %v857_v11 = vrot.slane %v849_v8, %v856_v6 }
 0x157   :  { %v852_v12 = vsub.f32 %v850_v9, %v851_v10  ;;  %v859_v13 = vmul.f32 %v857_v11, %v801_v23  ;;  %v869_v17 = vmul.f32 %v1053_v14, %v857_v11  ;;  %v873_v18 = vmul.f32 %v1055_v15, %v857_v11 }
 0x158   :  { %v877_v19 = vmul.f32 %v1057_v34, %v857_v11 }
 0x159   :  { %v864_v16 = vrot.slane %v852_v12, %v856_v6 }
 0x15b   :  { %v866_v20 = vadd.f32 %v864_v16, %v859_v13  ;;  %v870_v21 = vadd.f32 %v869_v17, %v864_v16  ;;  %v874_v22 = vadd.f32 %v873_v18, %v864_v16  ;;  %v878_v23 = vadd.f32 %v877_v19, %v864_v16 }
 0x15d   :  { %867 = vst [vmem:[%s1515_s4] sm:$0x3] %v866_v20  ;;  %1054 = vst [vmem:[%s1515_s4 + $0x2] sm:$0x3] %v870_v21 }
 0x15e   :  { %1056 = vst [vmem:[%s1515_s4 + $0x4] sm:$0x3] %v874_v22  ;;  %1058 = vst [vmem:[%s1515_s4 + $0x6] sm:$0x3] %v878_v23 }

// kernel: _lambda_.16
= control target key start
LH: loop header
LB: loop body
LE: loop exit
PB: predicated region body
PF: predicated region fallthrough
CT: control target
= control target key end

     0   :  { %s2652_s1 = inlined_call_operand.vmem [shape: bf16[4,512,128], index: 1, kind: input, shape index: {}]   ;;  %s2653_s0 = inlined_call_operand.vmem [shape: bf16[4,8,512], index: 0, kind: input, shape index: {}]   ;;  %s2654_s2 = inlined_call_operand.vmem [shape: f32[1,128], index: 2, kind: input, shape index: {}]   ;;  %s2655_s3 = inlined_call_operand.vmem [shape: f32[1,128], index: 3, kind: input, shape index: {}]   ;;  %s2656_s4 = inlined_call_operand.vmem [shape: f32[4,8,128], index: 4, kind: output, shape index: {}]  }
   0x1   :  { %v2053_v0 = vld [vmem:[%s2652_s1 + $0x40] sm:$0xff]   ;;  %v2057_v4 = vld [vmem:[%s2652_s1 + $0x48] sm:$0xff]   ;;  %v2061_v8 = vld [vmem:[%s2652_s1 + $0x50] sm:$0xff]  }
   0x2   :  { %v2054_v1 = vld [vmem:[%s2652_s1 + $0xc0] sm:$0xff]   ;;  %1877 = vmatprep.subr.bf16.mxu0 %v2053_v0  ;;  %v2058_v5 = vld [vmem:[%s2652_s1 + $0xc8] sm:$0xff]   ;;  %v2062_v9 = vld [vmem:[%s2652_s1 + $0xd0] sm:$0xff]  }
   0x3   :  { %v2055_v2 = vld [vmem:[%s2652_s1] sm:$0xff]   ;;  %1899 = vmatprep.subr.bf16.mxu1 %v2054_v1  ;;  %v2059_v6 = vld [vmem:[%s2652_s1 + $0x8] sm:$0xff]   ;;  %v2063_v10 = vld [vmem:[%s2652_s1 + $0x10] sm:$0xff]  }
   0x4   :  { %v2056_v3 = vld [vmem:[%s2652_s1 + $0x80] sm:$0xff]   ;;  %1878 = vmatpush3.bf16.msra.mxu0 %v2055_v2  ;;  %v2060_v7 = vld [vmem:[%s2652_s1 + $0x88] sm:$0xff]   ;;  %v2064_v11 = vld [vmem:[%s2652_s1 + $0x90] sm:$0xff]  }
   0x5   :  { %1900 = vmatpush3.bf16.msra.mxu1 %v2056_v3  ;;  %1879 = vmatprep.subr.bf16.mxu0 %v2057_v4  ;;  %v2065_v12 = vld [vmem:[%s2652_s1 + $0x58] sm:$0xff]   ;;  %v2069_v16 = vld [vmem:[%s2652_s1 + $0x60] sm:$0xff]   ;;  %v2073_v20 = vld [vmem:[%s2652_s1 + $0x68] sm:$0xff]  }
   0x6   :  { %1901 = vmatprep.subr.bf16.mxu1 %v2058_v5  ;;  %v2066_v13 = vld [vmem:[%s2652_s1 + $0xd8] sm:$0xff]   ;;  %v2070_v17 = vld [vmem:[%s2652_s1 + $0xe0] sm:$0xff]   ;;  %v2074_v21 = vld [vmem:[%s2652_s1 + $0xe8] sm:$0xff]  }
   0x7   :  { %v2067_v14 = vld [vmem:[%s2652_s1 + $0x18] sm:$0xff]   ;;  %v2071_v18 = vld [vmem:[%s2652_s1 + $0x20] sm:$0xff]   ;;  %v2075_v22 = vld [vmem:[%s2652_s1 + $0x28] sm:$0xff]  }
   0x8   :  { %1880 = vmatpush3.bf16.msra.mxu0 %v2059_v6  ;;  %v2068_v15 = vld [vmem:[%s2652_s1 + $0x98] sm:$0xff]   ;;  %v2072_v19 = vld [vmem:[%s2652_s1 + $0xa0] sm:$0xff]   ;;  %v2076_v23 = vld [vmem:[%s2652_s1 + $0xa8] sm:$0xff]  }
   0x9   :  { %1902 = vmatpush3.bf16.msra.mxu1 %v2060_v7  ;;  %1881 = vmatprep.subr.bf16.mxu0 %v2061_v8  ;;  %v2077_v24 = vld [vmem:[%s2652_s1 + $0x70] sm:$0xff]   ;;  %v2081_v28 = vld [vmem:[%s2652_s1 + $0x78] sm:$0xff]   ;;  %v18_v32 = vld [vmem:[%s2653_s0] sm:$0xff] }
   0xa   :  { %1903 = vmatprep.subr.bf16.mxu1 %v2062_v9  ;;  %v2078_v25 = vld [vmem:[%s2652_s1 + $0xf0] sm:$0xff]   ;;  %v2082_v29 = vld [vmem:[%s2652_s1 + $0xf8] sm:$0xff]   ;;  %v19_v33 = vld [vmem:[%s2653_s0 + $0x8] sm:$0xff]  ;;  %v20_v34 = vunpack.c.l.bf16 %v18_v32  ;;  %v21_v35 = vunpack.c.h.bf16 %v18_v32 }
   0xb   :  { %v2079_v26 = vld [vmem:[%s2652_s1 + $0x30] sm:$0xff]   ;;  %v2083_v30 = vld [vmem:[%s2652_s1 + $0x38] sm:$0xff]   ;;  %v22_v36 = vunpack.c.l.bf16 %v19_v33  ;;  %v23_v37 = vunpack.c.h.bf16 %v19_v33  ;;  %v2085_v38 = vld [vmem:[%s2652_s1 + $0x140] sm:$0xff]  }
   0xc   :  { %1882 = vmatpush3.bf16.msra.mxu0 %v2063_v10  ;;  %v2080_v27 = vld [vmem:[%s2652_s1 + $0xb0] sm:$0xff]   ;;  %v2084_v31 = vld [vmem:[%s2652_s1 + $0xb8] sm:$0xff]   ;;  %v2086_v39 = vld [vmem:[%s2652_s1 + $0x1c0] sm:$0xff]   ;;  %v24_v40 = vmax.f32 %v20_v34, 0.0  ;;  %v25_v41 = vmax.f32 %v21_v35, 0.0 }
   0xd   :  { %1904 = vmatpush3.bf16.msra.mxu1 %v2064_v11  ;;  %1883 = vmatprep.subr.bf16.mxu0 %v2065_v12  ;;  %v26_v42 = vmax.f32 %v22_v36, 0.0  ;;  %v27_v43 = vmax.f32 %v23_v37, 0.0  ;;  %v2087_v44 = vld [vmem:[%s2652_s1 + $0x100] sm:$0xff]   ;;  %v2089_v50 = vld [vmem:[%s2652_s1 + $0x148] sm:$0xff]   ;;  %v2093_v54 = vld [vmem:[%s2652_s1 + $0x150] sm:$0xff]  }
   0xe   :  { %1905 = vmatprep.subr.bf16.mxu1 %v2066_v13  ;;  %v29_v45 = vpack.c.bf16 %v25_v41, %v25_v41  ;;  %v28_v47 = vpack.c.bf16 %v24_v40, %v24_v40  ;;  %v2088_v49 = vld [vmem:[%s2652_s1 + $0x180] sm:$0xff]   ;;  %v2090_v51 = vld [vmem:[%s2652_s1 + $0x1c8] sm:$0xff]   ;;  %v2094_v55 = vld [vmem:[%s2652_s1 + $0x1d0] sm:$0xff]  }
   0xf   :  { %v31_v46 = vpack.c.bf16 %v27_v43, %v27_v43  ;;  %v30_v48 = vpack.c.bf16 %v26_v42, %v26_v42  ;;  %v2091_v52 = vld [vmem:[%s2652_s1 + $0x108] sm:$0xff]   ;;  %v2095_v56 = vld [vmem:[%s2652_s1 + $0x110] sm:$0xff]   ;;  %v2097_v58 = vld [vmem:[%s2652_s1 + $0x158] sm:$0xff]  }
  0x10   :  { %1884 = vmatpush3.bf16.msra.mxu0 %v2067_v14  ;;  %320 = vmatprep.mubr.bf16.mxu0 %v29_v45  ;;  %v2092_v53 = vld [vmem:[%s2652_s1 + $0x188] sm:$0xff]   ;;  %v2096_v57 = vld [vmem:[%s2652_s1 + $0x190] sm:$0xff]   ;;  %v2098_v59 = vld [vmem:[%s2652_s1 + $0x1d8] sm:$0xff]  }
  0x11   :  { %1906 = vmatpush3.bf16.msra.mxu1 %v2068_v15  ;;  %1885 = vmatprep.subr.bf16.mxu0 %v2069_v16  ;;  %v2099_v60 = vld [vmem:[%s2652_s1 + $0x118] sm:$0xff]   ;;  %v2101_v62 = vld [vmem:[%s2652_s1 + $0x160] sm:$0xff]   ;;  %v2105_v2 = vld [vmem:[%s2652_s1 + $0x168] sm:$0xff]  }
  0x12   :  { %1907 = vmatprep.subr.bf16.mxu1 %v2070_v17  ;;  %360 = vmatprep.mubr.bf16.mxu1 %v31_v46  ;;  %v2100_v61 = vld [vmem:[%s2652_s1 + $0x198] sm:$0xff]   ;;  %v2102_v63 = vld [vmem:[%s2652_s1 + $0x1e0] sm:$0xff]   ;;  %v2106_v3 = vld [vmem:[%s2652_s1 + $0x1e8] sm:$0xff]  }
  0x13   :  { %v2103_v0 = vld [vmem:[%s2652_s1 + $0x120] sm:$0xff]   ;;  %v2107_v4 = vld [vmem:[%s2652_s1 + $0x128] sm:$0xff]   ;;  %v2109_v6 = vld [vmem:[%s2652_s1 + $0x170] sm:$0xff]  }
  0x14   :  { %1886 = vmatpush3.bf16.msra.mxu0 %v2071_v18  ;;  %v2104_v1 = vld [vmem:[%s2652_s1 + $0x1a0] sm:$0xff]   ;;  %v2108_v5 = vld [vmem:[%s2652_s1 + $0x1a8] sm:$0xff]   ;;  %v2110_v7 = vld [vmem:[%s2652_s1 + $0x1f0] sm:$0xff]  }
  0x15   :  { %1908 = vmatpush3.bf16.msra.mxu1 %v2072_v19  ;;  %1887 = vmatprep.subr.bf16.mxu0 %v2073_v20  ;;  %v2111_v8 = vld [vmem:[%s2652_s1 + $0x130] sm:$0xff]   ;;  %v2113_v10 = vld [vmem:[%s2652_s1 + $0x178] sm:$0xff]   ;;  %v2117_v20 = vld [vmem:[%s2652_s1 + $0x240] sm:$0xff]  }
  0x16   :  { %1909 = vmatprep.subr.bf16.mxu1 %v2074_v21  ;;  %v2112_v9 = vld [vmem:[%s2652_s1 + $0x1b0] sm:$0xff]   ;;  %v2114_v11 = vld [vmem:[%s2652_s1 + $0x1f8] sm:$0xff]   ;;  %v2118_v21 = vld [vmem:[%s2652_s1 + $0x2c0] sm:$0xff]  }
  0x17   :  { %v2115_v12 = vld [vmem:[%s2652_s1 + $0x138] sm:$0xff]   ;;  %v1571_v14 = vld [vmem:[%s2653_s0 + $0x10] sm:$0xff]  ;;  %v2121_v32 = vld [vmem:[%s2652_s1 + $0x248] sm:$0xff]  }
  0x18   :  { %1888 = vmatpush3.bf16.msra.mxu0 %v2075_v22  ;;  %v2116_v13 = vld [vmem:[%s2652_s1 + $0x1b8] sm:$0xff]   ;;  %v379_v16 = vunpack.c.l.bf16 %v1571_v14  ;;  %v380_v17 = vunpack.c.h.bf16 %v1571_v14  ;;  %v2122_v33 = vld [vmem:[%s2652_s1 + $0x2c8] sm:$0xff]   ;;  %v2125_v36 = vld [vmem:[%s2652_s1 + $0x250] sm:$0xff]  }
  0x19   :  { %1910 = vmatpush3.bf16.msra.mxu1 %v2076_v23  ;;  %1889 = vmatprep.subr.bf16.mxu0 %v2077_v24  ;;  %v1572_v15 = vld [vmem:[%s2653_s0 + $0x18] sm:$0xff]  ;;  %v2123_v34 = vld [vmem:[%s2652_s1 + $0x208] sm:$0xff]   ;;  %v2126_v37 = vld [vmem:[%s2652_s1 + $0x2d0] sm:$0xff]  }
  0x1a   :  { %1911 = vmatprep.subr.bf16.mxu1 %v2078_v25  ;;  %v381_v18 = vunpack.c.l.bf16 %v1572_v15  ;;  %v382_v19 = vunpack.c.h.bf16 %v1572_v15  ;;  %v383_v22 = vmax.f32 %v379_v16, 0.0  ;;  %v384_v23 = vmax.f32 %v380_v17, 0.0  ;;  %v2124_v35 = vld [vmem:[%s2652_s1 + $0x288] sm:$0xff]   ;;  %v2129_v40 = vld [vmem:[%s2652_s1 + $0x258] sm:$0xff]   ;;  %v2134_v45 = vld [vmem:[%s2652_s1 + $0x2e0] sm:$0xff]  }
  0x1b   :  { %v2130_v41 = vld [vmem:[%s2652_s1 + $0x2d8] sm:$0xff]   ;;  %v2135_v46 = vld [vmem:[%s2652_s1 + $0x220] sm:$0xff]   ;;  %v2153_v14 = vld [vmem:[%s2652_s1 + $0x348] sm:$0xff]  }
  0x1c   :  { %1890 = vmatpush3.bf16.msra.mxu0 %v2079_v26  ;;  %v385_v24 = vmax.f32 %v381_v18, 0.0  ;;  %v386_v25 = vmax.f32 %v382_v19, 0.0  ;;  %v2119_v26 = vld [vmem:[%s2652_s1 + $0x200] sm:$0xff]   ;;  %v2131_v42 = vld [vmem:[%s2652_s1 + $0x218] sm:$0xff]   ;;  %v2154_v15 = vld [vmem:[%s2652_s1 + $0x3c8] sm:$0xff]  }
  0x1d   :  { %1912 = vmatpush3.bf16.msra.mxu1 %v2080_v27  ;;  %1891 = vmatprep.subr.bf16.mxu0 %v2081_v28  ;;  %v388_v27 = vpack.c.bf16 %v384_v23, %v384_v23  ;;  %v2132_v43 = vld [vmem:[%s2652_s1 + $0x298] sm:$0xff]   ;;  %v2155_v16 = vld [vmem:[%s2652_s1 + $0x308] sm:$0xff]   ;;  %v2157_v18 = vld [vmem:[%s2652_s1 + $0x350] sm:$0xff]  }
  0x1e   :  { %1913 = vmatprep.subr.bf16.mxu1 %v2082_v29  ;;  %v390_v28 = vpack.c.bf16 %v386_v25, %v386_v25  ;;  %v387_v29 = vpack.c.bf16 %v383_v22, %v383_v22  ;;  %v2156_v17 = vld [vmem:[%s2652_s1 + $0x388] sm:$0xff]   ;;  %v2158_v19 = vld [vmem:[%s2652_s1 + $0x3d0] sm:$0xff]   ;;  %v2161_v22 = vld [vmem:[%s2652_s1 + $0x358] sm:$0xff]  }
  0x1f   :  { %v2162_v23 = vld [vmem:[%s2652_s1 + $0x3d8] sm:$0xff]  }
  0x20   :  { %1892 = vmatpush3.bf16.msra.mxu0 %v2083_v30  ;;  %v389_v30 = vpack.c.bf16 %v385_v24, %v385_v24  ;;  %v2163_v24 = vld [vmem:[%s2652_s1 + $0x318] sm:$0xff]  }
  0x21   :  { %1914 = vmatpush3.bf16.msra.mxu1 %v2084_v31  ;;  %1921 = vmatprep.subr.bf16.mxu0 %v2085_v38  ;;  %v2120_v31 = vld [vmem:[%s2652_s1 + $0x280] sm:$0xff]   ;;  %v2127_v38 = vld [vmem:[%s2652_s1 + $0x210] sm:$0xff]   ;;  %v2164_v25 = vld [vmem:[%s2652_s1 + $0x398] sm:$0xff]  }
  0x22   :  { %1943 = vmatprep.subr.bf16.mxu1 %v2086_v39  ;;  %v2128_v39 = vld [vmem:[%s2652_s1 + $0x290] sm:$0xff]  }
  0x23   :  { %321 = vmatmul.mubr.bf16.vlgmr.msra.gmra.mrb[0].mxu0 %v28_v47  ;;  %v2136_v47 = vld [vmem:[%s2652_s1 + $0x2a0] sm:$0xff]  }
  0x24   :  { %361 = vmatmul.mubr.bf16.vlgmr.msra.gmra.mrb[0].mxu1 %v30_v48  ;;  %1922 = vmatpush3.bf16.msra.mxu0 %v2087_v44  ;;  %v2133_v44 = vld [vmem:[%s2652_s1 + $0x260] sm:$0xff]   ;;  %v2137_v48 = vld [vmem:[%s2652_s1 + $0x268] sm:$0xff]  }
  0x25   :  { %1944 = vmatpush3.bf16.msra.mxu1 %v2088_v49  ;;  %1923 = vmatprep.subr.bf16.mxu0 %v2089_v50  ;;  %v2138_v49 = vld [vmem:[%s2652_s1 + $0x2e8] sm:$0xff]  }
  0x26   :  { %1945 = vmatprep.subr.bf16.mxu1 %v2090_v51  ;;  %680 = vmatprep.mubr.bf16.mxu0 %v388_v27  ;;  %v2139_v50 = vld [vmem:[%s2652_s1 + $0x228] sm:$0xff]   ;;  %v2166_v27 = vld [vmem:[%s2652_s1 + $0x3e0] sm:$0xff]  }
  0x27   :  { %720 = vmatprep.mubr.bf16.mxu1 %v390_v28  ;;  %v2140_v51 = vld [vmem:[%s2652_s1 + $0x2a8] sm:$0xff]   ;;  %v2167_v28 = vld [vmem:[%s2652_s1 + $0x320] sm:$0xff]  }
  0x28   :  { %1924 = vmatpush3.bf16.msra.mxu0 %v2091_v52  ;;  %v2141_v52 = vld [vmem:[%s2652_s1 + $0x270] sm:$0xff]  }
  0x29   :  { %1946 = vmatpush3.bf16.msra.mxu1 %v2092_v53  ;;  %1925 = vmatprep.subr.bf16.mxu0 %v2093_v54  ;;  %v2142_v53 = vld [vmem:[%s2652_s1 + $0x2f0] sm:$0xff]  }
  0x2a   :  { %1947 = vmatprep.subr.bf16.mxu1 %v2094_v55  ;;  %v2143_v54 = vld [vmem:[%s2652_s1 + $0x230] sm:$0xff]  }
  0x2b   :  { %v2144_v55 = vld [vmem:[%s2652_s1 + $0x2b0] sm:$0xff]  }
  0x2c   :  { %1926 = vmatpush3.bf16.msra.mxu0 %v2095_v56  ;;  %v2145_v56 = vld [vmem:[%s2652_s1 + $0x278] sm:$0xff]  }
  0x2d   :  { %1948 = vmatpush3.bf16.msra.mxu1 %v2096_v57  ;;  %1927 = vmatprep.subr.bf16.mxu0 %v2097_v58  ;;  %v2146_v57 = vld [vmem:[%s2652_s1 + $0x2f8] sm:$0xff]  }
  0x2e   :  { %1949 = vmatprep.subr.bf16.mxu1 %v2098_v59  ;;  %v2147_v58 = vld [vmem:[%s2652_s1 + $0x238] sm:$0xff]  }
  0x2f   :  { %v2148_v59 = vld [vmem:[%s2652_s1 + $0x2b8] sm:$0xff]  }
  0x30   :  { %1928 = vmatpush3.bf16.msra.mxu0 %v2099_v60  ;;  %v1670_v60 = vld [vmem:[%s2653_s0 + $0x20] sm:$0xff] }
  0x31   :  { %1950 = vmatpush3.bf16.msra.mxu1 %v2100_v61  ;;  %1929 = vmatprep.subr.bf16.mxu0 %v2101_v62  ;;  %v740_v61 = vunpack.c.l.bf16 %v1670_v60  ;;  %v741_v62 = vunpack.c.h.bf16 %v1670_v60 }
  0x32   :  { %1951 = vmatprep.subr.bf16.mxu1 %v2102_v63  ;;  %v1671_v63 = vld [vmem:[%s2653_s0 + $0x28] sm:$0xff] }
  0x34   :  { %1930 = vmatpush3.bf16.msra.mxu0 %v2103_v0  ;;  %v742_v0 = vunpack.c.l.bf16 %v1671_v63 }
  0x35   :  { %1952 = vmatpush3.bf16.msra.mxu1 %v2104_v1  ;;  %1931 = vmatprep.subr.bf16.mxu0 %v2105_v2  ;;  %v743_v1 = vunpack.c.h.bf16 %v1671_v63  ;;  %v2149_v2 = vld [vmem:[%s2652_s1 + $0x340] sm:$0xff]  }
  0x36   :  { %1953 = vmatprep.subr.bf16.mxu1 %v2106_v3  ;;  %v744_v3 = vmax.f32 %v740_v61, 0.0 }
  0x38   :  { %1932 = vmatpush3.bf16.msra.mxu0 %v2107_v4  ;;  %v745_v4 = vmax.f32 %v741_v62, 0.0 }
  0x39   :  { %1954 = vmatpush3.bf16.msra.mxu1 %v2108_v5  ;;  %1933 = vmatprep.subr.bf16.mxu0 %v2109_v6  ;;  %v2150_v5 = vld [vmem:[%s2652_s1 + $0x3c0] sm:$0xff]  }
  0x3a   :  { %1955 = vmatprep.subr.bf16.mxu1 %v2110_v7  ;;  %v2151_v6 = vld [vmem:[%s2652_s1 + $0x300] sm:$0xff]   ;;  %v746_v7 = vmax.f32 %v742_v0, 0.0 }
  0x3c   :  { %1934 = vmatpush3.bf16.msra.mxu0 %v2111_v8  ;;  %v747_v8 = vmax.f32 %v743_v1, 0.0 }
  0x3d   :  { %1956 = vmatpush3.bf16.msra.mxu1 %v2112_v9  ;;  %1935 = vmatprep.subr.bf16.mxu0 %v2113_v10  ;;  %v749_v9 = vpack.c.bf16 %v745_v4, %v745_v4  ;;  %v748_v10 = vpack.c.bf16 %v744_v3, %v744_v3 }
  0x3e   :  { %1957 = vmatprep.subr.bf16.mxu1 %v2114_v11  ;;  %v2152_v11 = vld [vmem:[%s2652_s1 + $0x380] sm:$0xff]  }
  0x40   :  { %1936 = vmatpush3.bf16.msra.mxu0 %v2115_v12  ;;  %v751_v12 = vpack.c.bf16 %v747_v8, %v747_v8 }
  0x41   :  { %1958 = vmatpush3.bf16.msra.mxu1 %v2116_v13  ;;  %1965 = vmatprep.subr.bf16.mxu0 %v2117_v20  ;;  %v750_v13 = vpack.c.bf16 %v746_v7, %v746_v7  ;;  %v2159_v20 = vld [vmem:[%s2652_s1 + $0x310] sm:$0xff]  }
  0x42   :  { %1987 = vmatprep.subr.bf16.mxu1 %v2118_v21  ;;  %v2160_v21 = vld [vmem:[%s2652_s1 + $0x390] sm:$0xff]  }
  0x43   :  { %681 = vmatmul.mubr.bf16.vlgmr.msra.gmra.mrb[4].mxu0 %v387_v29  ;;  %v2168_v29 = vld [vmem:[%s2652_s1 + $0x3a0] sm:$0xff]  }
  0x44   :  { %721 = vmatmul.mubr.bf16.vlgmr.msra.gmra.mrb[4].mxu1 %v389_v30  ;;  %1966 = vmatpush3.bf16.msra.mxu0 %v2119_v26  ;;  %v2165_v26 = vld [vmem:[%s2652_s1 + $0x360] sm:$0xff]   ;;  %v2169_v30 = vld [vmem:[%s2652_s1 + $0x368] sm:$0xff]  }
  0x45   :  { %1988 = vmatpush3.bf16.msra.mxu1 %v2120_v31  ;;  %1967 = vmatprep.subr.bf16.mxu0 %v2121_v32  ;;  %v2170_v31 = vld [vmem:[%s2652_s1 + $0x3e8] sm:$0xff]  }
  0x46   :  { %1989 = vmatprep.subr.bf16.mxu1 %v2122_v33  ;;  %1041 = vmatprep.mubr.bf16.mxu0 %v749_v9  ;;  %v2171_v32 = vld [vmem:[%s2652_s1 + $0x328] sm:$0xff]  }
  0x47   :  { %1081 = vmatprep.mubr.bf16.mxu1 %v751_v12  ;;  %v2172_v33 = vld [vmem:[%s2652_s1 + $0x3a8] sm:$0xff]  }
  0x48   :  { %1968 = vmatpush3.bf16.msra.mxu0 %v2123_v34  ;;  %v2173_v34 = vld [vmem:[%s2652_s1 + $0x370] sm:$0xff]  }
  0x49   :  { %1990 = vmatpush3.bf16.msra.mxu1 %v2124_v35  ;;  %1969 = vmatprep.subr.bf16.mxu0 %v2125_v36  ;;  %v2174_v35 = vld [vmem:[%s2652_s1 + $0x3f0] sm:$0xff]  }
  0x4a   :  { %1991 = vmatprep.subr.bf16.mxu1 %v2126_v37  ;;  %v2175_v36 = vld [vmem:[%s2652_s1 + $0x330] sm:$0xff]  }
  0x4b   :  { %v2176_v37 = vld [vmem:[%s2652_s1 + $0x3b0] sm:$0xff]  }
  0x4c   :  { %1970 = vmatpush3.bf16.msra.mxu0 %v2127_v38  ;;  %v2177_v38 = vld [vmem:[%s2652_s1 + $0x378] sm:$0xff]  }
  0x4d   :  { %1992 = vmatpush3.bf16.msra.mxu1 %v2128_v39  ;;  %1971 = vmatprep.subr.bf16.mxu0 %v2129_v40  ;;  %v2178_v39 = vld [vmem:[%s2652_s1 + $0x3f8] sm:$0xff]  }
  0x4e   :  { %1993 = vmatprep.subr.bf16.mxu1 %v2130_v41  ;;  %v2179_v40 = vld [vmem:[%s2652_s1 + $0x338] sm:$0xff]   ;;  %v1769_v41 = vld [vmem:[%s2653_s0 + $0x30] sm:$0xff] }
  0x50   :  { %1972 = vmatpush3.bf16.msra.mxu0 %v2131_v42  ;;  %v2180_v42 = vld [vmem:[%s2652_s1 + $0x3b8] sm:$0xff]  }
  0x51   :  { %1994 = vmatpush3.bf16.msra.mxu1 %v2132_v43  ;;  %1973 = vmatprep.subr.bf16.mxu0 %v2133_v44  ;;  %v1101_v43 = vunpack.c.l.bf16 %v1769_v41  ;;  %v1102_v44 = vunpack.c.h.bf16 %v1769_v41 }
  0x52   :  { %1995 = vmatprep.subr.bf16.mxu1 %v2134_v45  ;;  %v1770_v45 = vld [vmem:[%s2653_s0 + $0x38] sm:$0xff] }
  0x54   :  { %1974 = vmatpush3.bf16.msra.mxu0 %v2135_v46  ;;  %v1103_v46 = vunpack.c.l.bf16 %v1770_v45 }
  0x55   :  { %1996 = vmatpush3.bf16.msra.mxu1 %v2136_v47  ;;  %1975 = vmatprep.subr.bf16.mxu0 %v2137_v48  ;;  %v1104_v47 = vunpack.c.h.bf16 %v1770_v45  ;;  %v1105_v48 = vmax.f32 %v1101_v43, 0.0 }
  0x56   :  { %1997 = vmatprep.subr.bf16.mxu1 %v2138_v49  ;;  %v1106_v49 = vmax.f32 %v1102_v44, 0.0 }
  0x58   :  { %1976 = vmatpush3.bf16.msra.mxu0 %v2139_v50  ;;  %v1107_v50 = vmax.f32 %v1103_v46, 0.0 }
  0x59   :  { %1998 = vmatpush3.bf16.msra.mxu1 %v2140_v51  ;;  %1977 = vmatprep.subr.bf16.mxu0 %v2141_v52  ;;  %v1108_v51 = vmax.f32 %v1104_v47, 0.0  ;;  %v1110_v52 = vpack.c.bf16 %v1106_v49, %v1106_v49 }
  0x5a   :  { %1999 = vmatprep.subr.bf16.mxu1 %v2142_v53  ;;  %v1109_v53 = vpack.c.bf16 %v1105_v48, %v1105_v48 }
  0x5c   :  { %1978 = vmatpush3.bf16.msra.mxu0 %v2143_v54  ;;  %v1112_v54 = vpack.c.bf16 %v1108_v51, %v1108_v51 }
  0x5d   :  { %2000 = vmatpush3.bf16.msra.mxu1 %v2144_v55  ;;  %1979 = vmatprep.subr.bf16.mxu0 %v2145_v56  ;;  %v1111_v55 = vpack.c.bf16 %v1107_v50, %v1107_v50 }
  0x5e   :  { %2001 = vmatprep.subr.bf16.mxu1 %v2146_v57 }
  0x60   :  { %1980 = vmatpush3.bf16.msra.mxu0 %v2147_v58 }
  0x61   :  { %2002 = vmatpush3.bf16.msra.mxu1 %v2148_v59  ;;  %2009 = vmatprep.subr.bf16.mxu0 %v2149_v2 }
  0x62   :  { %2031 = vmatprep.subr.bf16.mxu1 %v2150_v5 }
  0x63   :  { %1042 = vmatmul.mubr.bf16.vlgmr.msra.gmra.mrb[8].mxu0 %v748_v10 }
  0x64   :  { %1082 = vmatmul.mubr.bf16.vlgmr.msra.gmra.mrb[8].mxu1 %v750_v13  ;;  %2010 = vmatpush3.bf16.msra.mxu0 %v2151_v6 }
  0x65   :  { %2032 = vmatpush3.bf16.msra.mxu1 %v2152_v11  ;;  %2011 = vmatprep.subr.bf16.mxu0 %v2153_v14 }
  0x66   :  { %2033 = vmatprep.subr.bf16.mxu1 %v2154_v15  ;;  %1402 = vmatprep.mubr.bf16.mxu0 %v1110_v52 }
  0x67   :  { %1442 = vmatprep.mubr.bf16.mxu1 %v1112_v54 }
  0x68   :  { %2012 = vmatpush3.bf16.msra.mxu0 %v2155_v16 }
  0x69   :  { %2034 = vmatpush3.bf16.msra.mxu1 %v2156_v17  ;;  %2013 = vmatprep.subr.bf16.mxu0 %v2157_v18 }
  0x6a   :  { %2035 = vmatprep.subr.bf16.mxu1 %v2158_v19 }
  0x6c   :  { %2014 = vmatpush3.bf16.msra.mxu0 %v2159_v20 }
  0x6d   :  { %2036 = vmatpush3.bf16.msra.mxu1 %v2160_v21  ;;  %2015 = vmatprep.subr.bf16.mxu0 %v2161_v22 }
  0x6e   :  { %2037 = vmatprep.subr.bf16.mxu1 %v2162_v23 }
  0x70   :  { %2016 = vmatpush3.bf16.msra.mxu0 %v2163_v24 }
  0x71   :  { %2038 = vmatpush3.bf16.msra.mxu1 %v2164_v25  ;;  %2017 = vmatprep.subr.bf16.mxu0 %v2165_v26 }
  0x72   :  { %2039 = vmatprep.subr.bf16.mxu1 %v2166_v27 }
  0x74   :  { %2018 = vmatpush3.bf16.msra.mxu0 %v2167_v28 }
  0x75   :  { %2040 = vmatpush3.bf16.msra.mxu1 %v2168_v29  ;;  %2019 = vmatprep.subr.bf16.mxu0 %v2169_v30 }
  0x76   :  { %2041 = vmatprep.subr.bf16.mxu1 %v2170_v31 }
  0x78   :  { %2020 = vmatpush3.bf16.msra.mxu0 %v2171_v32 }
  0x79   :  { %2042 = vmatpush3.bf16.msra.mxu1 %v2172_v33  ;;  %2021 = vmatprep.subr.bf16.mxu0 %v2173_v34 }
  0x7a   :  { %2043 = vmatprep.subr.bf16.mxu1 %v2174_v35 }
  0x7c   :  { %2022 = vmatpush3.bf16.msra.mxu0 %v2175_v36 }
  0x7d   :  { %2044 = vmatpush3.bf16.msra.mxu1 %v2176_v37  ;;  %2023 = vmatprep.subr.bf16.mxu0 %v2177_v38 }
  0x7e   :  { %2045 = vmatprep.subr.bf16.mxu1 %v2178_v39 }
  0x80   :  { %2024 = vmatpush3.bf16.msra.mxu0 %v2179_v40 }
  0x81   :  { %2046 = vmatpush3.bf16.msra.mxu1 %v2180_v42 }
  0x83   :  { %1403 = vmatmul.mubr.bf16.vlgmr.msra.gmra.mrb[12].mxu0 %v1109_v53 }
  0x84   :  { %1443 = vmatmul.mubr.bf16.vlgmr.msra.gmra.mrb[12].mxu1 %v1111_v55 }
  0xf6   :  { %v1893_v56 = vpop.f32.mrb[0].mxu0 }
  0xf7   :  { %v1915_v57 = vpop.f32.mrb[0].mxu1  ;;  %v1894_v58 = vpop.f32.mrb[1].mxu0 }
  0xf8   :  { %v1916_v59 = vpop.f32.mrb[1].mxu1  ;;  %v1895_v60 = vadd.f32 %v1894_v58, %v1893_v56  ;;  %v1896_v62 = vpop.f32.mrb[2].mxu0 }
  0xf9   :  { %v1917_v61 = vadd.f32 %v1916_v59, %v1915_v57  ;;  %v1918_v63 = vpop.f32.mrb[2].mxu1  ;;  %v1897_v0 = vpop.f32.mrb[3].mxu0 }
  0xfa   :  { %v1919_v1 = vpop.f32.mrb[3].mxu1 }
  0xfb   :  { %v2616_v2 = vadd.f32 %v1917_v61, %v1895_v60 }
  0xfd   :  { %v369_v3 = vrot.slane %v2616_v2, 4 }
  0xff   :  { %v370_v4 = vadd.f32 %v369_v3, %v2616_v2 }
 0x101   :  { %v371_v15 = vrot.slane %v370_v4, 2 }
 0x103   :  { %v372_v18 = vadd.f32 %v371_v15, %v370_v4 }
 0x105   :  { %v373_v21 = vrot.slane %v372_v18, 1 }
 0x107   :  { %v374_v24 = vadd.f32 %v373_v21, %v372_v18 }
 0x116   :  { %v1937_v5 = vpop.f32.mrb[4].mxu0 }
 0x117   :  { %v1959_v6 = vpop.f32.mrb[4].mxu1  ;;  %v1938_v7 = vpop.f32.mrb[5].mxu0 }
 0x118   :  { %v1960_v8 = vpop.f32.mrb[5].mxu1  ;;  %v1939_v9 = vadd.f32 %v1938_v7, %v1937_v5  ;;  %v1940_v11 = vpop.f32.mrb[6].mxu0 }
 0x119   :  { %v1961_v10 = vadd.f32 %v1960_v8, %v1959_v6  ;;  %v1962_v12 = vpop.f32.mrb[6].mxu1  ;;  %v1941_v13 = vpop.f32.mrb[7].mxu0 }
 0x11a   :  { %v1963_v14 = vpop.f32.mrb[7].mxu1 }
 0x11b   :  { %v2620_v16 = vadd.f32 %v1961_v10, %v1939_v9 }
 0x11d   :  { %v730_v17 = vrot.slane %v2620_v16, 4 }
 0x11f   :  { %v731_v19 = vadd.f32 %v730_v17, %v2620_v16 }
 0x121   :  { %v732_v20 = vrot.slane %v731_v19, 2 }
 0x123   :  { %v733_v22 = vadd.f32 %v732_v20, %v731_v19 }
 0x125   :  { %v734_v23 = vrot.slane %v733_v22, 1 }
 0x127   :  { %v735_v25 = vadd.f32 %v734_v23, %v733_v22 }
 0x129   :  { %v736_v26 = vadd.f32 %v735_v25, %v374_v24 }
 0x136   :  { %v1981_v27 = vpop.f32.mrb[8].mxu0 }
 0x137   :  { %v2003_v28 = vpop.f32.mrb[8].mxu1  ;;  %v1982_v29 = vpop.f32.mrb[9].mxu0 }
 0x138   :  { %v1983_v30 = vadd.f32 %v1982_v29, %v1981_v27  ;;  %v2004_v31 = vpop.f32.mrb[9].mxu1  ;;  %v1984_v32 = vpop.f32.mrb[10].mxu0 }
 0x139   :  { %v2005_v33 = vadd.f32 %v2004_v31, %v2003_v28  ;;  %v2006_v34 = vpop.f32.mrb[10].mxu1  ;;  %v1985_v35 = vpop.f32.mrb[11].mxu0 }
 0x13a   :  { %v2007_v36 = vpop.f32.mrb[11].mxu1 }
 0x13b   :  { %v2624_v37 = vadd.f32 %v2005_v33, %v1983_v30 }
 0x13d   :  { %v1091_v38 = vrot.slane %v2624_v37, 4 }
 0x13f   :  { %v1092_v39 = vadd.f32 %v1091_v38, %v2624_v37 }
 0x141   :  { %v1093_v40 = vrot.slane %v1092_v39, 2 }
 0x143   :  { %v1094_v41 = vadd.f32 %v1093_v40, %v1092_v39  ;;  %v1509_v40 = vlaneseq }
 0x145   :  { %v1095_v42 = vrot.slane %v1094_v41, 1 }
 0x147   :  { %v1096_v43 = vadd.f32 %v1095_v42, %v1094_v41  ;;  %v1510_v41 = vshrl.u32 %v1509_v40, 7  ;;  %v1501_v42 = vld [vmem:[%s2654_s2] sm:$0x1] }
 0x149   :  { %v1097_v44 = vadd.f32 %v1096_v43, %v736_v26  ;;  %v1511_v43 = vsub.s32 0, %v1510_v41 }
 0x156   :  { %v2025_v45 = vpop.f32.mrb[12].mxu0 }
 0x157   :  { %v2047_v46 = vpop.f32.mrb[12].mxu1  ;;  %v2026_v47 = vpop.f32.mrb[13].mxu0 }
 0x158   :  { %v2027_v48 = vadd.f32 %v2026_v47, %v2025_v45  ;;  %v2048_v49 = vpop.f32.mrb[13].mxu1  ;;  %v2028_v50 = vpop.f32.mrb[14].mxu0 }
 0x159   :  { %v2049_v51 = vadd.f32 %v2048_v49, %v2047_v46  ;;  %v2050_v52 = vpop.f32.mrb[14].mxu1  ;;  %v2029_v53 = vpop.f32.mrb[15].mxu0  ;;  %v1505_v46 = vld [vmem:[%s2655_s3] sm:$0x1] }
 0x15a   :  { %v2051_v54 = vpop.f32.mrb[15].mxu1 }
 0x15b   :  { %v1445_v55 = vadd.f32 %v2049_v51, %v2027_v48 }
 0x15d   :  { %v1452_v56 = vrot.slane %v1445_v55, 4 }
 0x15f   :  { %v1453_v57 = vadd.f32 %v1452_v56, %v1445_v55 }
 0x161   :  { %v1454_v58 = vrot.slane %v1453_v57, 2 }
 0x163   :  { %v1455_v59 = vadd.f32 %v1454_v58, %v1453_v57 }
 0x165   :  { %v1456_v60 = vrot.slane %v1455_v59, 1 }
 0x167   :  { %v1457_v61 = vadd.f32 %v1456_v60, %v1455_v59 }
 0x169   :  { %v1458_v62 = vadd.f32 %v1457_v61, %v1097_v44 }
 0x16b   :  { %v1459_v63 = vmul.f32 0.03125, %v1458_v62 }
 0x16d   :  { %v1461_v0 = vsub.f32 %v2616_v2, %v1459_v63  ;;  %v1471_v1 = vsub.f32 %v2620_v16, %v1459_v63  ;;  %v1481_v3 = vsub.f32 %v2624_v37, %v1459_v63  ;;  %v1491_v4 = vsub.f32 %v1445_v55, %v1459_v63 }
 0x16f   :  { %v1462_v5 = vmul.f32 %v1461_v0, %v1461_v0  ;;  %v1472_v6 = vmul.f32 %v1471_v1, %v1471_v1  ;;  %v1482_v7 = vmul.f32 %v1481_v3, %v1481_v3  ;;  %v1492_v8 = vmul.f32 %v1491_v4, %v1491_v4 }
 0x171   :  { %v1463_v9 = vrot.slane %v1462_v5, 4  ;;  %v1473_v10 = vrot.slane %v1472_v6, 4  ;;  %v1483_v11 = vrot.slane %v1482_v7, 4  ;;  %v1493_v12 = vrot.slane %v1492_v8, 4 }
 0x173   :  { %v1464_v13 = vadd.f32 %v1463_v9, %v1462_v5  ;;  %v1474_v14 = vadd.f32 %v1473_v10, %v1472_v6  ;;  %v1484_v15 = vadd.f32 %v1483_v11, %v1482_v7  ;;  %v1494_v17 = vadd.f32 %v1493_v12, %v1492_v8 }
 0x175   :  { %v1465_v18 = vrot.slane %v1464_v13, 2  ;;  %v1475_v19 = vrot.slane %v1474_v14, 2  ;;  %v1485_v20 = vrot.slane %v1484_v15, 2  ;;  %v1495_v21 = vrot.slane %v1494_v17, 2 }
 0x177   :  { %v1466_v22 = vadd.f32 %v1465_v18, %v1464_v13  ;;  %v1476_v23 = vadd.f32 %v1475_v19, %v1474_v14  ;;  %v1486_v24 = vadd.f32 %v1485_v20, %v1484_v15  ;;  %v1496_v25 = vadd.f32 %v1495_v21, %v1494_v17 }
 0x179   :  { %v1467_v26 = vrot.slane %v1466_v22, 1  ;;  %v1477_v27 = vrot.slane %v1476_v23, 1  ;;  %v1487_v28 = vrot.slane %v1486_v24, 1  ;;  %v1497_v31 = vrot.slane %v1496_v25, 1 }
 0x17b   :  { %v1468_v29 = vadd.f32 %v1467_v26, %v1466_v22  ;;  %v1478_v30 = vadd.f32 %v1477_v27, %v1476_v23  ;;  %v1488_v33 = vadd.f32 %v1487_v28, %v1486_v24  ;;  %v1498_v35 = vadd.f32 %v1497_v31, %v1496_v25 }
 0x17d   :  { %v1479_v32 = vadd.f32 %v1478_v30, %v1468_v29 }
 0x17f   :  { %v1489_v34 = vadd.f32 %v1488_v33, %v1479_v32 }
 0x181   :  { %v1499_v36 = vadd.f32 %v1498_v35, %v1489_v34 }
 0x183   :  { %v1500_v38 = vmul.f32 0.03125, %v1499_v36 }
 0x185   :  { %v1502_v39 = vadd.f32 1e-05, %v1500_v38 }
 0x187   :  { %2181 = vrsqrt.f32 %v1502_v39 }
 0x191   :  { %v2182_v44 = vpop.eup %2181 }
 0x192   :  { %v1504_v45 = vmul.f32 %v2182_v44, %v1501_v42 }
 0x194   :  { %v1506_v47 = vmul.f32 %v1504_v45, %v1459_v63  ;;  %v1512_v48 = vrot.slane %v1504_v45, %v1511_v43 }
 0x196   :  { %v1507_v49 = vsub.f32 %v1505_v46, %v1506_v47  ;;  %v1514_v50 = vmul.f32 %v1512_v48, %v2616_v2  ;;  %v1524_v51 = vmul.f32 %v1512_v48, %v2620_v16  ;;  %v1528_v52 = vmul.f32 %v1512_v48, %v2624_v37 }
 0x197   :  { %v1532_v53 = vmul.f32 %v1512_v48, %v1445_v55 }
 0x198   :  { %v1519_v54 = vrot.slane %v1507_v49, %v1511_v43 }
 0x19a   :  { %v1521_v56 = vadd.f32 %v1519_v54, %v1514_v50  ;;  %v1525_v57 = vadd.f32 %v1524_v51, %v1519_v54  ;;  %v1529_v58 = vadd.f32 %v1528_v52, %v1519_v54  ;;  %v1533_v59 = vadd.f32 %v1532_v53, %v1519_v54 }
 0x19c   :  { %1522 = vst [vmem:[%s2656_s4] sm:$0xff] %v1521_v56  ;;  %1872 = vst [vmem:[%s2656_s4 + $0x8] sm:$0xff] %v1525_v57 }
 0x19d   :  { %1874 = vst [vmem:[%s2656_s4 + $0x10] sm:$0xff] %v1529_v58  ;;  %1876 = vst [vmem:[%s2656_s4 + $0x18] sm:$0xff] %v1533_v59 }

// kernel: _lambda_.17
= control target key start
LH: loop header
LB: loop body
LE: loop exit
PB: predicated region body
PF: predicated region fallthrough
CT: control target
= control target key end

     0   :  { %s1876_s1 = inlined_call_operand.vmem [shape: bf16[4,256,128], index: 1, kind: input, shape index: {}]   ;;  %s1877_s0 = inlined_call_operand.vmem [shape: bf16[4,32,256], index: 0, kind: input, shape index: {}]   ;;  %s1878_s2 = inlined_call_operand.vmem [shape: f32[1,128], index: 2, kind: input, shape index: {}]   ;;  %s1879_s3 = inlined_call_operand.vmem [shape: f32[1,128], index: 3, kind: input, shape index: {}]   ;;  %s1880_s4 = inlined_call_operand.vmem [shape: f32[4,32,128], index: 4, kind: output, shape index: {}]  }
   0x1   :  { %v1392_v0 = vld [vmem:[%s1876_s1 + $0x40] sm:$0xff]   ;;  %v1396_v4 = vld [vmem:[%s1876_s1 + $0x48] sm:$0xff]   ;;  %v1400_v8 = vld [vmem:[%s1876_s1 + $0x50] sm:$0xff]  }
   0x2   :  { %v1393_v1 = vld [vmem:[%s1876_s1 + $0xc0] sm:$0xff]   ;;  %1280 = vmatprep.subr.bf16.mxu0 %v1392_v0  ;;  %v1397_v5 = vld [vmem:[%s1876_s1 + $0xc8] sm:$0xff]   ;;  %v1401_v9 = vld [vmem:[%s1876_s1 + $0xd0] sm:$0xff]  }
   0x3   :  { %v1394_v2 = vld [vmem:[%s1876_s1] sm:$0xff]   ;;  %1308 = vmatprep.subr.bf16.mxu1 %v1393_v1  ;;  %v1398_v6 = vld [vmem:[%s1876_s1 + $0x8] sm:$0xff]   ;;  %v1402_v10 = vld [vmem:[%s1876_s1 + $0x10] sm:$0xff]  }
   0x4   :  { %v1395_v3 = vld [vmem:[%s1876_s1 + $0x80] sm:$0xff]   ;;  %1281 = vmatpush3.bf16.msra.mxu0 %v1394_v2  ;;  %v1399_v7 = vld [vmem:[%s1876_s1 + $0x88] sm:$0xff]   ;;  %v1403_v11 = vld [vmem:[%s1876_s1 + $0x90] sm:$0xff]  }
   0x5   :  { %1309 = vmatpush3.bf16.msra.mxu1 %v1395_v3  ;;  %1282 = vmatprep.subr.bf16.mxu0 %v1396_v4  ;;  %v1404_v12 = vld [vmem:[%s1876_s1 + $0x58] sm:$0xff]   ;;  %v1408_v16 = vld [vmem:[%s1876_s1 + $0x60] sm:$0xff]   ;;  %v1412_v20 = vld [vmem:[%s1876_s1 + $0x68] sm:$0xff]  }
   0x6   :  { %1310 = vmatprep.subr.bf16.mxu1 %v1397_v5  ;;  %v1405_v13 = vld [vmem:[%s1876_s1 + $0xd8] sm:$0xff]   ;;  %v1409_v17 = vld [vmem:[%s1876_s1 + $0xe0] sm:$0xff]   ;;  %v1413_v21 = vld [vmem:[%s1876_s1 + $0xe8] sm:$0xff]  }
   0x7   :  { %v1406_v14 = vld [vmem:[%s1876_s1 + $0x18] sm:$0xff]   ;;  %v1410_v18 = vld [vmem:[%s1876_s1 + $0x20] sm:$0xff]   ;;  %v1414_v22 = vld [vmem:[%s1876_s1 + $0x28] sm:$0xff]  }
   0x8   :  { %1283 = vmatpush3.bf16.msra.mxu0 %v1398_v6  ;;  %v1407_v15 = vld [vmem:[%s1876_s1 + $0x98] sm:$0xff]   ;;  %v1411_v19 = vld [vmem:[%s1876_s1 + $0xa0] sm:$0xff]   ;;  %v1415_v23 = vld [vmem:[%s1876_s1 + $0xa8] sm:$0xff]  }
   0x9   :  { %1311 = vmatpush3.bf16.msra.mxu1 %v1399_v7  ;;  %1284 = vmatprep.subr.bf16.mxu0 %v1400_v8  ;;  %v1416_v24 = vld [vmem:[%s1876_s1 + $0x70] sm:$0xff]   ;;  %v1420_v28 = vld [vmem:[%s1876_s1 + $0x78] sm:$0xff]   ;;  %v18_v32 = vld [vmem:[%s1877_s0] sm:$0xff] }
   0xa   :  { %1312 = vmatprep.subr.bf16.mxu1 %v1401_v9  ;;  %v1417_v25 = vld [vmem:[%s1876_s1 + $0xf0] sm:$0xff]   ;;  %v1421_v29 = vld [vmem:[%s1876_s1 + $0xf8] sm:$0xff]   ;;  %v19_v33 = vld [vmem:[%s1877_s0 + $0x8] sm:$0xff]  ;;  %v22_v35 = vunpack.c.l.bf16 %v18_v32  ;;  %v23_v36 = vunpack.c.h.bf16 %v18_v32 }
   0xb   :  { %v1418_v26 = vld [vmem:[%s1876_s1 + $0x30] sm:$0xff]   ;;  %v1422_v30 = vld [vmem:[%s1876_s1 + $0x38] sm:$0xff]   ;;  %v1076_v34 = vld [vmem:[%s1877_s0 + $0x20] sm:$0xff]  ;;  %v24_v37 = vunpack.c.l.bf16 %v19_v33  ;;  %v25_v38 = vunpack.c.h.bf16 %v19_v33 }
   0xc   :  { %1285 = vmatpush3.bf16.msra.mxu0 %v1402_v10  ;;  %v1419_v27 = vld [vmem:[%s1876_s1 + $0xb0] sm:$0xff]   ;;  %v1423_v31 = vld [vmem:[%s1876_s1 + $0xb8] sm:$0xff]   ;;  %v1077_v39 = vld [vmem:[%s1877_s0 + $0x28] sm:$0xff]  ;;  %v238_v40 = vunpack.c.l.bf16 %v1076_v34  ;;  %v239_v41 = vunpack.c.h.bf16 %v1076_v34  ;;  %v30_v45 = vmax.f32 %v22_v35, 0.0  ;;  %v31_v46 = vmax.f32 %v23_v36, 0.0 }
   0xd   :  { %1313 = vmatpush3.bf16.msra.mxu1 %v1403_v11  ;;  %1286 = vmatprep.subr.bf16.mxu0 %v1404_v12  ;;  %v240_v42 = vunpack.c.l.bf16 %v1077_v39  ;;  %v241_v43 = vunpack.c.h.bf16 %v1077_v39  ;;  %v1424_v44 = vld [vmem:[%s1876_s1 + $0x140] sm:$0xff]   ;;  %v32_v47 = vmax.f32 %v24_v37, 0.0  ;;  %v33_v48 = vmax.f32 %v25_v38, 0.0  ;;  %v1428_v60 = vld [vmem:[%s1876_s1 + $0x148] sm:$0xff]   ;;  %v20_v0 = vld [vmem:[%s1877_s0 + $0x10] sm:$0xff] }
   0xe   :  { %1314 = vmatprep.subr.bf16.mxu1 %v1405_v13  ;;  %v1425_v49 = vld [vmem:[%s1876_s1 + $0x1c0] sm:$0xff]   ;;  %v246_v51 = vmax.f32 %v238_v40, 0.0  ;;  %v247_v52 = vmax.f32 %v239_v41, 0.0  ;;  %v1429_v61 = vld [vmem:[%s1876_s1 + $0x1c8] sm:$0xff]   ;;  %v21_v1 = vld [vmem:[%s1877_s0 + $0x18] sm:$0xff]  ;;  %v27_v2 = vunpack.c.h.bf16 %v20_v0  ;;  %v26_v6 = vunpack.c.l.bf16 %v20_v0 }
   0xf   :  { %v1426_v50 = vld [vmem:[%s1876_s1 + $0x100] sm:$0xff]   ;;  %v248_v53 = vmax.f32 %v240_v42, 0.0  ;;  %v249_v54 = vmax.f32 %v241_v43, 0.0  ;;  %v39_v55 = vpack.c.bf16 %v33_v48, %v31_v46  ;;  %v38_v56 = vpack.c.bf16 %v32_v47, %v30_v45  ;;  %v1430_v62 = vld [vmem:[%s1876_s1 + $0x108] sm:$0xff]   ;;  %v1078_v4 = vld [vmem:[%s1877_s0 + $0x30] sm:$0xff] }
  0x10   :  { %1287 = vmatpush3.bf16.msra.mxu0 %v1406_v14  ;;  %v1427_v59 = vld [vmem:[%s1876_s1 + $0x180] sm:$0xff]   ;;  %v1431_v63 = vld [vmem:[%s1876_s1 + $0x188] sm:$0xff]   ;;  %v29_v3 = vunpack.c.h.bf16 %v21_v1  ;;  %v1079_v5 = vld [vmem:[%s1877_s0 + $0x38] sm:$0xff]  ;;  %v28_v7 = vunpack.c.l.bf16 %v21_v1  ;;  %v243_v8 = vunpack.c.h.bf16 %v1078_v4  ;;  %v242_v10 = vunpack.c.l.bf16 %v1078_v4 }
  0x11   :  { %1315 = vmatpush3.bf16.msra.mxu1 %v1407_v15  ;;  %1288 = vmatprep.subr.bf16.mxu0 %v1408_v16  ;;  %v255_v57 = vpack.c.bf16 %v249_v54, %v247_v52  ;;  %v254_v58 = vpack.c.bf16 %v248_v53, %v246_v51  ;;  %v245_v9 = vunpack.c.h.bf16 %v1079_v5  ;;  %v244_v11 = vunpack.c.l.bf16 %v1079_v5  ;;  %v1432_v12 = vld [vmem:[%s1876_s1 + $0x150] sm:$0xff]   ;;  %v1440_v32 = vld [vmem:[%s1876_s1 + $0x160] sm:$0xff]   ;;  %v1444_v36 = vld [vmem:[%s1876_s1 + $0x168] sm:$0xff]  }
  0x12   :  { %1316 = vmatprep.subr.bf16.mxu1 %v1409_v17  ;;  %202 = vmatprep.mubr.bf16.mxu0 %v39_v55  ;;  %v35_v13 = vmax.f32 %v27_v2, 0.0  ;;  %v37_v14 = vmax.f32 %v29_v3, 0.0  ;;  %v34_v15 = vmax.f32 %v26_v6, 0.0  ;;  %v36_v16 = vmax.f32 %v28_v7, 0.0  ;;  %v1441_v33 = vld [vmem:[%s1876_s1 + $0x1e0] sm:$0xff]   ;;  %v1445_v37 = vld [vmem:[%s1876_s1 + $0x1e8] sm:$0xff]  }
  0x13   :  { %419 = vmatprep.mubr.bf16.mxu1 %v255_v57  ;;  %v251_v17 = vmax.f32 %v243_v8, 0.0  ;;  %v1442_v34 = vld [vmem:[%s1876_s1 + $0x120] sm:$0xff]   ;;  %v1446_v38 = vld [vmem:[%s1876_s1 + $0x128] sm:$0xff]   ;;  %v1448_v40 = vld [vmem:[%s1876_s1 + $0x170] sm:$0xff]  }
  0x14   :  { %1289 = vmatpush3.bf16.msra.mxu0 %v1410_v18  ;;  %v253_v18 = vmax.f32 %v245_v9, 0.0  ;;  %v1443_v35 = vld [vmem:[%s1876_s1 + $0x1a0] sm:$0xff]   ;;  %v1447_v39 = vld [vmem:[%s1876_s1 + $0x1a8] sm:$0xff]   ;;  %v1449_v41 = vld [vmem:[%s1876_s1 + $0x1f0] sm:$0xff]  }
  0x15   :  { %1317 = vmatpush3.bf16.msra.mxu1 %v1411_v19  ;;  %1290 = vmatprep.subr.bf16.mxu0 %v1412_v20  ;;  %v250_v19 = vmax.f32 %v242_v10, 0.0  ;;  %v252_v20 = vmax.f32 %v244_v11, 0.0  ;;  %v1450_v42 = vld [vmem:[%s1876_s1 + $0x130] sm:$0xff]   ;;  %v1453_v45 = vld [vmem:[%s1876_s1 + $0x1f8] sm:$0xff]   ;;  %v1132_v48 = vld [vmem:[%s1877_s0 + $0x40] sm:$0xff] }
  0x16   :  { %1318 = vmatprep.subr.bf16.mxu1 %v1413_v21  ;;  %v1433_v21 = vld [vmem:[%s1876_s1 + $0x1d0] sm:$0xff]   ;;  %v1454_v46 = vld [vmem:[%s1876_s1 + $0x138] sm:$0xff]   ;;  %v457_v51 = vunpack.c.h.bf16 %v1132_v48  ;;  %v1188_v52 = vld [vmem:[%s1877_s0 + $0x60] sm:$0xff] }
  0x17   :  { %v1451_v43 = vld [vmem:[%s1876_s1 + $0x1b0] sm:$0xff]   ;;  %v1455_v47 = vld [vmem:[%s1876_s1 + $0x1b8] sm:$0xff]   ;;  %v1189_v53 = vld [vmem:[%s1877_s0 + $0x68] sm:$0xff]  ;;  %v675_v57 = vunpack.c.h.bf16 %v1188_v52 }
  0x18   :  { %1291 = vmatpush3.bf16.msra.mxu0 %v1414_v22  ;;  %v1434_v22 = vld [vmem:[%s1876_s1 + $0x110] sm:$0xff]   ;;  %v1191_v1 = vld [vmem:[%s1877_s0 + $0x78] sm:$0xff] }
  0x19   :  { %1319 = vmatpush3.bf16.msra.mxu1 %v1415_v23  ;;  %1292 = vmatprep.subr.bf16.mxu0 %v1416_v24  ;;  %v41_v23 = vpack.c.bf16 %v37_v14, %v35_v13  ;;  %v40_v24 = vpack.c.bf16 %v36_v16, %v34_v15  ;;  %v1190_v0 = vld [vmem:[%s1877_s0 + $0x70] sm:$0xff]  ;;  %v683_v5 = vmax.f32 %v675_v57, 0.0  ;;  %v681_v13 = vunpack.c.h.bf16 %v1191_v1 }
  0x1a   :  { %1320 = vmatprep.subr.bf16.mxu1 %v1417_v25  ;;  %v257_v25 = vpack.c.bf16 %v253_v18, %v251_v17 }
  0x1c   :  { %1293 = vmatpush3.bf16.msra.mxu0 %v1418_v26  ;;  %v256_v26 = vpack.c.bf16 %v252_v20, %v250_v19  ;;  %v689_v19 = vmax.f32 %v681_v13, 0.0 }
  0x1d   :  { %1321 = vmatpush3.bf16.msra.mxu1 %v1419_v27  ;;  %1294 = vmatprep.subr.bf16.mxu0 %v1420_v28  ;;  %v1435_v27 = vld [vmem:[%s1876_s1 + $0x190] sm:$0xff]   ;;  %v1436_v28 = vld [vmem:[%s1876_s1 + $0x158] sm:$0xff]  }
  0x1e   :  { %1322 = vmatprep.subr.bf16.mxu1 %v1421_v29  ;;  %v1437_v29 = vld [vmem:[%s1876_s1 + $0x1d8] sm:$0xff]  }
  0x20   :  { %1295 = vmatpush3.bf16.msra.mxu0 %v1422_v30  ;;  %v1438_v30 = vld [vmem:[%s1876_s1 + $0x118] sm:$0xff]  }
  0x21   :  { %1323 = vmatpush3.bf16.msra.mxu1 %v1423_v31  ;;  %1336 = vmatprep.subr.bf16.mxu0 %v1424_v44  ;;  %v1439_v31 = vld [vmem:[%s1876_s1 + $0x198] sm:$0xff]  }
  0x22   :  { %1364 = vmatprep.subr.bf16.mxu1 %v1425_v49  ;;  %v1452_v44 = vld [vmem:[%s1876_s1 + $0x178] sm:$0xff]   ;;  %v1133_v49 = vld [vmem:[%s1877_s0 + $0x48] sm:$0xff] }
  0x23   :  { %203 = vmatmul.mubr.bf16.vlgmr.msra.gmra.mrb[0].mxu0 %v38_v56  ;;  %v458_v54 = vunpack.c.l.bf16 %v1133_v49  ;;  %v459_v55 = vunpack.c.h.bf16 %v1133_v49  ;;  %v674_v56 = vunpack.c.l.bf16 %v1188_v52 }
  0x24   :  { %420 = vmatmul.mubr.bf16.vlgmr.msra.gmra.mrb[0].mxu1 %v254_v58  ;;  %1337 = vmatpush3.bf16.msra.mxu0 %v1426_v50  ;;  %v456_v50 = vunpack.c.l.bf16 %v1132_v48  ;;  %v1134_v58 = vld [vmem:[%s1877_s0 + $0x50] sm:$0xff] }
  0x25   :  { %1365 = vmatpush3.bf16.msra.mxu1 %v1427_v59  ;;  %1338 = vmatprep.subr.bf16.mxu0 %v1428_v60  ;;  %v1135_v59 = vld [vmem:[%s1877_s0 + $0x58] sm:$0xff]  ;;  %v466_v2 = vmax.f32 %v458_v54, 0.0  ;;  %v467_v3 = vmax.f32 %v459_v55, 0.0  ;;  %v682_v4 = vmax.f32 %v674_v56, 0.0  ;;  %v461_v8 = vunpack.c.h.bf16 %v1134_v58 }
  0x26   :  { %1366 = vmatprep.subr.bf16.mxu1 %v1429_v61  ;;  %210 = vmatprep.mubr.bf16.mxu0 %v41_v23  ;;  %v464_v60 = vmax.f32 %v456_v50, 0.0  ;;  %v465_v61 = vmax.f32 %v457_v51, 0.0  ;;  %v463_v9 = vunpack.c.h.bf16 %v1135_v59  ;;  %v460_v20 = vunpack.c.l.bf16 %v1134_v58 }
  0x27   :  { %427 = vmatprep.mubr.bf16.mxu1 %v257_v25  ;;  %v469_v16 = vmax.f32 %v461_v8, 0.0  ;;  %v678_v23 = vunpack.c.l.bf16 %v1190_v0 }
  0x28   :  { %1339 = vmatpush3.bf16.msra.mxu0 %v1430_v62  ;;  %v676_v62 = vunpack.c.l.bf16 %v1189_v53  ;;  %v472_v10 = vpack.c.bf16 %v466_v2, %v464_v60  ;;  %v473_v11 = vpack.c.bf16 %v467_v3, %v465_v61  ;;  %v471_v17 = vmax.f32 %v463_v9, 0.0 }
  0x29   :  { %1367 = vmatpush3.bf16.msra.mxu1 %v1431_v63  ;;  %1340 = vmatprep.subr.bf16.mxu0 %v1432_v12  ;;  %v677_v63 = vunpack.c.h.bf16 %v1189_v53  ;;  %v679_v12 = vunpack.c.h.bf16 %v1190_v0 }
  0x2a   :  { %1368 = vmatprep.subr.bf16.mxu1 %v1433_v21  ;;  %v684_v6 = vmax.f32 %v676_v62, 0.0  ;;  %v462_v21 = vunpack.c.l.bf16 %v1135_v59 }
  0x2b   :  { %211 = vmatmul.mubr.bf16.gmra.mrb[4].mxu0 %v40_v24  ;;  %v685_v7 = vmax.f32 %v677_v63, 0.0  ;;  %v687_v18 = vmax.f32 %v679_v12, 0.0  ;;  %v680_v24 = vunpack.c.l.bf16 %v1191_v1 }
  0x2c   :  { %1341 = vmatpush3.bf16.msra.mxu0 %v1434_v22  ;;  %428 = vmatmul.mubr.bf16.gmra.mrb[4].mxu1 %v256_v26  ;;  %v690_v14 = vpack.c.bf16 %v684_v6, %v682_v4  ;;  %v475_v22 = vpack.c.bf16 %v471_v17, %v469_v16  ;;  %v468_v26 = vmax.f32 %v460_v20, 0.0 }
  0x2d   :  { %1342 = vmatprep.subr.bf16.mxu0 %v1436_v28  ;;  %1369 = vmatpush3.bf16.msra.mxu1 %v1435_v27  ;;  %v691_v15 = vpack.c.bf16 %v685_v7, %v683_v5  ;;  %v693_v25 = vpack.c.bf16 %v689_v19, %v687_v18  ;;  %v470_v27 = vmax.f32 %v462_v21, 0.0  ;;  %v686_v28 = vmax.f32 %v678_v23, 0.0 }
  0x2e   :  { %1370 = vmatprep.subr.bf16.mxu1 %v1437_v29  ;;  %637 = vmatprep.mubr.bf16.mxu0 %v473_v11  ;;  %v688_v29 = vmax.f32 %v680_v24, 0.0 }
  0x2f   :  { %855 = vmatprep.mubr.bf16.mxu1 %v691_v15 }
  0x30   :  { %1343 = vmatpush3.bf16.msra.mxu0 %v1438_v30  ;;  %v474_v30 = vpack.c.bf16 %v470_v27, %v468_v26 }
  0x31   :  { %1344 = vmatprep.subr.bf16.mxu0 %v1440_v32  ;;  %1371 = vmatpush3.bf16.msra.mxu1 %v1439_v31  ;;  %v692_v31 = vpack.c.bf16 %v688_v29, %v686_v28 }
  0x32   :  { %1372 = vmatprep.subr.bf16.mxu1 %v1441_v33 }
  0x34   :  { %1345 = vmatpush3.bf16.msra.mxu0 %v1442_v34 }
  0x35   :  { %1346 = vmatprep.subr.bf16.mxu0 %v1444_v36  ;;  %1373 = vmatpush3.bf16.msra.mxu1 %v1443_v35 }
  0x36   :  { %1374 = vmatprep.subr.bf16.mxu1 %v1445_v37 }
  0x38   :  { %1347 = vmatpush3.bf16.msra.mxu0 %v1446_v38 }
  0x39   :  { %1348 = vmatprep.subr.bf16.mxu0 %v1448_v40  ;;  %1375 = vmatpush3.bf16.msra.mxu1 %v1447_v39 }
  0x3a   :  { %1376 = vmatprep.subr.bf16.mxu1 %v1449_v41 }
  0x3c   :  { %1349 = vmatpush3.bf16.msra.mxu0 %v1450_v42 }
  0x3d   :  { %1350 = vmatprep.subr.bf16.mxu0 %v1452_v44  ;;  %1377 = vmatpush3.bf16.msra.mxu1 %v1451_v43 }
  0x3e   :  { %1378 = vmatprep.subr.bf16.mxu1 %v1453_v45 }
  0x40   :  { %1351 = vmatpush3.bf16.msra.mxu0 %v1454_v46 }
  0x41   :  { %1379 = vmatpush3.bf16.msra.mxu1 %v1455_v47 }
  0x43   :  { %638 = vmatmul.mubr.bf16.vlgmr.msra.gmra.mrb[8].mxu0 %v472_v10 }
  0x44   :  { %856 = vmatmul.mubr.bf16.vlgmr.msra.gmra.mrb[8].mxu1 %v690_v14  ;;  %645 = vmatprep.mubr.bf16.mxu0 %v475_v22 }
  0x45   :  { %863 = vmatprep.mubr.bf16.mxu1 %v693_v25 }
  0x4b   :  { %646 = vmatmul.mubr.bf16.gmra.mrb[12].mxu0 %v474_v30 }
  0x4c   :  { %864 = vmatmul.mubr.bf16.gmra.mrb[12].mxu1 %v692_v31 }
  0xf6   :  { %v1296_v32 = vpop.f32.mrb[0].mxu0 }
  0xf7   :  { %v1324_v33 = vpop.f32.mrb[0].mxu1  ;;  %v1297_v34 = vpop.f32.mrb[1].mxu0 }
  0xf8   :  { %v1723_v35 = vadd.f32 %v1297_v34, %v1296_v32  ;;  %v1325_v36 = vpop.f32.mrb[1].mxu1  ;;  %v1299_v37 = vpop.f32.mrb[2].mxu0 }
  0xf9   :  { %v1725_v38 = vadd.f32 %v1325_v36, %v1324_v33  ;;  %v1327_v39 = vpop.f32.mrb[2].mxu1  ;;  %v1300_v40 = vpop.f32.mrb[3].mxu0 }
  0xfa   :  { %v1727_v41 = vadd.f32 %v1300_v40, %v1299_v37  ;;  %v1328_v42 = vpop.f32.mrb[3].mxu1 }
  0xfb   :  { %v1729_v43 = vadd.f32 %v1328_v42, %v1327_v39 }
  0xfc   :  { %v223_v56 = vadd.f32 %v1727_v41, %v1723_v35 }
  0xfd   :  { %v441_v57 = vadd.f32 %v1729_v43, %v1725_v38 }
  0xfe   :  { %v1302_v44 = vpop.f32.mrb[4].mxu0 }
  0xff   :  { %v1330_v45 = vpop.f32.mrb[4].mxu1  ;;  %v1303_v46 = vpop.f32.mrb[5].mxu0 }
 0x100   :  { %v1731_v47 = vadd.f32 %v1303_v46, %v1302_v44  ;;  %v1331_v48 = vpop.f32.mrb[5].mxu1  ;;  %v1305_v49 = vpop.f32.mrb[6].mxu0 }
 0x101   :  { %v1733_v50 = vadd.f32 %v1331_v48, %v1330_v45  ;;  %v1333_v51 = vpop.f32.mrb[6].mxu1  ;;  %v1306_v52 = vpop.f32.mrb[7].mxu0 }
 0x102   :  { %v1735_v53 = vadd.f32 %v1306_v52, %v1305_v49  ;;  %v1334_v54 = vpop.f32.mrb[7].mxu1  ;;  %v224_v58 = vadd.f32 %v1731_v47, %v223_v56 }
 0x103   :  { %v1737_v55 = vadd.f32 %v1334_v54, %v1333_v51  ;;  %v442_v59 = vadd.f32 %v1733_v50, %v441_v57 }
 0x104   :  { %v225_v60 = vadd.f32 %v1735_v53, %v224_v58 }
 0x105   :  { %v443_v61 = vadd.f32 %v1737_v55, %v442_v59 }
 0x106   :  { %v226_v1 = vrot.slane %v225_v60, 4 }
 0x107   :  { %v444_v2 = vrot.slane %v443_v61, 4 }
 0x108   :  { %v227_v12 = vadd.f32 %v226_v1, %v225_v60 }
 0x109   :  { %v445_v13 = vadd.f32 %v444_v2, %v443_v61 }
 0x10a   :  { %v228_v17 = vrot.slane %v227_v12, 2 }
 0x10b   :  { %v446_v18 = vrot.slane %v445_v13, 2 }
 0x10c   :  { %v229_v32 = vadd.f32 %v228_v17, %v227_v12 }
 0x10d   :  { %v447_v33 = vadd.f32 %v446_v18, %v445_v13 }
 0x10e   :  { %v230_v40 = vrot.slane %v229_v32, 1 }
 0x10f   :  { %v448_v42 = vrot.slane %v447_v33, 1 }
 0x110   :  { %v231_v49 = vadd.f32 %v230_v40, %v229_v32 }
 0x111   :  { %v449_v51 = vadd.f32 %v448_v42, %v447_v33 }
 0x113   :  { %v450_v58 = vadd.f32 %v449_v51, %v231_v49 }
 0x116   :  { %v1352_v62 = vpop.f32.mrb[8].mxu0 }
 0x117   :  { %v1380_v63 = vpop.f32.mrb[8].mxu1  ;;  %v1353_v0 = vpop.f32.mrb[9].mxu0 }
 0x118   :  { %v1747_v3 = vadd.f32 %v1353_v0, %v1352_v62  ;;  %v1381_v4 = vpop.f32.mrb[9].mxu1  ;;  %v1355_v5 = vpop.f32.mrb[10].mxu0 }
 0x119   :  { %v1749_v6 = vadd.f32 %v1381_v4, %v1380_v63  ;;  %v1383_v7 = vpop.f32.mrb[10].mxu1  ;;  %v1356_v8 = vpop.f32.mrb[11].mxu0 }
 0x11a   :  { %v1751_v9 = vadd.f32 %v1356_v8, %v1355_v5  ;;  %v1384_v10 = vpop.f32.mrb[11].mxu1 }
 0x11b   :  { %v1753_v11 = vadd.f32 %v1384_v10, %v1383_v7 }
 0x11c   :  { %v659_v19 = vadd.f32 %v1751_v9, %v1747_v3 }
 0x11d   :  { %v877_v23 = vadd.f32 %v1753_v11, %v1749_v6 }
 0x11e   :  { %v1358_v14 = vpop.f32.mrb[12].mxu0 }
 0x11f   :  { %v1386_v15 = vpop.f32.mrb[12].mxu1  ;;  %v1359_v16 = vpop.f32.mrb[13].mxu0 }
 0x120   :  { %v1757_v20 = vadd.f32 %v1359_v16, %v1358_v14  ;;  %v1387_v21 = vpop.f32.mrb[13].mxu1  ;;  %v1361_v22 = vpop.f32.mrb[14].mxu0 }
 0x121   :  { %v1761_v24 = vadd.f32 %v1387_v21, %v1386_v15  ;;  %v1389_v25 = vpop.f32.mrb[14].mxu1  ;;  %v1362_v26 = vpop.f32.mrb[15].mxu0 }
 0x122   :  { %v660_v27 = vadd.f32 %v1757_v20, %v659_v19  ;;  %v1764_v28 = vadd.f32 %v1362_v26, %v1361_v22  ;;  %v1390_v29 = vpop.f32.mrb[15].mxu1 }
 0x123   :  { %v878_v30 = vadd.f32 %v1761_v24, %v877_v23  ;;  %v1767_v31 = vadd.f32 %v1390_v29, %v1389_v25 }
 0x124   :  { %v661_v34 = vadd.f32 %v1764_v28, %v660_v27 }
 0x125   :  { %v879_v36 = vadd.f32 %v1767_v31, %v878_v30 }
 0x126   :  { %v662_v37 = vrot.slane %v661_v34, 4 }
 0x127   :  { %v880_v39 = vrot.slane %v879_v36, 4 }
 0x128   :  { %v663_v44 = vadd.f32 %v662_v37, %v661_v34 }
 0x129   :  { %v881_v45 = vadd.f32 %v880_v39, %v879_v36 }
 0x12a   :  { %v664_v46 = vrot.slane %v663_v44, 2 }
 0x12b   :  { %v882_v48 = vrot.slane %v881_v45, 2 }
 0x12c   :  { %v665_v52 = vadd.f32 %v664_v46, %v663_v44 }
 0x12d   :  { %v883_v54 = vadd.f32 %v882_v48, %v881_v45 }
 0x12e   :  { %v666_v56 = vrot.slane %v665_v52, 1 }
 0x12f   :  { %v884_v57 = vrot.slane %v883_v54, 1 }
 0x130   :  { %v667_v59 = vadd.f32 %v666_v56, %v665_v52 }
 0x131   :  { %v885_v61 = vadd.f32 %v884_v57, %v883_v54 }
 0x132   :  { %v668_v60 = vadd.f32 %v667_v59, %v450_v58 }
 0x134   :  { %v886_v62 = vadd.f32 %v885_v61, %v668_v60 }
 0x136   :  { %v1771_v63 = vmul.f32 0.0078125, %v886_v62 }
 0x138   :  { %v892_v0 = vsub.f32 %v1723_v35, %v1771_v63  ;;  %v893_v1 = vsub.f32 %v1727_v41, %v1771_v63  ;;  %v894_v2 = vsub.f32 %v1731_v47, %v1771_v63  ;;  %v895_v4 = vsub.f32 %v1735_v53, %v1771_v63 }
 0x139   :  { %v914_v5 = vsub.f32 %v1725_v38, %v1771_v63  ;;  %v915_v7 = vsub.f32 %v1729_v43, %v1771_v63  ;;  %v916_v8 = vsub.f32 %v1733_v50, %v1771_v63  ;;  %v917_v14 = vsub.f32 %v1737_v55, %v1771_v63 }
 0x13a   :  { %v896_v10 = vmul.f32 %v892_v0, %v892_v0  ;;  %v897_v12 = vmul.f32 %v893_v1, %v893_v1  ;;  %v898_v13 = vmul.f32 %v894_v2, %v894_v2  ;;  %v899_v15 = vmul.f32 %v895_v4, %v895_v4 }
 0x13b   :  { %v918_v16 = vmul.f32 %v914_v5, %v914_v5  ;;  %v919_v17 = vmul.f32 %v915_v7, %v915_v7  ;;  %v920_v18 = vmul.f32 %v916_v8, %v916_v8  ;;  %v936_v21 = vsub.f32 %v1747_v3, %v1771_v63 }
 0x13c   :  { %v900_v19 = vadd.f32 %v897_v12, %v896_v10  ;;  %v937_v22 = vsub.f32 %v1751_v9, %v1771_v63  ;;  %v938_v23 = vsub.f32 %v1757_v20, %v1771_v63  ;;  %v939_v26 = vsub.f32 %v1764_v28, %v1771_v63 }
 0x13d   :  { %v922_v25 = vadd.f32 %v919_v17, %v918_v16  ;;  %v958_v27 = vsub.f32 %v1749_v6, %v1771_v63  ;;  %v959_v29 = vsub.f32 %v1753_v11, %v1771_v63  ;;  %v921_v32 = vmul.f32 %v917_v14, %v917_v14 }
 0x13e   :  { %v901_v30 = vadd.f32 %v900_v19, %v898_v13  ;;  %v940_v33 = vmul.f32 %v936_v21, %v936_v21  ;;  %v941_v34 = vmul.f32 %v937_v22, %v937_v22  ;;  %v942_v37 = vmul.f32 %v938_v23, %v938_v23 }
 0x13f   :  { %v923_v36 = vadd.f32 %v922_v25, %v920_v18  ;;  %v960_v39 = vsub.f32 %v1761_v24, %v1771_v63  ;;  %v961_v40 = vsub.f32 %v1767_v31, %v1771_v63  ;;  %v962_v45 = vmul.f32 %v958_v27, %v958_v27 }
 0x140   :  { %v902_v42 = vadd.f32 %v901_v30, %v899_v15  ;;  %v944_v44 = vadd.f32 %v941_v34, %v940_v33  ;;  %v963_v46 = vmul.f32 %v959_v29, %v959_v29  ;;  %v943_v49 = vmul.f32 %v939_v26, %v939_v26 }
 0x141   :  { %v924_v48 = vadd.f32 %v923_v36, %v921_v32  ;;  %v964_v54 = vmul.f32 %v960_v39, %v960_v39  ;;  %v965_v60 = vmul.f32 %v961_v40, %v961_v40  ;;  %v985_v34 = vlaneseq }
 0x142   :  { %v903_v51 = vrot.slane %v902_v42, 4  ;;  %v945_v52 = vadd.f32 %v944_v44, %v942_v37  ;;  %v966_v56 = vadd.f32 %v963_v46, %v962_v45  ;;  %v977_v37 = vld [vmem:[%s1878_s2] sm:$0x1] }
 0x143   :  { %v925_v57 = vrot.slane %v924_v48, 4  ;;  %v986_v36 = vshrl.u32 %v985_v34, 7  ;;  %v981_v44 = vld [vmem:[%s1879_s3] sm:$0x1] }
 0x144   :  { %v904_v58 = vadd.f32 %v903_v51, %v902_v42  ;;  %v946_v59 = vadd.f32 %v945_v52, %v943_v49  ;;  %v967_v61 = vadd.f32 %v966_v56, %v964_v54 }
 0x145   :  { %v926_v62 = vadd.f32 %v925_v57, %v924_v48  ;;  %v987_v39 = vsub.s32 0, %v986_v36 }
 0x146   :  { %v905_v0 = vrot.slane %v904_v58, 2  ;;  %v947_v1 = vrot.slane %v946_v59, 4  ;;  %v968_v2 = vadd.f32 %v967_v61, %v965_v60 }
 0x147   :  { %v927_v4 = vrot.slane %v926_v62, 2 }
 0x148   :  { %v906_v5 = vadd.f32 %v905_v0, %v904_v58  ;;  %v948_v7 = vadd.f32 %v947_v1, %v946_v59  ;;  %v969_v8 = vrot.slane %v968_v2, 4 }
 0x149   :  { %v928_v10 = vadd.f32 %v927_v4, %v926_v62 }
 0x14a   :  { %v907_v12 = vrot.slane %v906_v5, 1  ;;  %v949_v13 = vrot.slane %v948_v7, 2  ;;  %v970_v14 = vadd.f32 %v969_v8, %v968_v2 }
 0x14b   :  { %v929_v15 = vrot.slane %v928_v10, 1 }
 0x14c   :  { %v908_v16 = vadd.f32 %v907_v12, %v906_v5  ;;  %v950_v17 = vadd.f32 %v949_v13, %v948_v7  ;;  %v971_v18 = vrot.slane %v970_v14, 2 }
 0x14d   :  { %v930_v19 = vadd.f32 %v929_v15, %v928_v10 }
 0x14e   :  { %v951_v21 = vrot.slane %v950_v17, 1  ;;  %v972_v22 = vadd.f32 %v971_v18, %v970_v14 }
 0x14f   :  { %v931_v23 = vadd.f32 %v930_v19, %v908_v16 }
 0x150   :  { %v952_v25 = vadd.f32 %v951_v21, %v950_v17  ;;  %v973_v26 = vrot.slane %v972_v22, 1 }
 0x152   :  { %v953_v27 = vadd.f32 %v952_v25, %v931_v23  ;;  %v974_v29 = vadd.f32 %v973_v26, %v972_v22 }
 0x154   :  { %v975_v30 = vadd.f32 %v974_v29, %v953_v27 }
 0x156   :  { %v976_v32 = vmul.f32 0.0078125, %v975_v30 }
 0x158   :  { %v978_v33 = vadd.f32 1e-05, %v976_v32 }
 0x15a   :  { %1456 = vrsqrt.f32 %v978_v33 }
 0x164   :  { %v1457_v40 = vpop.eup %1456 }
 0x165   :  { %v980_v42 = vmul.f32 %v1457_v40, %v977_v37 }
 0x167   :  { %v982_v45 = vmul.f32 %v980_v42, %v1771_v63  ;;  %v988_v46 = vrot.slane %v980_v42, %v987_v39 }
 0x169   :  { %v983_v48 = vsub.f32 %v981_v44, %v982_v45  ;;  %v990_v49 = vmul.f32 %v1723_v35, %v988_v46  ;;  %v991_v51 = vmul.f32 %v1727_v41, %v988_v46  ;;  %v992_v52 = vmul.f32 %v1731_v47, %v988_v46 }
 0x16a   :  { %v993_v54 = vmul.f32 %v1735_v53, %v988_v46  ;;  %v1012_v56 = vmul.f32 %v1725_v38, %v988_v46  ;;  %v1013_v57 = vmul.f32 %v1729_v43, %v988_v46  ;;  %v1014_v58 = vmul.f32 %v1733_v50, %v988_v46 }
 0x16b   :  { %v998_v59 = vrot.slane %v983_v48, %v987_v39  ;;  %v1015_v60 = vmul.f32 %v1737_v55, %v988_v46  ;;  %v1028_v63 = vmul.f32 %v1747_v3, %v988_v46  ;;  %v1029_v61 = vmul.f32 %v1751_v9, %v988_v46 }
 0x16c   :  { %v1030_v35 = vmul.f32 %v1757_v20, %v988_v46  ;;  %v1031_v41 = vmul.f32 %v1764_v28, %v988_v46  ;;  %v1044_v47 = vmul.f32 %v1749_v6, %v988_v46  ;;  %v1045_v53 = vmul.f32 %v1753_v11, %v988_v46 }
 0x16d   :  { %v1000_v38 = vadd.f32 %v998_v59, %v990_v49  ;;  %v1001_v62 = vadd.f32 %v998_v59, %v991_v51  ;;  %v1002_v43 = vadd.f32 %v998_v59, %v992_v52  ;;  %v1003_v0 = vadd.f32 %v998_v59, %v993_v54 }
 0x16e   :  { %v1016_v50 = vadd.f32 %v1012_v56, %v998_v59  ;;  %v1017_v1 = vadd.f32 %v1013_v57, %v998_v59  ;;  %v1018_v2 = vadd.f32 %v1014_v58, %v998_v59  ;;  %v1019_v55 = vadd.f32 %v1015_v60, %v998_v59 }
 0x16f   :  { %1004 = vst [vmem:[%s1880_s4] sm:$0xff] %v1000_v38  ;;  %1005 = vst [vmem:[%s1880_s4 + $0x8] sm:$0xff] %v1001_v62  ;;  %v1032_v3 = vadd.f32 %v1028_v63, %v998_v59  ;;  %v1033_v6 = vadd.f32 %v1029_v61, %v998_v59  ;;  %v1034_v9 = vadd.f32 %v1030_v35, %v998_v59 }
 0x170   :  { %1006 = vst [vmem:[%s1880_s4 + $0x10] sm:$0xff] %v1002_v43  ;;  %1007 = vst [vmem:[%s1880_s4 + $0x18] sm:$0xff] %v1003_v0  ;;  %v1035_v11 = vadd.f32 %v1031_v41, %v998_v59  ;;  %v1046_v20 = vmul.f32 %v1761_v24, %v988_v46  ;;  %v1047_v28 = vmul.f32 %v1767_v31, %v988_v46 }
 0x171   :  { %1260 = vst [vmem:[%s1880_s4 + $0x20] sm:$0xff] %v1016_v50  ;;  %1261 = vst [vmem:[%s1880_s4 + $0x28] sm:$0xff] %v1017_v1  ;;  %v1048_v4 = vadd.f32 %v1044_v47, %v998_v59  ;;  %v1049_v5 = vadd.f32 %v1045_v53, %v998_v59 }
 0x172   :  { %1262 = vst [vmem:[%s1880_s4 + $0x30] sm:$0xff] %v1018_v2  ;;  %1263 = vst [vmem:[%s1880_s4 + $0x38] sm:$0xff] %v1019_v55  ;;  %v1050_v24 = vadd.f32 %v1046_v20, %v998_v59  ;;  %v1051_v31 = vadd.f32 %v1047_v28, %v998_v59 }
 0x173   :  { %1268 = vst [vmem:[%s1880_s4 + $0x40] sm:$0xff] %v1032_v3  ;;  %1269 = vst [vmem:[%s1880_s4 + $0x48] sm:$0xff] %v1033_v6 }
 0x174   :  { %1270 = vst [vmem:[%s1880_s4 + $0x50] sm:$0xff] %v1034_v9  ;;  %1271 = vst [vmem:[%s1880_s4 + $0x58] sm:$0xff] %v1035_v11 }
 0x175   :  { %1276 = vst [vmem:[%s1880_s4 + $0x60] sm:$0xff] %v1048_v4  ;;  %1277 = vst [vmem:[%s1880_s4 + $0x68] sm:$0xff] %v1049_v5 }
 0x176   :  { %1278 = vst [vmem:[%s1880_s4 + $0x70] sm:$0xff] %v1050_v24  ;;  %1279 = vst [vmem:[%s1880_s4 + $0x78] sm:$0xff] %v1051_v31 }

// kernel: _lambda_.18
= control target key start
LH: loop header
LB: loop body
LE: loop exit
PB: predicated region body
PF: predicated region fallthrough
CT: control target
= control target key end

     0   :  { %s3231_s1 = inlined_call_operand.vmem [shape: bf16[4,128,128], index: 1, kind: input, shape index: {}]   ;;  %s3232_s0 = inlined_call_operand.vmem [shape: bf16[4,128,128], index: 0, kind: input, shape index: {}]   ;;  %s3233_s2 = inlined_call_operand.vmem [shape: f32[1,128], index: 2, kind: input, shape index: {}]   ;;  %s3234_s3 = inlined_call_operand.vmem [shape: f32[1,128], index: 3, kind: input, shape index: {}]   ;;  %s3235_s4 = inlined_call_operand.vmem [shape: f32[4,128,128], index: 4, kind: output, shape index: {}]  }
   0x1   :  { %v2263_v0 = vld [vmem:[%s3231_s1] sm:$0xff]   ;;  %v2265_v2 = vld [vmem:[%s3231_s1 + $0x8] sm:$0xff]   ;;  %v2267_v4 = vld [vmem:[%s3231_s1 + $0x10] sm:$0xff]  }
   0x2   :  { %v2264_v1 = vld [vmem:[%s3231_s1 + $0x40] sm:$0xff]   ;;  %2135 = vmatprep.subr.bf16.mxu0 %v2263_v0  ;;  %v2266_v3 = vld [vmem:[%s3231_s1 + $0x48] sm:$0xff]   ;;  %v2268_v5 = vld [vmem:[%s3231_s1 + $0x50] sm:$0xff]  }
   0x3   :  { %2167 = vmatprep.subr.bf16.mxu1 %v2264_v1  ;;  %2136 = vmatpush3.bf16.msra.mxu0 %v2263_v0  ;;  %v2269_v6 = vld [vmem:[%s3231_s1 + $0x18] sm:$0xff]   ;;  %v2271_v8 = vld [vmem:[%s3231_s1 + $0x20] sm:$0xff]   ;;  %v2273_v10 = vld [vmem:[%s3231_s1 + $0x28] sm:$0xff]  }
   0x4   :  { %2168 = vmatpush3.bf16.msra.mxu1 %v2264_v1  ;;  %2137 = vmatprep.subr.bf16.mxu0 %v2265_v2  ;;  %v2270_v7 = vld [vmem:[%s3231_s1 + $0x58] sm:$0xff]   ;;  %v2272_v9 = vld [vmem:[%s3231_s1 + $0x60] sm:$0xff]   ;;  %v2274_v13 = vld [vmem:[%s3231_s1 + $0x68] sm:$0xff]  }
   0x5   :  { %2169 = vmatprep.subr.bf16.mxu1 %v2266_v3  ;;  %v1913_v11 = vld [vmem:[%s3232_s0] sm:$0xff]   ;;  %v2040_v18 = vld [vmem:[%s3232_s0 + $0x8] sm:$0xff]   ;;  %v2275_v24 = vld [vmem:[%s3231_s1 + $0x30] sm:$0xff]  }
   0x6   :  { %v2047_v12 = vld [vmem:[%s3232_s0 + $0x40] sm:$0xff]   ;;  %v1914_v14 = vunpack.c.l.bf16 %v1913_v11  ;;  %v1915_v15 = vunpack.c.h.bf16 %v1913_v11  ;;  %v2048_v23 = vld [vmem:[%s3232_s0 + $0x48] sm:$0xff]   ;;  %v2276_v25 = vld [vmem:[%s3231_s1 + $0x70] sm:$0xff]   ;;  %v1918_v28 = vunpack.c.l.bf16 %v2040_v18  ;;  %v1919_v29 = vunpack.c.h.bf16 %v2040_v18 }
   0x7   :  { %2138 = vmatpush3.bf16.msra.mxu0 %v2265_v2  ;;  %v1946_v16 = vunpack.c.l.bf16 %v2047_v12  ;;  %v1947_v17 = vunpack.c.h.bf16 %v2047_v12  ;;  %v1950_v30 = vunpack.c.l.bf16 %v2048_v23  ;;  %v1951_v31 = vunpack.c.h.bf16 %v2048_v23  ;;  %v2041_v32 = vld [vmem:[%s3232_s0 + $0x10] sm:$0xff]   ;;  %v2277_v34 = vld [vmem:[%s3231_s1 + $0x38] sm:$0xff]   ;;  %v2279_v45 = vld [vmem:[%s3231_s1 + $0x80] sm:$0xff]  }
   0x8   :  { %2170 = vmatpush3.bf16.msra.mxu1 %v2266_v3  ;;  %2139 = vmatprep.subr.bf16.mxu0 %v2267_v4  ;;  %v50_v19 = vmax.f32 %v1914_v14, 0.0  ;;  %v51_v20 = vmax.f32 %v1915_v15, 0.0  ;;  %v2049_v33 = vld [vmem:[%s3232_s0 + $0x50] sm:$0xff]   ;;  %v2278_v35 = vld [vmem:[%s3231_s1 + $0x78] sm:$0xff]   ;;  %v52_v36 = vmax.f32 %v1918_v28, 0.0  ;;  %v1922_v37 = vunpack.c.l.bf16 %v2041_v32  ;;  %v2280_v47 = vld [vmem:[%s3231_s1 + $0xc0] sm:$0xff]  }
   0x9   :  { %2171 = vmatprep.subr.bf16.mxu1 %v2268_v5  ;;  %v306_v21 = vmax.f32 %v1946_v16, 0.0  ;;  %v307_v22 = vmax.f32 %v1947_v17, 0.0  ;;  %v1923_v38 = vunpack.c.h.bf16 %v2041_v32  ;;  %v1954_v39 = vunpack.c.l.bf16 %v2049_v33  ;;  %v2042_v44 = vld [vmem:[%s3232_s0 + $0x18] sm:$0xff]   ;;  %v2043_v55 = vld [vmem:[%s3232_s0 + $0x20] sm:$0xff]   ;;  %v2281_v60 = vld [vmem:[%s3231_s1 + $0x88] sm:$0xff]  }
   0xa   :  { %v66_v26 = vpack.c.bf16 %v51_v20, %v50_v19  ;;  %v53_v40 = vmax.f32 %v1919_v29, 0.0  ;;  %v308_v41 = vmax.f32 %v1950_v30, 0.0  ;;  %v309_v42 = vmax.f32 %v1951_v31, 0.0  ;;  %v2050_v46 = vld [vmem:[%s3232_s0 + $0x58] sm:$0xff]   ;;  %v2051_v59 = vld [vmem:[%s3232_s0 + $0x60] sm:$0xff]   ;;  %v2282_v61 = vld [vmem:[%s3231_s1 + $0xc8] sm:$0xff]  }
   0xb   :  { %2140 = vmatpush3.bf16.msra.mxu0 %v2267_v4  ;;  %v322_v27 = vpack.c.bf16 %v307_v22, %v306_v21  ;;  %v1955_v43 = vunpack.c.h.bf16 %v2049_v33  ;;  %v54_v48 = vmax.f32 %v1922_v37, 0.0  ;;  %v55_v49 = vmax.f32 %v1923_v38, 0.0  ;;  %v2052_v11 = vld [vmem:[%s3232_s0 + $0x68] sm:$0xff]   ;;  %v2045_v19 = vld [vmem:[%s3232_s0 + $0x30] sm:$0xff]   ;;  %v2285_v21 = vld [vmem:[%s3231_s1 + $0x98] sm:$0xff]  }
   0xc   :  { %2172 = vmatpush3.bf16.msra.mxu1 %v2268_v5  ;;  %2141 = vmatprep.subr.bf16.mxu0 %v2269_v6  ;;  %v310_v50 = vmax.f32 %v1954_v39, 0.0  ;;  %v1926_v51 = vunpack.c.l.bf16 %v2042_v44  ;;  %v67_v52 = vpack.c.bf16 %v53_v40, %v52_v36  ;;  %v1927_v54 = vunpack.c.h.bf16 %v2042_v44  ;;  %v2046_v30 = vld [vmem:[%s3232_s0 + $0x38] sm:$0xff]   ;;  %v2287_v38 = vld [vmem:[%s3231_s1 + $0xa0] sm:$0xff]  }
   0xd   :  { %2173 = vmatprep.subr.bf16.mxu1 %v2270_v7  ;;  %2151 = vmatprep.mubr.bf16.mxu0 %v66_v26  ;;  %v311_v53 = vmax.f32 %v1955_v43, 0.0  ;;  %v323_v56 = vpack.c.bf16 %v309_v42, %v308_v41  ;;  %v1958_v57 = vunpack.c.l.bf16 %v2050_v46  ;;  %v1959_v58 = vunpack.c.h.bf16 %v2050_v46  ;;  %v2054_v31 = vld [vmem:[%s3232_s0 + $0x78] sm:$0xff]   ;;  %v2288_v42 = vld [vmem:[%s3231_s1 + $0xe0] sm:$0xff]  }
   0xe   :  { %2183 = vmatprep.mubr.bf16.mxu1 %v322_v27  ;;  %v68_v62 = vpack.c.bf16 %v55_v49, %v54_v48  ;;  %v56_v63 = vmax.f32 %v1926_v51, 0.0  ;;  %v1930_v0 = vunpack.c.l.bf16 %v2043_v55  ;;  %v1931_v1 = vunpack.c.h.bf16 %v2043_v55  ;;  %v2055_v49 = vld [vmem:[%s3232_s0 + $0x80] sm:$0xff]  }
   0xf   :  { %2142 = vmatpush3.bf16.msra.mxu0 %v2269_v6  ;;  %v324_v2 = vpack.c.bf16 %v311_v53, %v310_v50  ;;  %v57_v3 = vmax.f32 %v1927_v54, 0.0  ;;  %v1962_v4 = vunpack.c.l.bf16 %v2051_v59  ;;  %v1963_v5 = vunpack.c.h.bf16 %v2051_v59  ;;  %v2044_v6 = vld [vmem:[%s3232_s0 + $0x28] sm:$0xff]   ;;  %v2063_v51 = vld [vmem:[%s3232_s0 + $0xc0] sm:$0xff]  }
  0x10   :  { %2174 = vmatpush3.bf16.msra.mxu1 %v2270_v7  ;;  %2143 = vmatprep.subr.bf16.mxu0 %v2271_v8  ;;  %v312_v7 = vmax.f32 %v1958_v57, 0.0  ;;  %v58_v12 = vmax.f32 %v1930_v0, 0.0  ;;  %v1934_v14 = vunpack.c.l.bf16 %v2044_v6  ;;  %v1935_v18 = vunpack.c.h.bf16 %v2044_v6  ;;  %v2056_v0 = vld [vmem:[%s3232_s0 + $0x88] sm:$0xff]   ;;  %v2292_v6 = vld [vmem:[%s3231_s1 + $0xf0] sm:$0xff]  }
  0x11   :  { %2175 = vmatprep.subr.bf16.mxu1 %v2272_v9  ;;  %v69_v15 = vpack.c.bf16 %v57_v3, %v56_v63  ;;  %v314_v16 = vmax.f32 %v1962_v4, 0.0  ;;  %v315_v17 = vmax.f32 %v1963_v5, 0.0  ;;  %v1966_v22 = vunpack.c.l.bf16 %v2052_v11  ;;  %v2057_v3 = vld [vmem:[%s3232_s0 + $0x90] sm:$0xff]  }
  0x12   :  { %v1967_v23 = vunpack.c.h.bf16 %v2052_v11  ;;  %v60_v27 = vmax.f32 %v1934_v14, 0.0  ;;  %v1938_v28 = vunpack.c.l.bf16 %v2045_v19  ;;  %v1939_v29 = vunpack.c.h.bf16 %v2045_v19 }
  0x13   :  { %2144 = vmatpush3.bf16.msra.mxu0 %v2271_v8  ;;  %v313_v8 = vmax.f32 %v1959_v58, 0.0  ;;  %v326_v32 = vpack.c.bf16 %v315_v17, %v314_v16  ;;  %v61_v33 = vmax.f32 %v1935_v18, 0.0  ;;  %v316_v36 = vmax.f32 %v1966_v22, 0.0  ;;  %v2293_v18 = vld [vmem:[%s3231_s1 + $0xb8] sm:$0xff]  }
  0x14   :  { %2176 = vmatpush3.bf16.msra.mxu1 %v2272_v9  ;;  %2145 = vmatprep.subr.bf16.mxu0 %v2273_v10  ;;  %v2283_v9 = vld [vmem:[%s3231_s1 + $0x90] sm:$0xff]   ;;  %v317_v37 = vmax.f32 %v1967_v23, 0.0  ;;  %v1942_v39 = vunpack.c.l.bf16 %v2046_v30  ;;  %v1943_v40 = vunpack.c.h.bf16 %v2046_v30  ;;  %v1974_v41 = vunpack.c.l.bf16 %v2054_v31 }
  0x15   :  { %2177 = vmatprep.subr.bf16.mxu1 %v2274_v13  ;;  %v325_v20 = vpack.c.bf16 %v313_v8, %v312_v7  ;;  %v62_v43 = vmax.f32 %v1938_v28, 0.0  ;;  %v63_v44 = vmax.f32 %v1939_v29, 0.0  ;;  %v71_v46 = vpack.c.bf16 %v61_v33, %v60_v27 }
  0x16   :  { %v327_v50 = vpack.c.bf16 %v317_v37, %v316_v36  ;;  %v64_v53 = vmax.f32 %v1942_v39, 0.0  ;;  %v65_v54 = vmax.f32 %v1943_v40, 0.0  ;;  %v320_v55 = vmax.f32 %v1974_v41, 0.0  ;;  %v2067_v37 = vld [vmem:[%s3232_s0 + $0xe0] sm:$0xff]  }
  0x17   :  { %2146 = vmatpush3.bf16.msra.mxu0 %v2273_v10  ;;  %v2284_v10 = vld [vmem:[%s3231_s1 + $0xd0] sm:$0xff]   ;;  %v72_v57 = vpack.c.bf16 %v63_v44, %v62_v43  ;;  %v1978_v59 = vunpack.c.l.bf16 %v2055_v49  ;;  %v2011_v63 = vunpack.c.h.bf16 %v2063_v51  ;;  %v1986_v16 = vunpack.c.l.bf16 %v2057_v3 }
  0x18   :  { %2178 = vmatpush3.bf16.msra.mxu1 %v2274_v13  ;;  %2147 = vmatprep.subr.bf16.mxu0 %v2275_v24  ;;  %v59_v13 = vmax.f32 %v1931_v1, 0.0  ;;  %v2291_v1 = vld [vmem:[%s3231_s1 + $0xb0] sm:$0xff]   ;;  %v73_v4 = vpack.c.bf16 %v65_v54, %v64_v53  ;;  %v1987_v17 = vunpack.c.h.bf16 %v2057_v3  ;;  %v2060_v54 = vld [vmem:[%s3232_s0 + $0xa8] sm:$0xff]  }
  0x19   :  { %2179 = vmatprep.subr.bf16.mxu1 %v2276_v25  ;;  %v564_v7 = vmax.f32 %v1978_v59, 0.0  ;;  %v823_v11 = vmax.f32 %v2011_v63, 0.0  ;;  %v568_v29 = vmax.f32 %v1986_v16, 0.0  ;;  %v1999_v63 = vunpack.c.h.bf16 %v2060_v54 }
  0x1a   :  { %v70_v26 = vpack.c.bf16 %v59_v13, %v58_v12  ;;  %v1982_v12 = vunpack.c.l.bf16 %v2056_v0  ;;  %v1983_v13 = vunpack.c.h.bf16 %v2056_v0  ;;  %v569_v30 = vmax.f32 %v1987_v17, 0.0  ;;  %v2070_v17 = vld [vmem:[%s3232_s0 + $0xf8] sm:$0xff]  }
  0x1b   :  { %2148 = vmatpush3.bf16.msra.mxu0 %v2275_v24  ;;  %v2053_v24 = vld [vmem:[%s3232_s0 + $0x70] sm:$0xff]  }
  0x1c   :  { %2180 = vmatpush3.bf16.msra.mxu1 %v2276_v25  ;;  %2149 = vmatprep.subr.bf16.mxu0 %v2277_v34  ;;  %v2286_v25 = vld [vmem:[%s3231_s1 + $0xd8] sm:$0xff]  }
  0x1d   :  { %2181 = vmatprep.subr.bf16.mxu1 %v2278_v35 }
  0x1f   :  { %2150 = vmatpush3.bf16.msra.mxu0 %v2277_v34  ;;  %v1970_v34 = vunpack.c.l.bf16 %v2053_v24 }
  0x20   :  { %2182 = vmatpush3.bf16.msra.mxu1 %v2278_v35  ;;  %2199 = vmatprep.subr.bf16.mxu0 %v2279_v45  ;;  %v1971_v35 = vunpack.c.h.bf16 %v2053_v24  ;;  %v566_v24 = vmax.f32 %v1982_v12, 0.0 }
  0x21   :  { %2231 = vmatprep.subr.bf16.mxu1 %v2280_v47 }
  0x22   :  { %2152 = vmatmul.mubr.bf16.vlgmr.msra.gmra.mrb[0].mxu0 %v67_v52  ;;  %v319_v48 = vmax.f32 %v1971_v35, 0.0  ;;  %v2289_v52 = vld [vmem:[%s3231_s1 + $0xa8] sm:$0xff]  }
  0x23   :  { %2184 = vmatmul.mubr.bf16.vlgmr.msra.gmra.mrb[0].mxu1 %v323_v56  ;;  %2200 = vmatpush3.bf16.msra.mxu0 %v2279_v45  ;;  %v1975_v45 = vunpack.c.h.bf16 %v2054_v31  ;;  %v2290_v56 = vld [vmem:[%s3231_s1 + $0xe8] sm:$0xff]   ;;  %v2066_v31 = vld [vmem:[%s3232_s0 + $0xd8] sm:$0xff]  }
  0x24   :  { %2232 = vmatpush3.bf16.msra.mxu1 %v2280_v47  ;;  %2201 = vmatprep.subr.bf16.mxu0 %v2281_v60  ;;  %v318_v47 = vmax.f32 %v1970_v34, 0.0  ;;  %v2059_v34 = vld [vmem:[%s3232_s0 + $0xa0] sm:$0xff]   ;;  %v2022_v39 = vunpack.c.l.bf16 %v2066_v31  ;;  %v2023_v40 = vunpack.c.h.bf16 %v2066_v31 }
  0x25   :  { %2233 = vmatprep.subr.bf16.mxu1 %v2282_v61  ;;  %2155 = vmatprep.mubr.bf16.mxu0 %v68_v62  ;;  %v321_v58 = vmax.f32 %v1975_v45, 0.0  ;;  %v2010_v62 = vunpack.c.l.bf16 %v2063_v51  ;;  %v1994_v43 = vunpack.c.l.bf16 %v2059_v34  ;;  %v1995_v44 = vunpack.c.h.bf16 %v2059_v34 }
  0x26   :  { %2187 = vmatprep.mubr.bf16.mxu1 %v324_v2  ;;  %v2064_v2 = vld [vmem:[%s3232_s0 + $0xc8] sm:$0xff]   ;;  %v829_v51 = vmax.f32 %v2023_v40, 0.0 }
  0x27   :  { %2202 = vmatpush3.bf16.msra.mxu0 %v2281_v60  ;;  %v1979_v60 = vunpack.c.h.bf16 %v2055_v49  ;;  %v329_v5 = vpack.c.bf16 %v321_v58, %v320_v55  ;;  %v2014_v14 = vunpack.c.l.bf16 %v2064_v2  ;;  %v573_v53 = vmax.f32 %v1995_v44, 0.0  ;;  %v2068_v55 = vld [vmem:[%s3232_s0 + $0xe8] sm:$0xff]   ;;  %v2061_v58 = vld [vmem:[%s3232_s0 + $0xb0] sm:$0xff]  }
  0x28   :  { %2234 = vmatpush3.bf16.msra.mxu1 %v2282_v61  ;;  %2203 = vmatprep.subr.bf16.mxu0 %v2283_v9  ;;  %v328_v61 = vpack.c.bf16 %v319_v48, %v318_v47  ;;  %v2027_v47 = vunpack.c.h.bf16 %v2067_v37  ;;  %v2030_v0 = vunpack.c.l.bf16 %v2068_v55  ;;  %v2002_v3 = vunpack.c.l.bf16 %v2061_v58 }
  0x29   :  { %2235 = vmatprep.subr.bf16.mxu1 %v2284_v10  ;;  %v565_v8 = vmax.f32 %v1979_v60, 0.0  ;;  %v824_v27 = vmax.f32 %v2014_v14, 0.0  ;;  %v2069_v60 = vld [vmem:[%s3232_s0 + $0xf0] sm:$0xff]   ;;  %v2062_v14 = vld [vmem:[%s3232_s0 + $0xb8] sm:$0xff]  }
  0x2a   :  { %2156 = vmatmul.mubr.bf16.gmra.mrb[4].mxu0 %v69_v15  ;;  %v2015_v15 = vunpack.c.h.bf16 %v2064_v2  ;;  %v2031_v2 = vunpack.c.h.bf16 %v2068_v55  ;;  %v576_v12 = vmax.f32 %v2002_v3, 0.0 }
  0x2b   :  { %2188 = vmatmul.mubr.bf16.gmra.mrb[4].mxu1 %v325_v20  ;;  %2204 = vmatpush3.bf16.msra.mxu0 %v2283_v9  ;;  %v2065_v9 = vld [vmem:[%s3232_s0 + $0xd0] sm:$0xff]   ;;  %v580_v22 = vpack.c.bf16 %v565_v8, %v564_v7  ;;  %v2035_v7 = vunpack.c.h.bf16 %v2069_v60 }
  0x2c   :  { %2236 = vmatpush3.bf16.msra.mxu1 %v2284_v10  ;;  %2205 = vmatprep.subr.bf16.mxu0 %v2285_v21  ;;  %v822_v10 = vmax.f32 %v2010_v62, 0.0  ;;  %v2018_v19 = vunpack.c.l.bf16 %v2065_v9  ;;  %v2019_v20 = vunpack.c.h.bf16 %v2065_v9  ;;  %v825_v28 = vmax.f32 %v2015_v15, 0.0 }
  0x2d   :  { %2237 = vmatprep.subr.bf16.mxu1 %v2286_v25  ;;  %2159 = vmatprep.mubr.bf16.mxu0 %v70_v26  ;;  %v2058_v26 = vld [vmem:[%s3232_s0 + $0x98] sm:$0xff]   ;;  %v1998_v62 = vunpack.c.l.bf16 %v2060_v54  ;;  %v575_v9 = vmax.f32 %v1999_v63, 0.0  ;;  %v835_v16 = vmax.f32 %v2035_v7, 0.0 }
  0x2e   :  { %2191 = vmatprep.mubr.bf16.mxu1 %v326_v32  ;;  %v838_v23 = vpack.c.bf16 %v823_v11, %v822_v10  ;;  %v826_v32 = vmax.f32 %v2018_v19, 0.0  ;;  %v827_v33 = vmax.f32 %v2019_v20, 0.0  ;;  %v1990_v35 = vunpack.c.l.bf16 %v2058_v26 }
  0x2f   :  { %2206 = vmatpush3.bf16.msra.mxu0 %v2285_v21  ;;  %v2294_v21 = vld [vmem:[%s3231_s1 + $0xf8] sm:$0xff]   ;;  %v1991_v36 = vunpack.c.h.bf16 %v2058_v26  ;;  %v839_v41 = vpack.c.bf16 %v825_v28, %v824_v27  ;;  %v574_v8 = vmax.f32 %v1998_v62, 0.0  ;;  %v832_v10 = vmax.f32 %v2030_v0, 0.0 }
  0x30   :  { %2238 = vmatpush3.bf16.msra.mxu1 %v2286_v25  ;;  %2207 = vmatprep.subr.bf16.mxu0 %v2287_v38  ;;  %v567_v25 = vmax.f32 %v1983_v13, 0.0  ;;  %v840_v45 = vpack.c.bf16 %v827_v33, %v826_v32  ;;  %v570_v48 = vmax.f32 %v1990_v35, 0.0  ;;  %v833_v11 = vmax.f32 %v2031_v2, 0.0 }
  0x31   :  { %2239 = vmatprep.subr.bf16.mxu1 %v2288_v42  ;;  %v571_v49 = vmax.f32 %v1991_v36, 0.0  ;;  %v2006_v19 = vunpack.c.l.bf16 %v2062_v14  ;;  %v2007_v20 = vunpack.c.h.bf16 %v2062_v14 }
  0x32   :  { %2160 = vmatmul.mubr.bf16.gmra.mrb[8].mxu0 %v71_v46  ;;  %v2026_v46 = vunpack.c.l.bf16 %v2067_v37 }
  0x33   :  { %2192 = vmatmul.mubr.bf16.gmra.mrb[8].mxu1 %v327_v50  ;;  %2208 = vmatpush3.bf16.msra.mxu0 %v2287_v38  ;;  %v581_v38 = vpack.c.bf16 %v567_v25, %v566_v24  ;;  %v828_v50 = vmax.f32 %v2022_v39, 0.0  ;;  %v583_v59 = vpack.c.bf16 %v571_v49, %v570_v48  ;;  %v2039_v24 = vunpack.c.h.bf16 %v2070_v17 }
  0x34   :  { %2240 = vmatpush3.bf16.msra.mxu1 %v2288_v42  ;;  %2209 = vmatprep.subr.bf16.mxu0 %v2289_v52  ;;  %v582_v42 = vpack.c.bf16 %v569_v30, %v568_v29  ;;  %v578_v26 = vmax.f32 %v2006_v19, 0.0  ;;  %v579_v27 = vmax.f32 %v2007_v20, 0.0 }
  0x35   :  { %2241 = vmatprep.subr.bf16.mxu1 %v2290_v56  ;;  %2163 = vmatprep.mubr.bf16.mxu0 %v72_v57  ;;  %v831_v57 = vmax.f32 %v2027_v47, 0.0  ;;  %v837_v29 = vmax.f32 %v2039_v24, 0.0 }
  0x36   :  { %2195 = vmatprep.mubr.bf16.mxu1 %v328_v61  ;;  %v841_v61 = vpack.c.bf16 %v829_v51, %v828_v50  ;;  %v587_v30 = vpack.c.bf16 %v579_v27, %v578_v26 }
  0x37   :  { %2210 = vmatpush3.bf16.msra.mxu0 %v2289_v52  ;;  %v572_v52 = vmax.f32 %v1994_v43, 0.0 }
  0x38   :  { %2242 = vmatpush3.bf16.msra.mxu1 %v2290_v56  ;;  %2211 = vmatprep.subr.bf16.mxu0 %v2291_v1  ;;  %v830_v56 = vmax.f32 %v2026_v46, 0.0 }
  0x39   :  { %2243 = vmatprep.subr.bf16.mxu1 %v2292_v6 }
  0x3a   :  { %2164 = vmatmul.mubr.bf16.gmra.mrb[12].mxu0 %v73_v4  ;;  %v2003_v4 = vunpack.c.h.bf16 %v2061_v58 }
  0x3b   :  { %2196 = vmatmul.mubr.bf16.gmra.mrb[12].mxu1 %v329_v5  ;;  %2212 = vmatpush3.bf16.msra.mxu0 %v2291_v1  ;;  %v584_v1 = vpack.c.bf16 %v573_v53, %v572_v52  ;;  %v842_v5 = vpack.c.bf16 %v831_v57, %v830_v56 }
  0x3c   :  { %2244 = vmatpush3.bf16.msra.mxu1 %v2292_v6  ;;  %2213 = vmatprep.subr.bf16.mxu0 %v2293_v18  ;;  %v2034_v6 = vunpack.c.l.bf16 %v2069_v60  ;;  %v577_v13 = vmax.f32 %v2003_v4, 0.0 }
  0x3d   :  { %2245 = vmatprep.subr.bf16.mxu1 %v2294_v21  ;;  %2215 = vmatprep.mubr.bf16.mxu0 %v580_v22 }
  0x3e   :  { %2247 = vmatprep.mubr.bf16.mxu1 %v838_v23  ;;  %v834_v15 = vmax.f32 %v2034_v6, 0.0  ;;  %v586_v22 = vpack.c.bf16 %v577_v13, %v576_v12  ;;  %v2038_v23 = vunpack.c.l.bf16 %v2070_v17 }
  0x3f   :  { %2214 = vmatpush3.bf16.msra.mxu0 %v2293_v18  ;;  %v585_v18 = vpack.c.bf16 %v575_v9, %v574_v8 }
  0x40   :  { %2246 = vmatpush3.bf16.msra.mxu1 %v2294_v21  ;;  %v843_v21 = vpack.c.bf16 %v833_v11, %v832_v10  ;;  %v844_v25 = vpack.c.bf16 %v835_v16, %v834_v15  ;;  %v836_v28 = vmax.f32 %v2038_v23, 0.0 }
  0x42   :  { %2216 = vmatmul.mubr.bf16.vlgmr.msra.gmra.mrb[16].mxu0 %v581_v38  ;;  %v845_v31 = vpack.c.bf16 %v837_v29, %v836_v28 }
  0x43   :  { %2248 = vmatmul.mubr.bf16.vlgmr.msra.gmra.mrb[16].mxu1 %v839_v41  ;;  %2219 = vmatprep.mubr.bf16.mxu0 %v582_v42 }
  0x44   :  { %2251 = vmatprep.mubr.bf16.mxu1 %v840_v45 }
  0x4a   :  { %2220 = vmatmul.mubr.bf16.gmra.mrb[20].mxu0 %v583_v59 }
  0x4b   :  { %2252 = vmatmul.mubr.bf16.gmra.mrb[20].mxu1 %v841_v61  ;;  %2223 = vmatprep.mubr.bf16.mxu0 %v584_v1 }
  0x4c   :  { %2255 = vmatprep.mubr.bf16.mxu1 %v842_v5 }
  0x52   :  { %2224 = vmatmul.mubr.bf16.gmra.mrb[24].mxu0 %v585_v18 }
  0x53   :  { %2256 = vmatmul.mubr.bf16.gmra.mrb[24].mxu1 %v843_v21  ;;  %2227 = vmatprep.mubr.bf16.mxu0 %v586_v22 }
  0x54   :  { %2259 = vmatprep.mubr.bf16.mxu1 %v844_v25 }
  0x5a   :  { %2228 = vmatmul.mubr.bf16.gmra.mrb[28].mxu0 %v587_v30 }
  0x5b   :  { %2260 = vmatmul.mubr.bf16.gmra.mrb[28].mxu1 %v845_v31 }
  0xf5   :  { %v2514_v32 = vpop.f32.mrb[0].mxu0 }
  0xf6   :  { %v2516_v33 = vpop.f32.mrb[0].mxu1  ;;  %v2518_v34 = vpop.f32.mrb[1].mxu0 }
  0xf7   :  { %3294 = vst [vmem:[#allocation2_spill] sm:$0xff] %v2516_v33  ;;  %v2520_v35 = vpop.f32.mrb[1].mxu1  ;;  %v2522_v36 = vpop.f32.mrb[2].mxu0 }
  0xf8   :  { %3295 = vst [vmem:[#allocation3_spill] sm:$0xff] %v2520_v35  ;;  %v2524_v37 = vpop.f32.mrb[2].mxu1  ;;  %v2526_v38 = vpop.f32.mrb[3].mxu0 }
  0xf9   :  { %3296 = vst [vmem:[#allocation4_spill] sm:$0xff] %v2524_v37  ;;  %v251_v39 = vadd.f32 %v2526_v38, %v2518_v34  ;;  %v2530_v40 = vpop.f32.mrb[3].mxu1 }
  0xfa   :  { %3297 = vst [vmem:[#allocation5_spill] sm:$0xff] %v2530_v40  ;;  %v509_v41 = vadd.f32 %v2530_v40, %v2520_v35 }
  0xfb   :  { %v252_v42 = vadd.f32 %v2514_v32, %v251_v39 }
  0xfc   :  { %v510_v43 = vadd.f32 %v2516_v33, %v509_v41 }
  0xfd   :  { %v2536_v44 = vpop.f32.mrb[4].mxu0  ;;  %v253_v45 = vadd.f32 %v2522_v36, %v252_v42 }
  0xfe   :  { %v2539_v46 = vpop.f32.mrb[4].mxu1  ;;  %v2541_v47 = vpop.f32.mrb[5].mxu0  ;;  %v511_v48 = vadd.f32 %v2524_v37, %v510_v43 }
  0xff   :  { %v254_v49 = vadd.f32 %v253_v45, %v2541_v47  ;;  %v2545_v50 = vpop.f32.mrb[5].mxu1  ;;  %v2547_v51 = vpop.f32.mrb[6].mxu0 }
 0x100   :  { %3298 = vst [vmem:[#allocation6_spill] sm:$0xff] %v2545_v50  ;;  %v512_v52 = vadd.f32 %v511_v48, %v2545_v50  ;;  %v2550_v53 = vpop.f32.mrb[6].mxu1  ;;  %v2552_v54 = vpop.f32.mrb[7].mxu0 }
 0x101   :  { %v255_v55 = vadd.f32 %v254_v49, %v2552_v54  ;;  %v2555_v56 = vpop.f32.mrb[7].mxu1 }
 0x102   :  { %3299 = vst [vmem:[#allocation7_spill] sm:$0xff] %v2555_v56  ;;  %v513_v57 = vadd.f32 %v512_v52, %v2555_v56 }
 0x103   :  { %v256_v58 = vadd.f32 %v2536_v44, %v255_v55 }
 0x104   :  { %v514_v59 = vadd.f32 %v2539_v46, %v513_v57 }
 0x105   :  { %v2560_v60 = vpop.f32.mrb[8].mxu0  ;;  %v257_v61 = vadd.f32 %v2547_v51, %v256_v58 }
 0x106   :  { %v2563_v62 = vpop.f32.mrb[8].mxu1  ;;  %v2565_v63 = vpop.f32.mrb[9].mxu0  ;;  %v515_v0 = vadd.f32 %v2550_v53, %v514_v59 }
 0x107   :  { %v258_v1 = vadd.f32 %v257_v61, %v2565_v63  ;;  %v2569_v2 = vpop.f32.mrb[9].mxu1  ;;  %v2571_v3 = vpop.f32.mrb[10].mxu0 }
 0x108   :  { %v516_v4 = vadd.f32 %v515_v0, %v2569_v2  ;;  %v2574_v5 = vpop.f32.mrb[10].mxu1  ;;  %v2576_v6 = vpop.f32.mrb[11].mxu0 }
 0x109   :  { %v259_v7 = vadd.f32 %v258_v1, %v2576_v6  ;;  %v2579_v8 = vpop.f32.mrb[11].mxu1 }
 0x10a   :  { %v517_v9 = vadd.f32 %v516_v4, %v2579_v8 }
 0x10b   :  { %v260_v10 = vadd.f32 %v2560_v60, %v259_v7 }
 0x10c   :  { %v518_v11 = vadd.f32 %v2563_v62, %v517_v9 }
 0x10d   :  { %v2584_v12 = vpop.f32.mrb[12].mxu0  ;;  %v261_v13 = vadd.f32 %v2571_v3, %v260_v10 }
 0x10e   :  { %3300 = vst [vmem:[#allocation8_spill] sm:$0xff] %v2584_v12  ;;  %v2587_v14 = vpop.f32.mrb[12].mxu1  ;;  %v2589_v15 = vpop.f32.mrb[13].mxu0  ;;  %v519_v16 = vadd.f32 %v2574_v5, %v518_v11 }
 0x10f   :  { %v262_v17 = vadd.f32 %v261_v13, %v2589_v15  ;;  %v2593_v18 = vpop.f32.mrb[13].mxu1  ;;  %v2595_v19 = vpop.f32.mrb[14].mxu0 }
 0x110   :  { %3301 = vst [vmem:[#allocation9_spill] sm:$0xff] %v2595_v19  ;;  %v520_v20 = vadd.f32 %v519_v16, %v2593_v18  ;;  %v2598_v21 = vpop.f32.mrb[14].mxu1  ;;  %v2600_v22 = vpop.f32.mrb[15].mxu0 }
 0x111   :  { %3302 = vst [vmem:[#allocation10_spill] sm:$0xff] %v2600_v22  ;;  %v263_v23 = vadd.f32 %v262_v17, %v2600_v22  ;;  %v2603_v24 = vpop.f32.mrb[15].mxu1 }
 0x112   :  { %v521_v25 = vadd.f32 %v520_v20, %v2603_v24 }
 0x113   :  { %v264_v26 = vadd.f32 %v2584_v12, %v263_v23 }
 0x114   :  { %v522_v27 = vadd.f32 %v2587_v14, %v521_v25 }
 0x115   :  { %v265_v28 = vadd.f32 %v2595_v19, %v264_v26  ;;  %v2609_v29 = vpop.f32.mrb[16].mxu0 }
 0x116   :  { %v523_v30 = vadd.f32 %v2598_v21, %v522_v27  ;;  %v2612_v31 = vpop.f32.mrb[16].mxu1  ;;  %v2614_v39 = vpop.f32.mrb[17].mxu0 }
 0x117   :  { %3303 = vst [vmem:[#allocation11_spill] sm:$0xff] %v2612_v31  ;;  %3304 = vst [vmem:[#allocation12_spill] sm:$0xff] %v2614_v39  ;;  %v266_v41 = vrot.slane %v265_v28, 4  ;;  %v2616_v42 = vpop.f32.mrb[17].mxu1  ;;  %v2618_v43 = vpop.f32.mrb[18].mxu0 }
 0x118   :  { %3305 = vst [vmem:[#allocation13_spill] sm:$0xff] %v2616_v42  ;;  %v524_v45 = vrot.slane %v523_v30, 4  ;;  %v2620_v48 = vpop.f32.mrb[18].mxu1  ;;  %v2622_v49 = vpop.f32.mrb[19].mxu0 }
 0x119   :  { %3306 = vst [vmem:[#allocation14_spill] sm:$0xff] %v2620_v48  ;;  %3307 = vst [vmem:[#allocation15_spill] sm:$0xff] %v2622_v49  ;;  %v267_v52 = vadd.f32 %v266_v41, %v265_v28  ;;  %v767_v55 = vadd.f32 %v2622_v49, %v2614_v39  ;;  %v2626_v57 = vpop.f32.mrb[19].mxu1 }
 0x11a   :  { %3308 = vst [vmem:[#allocation16_spill] sm:$0xff] %v2626_v57  ;;  %v525_v58 = vadd.f32 %v524_v45, %v523_v30  ;;  %v1025_v59 = vadd.f32 %v2626_v57, %v2616_v42 }
 0x11b   :  { %v268_v61 = vrot.slane %v267_v52, 2  ;;  %v768_v0 = vadd.f32 %v2609_v29, %v767_v55 }
 0x11c   :  { %v526_v1 = vrot.slane %v525_v58, 2  ;;  %v1026_v4 = vadd.f32 %v2612_v31, %v1025_v59 }
 0x11d   :  { %v269_v7 = vadd.f32 %v268_v61, %v267_v52  ;;  %v2632_v9 = vpop.f32.mrb[20].mxu0  ;;  %v769_v10 = vadd.f32 %v2618_v43, %v768_v0 }
 0x11e   :  { %3309 = vst [vmem:[#allocation17_spill] sm:$0xff] %v2632_v9  ;;  %v527_v11 = vadd.f32 %v526_v1, %v525_v58  ;;  %v2635_v13 = vpop.f32.mrb[20].mxu1  ;;  %v2637_v16 = vpop.f32.mrb[21].mxu0  ;;  %v1027_v17 = vadd.f32 %v2620_v48, %v1026_v4 }
 0x11f   :  { %3310 = vst [vmem:[#allocation18_spill] sm:$0xff] %v2635_v13  ;;  %v270_v20 = vrot.slane %v269_v7, 1  ;;  %v770_v23 = vadd.f32 %v769_v10, %v2637_v16  ;;  %v2641_v25 = vpop.f32.mrb[21].mxu1  ;;  %v2643_v26 = vpop.f32.mrb[22].mxu0 }
 0x120   :  { %3311 = vst [vmem:[#allocation19_spill] sm:$0xff] %v2641_v25  ;;  %3312 = vst [vmem:[#allocation20_spill] sm:$0xff] %v2643_v26  ;;  %v528_v27 = vrot.slane %v527_v11, 1  ;;  %v1028_v28 = vadd.f32 %v1027_v17, %v2641_v25  ;;  %v2646_v30 = vpop.f32.mrb[22].mxu1  ;;  %v2648_v41 = vpop.f32.mrb[23].mxu0 }
 0x121   :  { %3313 = vst [vmem:[#allocation21_spill] sm:$0xff] %v2646_v30  ;;  %3314 = vst [vmem:[#allocation22_spill] sm:$0xff] %v2648_v41  ;;  %v271_v45 = vadd.f32 %v270_v20, %v269_v7  ;;  %v771_v52 = vadd.f32 %v770_v23, %v2648_v41  ;;  %v2651_v55 = vpop.f32.mrb[23].mxu1 }
 0x122   :  { %3315 = vst [vmem:[#allocation23_spill] sm:$0xff] %v2651_v55  ;;  %v529_v58 = vadd.f32 %v528_v27, %v527_v11  ;;  %v1029_v59 = vadd.f32 %v1028_v28, %v2651_v55 }
 0x123   :  { %v772_v61 = vadd.f32 %v2632_v9, %v771_v52 }
 0x124   :  { %v530_v0 = vadd.f32 %v529_v58, %v271_v45  ;;  %v1030_v1 = vadd.f32 %v2635_v13, %v1029_v59 }
 0x125   :  { %v2656_v4 = vpop.f32.mrb[24].mxu0  ;;  %v773_v10 = vadd.f32 %v2643_v26, %v772_v61 }
 0x126   :  { %3316 = vst [vmem:[#allocation24_spill] sm:$0xff] %v2656_v4  ;;  %v2659_v17 = vpop.f32.mrb[24].mxu1  ;;  %v2661_v25 = vpop.f32.mrb[25].mxu0  ;;  %v1031_v7 = vadd.f32 %v2646_v30, %v1030_v1 }
 0x127   :  { %3317 = vst [vmem:[#allocation25_spill] sm:$0xff] %v2659_v17  ;;  %3318 = vst [vmem:[#allocation26_spill] sm:$0xff] %v2661_v25  ;;  %v774_v20 = vadd.f32 %v773_v10, %v2661_v25  ;;  %v2665_v11 = vpop.f32.mrb[25].mxu1  ;;  %v2667_v23 = vpop.f32.mrb[26].mxu0 }
 0x128   :  { %3319 = vst [vmem:[#allocation27_spill] sm:$0xff] %v2665_v11  ;;  %3320 = vst [vmem:[#allocation28_spill] sm:$0xff] %v2667_v23  ;;  %v1032_v27 = vadd.f32 %v1031_v7, %v2665_v11  ;;  %v2670_v28 = vpop.f32.mrb[26].mxu1  ;;  %v2672_v45 = vpop.f32.mrb[27].mxu0 }
 0x129   :  { %3321 = vst [vmem:[#allocation29_spill] sm:$0xff] %v2670_v28  ;;  %3322 = vst [vmem:[#allocation30_spill] sm:$0xff] %v2672_v45  ;;  %v775_v52 = vadd.f32 %v774_v20, %v2672_v45  ;;  %v2675_v58 = vpop.f32.mrb[27].mxu1 }
 0x12a   :  { %3323 = vst [vmem:[#allocation31_spill] sm:$0xff] %v2675_v58  ;;  %v1033_v59 = vadd.f32 %v1032_v27, %v2675_v58 }
 0x12b   :  { %v776_v61 = vadd.f32 %v2656_v4, %v775_v52 }
 0x12c   :  { %v1034_v1 = vadd.f32 %v2659_v17, %v1033_v59 }
 0x12d   :  { %v2680_v10 = vpop.f32.mrb[28].mxu0  ;;  %v777_v30 = vadd.f32 %v2667_v23, %v776_v61 }
 0x12e   :  { %3324 = vst [vmem:[#allocation32_spill] sm:$0xff] %v2680_v10  ;;  %v2683_v13 = vpop.f32.mrb[28].mxu1  ;;  %v2685_v7 = vpop.f32.mrb[29].mxu0  ;;  %v1035_v11 = vadd.f32 %v2670_v28, %v1034_v1 }
 0x12f   :  { %3325 = vst [vmem:[#allocation33_spill] sm:$0xff] %v2685_v7  ;;  %v778_v20 = vadd.f32 %v777_v30, %v2685_v7  ;;  %v2689_v55 = vpop.f32.mrb[29].mxu1  ;;  %v2691_v48 = vpop.f32.mrb[30].mxu0 }
 0x130   :  { %3326 = vst [vmem:[#allocation34_spill] sm:$0xff] %v2689_v55  ;;  %3327 = vst [vmem:[#allocation35_spill] sm:$0xff] %v2691_v48  ;;  %v1036_v27 = vadd.f32 %v1035_v11, %v2689_v55  ;;  %v2694_v52 = vpop.f32.mrb[30].mxu1  ;;  %v2696_v59 = vpop.f32.mrb[31].mxu0 }
 0x131   :  { %3328 = vst [vmem:[#allocation36_spill] sm:$0xff] %v2694_v52  ;;  %3329 = vst [vmem:[#allocation37_spill] sm:$0xff] %v2696_v59  ;;  %v779_v61 = vadd.f32 %v778_v20, %v2696_v59  ;;  %v2699_v17 = vpop.f32.mrb[31].mxu1 }
 0x132   :  { %3330 = vst [vmem:[#allocation38_spill] sm:$0xff] %v2699_v17  ;;  %v1037_v58 = vadd.f32 %v1036_v27, %v2699_v17 }
 0x133   :  { %v780_v1 = vadd.f32 %v2680_v10, %v779_v61 }
 0x134   :  { %v1038_v30 = vadd.f32 %v2683_v13, %v1037_v58 }
 0x135   :  { %v781_v28 = vadd.f32 %v2691_v48, %v780_v1 }
 0x136   :  { %v1039_v7 = vadd.f32 %v2694_v52, %v1038_v30 }
 0x137   :  { %v782_v23 = vrot.slane %v781_v28, 4 }
 0x138   :  { %v1040_v11 = vrot.slane %v1039_v7, 4 }
 0x139   :  { %v783_v55 = vadd.f32 %v782_v23, %v781_v28 }
 0x13a   :  { %v1041_v4 = vadd.f32 %v1040_v11, %v1039_v7 }
 0x13b   :  { %v784_v45 = vrot.slane %v783_v55, 2 }
 0x13c   :  { %v1042_v31 = vrot.slane %v1041_v4, 2 }
 0x13d   :  { %v785_v25 = vadd.f32 %v784_v45, %v783_v55 }
 0x13e   :  { %v1043_v20 = vadd.f32 %v1042_v31, %v1041_v4 }
 0x13f   :  { %v786_v59 = vrot.slane %v785_v25, 1 }
 0x140   :  { %v1044_v26 = vrot.slane %v1043_v20, 1 }
 0x141   :  { %v787_v57 = vadd.f32 %v786_v59, %v785_v25 }
 0x142   :  { %v1045_v17 = vadd.f32 %v1044_v26, %v1043_v20 }
 0x143   :  { %v788_v27 = vadd.f32 %v787_v57, %v530_v0 }
 0x145   :  { %v1046_v61 = vadd.f32 %v1045_v17, %v788_v27 }
 0x147   :  { %v2706_v10 = vmul.f32 0.001953125, %v1046_v61 }
 0x149   :  { %v1064_v58 = vsub.f32 %v2518_v34, %v2706_v10  ;;  %v1065_v1 = vsub.f32 %v2526_v38, %v2706_v10  ;;  %v1066_v23 = vsub.f32 %v2514_v32, %v2706_v10  ;;  %v1067_v31 = vsub.f32 %v2522_v36, %v2706_v10 }
 0x14a   :  { %v1068_v57 = vsub.f32 %v2541_v47, %v2706_v10  ;;  %v1134_v0 = vsub.f32 %v2520_v35, %v2706_v10  ;;  %v1135_v4 = vsub.f32 %v2530_v40, %v2706_v10  ;;  %v1069_v17 = vsub.f32 %v2552_v54, %v2706_v10 }
 0x14b   :  { %v1080_v28 = vmul.f32 %v1064_v58, %v1064_v58  ;;  %v1081_v55 = vmul.f32 %v1065_v1, %v1065_v1  ;;  %v1082_v25 = vmul.f32 %v1066_v23, %v1066_v23  ;;  %v1083_v45 = vmul.f32 %v1067_v31, %v1067_v31 }
 0x14c   :  { %v1070_v59 = vsub.f32 %v2536_v44, %v2706_v10  ;;  %v1084_v30 = vmul.f32 %v1068_v57, %v1068_v57  ;;  %v1136_v20 = vsub.f32 %v2516_v33, %v2706_v10  ;;  %v1150_v27 = vmul.f32 %v1134_v0, %v1134_v0 }
 0x14d   :  { %v1096_v26 = vadd.f32 %v1081_v55, %v1080_v28  ;;  %v1151_v61 = vmul.f32 %v1135_v4, %v1135_v4  ;;  %v1071_v58 = vsub.f32 %v2547_v51, %v2706_v10  ;;  %v1085_v1 = vmul.f32 %v1069_v17, %v1069_v17 }
 0x14e   :  { %v1072_v28 = vsub.f32 %v2565_v63, %v2706_v10  ;;  %v1073_v55 = vsub.f32 %v2576_v6, %v2706_v10  ;;  %v1137_v31 = vsub.f32 %v2524_v37, %v2706_v10  ;;  %v1074_v57 = vsub.f32 %v2560_v60, %v2706_v10 }
 0x14f   :  { %v1097_v7 = vadd.f32 %v1096_v26, %v1082_v25  ;;  %v1075_v25 = vsub.f32 %v2571_v3, %v2706_v10  ;;  %v1086_v26 = vmul.f32 %v1070_v59, %v1070_v59  ;;  %v1076_v4 = vsub.f32 %v2589_v15, %v2706_v10 }
 0x150   :  { %v1138_v17 = vsub.f32 %v2545_v50, %v2706_v10  ;;  %v1087_v37 = vmul.f32 %v1071_v58, %v1071_v58  ;;  %v1079_v59 = vsub.f32 %v2595_v19, %v2706_v10  ;;  %v1088_v35 = vmul.f32 %v1072_v28, %v1072_v28 }
 0x151   :  { %v1098_v11 = vadd.f32 %v1097_v7, %v1083_v45  ;;  %v1152_v45 = vmul.f32 %v1136_v20, %v1136_v20  ;;  %v1166_v7 = vadd.f32 %v1151_v61, %v1150_v27  ;;  %v1204_v20 = vsub.f32 %v2614_v39, %v2706_v10 }
 0x152   :  { %v1205_v27 = vsub.f32 %v2622_v49, %v2706_v10  ;;  %v1089_v61 = vmul.f32 %v1073_v55, %v1073_v55  ;;  %v1140_v58 = vsub.f32 %v2539_v46, %v2706_v10  ;;  %v1090_v19 = vmul.f32 %v1074_v57, %v1074_v57 }
 0x153   :  { %v1099_v23 = vadd.f32 %v1098_v11, %v1084_v30  ;;  %v1077_v30 = vsub.f32 %v2600_v22, %v2706_v10  ;;  %v1078_v11 = vsub.f32 %v2584_v12, %v2706_v10  ;;  %v1167_v40 = vadd.f32 %v1166_v7, %v1152_v45 }
 0x154   :  { %v1091_v12 = vmul.f32 %v1075_v25, %v1075_v25  ;;  %v1092_v22 = vmul.f32 %v1076_v4, %v1076_v4  ;;  %v1206_v7 = vsub.f32 %v2609_v29, %v2706_v10  ;;  %v1220_v55 = vmul.f32 %v1204_v20, %v1204_v20 }
 0x155   :  { %v1100_v0 = vadd.f32 %v1099_v23, %v1085_v1  ;;  %v1139_v1 = vsub.f32 %v2555_v56, %v2706_v10  ;;  %v1153_v23 = vmul.f32 %v1137_v31, %v1137_v31  ;;  %v1093_v31 = vmul.f32 %v1077_v30, %v1077_v30 }
 0x156   :  { %v1221_v49 = vmul.f32 %v1205_v27, %v1205_v27  ;;  %v1094_v39 = vmul.f32 %v1078_v11, %v1078_v11  ;;  %v1156_v57 = vmul.f32 %v1140_v58, %v1140_v58  ;;  %v1095_v4 = vmul.f32 %v1079_v59, %v1079_v59 }
 0x157   :  { %v1101_v33 = vadd.f32 %v1100_v0, %v1086_v26  ;;  %v1154_v26 = vmul.f32 %v1138_v17, %v1138_v17  ;;  %v1168_v0 = vadd.f32 %v1167_v40, %v1153_v23  ;;  %v1142_v40 = vsub.f32 %v2569_v2, %v2706_v10 }
 0x158   :  { %v1207_v17 = vsub.f32 %v2618_v43, %v2706_v10  ;;  %v1145_v30 = vsub.f32 %v2574_v5, %v2706_v10  ;;  %v1208_v20 = vsub.f32 %v2637_v16, %v2706_v10  ;;  %v1222_v59 = vmul.f32 %v1206_v7, %v1206_v7 }
 0x159   :  { %v1102_v50 = vadd.f32 %v1101_v33, %v1087_v37  ;;  %v1141_v33 = vsub.f32 %v2550_v53, %v2706_v10  ;;  %v1155_v37 = vmul.f32 %v1139_v1, %v1139_v1  ;;  %v1169_v28 = vadd.f32 %v1168_v0, %v1154_v26 }
 0x15a   :  { %v1146_v27 = vsub.f32 %v2593_v18, %v2706_v10  ;;  %v1158_v58 = vmul.f32 %v1142_v40, %v1142_v40  ;;  %v1224_v40 = vmul.f32 %v1208_v20, %v1208_v20 }
 0x15b   :  { %v1103_v56 = vadd.f32 %v1102_v50, %v1088_v35  ;;  %v1170_v25 = vadd.f32 %v1169_v28, %v1155_v37  ;;  %v1143_v50 = vsub.f32 %v2579_v8, %v2706_v10  ;;  %v1157_v11 = vmul.f32 %v1141_v33, %v1141_v33 }
 0x15c   :  { %v1209_v37 = vsub.f32 %v2648_v41, %v2706_v10  ;;  %v1223_v33 = vmul.f32 %v1207_v17, %v1207_v17  ;;  %v1274_v17 = vsub.f32 %v2616_v42, %v2706_v10  ;;  %v3334_v42 = vld [vmem:[#allocation11_spill] sm:$0xff] }
 0x15d   :  { %v1104_v45 = vadd.f32 %v1103_v56, %v1089_v61  ;;  %v1144_v56 = vsub.f32 %v2563_v62, %v2706_v10  ;;  %v1171_v1 = vadd.f32 %v1170_v25, %v1156_v57  ;;  %v1147_v61 = vsub.f32 %v2603_v24, %v2706_v10 }
 0x15e   :  { %v1210_v57 = vsub.f32 %v2632_v9, %v2706_v10 }
 0x15f   :  { %v1105_v35 = vadd.f32 %v1104_v45, %v1090_v19  ;;  %v1236_v19 = vadd.f32 %v1221_v49, %v1220_v55  ;;  %v1172_v26 = vadd.f32 %v1171_v1, %v1157_v11  ;;  %v1149_v49 = vsub.f32 %v2598_v21, %v2706_v10  ;;  %v3331_v11 = vld [vmem:[#allocation16_spill] sm:$0xff] }
 0x160   :  { %v1159_v45 = vmul.f32 %v1143_v50, %v1143_v50  ;;  %v1275_v1 = vsub.f32 %v3331_v11, %v2706_v10  ;;  %v1225_v50 = vmul.f32 %v1209_v37, %v1209_v37  ;;  %v1276_v11 = vsub.f32 %v3334_v42, %v2706_v10  ;;  %v3335_v37 = vld [vmem:[#allocation30_spill] sm:$0xff] }
 0x161   :  { %v1106_v23 = vadd.f32 %v1105_v35, %v1091_v12  ;;  %v1237_v28 = vadd.f32 %v1236_v19, %v1222_v59  ;;  %v1148_v12 = vsub.f32 %v2587_v14, %v2706_v10  ;;  %v1173_v7 = vadd.f32 %v1172_v26, %v1158_v58  ;;  %v3332_v59 = vld [vmem:[#allocation20_spill] sm:$0xff] }
 0x162   :  { %v1211_v19 = vsub.f32 %v3332_v59, %v2706_v10  ;;  %v1162_v26 = vmul.f32 %v1146_v27, %v1146_v27  ;;  %v1292_v42 = vmul.f32 %v1276_v11, %v1276_v11  ;;  %v3342_v11 = vld [vmem:[#allocation18_spill] sm:$0xff] }
 0x163   :  { %v1107_v0 = vadd.f32 %v1106_v23, %v1092_v22  ;;  %v1238_v25 = vadd.f32 %v1237_v28, %v1223_v33  ;;  %v1160_v22 = vmul.f32 %v1144_v56, %v1144_v56  ;;  %v1174_v35 = vadd.f32 %v1173_v7, %v1159_v45  ;;  %v3333_v56 = vld [vmem:[#allocation26_spill] sm:$0xff] }
 0x164   :  { %v1212_v33 = vsub.f32 %v3333_v56, %v2706_v10  ;;  %v1226_v28 = vmul.f32 %v1210_v57, %v1210_v57 }
 0x165   :  { %v1108_v55 = vadd.f32 %v1107_v0, %v1093_v31  ;;  %v1239_v58 = vadd.f32 %v1238_v25, %v1224_v40  ;;  %v1161_v31 = vmul.f32 %v1145_v30, %v1145_v30  ;;  %v1163_v0 = vmul.f32 %v1147_v61, %v1147_v61 }
 0x166   :  { %v1175_v9 = vadd.f32 %v1174_v35, %v1160_v22  ;;  %v1213_v40 = vsub.f32 %v3335_v37, %v2706_v10  ;;  %v1227_v30 = vmul.f32 %v1211_v19, %v1211_v19  ;;  %v1164_v61 = vmul.f32 %v1148_v12, %v1148_v12  ;;  %v3336_v22 = vld [vmem:[#allocation14_spill] sm:$0xff]  ;;  %v3339_v19 = vld [vmem:[#allocation28_spill] sm:$0xff] }
 0x167   :  { %v1109_v23 = vadd.f32 %v1108_v55, %v1094_v39  ;;  %v1240_v45 = vadd.f32 %v1239_v58, %v1225_v50  ;;  %v1290_v39 = vmul.f32 %v1274_v17, %v1274_v17  ;;  %v1291_v55 = vmul.f32 %v1275_v1, %v1275_v1  ;;  %v3338_v1 = vld [vmem:[#allocation19_spill] sm:$0xff] }
 0x168   :  { %v1176_v7 = vadd.f32 %v1175_v9, %v1161_v31  ;;  %v1165_v25 = vmul.f32 %v1149_v49, %v1149_v49  ;;  %v1277_v35 = vsub.f32 %v3336_v22, %v2706_v10  ;;  %v3337_v9 = vld [vmem:[#allocation24_spill] sm:$0xff]  ;;  %v1228_v50 = vmul.f32 %v1212_v33, %v1212_v33  ;;  %v3341_v33 = vld [vmem:[#allocation33_spill] sm:$0xff] }
 0x169   :  { %v1110_v20 = vadd.f32 %v1109_v23, %v1095_v4  ;;  %v1241_v27 = vadd.f32 %v1240_v45, %v1226_v28  ;;  %v1214_v23 = vsub.f32 %v3337_v9, %v2706_v10  ;;  %v1278_v31 = vsub.f32 %v3338_v1, %v2706_v10  ;;  %v3340_v28 = vld [vmem:[#allocation23_spill] sm:$0xff] }
 0x16a   :  { %v1177_v4 = vadd.f32 %v1176_v7, %v1162_v26  ;;  %v1306_v37 = vadd.f32 %v1291_v55, %v1290_v39  ;;  %v1215_v12 = vsub.f32 %v3339_v19, %v2706_v10  ;;  %v1229_v49 = vmul.f32 %v1213_v40, %v1213_v40  ;;  %v3343_v40 = vld [vmem:[#allocation37_spill] sm:$0xff] }
 0x16b   :  { %v1111_v41 = vrot.slane %v1110_v20, 4  ;;  %v1242_v58 = vadd.f32 %v1241_v27, %v1227_v30  ;;  %v1279_v45 = vsub.f32 %v3340_v28, %v2706_v10  ;;  %v1293_v7 = vmul.f32 %v1277_v35, %v1277_v35 }
 0x16c   :  { %v1178_v17 = vadd.f32 %v1177_v4, %v1163_v0  ;;  %v1307_v22 = vadd.f32 %v1306_v37, %v1292_v42  ;;  %v1216_v0 = vsub.f32 %v3341_v33, %v2706_v10  ;;  %v1230_v30 = vmul.f32 %v1214_v23, %v1214_v23  ;;  %v3345_v23 = vld [vmem:[#allocation32_spill] sm:$0xff] }
 0x16d   :  { %v1112_v57 = vadd.f32 %v1111_v41, %v1110_v20  ;;  %v1243_v26 = vadd.f32 %v1242_v58, %v1228_v50  ;;  %v1280_v39 = vsub.f32 %v3342_v11, %v2706_v10  ;;  %v1294_v55 = vmul.f32 %v1278_v31, %v1278_v31 }
 0x16e   :  { %v1179_v20 = vadd.f32 %v1178_v17, %v1164_v61  ;;  %v1308_v1 = vadd.f32 %v1307_v22, %v1293_v7  ;;  %v1217_v50 = vsub.f32 %v3343_v40, %v2706_v10  ;;  %v1231_v58 = vmul.f32 %v1215_v12, %v1215_v12  ;;  %v3344_v61 = vld [vmem:[#allocation21_spill] sm:$0xff]  ;;  %v3346_v22 = vld [vmem:[#allocation27_spill] sm:$0xff] }
 0x16f   :  { %v1113_v41 = vrot.slane %v1112_v57, 2  ;;  %v1244_v27 = vadd.f32 %v1243_v26, %v1229_v49  ;;  %v1281_v35 = vsub.f32 %v3344_v61, %v2706_v10  ;;  %v1295_v17 = vmul.f32 %v1279_v45, %v1279_v45 }
 0x170   :  { %v1180_v4 = vadd.f32 %v1179_v20, %v1165_v25  ;;  %v1309_v33 = vadd.f32 %v1308_v1, %v1294_v55  ;;  %v1218_v25 = vsub.f32 %v3345_v23, %v2706_v10  ;;  %v1232_v49 = vmul.f32 %v1216_v0, %v1216_v0 }
 0x171   :  { %v1245_v28 = vadd.f32 %v1244_v27, %v1230_v30  ;;  %v1114_v42 = vadd.f32 %v1113_v41, %v1112_v57  ;;  %v1282_v31 = vsub.f32 %v3346_v22, %v2706_v10  ;;  %v1296_v7 = vmul.f32 %v1280_v39, %v1280_v39  ;;  %v3347_v57 = vld [vmem:[#allocation31_spill] sm:$0xff] }
 0x172   :  { %v1181_v37 = vrot.slane %v1180_v4, 4  ;;  %v1310_v11 = vadd.f32 %v1309_v33, %v1295_v17  ;;  %v1219_v12 = vsub.f32 %v2691_v48, %v2706_v10  ;;  %v1233_v30 = vmul.f32 %v1217_v50, %v1217_v50  ;;  %v3349_v50 = vld [vmem:[#allocation29_spill] sm:$0xff] }
 0x173   :  { %v1246_v26 = vadd.f32 %v1245_v28, %v1231_v58  ;;  %v1283_v45 = vsub.f32 %v3347_v57, %v2706_v10  ;;  %v1115_v1 = vrot.slane %v1114_v42, 1  ;;  %v1297_v55 = vmul.f32 %v1281_v35, %v1281_v35  ;;  %v3348_v58 = vld [vmem:[#allocation25_spill] sm:$0xff] }
 0x174   :  { %v1182_v20 = vadd.f32 %v1181_v37, %v1180_v4  ;;  %v1311_v61 = vadd.f32 %v1310_v11, %v1296_v7  ;;  %v1234_v0 = vmul.f32 %v1218_v25, %v1218_v25  ;;  %v1284_v37 = vsub.f32 %v3348_v58, %v2706_v10  ;;  %v3350_v11 = vld [vmem:[#allocation34_spill] sm:$0xff] }
 0x175   :  { %v1247_v27 = vadd.f32 %v1246_v26, %v1232_v49  ;;  %v1298_v39 = vmul.f32 %v1282_v31, %v1282_v31  ;;  %v1235_v17 = vmul.f32 %v1219_v12, %v1219_v12  ;;  %v1285_v49 = vsub.f32 %v3349_v50, %v2706_v10 }
 0x176   :  { %v1183_v41 = vrot.slane %v1182_v20, 2  ;;  %v1312_v33 = vadd.f32 %v1311_v61, %v1297_v55  ;;  %v1116_v26 = vadd.f32 %v1115_v1, %v1114_v42  ;;  %v1299_v57 = vmul.f32 %v1283_v45, %v1283_v45  ;;  %v3351_v61 = vld [vmem:[#allocation38_spill] sm:$0xff] }
 0x177   :  { %v1248_v28 = vadd.f32 %v1247_v27, %v1233_v30  ;;  %v1286_v25 = vsub.f32 %v3350_v11, %v2706_v10  ;;  %v1287_v31 = vsub.f32 %v3351_v61, %v2706_v10  ;;  %v1301_v12 = vmul.f32 %v1285_v49, %v1285_v49 }
 0x178   :  { %v1184_v4 = vadd.f32 %v1183_v41, %v1182_v20  ;;  %v1313_v23 = vadd.f32 %v1312_v33, %v1298_v39  ;;  %v1300_v20 = vmul.f32 %v1284_v37, %v1284_v37  ;;  %v1288_v42 = vsub.f32 %v2683_v13, %v2706_v10 }
 0x179   :  { %v1249_v22 = vadd.f32 %v1248_v28, %v1234_v0  ;;  %v1302_v45 = vmul.f32 %v1286_v25, %v1286_v25  ;;  %v1303_v0 = vmul.f32 %v1287_v31, %v1287_v31  ;;  %v1337_v31 = vlaneseq }
 0x17a   :  { %v1185_v48 = vrot.slane %v1184_v4, 1  ;;  %v1314_v7 = vadd.f32 %v1313_v23, %v1299_v57  ;;  %v1304_v57 = vmul.f32 %v1288_v42, %v1288_v42  ;;  %v1329_v42 = vld [vmem:[%s3233_s2] sm:$0x1] }
 0x17b   :  { %v1250_v40 = vadd.f32 %v1249_v22, %v1235_v17 }
 0x17c   :  { %v1186_v35 = vadd.f32 %v1185_v48, %v1184_v4  ;;  %v1315_v41 = vadd.f32 %v1314_v7, %v1300_v20  ;;  %v1289_v48 = vsub.f32 %v2694_v52, %v2706_v10 }
 0x17d   :  { %v1251_v30 = vrot.slane %v1250_v40, 4 }
 0x17e   :  { %v1187_v27 = vadd.f32 %v1186_v35, %v1116_v26  ;;  %v1316_v1 = vadd.f32 %v1315_v41, %v1301_v12  ;;  %v1305_v39 = vmul.f32 %v1289_v48, %v1289_v48 }
 0x17f   :  { %v1252_v55 = vadd.f32 %v1251_v30, %v1250_v40 }
 0x180   :  { %v1317_v28 = vadd.f32 %v1316_v1, %v1302_v45 }
 0x181   :  { %v1253_v22 = vrot.slane %v1252_v55, 2 }
 0x182   :  { %v1318_v4 = vadd.f32 %v1317_v28, %v1303_v0 }
 0x183   :  { %v1254_v23 = vadd.f32 %v1253_v22, %v1252_v55  ;;  %v1338_v55 = vshrl.u32 %v1337_v31, 7 }
 0x184   :  { %v1319_v33 = vadd.f32 %v1318_v4, %v1304_v57 }
 0x185   :  { %v1255_v37 = vrot.slane %v1254_v23, 1  ;;  %v1339_v45 = vsub.s32 0, %v1338_v55 }
 0x186   :  { %v1320_v49 = vadd.f32 %v1319_v33, %v1305_v39  ;;  %v3352_v33 = vld [vmem:[#allocation10_spill] sm:$0xff] }
 0x187   :  { %v1256_v17 = vadd.f32 %v1255_v37, %v1254_v23 }
 0x188   :  { %v1321_v26 = vrot.slane %v1320_v49, 4 }
 0x189   :  { %v1257_v40 = vadd.f32 %v1256_v17, %v1187_v27  ;;  %v1333_v27 = vld [vmem:[%s3234_s3] sm:$0x1] }
 0x18a   :  { %v1322_v35 = vadd.f32 %v1321_v26, %v1320_v49  ;;  %v3356_v26 = vld [vmem:[#allocation5_spill] sm:$0xff] }
 0x18c   :  { %v1323_v20 = vrot.slane %v1322_v35, 2 }
 0x18e   :  { %v1324_v25 = vadd.f32 %v1323_v20, %v1322_v35  ;;  %v3357_v35 = vld [vmem:[#allocation2_spill] sm:$0xff]  ;;  %v3358_v20 = vld [vmem:[#allocation4_spill] sm:$0xff] }
 0x190   :  { %v1325_v7 = vrot.slane %v1324_v25, 1 }
 0x192   :  { %v1326_v30 = vadd.f32 %v1325_v7, %v1324_v25  ;;  %v3359_v7 = vld [vmem:[#allocation6_spill] sm:$0xff] }
 0x194   :  { %v1327_v12 = vadd.f32 %v1326_v30, %v1257_v40 }
 0x196   :  { %v1328_v41 = vmul.f32 0.001953125, %v1327_v12  ;;  %v3360_v12 = vld [vmem:[#allocation7_spill] sm:$0xff] }
 0x198   :  { %v1330_v52 = vadd.f32 1e-05, %v1328_v41 }
 0x19a   :  { %2295 = vrsqrt.f32 %v1330_v52 }
 0x1a4   :  { %v2296_v1 = vpop.eup %2295 }
 0x1a5   :  { %v1332_v22 = vmul.f32 %v2296_v1, %v1329_v42 }
 0x1a7   :  { %v1334_v48 = vmul.f32 %v1332_v22, %v2706_v10  ;;  %v2843_v0 = vrot.slane %v1332_v22, %v1339_v45 }
 0x1a9   :  { %v1335_v28 = vsub.f32 %v1333_v27, %v1334_v48  ;;  %v1342_v52 = vmul.f32 %v2843_v0, %v2518_v34  ;;  %v1343_v23 = vmul.f32 %v2843_v0, %v2526_v38  ;;  %v1344_v57 = vmul.f32 %v2514_v32, %v2843_v0 }
 0x1aa   :  { %v1345_v4 = vmul.f32 %v2522_v36, %v2843_v0  ;;  %v1346_v37 = vmul.f32 %v2843_v0, %v2541_v47  ;;  %v1347_v10 = vmul.f32 %v2843_v0, %v2552_v54  ;;  %v1348_v39 = vmul.f32 %v2536_v44, %v2843_v0 }
 0x1ab   :  { %v1349_v34 = vmul.f32 %v2547_v51, %v2843_v0  ;;  %v1350_v38 = vmul.f32 %v2843_v0, %v2565_v63  ;;  %v1351_v32 = vmul.f32 %v2843_v0, %v2576_v6  ;;  %v1352_v36 = vmul.f32 %v2560_v60, %v2843_v0  ;;  %v3353_v51 = vld [vmem:[#allocation8_spill] sm:$0xff]  ;;  %v3354_v63 = vld [vmem:[#allocation9_spill] sm:$0xff]  ;;  %v3355_v6 = vld [vmem:[#allocation3_spill] sm:$0xff] }
 0x1ac   :  { %v1353_v47 = vmul.f32 %v2571_v3, %v2843_v0  ;;  %v1354_v54 = vmul.f32 %v2843_v0, %v2589_v15  ;;  %v1355_v44 = vmul.f32 %v2843_v0, %v3352_v33  ;;  %v1356_v17 = vmul.f32 %v3353_v51, %v2843_v0 }
 0x1ad   :  { %v1357_v49 = vmul.f32 %v3354_v63, %v2843_v0  ;;  %v2877_v40 = vrot.slane %v1335_v28, %v1339_v45  ;;  %v1412_v60 = vmul.f32 %v2843_v0, %v3355_v6  ;;  %v1413_v3 = vmul.f32 %v2843_v0, %v3356_v26 }
 0x1ae   :  { %v1414_v15 = vmul.f32 %v3357_v35, %v2843_v0  ;;  %v1415_v25 = vmul.f32 %v3358_v20, %v2843_v0  ;;  %v1416_v30 = vmul.f32 %v2843_v0, %v3359_v7  ;;  %v1417_v41 = vmul.f32 %v2843_v0, %v3360_v12  ;;  %v3361_v35 = vld [vmem:[#allocation12_spill] sm:$0xff]  ;;  %v3362_v20 = vld [vmem:[#allocation15_spill] sm:$0xff] }
 0x1af   :  { %v1364_v31 = vadd.f32 %v2877_v40, %v1342_v52  ;;  %v1365_v55 = vadd.f32 %v2877_v40, %v1343_v23  ;;  %v1366_v42 = vadd.f32 %v2877_v40, %v1344_v57  ;;  %v1367_v45 = vadd.f32 %v2877_v40, %v1345_v4 }
 0x1b0   :  { %v1368_v1 = vadd.f32 %v2877_v40, %v1346_v37  ;;  %v1369_v22 = vadd.f32 %v2877_v40, %v1347_v10  ;;  %v1370_v27 = vadd.f32 %v2877_v40, %v1348_v39  ;;  %v1371_v48 = vadd.f32 %v2877_v40, %v1349_v34 }
 0x1b1   :  { %v1372_v28 = vadd.f32 %v2877_v40, %v1350_v38  ;;  %v1373_v33 = vadd.f32 %v2877_v40, %v1351_v32  ;;  %v1374_v52 = vadd.f32 %v2877_v40, %v1352_v36  ;;  %v1375_v23 = vadd.f32 %v2877_v40, %v1353_v47  ;;  %1380 = vst [vmem:[%s3235_s4] sm:$0xff] %v1364_v31 }
 0x1b2   :  { %1381 = vst [vmem:[%s3235_s4 + $0x8] sm:$0xff] %v1365_v55  ;;  %1382 = vst [vmem:[%s3235_s4 + $0x10] sm:$0xff] %v1366_v42  ;;  %v1376_v57 = vadd.f32 %v2877_v40, %v1354_v54  ;;  %v1377_v4 = vadd.f32 %v2877_v40, %v1355_v44  ;;  %v1378_v37 = vadd.f32 %v2877_v40, %v1356_v17  ;;  %v3364_v55 = vld [vmem:[#allocation17_spill] sm:$0xff]  ;;  %v3365_v42 = vld [vmem:[#allocation30_spill] sm:$0xff] }
 0x1b3   :  { %1383 = vst [vmem:[%s3235_s4 + $0x18] sm:$0xff] %v1367_v45  ;;  %v1379_v10 = vadd.f32 %v2877_v40, %v1357_v49  ;;  %1384 = vst [vmem:[%s3235_s4 + $0x20] sm:$0xff] %v1368_v1  ;;  %v1418_v39 = vmul.f32 %v2539_v46, %v2843_v0  ;;  %v1419_v34 = vmul.f32 %v2550_v53, %v2843_v0 }
 0x1b4   :  { %1385 = vst [vmem:[%s3235_s4 + $0x28] sm:$0xff] %v1369_v22  ;;  %1386 = vst [vmem:[%s3235_s4 + $0x30] sm:$0xff] %v1370_v27  ;;  %v1420_v38 = vmul.f32 %v2843_v0, %v2569_v2  ;;  %v1421_v32 = vmul.f32 %v2843_v0, %v2579_v8  ;;  %v1422_v46 = vmul.f32 %v2563_v62, %v2843_v0  ;;  %v3366_v27 = vld [vmem:[#allocation33_spill] sm:$0xff] }
 0x1b5   :  { %1387 = vst [vmem:[%s3235_s4 + $0x38] sm:$0xff] %v1371_v48  ;;  %1388 = vst [vmem:[%s3235_s4 + $0x40] sm:$0xff] %v1372_v28  ;;  %v1423_v53 = vmul.f32 %v2574_v5, %v2843_v0  ;;  %v1424_v2 = vmul.f32 %v2843_v0, %v2593_v18  ;;  %v1425_v8 = vmul.f32 %v2843_v0, %v2603_v24  ;;  %v3367_v28 = vld [vmem:[#allocation37_spill] sm:$0xff] }
 0x1b6   :  { %1389 = vst [vmem:[%s3235_s4 + $0x48] sm:$0xff] %v1373_v33  ;;  %1390 = vst [vmem:[%s3235_s4 + $0x50] sm:$0xff] %v1374_v52  ;;  %v1426_v36 = vmul.f32 %v2587_v14, %v2843_v0  ;;  %v1427_v47 = vmul.f32 %v2598_v21, %v2843_v0  ;;  %v1428_v54 = vadd.f32 %v1412_v60, %v2877_v40 }
 0x1b7   :  { %1391 = vst [vmem:[%s3235_s4 + $0x58] sm:$0xff] %v1375_v23  ;;  %1392 = vst [vmem:[%s3235_s4 + $0x60] sm:$0xff] %v1376_v57  ;;  %v1429_v44 = vadd.f32 %v1413_v3, %v2877_v40  ;;  %v1430_v62 = vadd.f32 %v1414_v15, %v2877_v40  ;;  %v1431_v5 = vadd.f32 %v1415_v25, %v2877_v40 }
 0x1b8   :  { %1393 = vst [vmem:[%s3235_s4 + $0x68] sm:$0xff] %v1377_v4  ;;  %1394 = vst [vmem:[%s3235_s4 + $0x70] sm:$0xff] %v1378_v37  ;;  %v1432_v51 = vadd.f32 %v1416_v30, %v2877_v40  ;;  %v1433_v18 = vadd.f32 %v1417_v41, %v2877_v40  ;;  %v1434_v24 = vadd.f32 %v1418_v39, %v2877_v40  ;;  %v3363_v41 = vld [vmem:[#allocation22_spill] sm:$0xff] }
 0x1b9   :  { %1395 = vst [vmem:[%s3235_s4 + $0x78] sm:$0xff] %v1379_v10  ;;  %v1435_v17 = vadd.f32 %v1419_v34, %v2877_v40  ;;  %v1436_v14 = vadd.f32 %v1420_v38, %v2877_v40  ;;  %v1437_v21 = vadd.f32 %v1421_v32, %v2877_v40  ;;  %1832 = vst [vmem:[%s3235_s4 + $0x80] sm:$0xff] %v1428_v54  ;;  %v3370_v54 = vld [vmem:[#allocation13_spill] sm:$0xff] }
 0x1ba   :  { %1833 = vst [vmem:[%s3235_s4 + $0x88] sm:$0xff] %v1429_v44  ;;  %v1438_v63 = vadd.f32 %v1422_v46, %v2877_v40  ;;  %v1439_v49 = vadd.f32 %v1423_v53, %v2877_v40  ;;  %v1440_v6 = vadd.f32 %v1424_v2, %v2877_v40  ;;  %v1441_v60 = vadd.f32 %v1425_v8, %v2877_v40 }
 0x1bb   :  { %1834 = vst [vmem:[%s3235_s4 + $0x90] sm:$0xff] %v1430_v62  ;;  %1835 = vst [vmem:[%s3235_s4 + $0x98] sm:$0xff] %v1431_v5  ;;  %v1442_v26 = vadd.f32 %v1426_v36, %v2877_v40  ;;  %v1443_v3 = vadd.f32 %v1427_v47, %v2877_v40  ;;  %v1476_v15 = vmul.f32 %v2843_v0, %v3361_v35  ;;  %v3371_v62 = vld [vmem:[#allocation16_spill] sm:$0xff]  ;;  %v3378_v35 = vld [vmem:[#allocation27_spill] sm:$0xff] }
 0x1bc   :  { %1836 = vst [vmem:[%s3235_s4 + $0xa0] sm:$0xff] %v1432_v51  ;;  %1837 = vst [vmem:[%s3235_s4 + $0xa8] sm:$0xff] %v1433_v18  ;;  %v1477_v25 = vmul.f32 %v2843_v0, %v3362_v20  ;;  %v1478_v7 = vmul.f32 %v2609_v29, %v2843_v0  ;;  %v1479_v30 = vmul.f32 %v2618_v43, %v2843_v0  ;;  %v3372_v51 = vld [vmem:[#allocation11_spill] sm:$0xff] }
 0x1bd   :  { %1838 = vst [vmem:[%s3235_s4 + $0xb0] sm:$0xff] %v1434_v24  ;;  %1839 = vst [vmem:[%s3235_s4 + $0xb8] sm:$0xff] %v1435_v17  ;;  %v1480_v12 = vmul.f32 %v2843_v0, %v2637_v16  ;;  %v1481_v31 = vmul.f32 %v2843_v0, %v3363_v41  ;;  %v1482_v29 = vmul.f32 %v3364_v55, %v2843_v0  ;;  %v3373_v24 = vld [vmem:[#allocation14_spill] sm:$0xff]  ;;  %v3379_v20 = vld [vmem:[#allocation31_spill] sm:$0xff] }
 0x1be   :  { %1840 = vst [vmem:[%s3235_s4 + $0xc0] sm:$0xff] %v1436_v14  ;;  %1841 = vst [vmem:[%s3235_s4 + $0xc8] sm:$0xff] %v1437_v21  ;;  %v1483_v43 = vmul.f32 %v3332_v59, %v2843_v0  ;;  %v1484_v16 = vmul.f32 %v2843_v0, %v3333_v56  ;;  %v1485_v45 = vmul.f32 %v2843_v0, %v3365_v42  ;;  %v3368_v59 = vld [vmem:[#allocation32_spill] sm:$0xff]  ;;  %v3369_v56 = vld [vmem:[#allocation35_spill] sm:$0xff] }
 0x1bf   :  { %1842 = vst [vmem:[%s3235_s4 + $0xd0] sm:$0xff] %v1438_v63  ;;  %1843 = vst [vmem:[%s3235_s4 + $0xd8] sm:$0xff] %v1439_v49  ;;  %v1486_v1 = vmul.f32 %v3337_v9, %v2843_v0  ;;  %v1487_v22 = vmul.f32 %v3339_v19, %v2843_v0  ;;  %v1488_v48 = vmul.f32 %v2843_v0, %v3366_v27  ;;  %v3374_v14 = vld [vmem:[#allocation19_spill] sm:$0xff]  ;;  %v3380_v55 = vld [vmem:[#allocation36_spill] sm:$0xff] }
 0x1c0   :  { %1844 = vst [vmem:[%s3235_s4 + $0xe0] sm:$0xff] %v1440_v6  ;;  %1845 = vst [vmem:[%s3235_s4 + $0xe8] sm:$0xff] %v1441_v60  ;;  %v1489_v33 = vmul.f32 %v2843_v0, %v3367_v28  ;;  %v1490_v52 = vmul.f32 %v3368_v59, %v2843_v0  ;;  %v1491_v23 = vmul.f32 %v3369_v56, %v2843_v0  ;;  %v3375_v63 = vld [vmem:[#allocation23_spill] sm:$0xff]  ;;  %v3376_v6 = vld [vmem:[#allocation18_spill] sm:$0xff] }
 0x1c1   :  { %1846 = vst [vmem:[%s3235_s4 + $0xf0] sm:$0xff] %v1442_v26  ;;  %1847 = vst [vmem:[%s3235_s4 + $0xf8] sm:$0xff] %v1443_v3  ;;  %v1492_v57 = vadd.f32 %v1476_v15, %v2877_v40  ;;  %v1493_v4 = vadd.f32 %v1477_v25, %v2877_v40  ;;  %v1494_v9 = vadd.f32 %v1478_v7, %v2877_v40  ;;  %v3377_v26 = vld [vmem:[#allocation21_spill] sm:$0xff] }
 0x1c2   :  { %v1495_v19 = vadd.f32 %v1479_v30, %v2877_v40  ;;  %v1496_v37 = vadd.f32 %v1480_v12, %v2877_v40  ;;  %v1497_v10 = vadd.f32 %v1481_v31, %v2877_v40  ;;  %v1498_v39 = vadd.f32 %v1482_v29, %v2877_v40 }
 0x1c3   :  { %v1499_v34 = vadd.f32 %v1483_v43, %v2877_v40  ;;  %v1500_v38 = vadd.f32 %v1484_v16, %v2877_v40  ;;  %v1501_v32 = vadd.f32 %v1485_v45, %v2877_v40  ;;  %1864 = vst [vmem:[%s3235_s4 + $0x100] sm:$0xff] %v1492_v57  ;;  %1865 = vst [vmem:[%s3235_s4 + $0x108] sm:$0xff] %v1493_v4 }
 0x1c4   :  { %v1502_v46 = vadd.f32 %v1486_v1, %v2877_v40  ;;  %v1503_v53 = vadd.f32 %v1487_v22, %v2877_v40  ;;  %v1504_v2 = vadd.f32 %v1488_v48, %v2877_v40  ;;  %v1505_v8 = vadd.f32 %v1489_v33, %v2877_v40  ;;  %1866 = vst [vmem:[%s3235_s4 + $0x110] sm:$0xff] %v1494_v9 }
 0x1c5   :  { %1867 = vst [vmem:[%s3235_s4 + $0x118] sm:$0xff] %v1495_v19  ;;  %1868 = vst [vmem:[%s3235_s4 + $0x120] sm:$0xff] %v1496_v37  ;;  %v1506_v36 = vadd.f32 %v1490_v52, %v2877_v40  ;;  %v1507_v47 = vadd.f32 %v1491_v23, %v2877_v40  ;;  %v1540_v44 = vmul.f32 %v2843_v0, %v3370_v54 }
 0x1c6   :  { %1869 = vst [vmem:[%s3235_s4 + $0x128] sm:$0xff] %v1497_v10  ;;  %1870 = vst [vmem:[%s3235_s4 + $0x130] sm:$0xff] %v1498_v39  ;;  %v1541_v5 = vmul.f32 %v2843_v0, %v3371_v62  ;;  %v1542_v18 = vmul.f32 %v3372_v51, %v2843_v0  ;;  %v1543_v17 = vmul.f32 %v3373_v24, %v2843_v0 }
 0x1c7   :  { %1871 = vst [vmem:[%s3235_s4 + $0x138] sm:$0xff] %v1499_v34  ;;  %1872 = vst [vmem:[%s3235_s4 + $0x140] sm:$0xff] %v1500_v38  ;;  %v1544_v21 = vmul.f32 %v2843_v0, %v3374_v14  ;;  %v1545_v49 = vmul.f32 %v2843_v0, %v3375_v63  ;;  %v1546_v60 = vmul.f32 %v3376_v6, %v2843_v0 }
 0x1c8   :  { %1873 = vst [vmem:[%s3235_s4 + $0x148] sm:$0xff] %v1501_v32  ;;  %1874 = vst [vmem:[%s3235_s4 + $0x150] sm:$0xff] %v1502_v46  ;;  %v1547_v3 = vmul.f32 %v3377_v26, %v2843_v0  ;;  %v1548_v15 = vmul.f32 %v2843_v0, %v3378_v35  ;;  %v1549_v25 = vmul.f32 %v2843_v0, %v3379_v20 }
 0x1c9   :  { %1875 = vst [vmem:[%s3235_s4 + $0x158] sm:$0xff] %v1503_v53  ;;  %1876 = vst [vmem:[%s3235_s4 + $0x160] sm:$0xff] %v1504_v2  ;;  %v1550_v7 = vmul.f32 %v3348_v58, %v2843_v0  ;;  %v1551_v30 = vmul.f32 %v3349_v50, %v2843_v0  ;;  %v1552_v12 = vmul.f32 %v2843_v0, %v3350_v11 }
 0x1ca   :  { %1877 = vst [vmem:[%s3235_s4 + $0x168] sm:$0xff] %v1505_v8  ;;  %1878 = vst [vmem:[%s3235_s4 + $0x170] sm:$0xff] %v1506_v36  ;;  %v1553_v41 = vmul.f32 %v2843_v0, %v3351_v61  ;;  %v1554_v31 = vmul.f32 %v2683_v13, %v2843_v0  ;;  %v1555_v29 = vmul.f32 %v3380_v55, %v2843_v0 }
 0x1cb   :  { %1879 = vst [vmem:[%s3235_s4 + $0x178] sm:$0xff] %v1507_v47  ;;  %v1556_v43 = vadd.f32 %v1540_v44, %v2877_v40  ;;  %v1557_v16 = vadd.f32 %v1541_v5, %v2877_v40  ;;  %v1558_v58 = vadd.f32 %v1542_v18, %v2877_v40  ;;  %v1559_v50 = vadd.f32 %v1543_v17, %v2877_v40 }
 0x1cc   :  { %v1560_v42 = vadd.f32 %v1544_v21, %v2877_v40  ;;  %v1561_v11 = vadd.f32 %v1545_v49, %v2877_v40  ;;  %v1562_v61 = vadd.f32 %v1546_v60, %v2877_v40  ;;  %v1563_v45 = vadd.f32 %v1547_v3, %v2877_v40 }
 0x1cd   :  { %v1564_v13 = vadd.f32 %v1548_v15, %v2877_v40  ;;  %v1565_v0 = vadd.f32 %v1549_v25, %v2877_v40  ;;  %1896 = vst [vmem:[%s3235_s4 + $0x180] sm:$0xff] %v1556_v43  ;;  %1897 = vst [vmem:[%s3235_s4 + $0x188] sm:$0xff] %v1557_v16  ;;  %v1566_v1 = vadd.f32 %v1550_v7, %v2877_v40 }
 0x1ce   :  { %v1567_v22 = vadd.f32 %v1551_v30, %v2877_v40  ;;  %v1568_v27 = vadd.f32 %v1552_v12, %v2877_v40  ;;  %v1569_v48 = vadd.f32 %v1553_v41, %v2877_v40  ;;  %1898 = vst [vmem:[%s3235_s4 + $0x190] sm:$0xff] %v1558_v58  ;;  %1899 = vst [vmem:[%s3235_s4 + $0x198] sm:$0xff] %v1559_v50 }
 0x1cf   :  { %1900 = vst [vmem:[%s3235_s4 + $0x1a0] sm:$0xff] %v1560_v42  ;;  %1901 = vst [vmem:[%s3235_s4 + $0x1a8] sm:$0xff] %v1561_v11  ;;  %v1570_v28 = vadd.f32 %v1554_v31, %v2877_v40  ;;  %v1571_v33 = vadd.f32 %v1555_v29, %v2877_v40 }
 0x1d0   :  { %1902 = vst [vmem:[%s3235_s4 + $0x1b0] sm:$0xff] %v1562_v61  ;;  %1903 = vst [vmem:[%s3235_s4 + $0x1b8] sm:$0xff] %v1563_v45 }
 0x1d1   :  { %1904 = vst [vmem:[%s3235_s4 + $0x1c0] sm:$0xff] %v1564_v13  ;;  %1905 = vst [vmem:[%s3235_s4 + $0x1c8] sm:$0xff] %v1565_v0 }
 0x1d2   :  { %1906 = vst [vmem:[%s3235_s4 + $0x1d0] sm:$0xff] %v1566_v1  ;;  %1907 = vst [vmem:[%s3235_s4 + $0x1d8] sm:$0xff] %v1567_v22 }
 0x1d3   :  { %1908 = vst [vmem:[%s3235_s4 + $0x1e0] sm:$0xff] %v1568_v27  ;;  %1909 = vst [vmem:[%s3235_s4 + $0x1e8] sm:$0xff] %v1569_v48 }
 0x1d4   :  { %1910 = vst [vmem:[%s3235_s4 + $0x1f0] sm:$0xff] %v1570_v28  ;;  %1911 = vst [vmem:[%s3235_s4 + $0x1f8] sm:$0xff] %v1571_v33 }

// kernel: _lambda_.19
= control target key start
LH: loop header
LB: loop body
LE: loop exit
PB: predicated region body
PF: predicated region fallthrough
CT: control target
= control target key end

     0   :  { %s1532_s12 = smov 0   ;;  %s1764_s0 = inlined_call_operand.vmem [shape: bf16[4,512,64], index: 0, kind: input, shape index: {}]   ;;  %s1765_s1 = inlined_call_operand.vmem [shape: bf16[4,64,128], index: 1, kind: input, shape index: {}]   ;;  %s1766_s2 = inlined_call_operand.vmem [shape: f32[1,128], index: 2, kind: input, shape index: {}]   ;;  %s1767_s3 = inlined_call_operand.vmem [shape: f32[4,512,128], index: 3, kind: output, shape index: {}]  }
   0x1 LB: > { %s1036_s13 = sadd.s32 4294967295, %s1510_s12   ;;  %p1040_p0 = scmp.ge.s32.totalorder %s1510_s12, 1  ;;  %s1510_s12 = sphi %s1532_s12, %s13_s12  }
   0x2   : > { %p147_p1 = scmp.lt.s32.totalorder %s1510_s12, 5 }
   0x4   : > { %p148_p2 = pnand %p1040_p0, %p147_p1 }
   0x5   : > { %p176_p3 = scmp.lt.s32.totalorder (!%p148_p2), %s1036_s13, 3  ;;  %vm455_vm0 = vcmask (!%p148_p2), 523264  }
   0x6   : > { %151 = sbr.rel (%p148_p2) target bundleno = 325 (0x145), region = 32 }
   0xd   : > { %s1769_s13 = smov (!%p176_p3, %s1036_s13), 3 }
   0xe   : > { %s1086_s14 = sshll.u32 %s1769_s13, 8  ;;  %s1087_s15 = sshll.u32 %s1769_s13, 5 }
   0xf   : > { %s1547_s18 = scalar_lea.vmem %s1765_s1, %s1087_s15  ;;  %s1553_s21 = scalar_lea.vmem %s1764_s0, %s1086_s14 }
  0x10   : > { %v1372_v0 = vld [vmem:[%s1547_s18] sm:$0xff]   ;;  %v1373_v1 = vld [vmem:[%s1547_s18 + $0x8] sm:$0xff]   ;;  %v1374_v2 = vld [vmem:[%s1547_s18 + $0x10] sm:$0xff]   ;;  %s1088_s24 = sshll.u32 %s1769_s13, 9 }
  0x11   : > { %1284 = vmatprep.subr.bf16.mxu0 %v1372_v0  ;;  %1356 = vmatprep.subr.bf16.mxu1 %v1372_v0  ;;  %v1090_v3 = vld [vmem:[%s1553_s21] sm:$0xff]   ;;  %v1217_v5 = vld [vmem:[%s1553_s21 + $0x8] sm:$0xff]   ;;  %v1218_v15 = vld [vmem:[%s1553_s21 + $0x10] sm:$0xff]   ;;  %s1643_s27 = scalar_lea.vmem %s1767_s3, %s1088_s24 }
  0x12   : > { %1285 = vmatpush3.bf16.msra.mxu0 %v1372_v0  ;;  %1360 = vmatpush3.bf16.msra.mxu1 %v1372_v0  ;;  %v1232_v4 = vld [vmem:[%s1553_s21 + $0x80] sm:$0xff]   ;;  %v1091_v6 = vunpack.c.l.bf16 %v1090_v3  ;;  %v1092_v7 = vunpack.c.h.bf16 %v1090_v3  ;;  %v1233_v10 = vld [vmem:[%s1553_s21 + $0x88] sm:$0xff]   ;;  %v1095_v11 = vunpack.c.l.bf16 %v1217_v5  ;;  %v1096_v12 = vunpack.c.h.bf16 %v1217_v5  ;;  %v1234_v20 = vld [vmem:[%s1553_s21 + $0x90] sm:$0xff]  }
  0x13   : > { %1286 = vmatprep.subr.bf16.mxu0 %v1373_v1  ;;  %1357 = vmatprep.subr.bf16.mxu1 %v1373_v1  ;;  %v1155_v8 = vunpack.c.l.bf16 %v1232_v4  ;;  %v1156_v9 = vunpack.c.h.bf16 %v1232_v4  ;;  %v1159_v13 = vunpack.c.l.bf16 %v1233_v10  ;;  %v1160_v14 = vunpack.c.h.bf16 %v1233_v10  ;;  %v1375_v21 = vld [vmem:[%s1547_s18 + $0x18] sm:$0xff]   ;;  %v1220_v36 = vld [vmem:[%s1553_s21 + $0x20] sm:$0xff]   ;;  %v1221_v58 = vld [vmem:[%s1553_s21 + $0x28] sm:$0xff]  }
  0x14   : > { %v320_v16 = vmax.f32 %v1091_v6, 0.0  ;;  %v321_v17 = vmax.f32 %v1092_v7, 0.0  ;;  %v322_v22 = vmax.f32 %v1095_v11, 0.0  ;;  %v323_v23 = vmax.f32 %v1096_v12, 0.0  ;;  %v1219_v32 = vld [vmem:[%s1553_s21 + $0x18] sm:$0xff]   ;;  %v1236_v39 = vld [vmem:[%s1553_s21 + $0xa0] sm:$0xff]  }
  0x15   : > { %v352_v18 = vmax.f32 %v1155_v8, 0.0  ;;  %v353_v19 = vmax.f32 %v1156_v9, 0.0  ;;  %v354_v24 = vmax.f32 %v1159_v13, 0.0  ;;  %v355_v25 = vmax.f32 %v1160_v14, 0.0  ;;  %v1235_v35 = vld [vmem:[%s1553_s21 + $0x98] sm:$0xff]   ;;  %v1237_v59 = vld [vmem:[%s1553_s21 + $0xa8] sm:$0xff]  }
  0x16   : > { %1287 = vmatpush3.bf16.msra.mxu0 %v1373_v1  ;;  %1361 = vmatpush3.bf16.msra.mxu1 %v1373_v1  ;;  %v384_v26 = vpack.c.bf16 %v321_v17, %v320_v16  ;;  %v1099_v28 = vunpack.c.l.bf16 %v1218_v15  ;;  %v1100_v29 = vunpack.c.h.bf16 %v1218_v15  ;;  %v1163_v30 = vunpack.c.l.bf16 %v1234_v20  ;;  %v1222_v62 = vld [vmem:[%s1553_s21 + $0x30] sm:$0xff]   ;;  %v1223_v16 = vld [vmem:[%s1553_s21 + $0x38] sm:$0xff]  }
  0x17   : > { %1288 = vmatprep.subr.bf16.mxu0 %v1374_v2  ;;  %1358 = vmatprep.subr.bf16.mxu1 %v1374_v2  ;;  %v400_v27 = vpack.c.bf16 %v353_v19, %v352_v18  ;;  %v1164_v31 = vunpack.c.h.bf16 %v1234_v20  ;;  %v385_v40 = vpack.c.bf16 %v323_v23, %v322_v22  ;;  %v401_v41 = vpack.c.bf16 %v355_v25, %v354_v24  ;;  %v1238_v63 = vld [vmem:[%s1553_s21 + $0xb0] sm:$0xff]   ;;  %v1224_v22 = vld [vmem:[%s1553_s21 + $0x40] sm:$0xff]  }
  0x18   : > { %v324_v33 = vmax.f32 %v1099_v28, 0.0  ;;  %v325_v34 = vmax.f32 %v1100_v29, 0.0  ;;  %v356_v37 = vmax.f32 %v1163_v30, 0.0  ;;  %1292 = vmatprep.mubr.msk.bf16.mxu0 %vm455_vm0, %v384_v26  ;;  %v1103_v42 = vunpack.c.l.bf16 %v1219_v32  ;;  %v1240_v23 = vld [vmem:[%s1553_s21 + $0xc0] sm:$0xff]  }
  0x19   : > { %v357_v38 = vmax.f32 %v1164_v31, 0.0  ;;  %1324 = vmatprep.mubr.msk.bf16.mxu1 %vm455_vm0, %v400_v27  ;;  %v1104_v43 = vunpack.c.h.bf16 %v1219_v32  ;;  %v1167_v44 = vunpack.c.l.bf16 %v1235_v35  ;;  %v1168_v45 = vunpack.c.h.bf16 %v1235_v35 }
  0x1a   : > { %1289 = vmatpush3.bf16.msra.mxu0 %v1374_v2  ;;  %1362 = vmatpush3.bf16.msra.mxu1 %v1374_v2  ;;  %v1107_v46 = vunpack.c.l.bf16 %v1220_v36  ;;  %v1108_v47 = vunpack.c.h.bf16 %v1220_v36  ;;  %v386_v48 = vpack.c.bf16 %v325_v34, %v324_v33  ;;  %v1171_v50 = vunpack.c.l.bf16 %v1236_v39 }
  0x1b   : > { %1290 = vmatprep.subr.bf16.mxu0 %v1375_v21  ;;  %1359 = vmatprep.subr.bf16.mxu1 %v1375_v21  ;;  %v402_v49 = vpack.c.bf16 %v357_v38, %v356_v37  ;;  %v1172_v51 = vunpack.c.h.bf16 %v1236_v39  ;;  %v326_v52 = vmax.f32 %v1103_v42, 0.0  ;;  %v327_v53 = vmax.f32 %v1104_v43, 0.0  ;;  %v1225_v42 = vld [vmem:[%s1553_s21 + $0x48] sm:$0xff]  }
  0x1c   : > { %v358_v54 = vmax.f32 %v1167_v44, 0.0  ;;  %v359_v55 = vmax.f32 %v1168_v45, 0.0  ;;  %v328_v56 = vmax.f32 %v1107_v46, 0.0  ;;  %v329_v57 = vmax.f32 %v1108_v47, 0.0  ;;  %v1241_v43 = vld [vmem:[%s1553_s21 + $0xc8] sm:$0xff]   ;;  %v1226_v46 = vld [vmem:[%s1553_s21 + $0x50] sm:$0xff]  }
  0x1d   : > { %v360_v60 = vmax.f32 %v1171_v50, 0.0  ;;  %v361_v61 = vmax.f32 %v1172_v51, 0.0  ;;  %v1111_v0 = vunpack.c.l.bf16 %v1221_v58  ;;  %v1112_v1 = vunpack.c.h.bf16 %v1221_v58  ;;  %v1242_v47 = vld [vmem:[%s1553_s21 + $0xd0] sm:$0xff]  }
  0x1e   : > { %1291 = vmatpush3.bf16.msra.mxu0 %v1375_v21  ;;  %1363 = vmatpush3.bf16.msra.mxu1 %v1375_v21  ;;  %v1175_v2 = vunpack.c.l.bf16 %v1237_v59  ;;  %v1176_v3 = vunpack.c.h.bf16 %v1237_v59  ;;  %v387_v4 = vpack.c.bf16 %v327_v53, %v326_v52  ;;  %v403_v5 = vpack.c.bf16 %v359_v55, %v358_v54  ;;  %v1239_v21 = vld [vmem:[%s1553_s21 + $0xb8] sm:$0xff]  }
  0x1f   : > { %v388_v6 = vpack.c.bf16 %v329_v57, %v328_v56  ;;  %v1115_v7 = vunpack.c.l.bf16 %v1222_v62  ;;  %v404_v8 = vpack.c.bf16 %v361_v61, %v360_v60  ;;  %v1116_v9 = vunpack.c.h.bf16 %v1222_v62 }
  0x20   : > { %v1179_v10 = vunpack.c.l.bf16 %v1238_v63  ;;  %v1180_v11 = vunpack.c.h.bf16 %v1238_v63  ;;  %v330_v12 = vmax.f32 %v1111_v0, 0.0  ;;  %v331_v13 = vmax.f32 %v1112_v1, 0.0  ;;  %v1227_v0 = vld [vmem:[%s1553_s21 + $0x58] sm:$0xff]  }
  0x21   : > { %1293 = vmatmul.mubr.msk.bf16.vlgmr.msra.gmra.mrb[0].mxu0 %vm455_vm0, %v385_v40  ;;  %1325 = vmatmul.mubr.msk.bf16.vlgmr.msra.gmra.mrb[0].mxu1 %vm455_vm0, %v401_v41  ;;  %v362_v14 = vmax.f32 %v1175_v2, 0.0  ;;  %v363_v15 = vmax.f32 %v1176_v3, 0.0  ;;  %v332_v17 = vmax.f32 %v1115_v7, 0.0  ;;  %v333_v18 = vmax.f32 %v1116_v9, 0.0  ;;  %v1244_v7 = vld [vmem:[%s1553_s21 + $0xe0] sm:$0xff]  }
  0x22   : > { %1296 = vmatprep.mubr.msk.bf16.mxu0 %vm455_vm0, %v386_v48  ;;  %1328 = vmatprep.mubr.msk.bf16.mxu1 %vm455_vm0, %v402_v49  ;;  %v364_v19 = vmax.f32 %v1179_v10, 0.0  ;;  %v365_v20 = vmax.f32 %v1180_v11, 0.0  ;;  %v389_v24 = vpack.c.bf16 %v331_v13, %v330_v12  ;;  %v1119_v26 = vunpack.c.l.bf16 %v1223_v16 }
  0x23   : > { %v405_v25 = vpack.c.bf16 %v363_v15, %v362_v14  ;;  %v1120_v27 = vunpack.c.h.bf16 %v1223_v16  ;;  %v1183_v28 = vunpack.c.l.bf16 %v1239_v21  ;;  %v1184_v29 = vunpack.c.h.bf16 %v1239_v21 }
  0x24   : > { %v1123_v30 = vunpack.c.l.bf16 %v1224_v22  ;;  %v1124_v31 = vunpack.c.h.bf16 %v1224_v22  ;;  %v390_v32 = vpack.c.bf16 %v333_v18, %v332_v17  ;;  %v406_v33 = vpack.c.bf16 %v365_v20, %v364_v19 }
  0x25   : > { %v1187_v34 = vunpack.c.l.bf16 %v1240_v23  ;;  %v1188_v35 = vunpack.c.h.bf16 %v1240_v23  ;;  %v334_v36 = vmax.f32 %v1119_v26, 0.0  ;;  %v335_v37 = vmax.f32 %v1120_v27, 0.0  ;;  %v1229_v26 = vld [vmem:[%s1553_s21 + $0x68] sm:$0xff]  }
  0x26   : > { %v366_v38 = vmax.f32 %v1183_v28, 0.0  ;;  %v367_v39 = vmax.f32 %v1184_v29, 0.0  ;;  %v336_v40 = vmax.f32 %v1123_v30, 0.0  ;;  %v337_v41 = vmax.f32 %v1124_v31, 0.0  ;;  %v1245_v27 = vld [vmem:[%s1553_s21 + $0xe8] sm:$0xff]   ;;  %v1230_v30 = vld [vmem:[%s1553_s21 + $0x70] sm:$0xff]  }
  0x27   : > { %v368_v44 = vmax.f32 %v1187_v34, 0.0  ;;  %v369_v45 = vmax.f32 %v1188_v35, 0.0  ;;  %v1127_v48 = vunpack.c.l.bf16 %v1225_v42  ;;  %v1128_v49 = vunpack.c.h.bf16 %v1225_v42  ;;  %v1246_v31 = vld [vmem:[%s1553_s21 + $0xf0] sm:$0xff]  }
  0x28   : > { %v1191_v50 = vunpack.c.l.bf16 %v1241_v43  ;;  %v1192_v51 = vunpack.c.h.bf16 %v1241_v43  ;;  %v391_v52 = vpack.c.bf16 %v335_v37, %v334_v36  ;;  %v407_v53 = vpack.c.bf16 %v367_v39, %v366_v38 }
  0x29   : > { %1297 = vmatmul.mubr.msk.bf16.gmra.mrb[4].mxu0 %vm455_vm0, %v387_v4  ;;  %1329 = vmatmul.mubr.msk.bf16.gmra.mrb[4].mxu1 %vm455_vm0, %v403_v5  ;;  %v392_v54 = vpack.c.bf16 %v337_v41, %v336_v40  ;;  %v1131_v55 = vunpack.c.l.bf16 %v1226_v46  ;;  %v408_v56 = vpack.c.bf16 %v369_v45, %v368_v44  ;;  %v1132_v57 = vunpack.c.h.bf16 %v1226_v46  ;;  %v1243_v5 = vld [vmem:[%s1553_s21 + $0xd8] sm:$0xff]  }
  0x2a   : > { %1300 = vmatprep.mubr.msk.bf16.mxu0 %vm455_vm0, %v388_v6  ;;  %1332 = vmatprep.mubr.msk.bf16.mxu1 %vm455_vm0, %v404_v8  ;;  %v1195_v58 = vunpack.c.l.bf16 %v1242_v47  ;;  %v1196_v59 = vunpack.c.h.bf16 %v1242_v47  ;;  %v338_v60 = vmax.f32 %v1127_v48, 0.0  ;;  %v339_v61 = vmax.f32 %v1128_v49, 0.0  ;;  %v1228_v6 = vld [vmem:[%s1553_s21 + $0x60] sm:$0xff]  }
  0x2b   : > { %v370_v62 = vmax.f32 %v1191_v50, 0.0  ;;  %v371_v63 = vmax.f32 %v1192_v51, 0.0  ;;  %v340_v1 = vmax.f32 %v1131_v55, 0.0  ;;  %v341_v2 = vmax.f32 %v1132_v57, 0.0 }
  0x2c   : > { %v372_v3 = vmax.f32 %v1195_v58, 0.0  ;;  %v373_v4 = vmax.f32 %v1196_v59, 0.0  ;;  %v393_v8 = vpack.c.bf16 %v339_v61, %v338_v60  ;;  %v1135_v10 = vunpack.c.l.bf16 %v1227_v0 }
  0x2d   : > { %v409_v9 = vpack.c.bf16 %v371_v63, %v370_v62  ;;  %v1136_v11 = vunpack.c.h.bf16 %v1227_v0  ;;  %v1199_v12 = vunpack.c.l.bf16 %v1243_v5  ;;  %v1200_v13 = vunpack.c.h.bf16 %v1243_v5 }
  0x2e   : > { %v1139_v14 = vunpack.c.l.bf16 %v1228_v6  ;;  %v1140_v15 = vunpack.c.h.bf16 %v1228_v6  ;;  %v394_v16 = vpack.c.bf16 %v341_v2, %v340_v1  ;;  %v410_v17 = vpack.c.bf16 %v373_v4, %v372_v3  ;;  %v1625_v4 = vld [vmem:[%s1766_s2] ss:$0 sm:$0xff] }
  0x2f   : > { %v1203_v18 = vunpack.c.l.bf16 %v1244_v7  ;;  %v1204_v19 = vunpack.c.h.bf16 %v1244_v7  ;;  %v342_v20 = vmax.f32 %v1135_v10, 0.0  ;;  %v343_v21 = vmax.f32 %v1136_v11, 0.0 }
  0x30   : > { %v374_v22 = vmax.f32 %v1199_v12, 0.0  ;;  %v375_v23 = vmax.f32 %v1200_v13, 0.0  ;;  %v1207_v34 = vunpack.c.l.bf16 %v1245_v27  ;;  %v1208_v35 = vunpack.c.h.bf16 %v1245_v27 }
  0x31   : > { %1301 = vmatmul.mubr.msk.bf16.gmra.mrb[8].mxu0 %vm455_vm0, %v389_v24  ;;  %1333 = vmatmul.mubr.msk.bf16.gmra.mrb[8].mxu1 %vm455_vm0, %v405_v25  ;;  %v344_v24 = vmax.f32 %v1139_v14, 0.0  ;;  %v345_v25 = vmax.f32 %v1140_v15, 0.0  ;;  %v376_v28 = vmax.f32 %v1203_v18, 0.0  ;;  %v377_v29 = vmax.f32 %v1204_v19, 0.0 }
  0x32   : > { %1304 = vmatprep.mubr.msk.bf16.mxu0 %vm455_vm0, %v390_v32  ;;  %1336 = vmatprep.mubr.msk.bf16.mxu1 %vm455_vm0, %v406_v33  ;;  %v1143_v32 = vunpack.c.l.bf16 %v1229_v26  ;;  %v1144_v33 = vunpack.c.h.bf16 %v1229_v26  ;;  %v395_v36 = vpack.c.bf16 %v343_v21, %v342_v20  ;;  %v411_v37 = vpack.c.bf16 %v375_v23, %v374_v22 }
  0x33   : > { %v396_v38 = vpack.c.bf16 %v345_v25, %v344_v24  ;;  %v1147_v39 = vunpack.c.l.bf16 %v1230_v30  ;;  %v412_v40 = vpack.c.bf16 %v377_v29, %v376_v28  ;;  %v1148_v41 = vunpack.c.h.bf16 %v1230_v30 }
  0x34   : > { %v1211_v42 = vunpack.c.l.bf16 %v1246_v31  ;;  %v1212_v43 = vunpack.c.h.bf16 %v1246_v31  ;;  %v346_v44 = vmax.f32 %v1143_v32, 0.0  ;;  %v347_v45 = vmax.f32 %v1144_v33, 0.0 }
  0x35   : > { %v378_v46 = vmax.f32 %v1207_v34, 0.0  ;;  %v379_v47 = vmax.f32 %v1208_v35, 0.0  ;;  %v348_v48 = vmax.f32 %v1147_v39, 0.0  ;;  %v349_v49 = vmax.f32 %v1148_v41, 0.0 }
  0x36   : > { %v380_v50 = vmax.f32 %v1211_v42, 0.0  ;;  %v381_v51 = vmax.f32 %v1212_v43, 0.0 }
  0x37   : > { %v413_v55 = vpack.c.bf16 %v379_v47, %v378_v46  ;;  %v398_v60 = vpack.c.bf16 %v349_v49, %v348_v48 }
  0x38   : > { %v414_v61 = vpack.c.bf16 %v381_v51, %v380_v50 }
  0x39   : > { %1305 = vmatmul.mubr.msk.bf16.gmra.mrb[12].mxu0 %vm455_vm0, %v391_v52  ;;  %1337 = vmatmul.mubr.msk.bf16.gmra.mrb[12].mxu1 %vm455_vm0, %v407_v53  ;;  %v1231_v52 = vld [vmem:[%s1553_s21 + $0x78] sm:$0xff]  }
  0x3a   : > { %1308 = vmatprep.mubr.msk.bf16.mxu0 %vm455_vm0, %v392_v54  ;;  %1340 = vmatprep.mubr.msk.bf16.mxu1 %vm455_vm0, %v408_v56  ;;  %v1247_v53 = vld [vmem:[%s1553_s21 + $0xf8] sm:$0xff]   ;;  %v397_v54 = vpack.c.bf16 %v347_v45, %v346_v44  ;;  %v1151_v56 = vunpack.c.l.bf16 %v1231_v52  ;;  %v1152_v57 = vunpack.c.h.bf16 %v1231_v52 }
  0x3b   : > { %v1215_v58 = vunpack.c.l.bf16 %v1247_v53  ;;  %v1216_v59 = vunpack.c.h.bf16 %v1247_v53 }
  0x3c   : > { %v350_v62 = vmax.f32 %v1151_v56, 0.0  ;;  %v351_v63 = vmax.f32 %v1152_v57, 0.0 }
  0x3d   : > { %v382_v0 = vmax.f32 %v1215_v58, 0.0  ;;  %v383_v1 = vmax.f32 %v1216_v59, 0.0 }
  0x3e   : > { %v399_v2 = vpack.c.bf16 %v351_v63, %v350_v62 }
  0x3f   : > { %v415_v3 = vpack.c.bf16 %v383_v1, %v382_v0 }
  0x41   : > { %1309 = vmatmul.mubr.msk.bf16.gmra.mrb[16].mxu0 %vm455_vm0, %v393_v8  ;;  %1341 = vmatmul.mubr.msk.bf16.gmra.mrb[16].mxu1 %vm455_vm0, %v409_v9 }
  0x42   : > { %1312 = vmatprep.mubr.msk.bf16.mxu0 %vm455_vm0, %v394_v16  ;;  %1344 = vmatprep.mubr.msk.bf16.mxu1 %vm455_vm0, %v410_v17 }
  0x49   : > { %1313 = vmatmul.mubr.msk.bf16.gmra.mrb[20].mxu0 %vm455_vm0, %v395_v36  ;;  %1345 = vmatmul.mubr.msk.bf16.gmra.mrb[20].mxu1 %vm455_vm0, %v411_v37 }
  0x4a   : > { %1316 = vmatprep.mubr.msk.bf16.mxu0 %vm455_vm0, %v396_v38  ;;  %1348 = vmatprep.mubr.msk.bf16.mxu1 %vm455_vm0, %v412_v40 }
  0x51   : > { %1317 = vmatmul.mubr.msk.bf16.gmra.mrb[24].mxu0 %vm455_vm0, %v397_v54  ;;  %1349 = vmatmul.mubr.msk.bf16.gmra.mrb[24].mxu1 %vm455_vm0, %v413_v55 }
  0x52   : > { %1320 = vmatprep.mubr.msk.bf16.mxu0 %vm455_vm0, %v398_v60  ;;  %1352 = vmatprep.mubr.msk.bf16.mxu1 %vm455_vm0, %v414_v61 }
  0x59   : > { %1321 = vmatmul.mubr.msk.bf16.gmra.mrb[28].mxu0 %vm455_vm0, %v399_v2  ;;  %1353 = vmatmul.mubr.msk.bf16.gmra.mrb[28].mxu1 %vm455_vm0, %v415_v3 }
  0xf4   : > { %v1294_v5 = vpop.f32.mrb[0].mxu0  ;;  %v1326_v6 = vpop.f32.mrb[0].mxu1 }
  0xf5   : > { %v595_v7 = vadd.f32 %v1294_v5, %v1625_v4  ;;  %v723_v8 = vadd.f32 %v1326_v6, %v1625_v4  ;;  %v586_v9 = vpop.f32.mrb[1].mxu0  ;;  %v714_v10 = vpop.f32.mrb[1].mxu1 }
  0xf6   : > { %v587_v11 = vadd.f32 %v1625_v4, %v586_v9  ;;  %v715_v12 = vadd.f32 %v1625_v4, %v714_v10  ;;  %v1295_v13 = vpop.f32.mrb[2].mxu0  ;;  %v1327_v14 = vpop.f32.mrb[2].mxu1 }
  0xf7   : > { %1376 = vtanh.f32 %v595_v7  ;;  %v598_v15 = vadd.f32 %v1295_v13, %v1625_v4  ;;  %v589_v16 = vpop.f32.mrb[3].mxu0  ;;  %v717_v17 = vpop.f32.mrb[3].mxu1  ;;  %v726_v18 = vadd.f32 %v1327_v14, %v1625_v4 }
  0xf8   : > { %1378 = vtanh.f32 %v723_v8  ;;  %v590_v19 = vadd.f32 %v1625_v4, %v589_v16  ;;  %v718_v20 = vadd.f32 %v1625_v4, %v717_v17 }
  0xf9   : > { %1380 = vtanh.f32 %v587_v11 }
  0xfa   : > { %1382 = vtanh.f32 %v715_v12 }
  0xfb   : > { %1384 = vtanh.f32 %v598_v15 }
  0xfc   : > { %1386 = vtanh.f32 %v726_v18  ;;  %v1298_v21 = vpop.f32.mrb[4].mxu0  ;;  %v1330_v22 = vpop.f32.mrb[4].mxu1 }
  0xfd   : > { %1388 = vtanh.f32 %v590_v19  ;;  %v611_v23 = vadd.f32 %v1298_v21, %v1625_v4  ;;  %v739_v24 = vadd.f32 %v1330_v22, %v1625_v4  ;;  %v602_v25 = vpop.f32.mrb[5].mxu0  ;;  %v730_v26 = vpop.f32.mrb[5].mxu1 }
  0xfe   : > { %1390 = vtanh.f32 %v718_v20  ;;  %v603_v27 = vadd.f32 %v1625_v4, %v602_v25  ;;  %v731_v28 = vadd.f32 %v1625_v4, %v730_v26  ;;  %v1299_v29 = vpop.f32.mrb[6].mxu0  ;;  %v1331_v30 = vpop.f32.mrb[6].mxu1 }
  0xff   : > { %1392 = vtanh.f32 %v611_v23  ;;  %v614_v31 = vadd.f32 %v1299_v29, %v1625_v4  ;;  %v605_v32 = vpop.f32.mrb[7].mxu0  ;;  %v733_v33 = vpop.f32.mrb[7].mxu1  ;;  %v742_v34 = vadd.f32 %v1331_v30, %v1625_v4 }
 0x100   : > { %1394 = vtanh.f32 %v739_v24  ;;  %v606_v36 = vadd.f32 %v1625_v4, %v605_v32  ;;  %v734_v38 = vadd.f32 %v1625_v4, %v733_v33 }
 0x101   : > { %v1377_v35 = vpop.eup %1376  ;;  %1396 = vtanh.f32 %v603_v27 }
 0x102   : > { %v1379_v37 = vpop.eup %1378  ;;  %907 = vst [vmem:[%s1643_s27 + $0x10] sm:$0xff] %v1377_v35  ;;  %1398 = vtanh.f32 %v731_v28 }
 0x103   : > { %v1381_v39 = vpop.eup %1380  ;;  %939 = vst [vmem:[%s1643_s27 + $0x110] sm:$0xff] %v1379_v37  ;;  %1400 = vtanh.f32 %v614_v31 }
 0x104   : > { %v1383_v40 = vpop.eup %1382  ;;  %905 = vst [vmem:[%s1643_s27] sm:$0xff] %v1381_v39  ;;  %1402 = vtanh.f32 %v742_v34  ;;  %v1302_v41 = vpop.f32.mrb[8].mxu0 }
 0x105   : > { %v1334_v42 = vpop.f32.mrb[8].mxu1  ;;  %v1385_v43 = vpop.eup %1384  ;;  %937 = vst [vmem:[%s1643_s27 + $0x100] sm:$0xff] %v1383_v40  ;;  %1404 = vtanh.f32 %v606_v36  ;;  %v627_v44 = vadd.f32 %v1302_v41, %v1625_v4 }
 0x106   : > { %v755_v45 = vadd.f32 %v1334_v42, %v1625_v4  ;;  %v618_v46 = vpop.f32.mrb[9].mxu0  ;;  %v746_v47 = vpop.f32.mrb[9].mxu1  ;;  %908 = vst [vmem:[%s1643_s27 + $0x18] sm:$0xff] %v1385_v43  ;;  %1406 = vtanh.f32 %v734_v38 }
 0x107   : > { %v1387_v48 = vpop.eup %1386  ;;  %v619_v49 = vadd.f32 %v1625_v4, %v618_v46  ;;  %v747_v50 = vadd.f32 %v1625_v4, %v746_v47  ;;  %v1303_v51 = vpop.f32.mrb[10].mxu0  ;;  %1408 = vtanh.f32 %v627_v44 }
 0x108   : > { %v1335_v52 = vpop.f32.mrb[10].mxu1  ;;  %v1389_v53 = vpop.eup %1388  ;;  %940 = vst [vmem:[%s1643_s27 + $0x118] sm:$0xff] %v1387_v48  ;;  %v630_v54 = vadd.f32 %v1303_v51, %v1625_v4  ;;  %1410 = vtanh.f32 %v755_v45 }
 0x109   : > { %v621_v55 = vpop.f32.mrb[11].mxu0  ;;  %v749_v56 = vpop.f32.mrb[11].mxu1  ;;  %906 = vst [vmem:[%s1643_s27 + $0x8] sm:$0xff] %v1389_v53  ;;  %v758_v58 = vadd.f32 %v1335_v52, %v1625_v4  ;;  %1412 = vtanh.f32 %v619_v49 }
 0x10a   : > { %v1391_v57 = vpop.eup %1390  ;;  %v622_v60 = vadd.f32 %v1625_v4, %v621_v55  ;;  %1414 = vtanh.f32 %v747_v50  ;;  %v750_v62 = vadd.f32 %v1625_v4, %v749_v56 }
 0x10b   : > { %v1393_v59 = vpop.eup %1392  ;;  %938 = vst [vmem:[%s1643_s27 + $0x108] sm:$0xff] %v1391_v57  ;;  %1416 = vtanh.f32 %v630_v54 }
 0x10c   : > { %v1395_v61 = vpop.eup %1394  ;;  %911 = vst [vmem:[%s1643_s27 + $0x30] sm:$0xff] %v1393_v59  ;;  %1418 = vtanh.f32 %v758_v58  ;;  %v1306_v1 = vpop.f32.mrb[12].mxu0 }
 0x10d   : > { %v1397_v63 = vpop.eup %1396  ;;  %943 = vst [vmem:[%s1643_s27 + $0x130] sm:$0xff] %v1395_v61  ;;  %v1338_v2 = vpop.f32.mrb[12].mxu1  ;;  %1420 = vtanh.f32 %v622_v60  ;;  %v643_v5 = vadd.f32 %v1306_v1, %v1625_v4 }
 0x10e   : > { %v1399_v0 = vpop.eup %1398  ;;  %909 = vst [vmem:[%s1643_s27 + $0x20] sm:$0xff] %v1397_v63  ;;  %v771_v6 = vadd.f32 %v1338_v2, %v1625_v4  ;;  %v634_v7 = vpop.f32.mrb[13].mxu0  ;;  %1422 = vtanh.f32 %v750_v62 }
 0x10f   : > { %v1401_v3 = vpop.eup %1400  ;;  %941 = vst [vmem:[%s1643_s27 + $0x120] sm:$0xff] %v1399_v0  ;;  %v762_v8 = vpop.f32.mrb[13].mxu1  ;;  %v635_v10 = vadd.f32 %v1625_v4, %v634_v7  ;;  %1424 = vtanh.f32 %v643_v5 }
 0x110   : > { %v1403_v9 = vpop.eup %1402  ;;  %912 = vst [vmem:[%s1643_s27 + $0x38] sm:$0xff] %v1401_v3  ;;  %v763_v11 = vadd.f32 %v1625_v4, %v762_v8  ;;  %v1307_v12 = vpop.f32.mrb[14].mxu0  ;;  %1426 = vtanh.f32 %v771_v6 }
 0x111   : > { %v1339_v13 = vpop.f32.mrb[14].mxu1  ;;  %v1405_v14 = vpop.eup %1404  ;;  %944 = vst [vmem:[%s1643_s27 + $0x138] sm:$0xff] %v1403_v9  ;;  %v646_v15 = vadd.f32 %v1307_v12, %v1625_v4  ;;  %1428 = vtanh.f32 %v635_v10 }
 0x112   : > { %v637_v16 = vpop.f32.mrb[15].mxu0  ;;  %v765_v17 = vpop.f32.mrb[15].mxu1  ;;  %910 = vst [vmem:[%s1643_s27 + $0x28] sm:$0xff] %v1405_v14  ;;  %v774_v19 = vadd.f32 %v1339_v13, %v1625_v4  ;;  %1430 = vtanh.f32 %v763_v11 }
 0x113   : > { %v1407_v18 = vpop.eup %1406  ;;  %v638_v21 = vadd.f32 %v1625_v4, %v637_v16  ;;  %v766_v23 = vadd.f32 %v1625_v4, %v765_v17  ;;  %1432 = vtanh.f32 %v646_v15 }
 0x114   : > { %v1409_v20 = vpop.eup %1408  ;;  %942 = vst [vmem:[%s1643_s27 + $0x128] sm:$0xff] %v1407_v18  ;;  %1434 = vtanh.f32 %v774_v19  ;;  %v1310_v26 = vpop.f32.mrb[16].mxu0 }
 0x115   : > { %v1411_v22 = vpop.eup %1410  ;;  %915 = vst [vmem:[%s1643_s27 + $0x50] sm:$0xff] %v1409_v20  ;;  %v1342_v27 = vpop.f32.mrb[16].mxu1  ;;  %1436 = vtanh.f32 %v638_v21  ;;  %v659_v29 = vadd.f32 %v1310_v26, %v1625_v4 }
 0x116   : > { %v1413_v24 = vpop.eup %1412  ;;  %947 = vst [vmem:[%s1643_s27 + $0x150] sm:$0xff] %v1411_v22  ;;  %v787_v30 = vadd.f32 %v1342_v27, %v1625_v4  ;;  %v650_v31 = vpop.f32.mrb[17].mxu0  ;;  %1438 = vtanh.f32 %v766_v23 }
 0x117   : > { %v1415_v25 = vpop.eup %1414  ;;  %913 = vst [vmem:[%s1643_s27 + $0x40] sm:$0xff] %v1413_v24  ;;  %v778_v32 = vpop.f32.mrb[17].mxu1  ;;  %v651_v34 = vadd.f32 %v1625_v4, %v650_v31  ;;  %1440 = vtanh.f32 %v659_v29 }
 0x118   : > { %v1417_v28 = vpop.eup %1416  ;;  %945 = vst [vmem:[%s1643_s27 + $0x140] sm:$0xff] %v1415_v25  ;;  %v779_v35 = vadd.f32 %v1625_v4, %v778_v32  ;;  %v1311_v36 = vpop.f32.mrb[18].mxu0  ;;  %1442 = vtanh.f32 %v787_v30 }
 0x119   : > { %v1419_v33 = vpop.eup %1418  ;;  %916 = vst [vmem:[%s1643_s27 + $0x58] sm:$0xff] %v1417_v28  ;;  %v1343_v37 = vpop.f32.mrb[18].mxu1  ;;  %v662_v39 = vadd.f32 %v1311_v36, %v1625_v4  ;;  %1444 = vtanh.f32 %v651_v34 }
 0x11a   : > { %v1421_v38 = vpop.eup %1420  ;;  %948 = vst [vmem:[%s1643_s27 + $0x158] sm:$0xff] %v1419_v33  ;;  %v653_v40 = vpop.f32.mrb[19].mxu0  ;;  %v790_v43 = vadd.f32 %v1343_v37, %v1625_v4  ;;  %1446 = vtanh.f32 %v779_v35 }
 0x11b   : > { %v781_v41 = vpop.f32.mrb[19].mxu1  ;;  %v1423_v42 = vpop.eup %1422  ;;  %914 = vst [vmem:[%s1643_s27 + $0x48] sm:$0xff] %v1421_v38  ;;  %v654_v45 = vadd.f32 %v1625_v4, %v653_v40  ;;  %1448 = vtanh.f32 %v662_v39 }
 0x11c   : > { %v1425_v44 = vpop.eup %1424  ;;  %946 = vst [vmem:[%s1643_s27 + $0x148] sm:$0xff] %v1423_v42  ;;  %v782_v47 = vadd.f32 %v1625_v4, %v781_v41  ;;  %1450 = vtanh.f32 %v790_v43  ;;  %v1314_v50 = vpop.f32.mrb[20].mxu0 }
 0x11d   : > { %v1427_v46 = vpop.eup %1426  ;;  %919 = vst [vmem:[%s1643_s27 + $0x70] sm:$0xff] %v1425_v44  ;;  %v1346_v51 = vpop.f32.mrb[20].mxu1  ;;  %1452 = vtanh.f32 %v654_v45  ;;  %v675_v53 = vadd.f32 %v1314_v50, %v1625_v4 }
 0x11e   : > { %v1429_v48 = vpop.eup %1428  ;;  %951 = vst [vmem:[%s1643_s27 + $0x170] sm:$0xff] %v1427_v46  ;;  %v803_v54 = vadd.f32 %v1346_v51, %v1625_v4  ;;  %v666_v55 = vpop.f32.mrb[21].mxu0  ;;  %1454 = vtanh.f32 %v782_v47 }
 0x11f   : > { %v1431_v49 = vpop.eup %1430  ;;  %917 = vst [vmem:[%s1643_s27 + $0x60] sm:$0xff] %v1429_v48  ;;  %v794_v56 = vpop.f32.mrb[21].mxu1  ;;  %v667_v58 = vadd.f32 %v1625_v4, %v666_v55  ;;  %1456 = vtanh.f32 %v675_v53 }
 0x120   : > { %v1433_v52 = vpop.eup %1432  ;;  %949 = vst [vmem:[%s1643_s27 + $0x160] sm:$0xff] %v1431_v49  ;;  %v795_v59 = vadd.f32 %v1625_v4, %v794_v56  ;;  %v1315_v60 = vpop.f32.mrb[22].mxu0  ;;  %1458 = vtanh.f32 %v803_v54 }
 0x121   : > { %v1435_v57 = vpop.eup %1434  ;;  %920 = vst [vmem:[%s1643_s27 + $0x78] sm:$0xff] %v1433_v52  ;;  %v1347_v61 = vpop.f32.mrb[22].mxu1  ;;  %v678_v63 = vadd.f32 %v1315_v60, %v1625_v4  ;;  %1460 = vtanh.f32 %v667_v58 }
 0x122   : > { %v1437_v62 = vpop.eup %1436  ;;  %952 = vst [vmem:[%s1643_s27 + $0x178] sm:$0xff] %v1435_v57  ;;  %v669_v0 = vpop.f32.mrb[23].mxu0  ;;  %v806_v3 = vadd.f32 %v1347_v61, %v1625_v4  ;;  %1462 = vtanh.f32 %v795_v59 }
 0x123   : > { %v797_v1 = vpop.f32.mrb[23].mxu1  ;;  %v1439_v2 = vpop.eup %1438  ;;  %918 = vst [vmem:[%s1643_s27 + $0x68] sm:$0xff] %v1437_v62  ;;  %v670_v6 = vadd.f32 %v1625_v4, %v669_v0  ;;  %1464 = vtanh.f32 %v678_v63 }
 0x124   : > { %v1441_v5 = vpop.eup %1440  ;;  %950 = vst [vmem:[%s1643_s27 + $0x168] sm:$0xff] %v1439_v2  ;;  %v798_v8 = vadd.f32 %v1625_v4, %v797_v1  ;;  %1466 = vtanh.f32 %v806_v3  ;;  %v1318_v11 = vpop.f32.mrb[24].mxu0 }
 0x125   : > { %v1443_v7 = vpop.eup %1442  ;;  %923 = vst [vmem:[%s1643_s27 + $0x90] sm:$0xff] %v1441_v5  ;;  %v1350_v12 = vpop.f32.mrb[24].mxu1  ;;  %1468 = vtanh.f32 %v670_v6  ;;  %v691_v14 = vadd.f32 %v1318_v11, %v1625_v4 }
 0x126   : > { %v1445_v9 = vpop.eup %1444  ;;  %955 = vst [vmem:[%s1643_s27 + $0x190] sm:$0xff] %v1443_v7  ;;  %v819_v15 = vadd.f32 %v1350_v12, %v1625_v4  ;;  %v682_v16 = vpop.f32.mrb[25].mxu0  ;;  %1470 = vtanh.f32 %v798_v8 }
 0x127   : > { %v1447_v10 = vpop.eup %1446  ;;  %921 = vst [vmem:[%s1643_s27 + $0x80] sm:$0xff] %v1445_v9  ;;  %v810_v17 = vpop.f32.mrb[25].mxu1  ;;  %v683_v19 = vadd.f32 %v1625_v4, %v682_v16  ;;  %1472 = vtanh.f32 %v691_v14 }
 0x128   : > { %v1449_v13 = vpop.eup %1448  ;;  %953 = vst [vmem:[%s1643_s27 + $0x180] sm:$0xff] %v1447_v10  ;;  %v811_v20 = vadd.f32 %v1625_v4, %v810_v17  ;;  %v1319_v21 = vpop.f32.mrb[26].mxu0  ;;  %1474 = vtanh.f32 %v819_v15 }
 0x129   : > { %v1451_v18 = vpop.eup %1450  ;;  %924 = vst [vmem:[%s1643_s27 + $0x98] sm:$0xff] %v1449_v13  ;;  %v1351_v22 = vpop.f32.mrb[26].mxu1  ;;  %v694_v24 = vadd.f32 %v1319_v21, %v1625_v4  ;;  %1476 = vtanh.f32 %v683_v19 }
 0x12a   : > { %v1453_v23 = vpop.eup %1452  ;;  %956 = vst [vmem:[%s1643_s27 + $0x198] sm:$0xff] %v1451_v18  ;;  %v685_v25 = vpop.f32.mrb[27].mxu0  ;;  %v822_v28 = vadd.f32 %v1351_v22, %v1625_v4  ;;  %1478 = vtanh.f32 %v811_v20 }
 0x12b   : > { %v813_v26 = vpop.f32.mrb[27].mxu1  ;;  %v1455_v27 = vpop.eup %1454  ;;  %922 = vst [vmem:[%s1643_s27 + $0x88] sm:$0xff] %v1453_v23  ;;  %v686_v30 = vadd.f32 %v1625_v4, %v685_v25  ;;  %1480 = vtanh.f32 %v694_v24 }
 0x12c   : > { %v1457_v29 = vpop.eup %1456  ;;  %954 = vst [vmem:[%s1643_s27 + $0x188] sm:$0xff] %v1455_v27  ;;  %v814_v32 = vadd.f32 %v1625_v4, %v813_v26  ;;  %1482 = vtanh.f32 %v822_v28  ;;  %v1322_v35 = vpop.f32.mrb[28].mxu0 }
 0x12d   : > { %v1459_v31 = vpop.eup %1458  ;;  %927 = vst [vmem:[%s1643_s27 + $0xb0] sm:$0xff] %v1457_v29  ;;  %v1354_v36 = vpop.f32.mrb[28].mxu1  ;;  %1484 = vtanh.f32 %v686_v30  ;;  %v707_v38 = vadd.f32 %v1322_v35, %v1625_v4 }
 0x12e   : > { %v1461_v33 = vpop.eup %1460  ;;  %959 = vst [vmem:[%s1643_s27 + $0x1b0] sm:$0xff] %v1459_v31  ;;  %v835_v39 = vadd.f32 %v1354_v36, %v1625_v4  ;;  %v698_v40 = vpop.f32.mrb[29].mxu0  ;;  %1486 = vtanh.f32 %v814_v32 }
 0x12f   : > { %v1463_v34 = vpop.eup %1462  ;;  %925 = vst [vmem:[%s1643_s27 + $0xa0] sm:$0xff] %v1461_v33  ;;  %v826_v41 = vpop.f32.mrb[29].mxu1  ;;  %v699_v43 = vadd.f32 %v1625_v4, %v698_v40  ;;  %1488 = vtanh.f32 %v707_v38 }
 0x130   : > { %v1465_v37 = vpop.eup %1464  ;;  %957 = vst [vmem:[%s1643_s27 + $0x1a0] sm:$0xff] %v1463_v34  ;;  %v827_v44 = vadd.f32 %v1625_v4, %v826_v41  ;;  %v1323_v45 = vpop.f32.mrb[30].mxu0  ;;  %1490 = vtanh.f32 %v835_v39 }
 0x131   : > { %v1467_v42 = vpop.eup %1466  ;;  %928 = vst [vmem:[%s1643_s27 + $0xb8] sm:$0xff] %v1465_v37  ;;  %v1355_v46 = vpop.f32.mrb[30].mxu1  ;;  %v710_v48 = vadd.f32 %v1323_v45, %v1625_v4  ;;  %1492 = vtanh.f32 %v699_v43 }
 0x132   : > { %v1469_v47 = vpop.eup %1468  ;;  %960 = vst [vmem:[%s1643_s27 + $0x1b8] sm:$0xff] %v1467_v42  ;;  %v701_v49 = vpop.f32.mrb[31].mxu0  ;;  %v838_v52 = vadd.f32 %v1355_v46, %v1625_v4  ;;  %1494 = vtanh.f32 %v827_v44 }
 0x133   : > { %v829_v50 = vpop.f32.mrb[31].mxu1  ;;  %v1471_v51 = vpop.eup %1470  ;;  %926 = vst [vmem:[%s1643_s27 + $0xa8] sm:$0xff] %v1469_v47  ;;  %v702_v54 = vadd.f32 %v1625_v4, %v701_v49  ;;  %1496 = vtanh.f32 %v710_v48 }
 0x134   : > { %v1473_v53 = vpop.eup %1472  ;;  %958 = vst [vmem:[%s1643_s27 + $0x1a8] sm:$0xff] %v1471_v51  ;;  %v830_v56 = vadd.f32 %v1625_v4, %v829_v50  ;;  %1498 = vtanh.f32 %v838_v52 }
 0x135   : > { %v1475_v55 = vpop.eup %1474  ;;  %931 = vst [vmem:[%s1643_s27 + $0xd0] sm:$0xff] %v1473_v53  ;;  %1500 = vtanh.f32 %v702_v54 }
 0x136   : > { %v1477_v57 = vpop.eup %1476  ;;  %963 = vst [vmem:[%s1643_s27 + $0x1d0] sm:$0xff] %v1475_v55  ;;  %1502 = vtanh.f32 %v830_v56 }
 0x137   : > { %v1479_v58 = vpop.eup %1478  ;;  %929 = vst [vmem:[%s1643_s27 + $0xc0] sm:$0xff] %v1477_v57 }
 0x138   : > { %v1481_v59 = vpop.eup %1480  ;;  %961 = vst [vmem:[%s1643_s27 + $0x1c0] sm:$0xff] %v1479_v58 }
 0x139   : > { %v1483_v60 = vpop.eup %1482  ;;  %932 = vst [vmem:[%s1643_s27 + $0xd8] sm:$0xff] %v1481_v59 }
 0x13a   : > { %v1485_v4 = vpop.eup %1484  ;;  %964 = vst [vmem:[%s1643_s27 + $0x1d8] sm:$0xff] %v1483_v60 }
 0x13b   : > { %v1487_v61 = vpop.eup %1486  ;;  %930 = vst [vmem:[%s1643_s27 + $0xc8] sm:$0xff] %v1485_v4 }
 0x13c   : > { %v1489_v62 = vpop.eup %1488  ;;  %962 = vst [vmem:[%s1643_s27 + $0x1c8] sm:$0xff] %v1487_v61 }
 0x13d   : > { %v1491_v63 = vpop.eup %1490  ;;  %935 = vst [vmem:[%s1643_s27 + $0xf0] sm:$0xff] %v1489_v62 }
 0x13e   : > { %v1493_v0 = vpop.eup %1492  ;;  %967 = vst [vmem:[%s1643_s27 + $0x1f0] sm:$0xff] %v1491_v63 }
 0x13f   : > { %v1495_v1 = vpop.eup %1494  ;;  %933 = vst [vmem:[%s1643_s27 + $0xe0] sm:$0xff] %v1493_v0 }
 0x140   : > { %v1497_v2 = vpop.eup %1496  ;;  %965 = vst [vmem:[%s1643_s27 + $0x1e0] sm:$0xff] %v1495_v1 }
 0x141   : > { %v1499_v3 = vpop.eup %1498  ;;  %936 = vst [vmem:[%s1643_s27 + $0xf8] sm:$0xff] %v1497_v2 }
 0x142   : > { %v1501_v5 = vpop.eup %1500  ;;  %968 = vst [vmem:[%s1643_s27 + $0x1f8] sm:$0xff] %v1499_v3 }
 0x143   : > { %v1503_v6 = vpop.eup %1502  ;;  %934 = vst [vmem:[%s1643_s27 + $0xe8] sm:$0xff] %v1501_v5 }
 0x144   : > { %966 = vst [vmem:[%s1643_s27 + $0x1e8] sm:$0xff] %v1503_v6 }
 0x145 PF: > { %s13_s12 = sadd.s32 1, %s1510_s12  }
 0x146   : > { %p10_p4 = scmp.ge.s32.totalorder %s13_s12, 6  }
 0x148   :  { %12 = sbr.rel (!%p10_p4) target bundleno = 1 (0x1), region = 65 }

</bundles_post_ra>
